<compile_context>
chip_gen: v7x
topology: tpu7x:2x2x1
jax: 0.10.0
libtpu: 0.0.40
codegen_flags: <defaults>
</compile_context>

<pallas_src>
import numpy as np

import jax
import jax.numpy as jnp
from jax.experimental import pallas as pl
from jax.experimental.pallas import tpu as pltpu


# --------------------------------------------------------------------------
# Host-side basis construction (port of the PyTorch helpers; plain numpy).
# --------------------------------------------------------------------------

def generate_wavefront_basis(num_feats, basis_block, period_length):
    period_coef = 2.0 * np.pi / period_length
    basis = np.asarray([basis_block], dtype=np.float64).repeat(num_feats, axis=0)  # (F, 2)
    powers = (2.0 ** np.arange(num_feats))[:, None]                                 # (F, 1)
    return (basis * powers * period_coef).astype(np.float32)


def generate_horizontal_basis(num_feats):
    return generate_wavefront_basis(num_feats, [0.0, 1.0], 4.0)


def generate_vertical_basis(num_feats):
    return generate_wavefront_basis(num_feats, [1.0, 0.0], 4.0)


def generate_diag_main_basis(num_feats):
    return generate_wavefront_basis(
        num_feats, [-1.0 / np.sqrt(2), 1.0 / np.sqrt(2)], 4.0 * np.sqrt(2))


def generate_anti_diag_basis(num_feats):
    return generate_wavefront_basis(
        num_feats, [1.0 / np.sqrt(2), 1.0 / np.sqrt(2)], 4.0 * np.sqrt(2))


def generate_logarithmic_basis(resolution, max_num_feats,
                               remove_lowest_freq=False, use_diagonal=False):
    n = int(np.ceil(np.log2(resolution)))
    bases = [generate_horizontal_basis(n), generate_vertical_basis(n)]
    if use_diagonal:
        bases += [generate_diag_main_basis(n), generate_anti_diag_basis(n)]
    if remove_lowest_freq:
        bases = [b[1:] for b in bases]
    basis = np.concatenate(bases, axis=0)                    # (L, 2)
    assert basis.shape[0] <= max_num_feats, (basis.shape, max_num_feats)
    return basis


# --------------------------------------------------------------------------
# Pallas kernel
# --------------------------------------------------------------------------

def _embed_kernel(coords_ref, basis_ref, const_ref, out_ref):
    """One (TN)-point tile: project coords, sin/cos, concat with const embs."""
    coords = coords_ref[...].astype(jnp.float32)              # (TN, 2)
    basis = basis_ref[...].astype(jnp.float32)                # (2, E)

    # K=2 contraction on the VPU: (TN,1)*(1,E) broadcast-MACs. The MXU would
    # pad K=2 to a full K granule for no benefit.
    raw = (coords[:, 0:1] * basis[0:1, :]
           + coords[:, 1:2] * basis[1:2, :])                  # (TN, E)

    # Single full-width store of the concatenated feature row:
    # [coords(2) | sin(E) | cos(E) | const(Ce)]  ->  (TN, 2 + 2E + Ce)
    out_ref[...] = jnp.concatenate(
        [coords,
         jnp.sin(raw),
         jnp.cos(raw),
         const_ref[...].astype(jnp.float32)],
        axis=-1,
    ).astype(out_ref.dtype)


def _choose_point_tile(n, cap=4096):
    """Largest tile <= cap that divides n and is a multiple of 8 (or n itself)."""
    if n <= cap:
        return n                       # full extent: exempt from the /8 rule
    t = (cap // 8) * 8
    while t >= 8:
        if n % t == 0:
            return t
        t -= 8
    return n


def inrgan_embed_forward(params, raw_coords, *, point_tile_cap=4096):
    """params: dict with 'log_basis' (L,2), 'random_basis' (2,R), 'const_embs' (1,N,Ce).
    raw_coords: (B, N, 2). Returns (B, N, 2 + 2*(L+R) + Ce)."""
    B, N, cin = raw_coords.shape
    assert cin == 2, "raw_coords last dim must be 2"

    log_basis = params["log_basis"]                       # (L, 2)
    random_basis = params["random_basis"]                 # (2, R)
    const_embs = params["const_embs"]                     # (1, N, Ce)
    assert const_embs.shape[1] == N, "img_size must equal resolution**2"

    # Merge the two projections into one (2, E) matrix (raw_embs = coords @ basis_all).
    basis_all = jnp.concatenate([jnp.transpose(log_basis), random_basis], axis=1)
    E = basis_all.shape[1]
    Ce = const_embs.shape[2]
    D = 2 + 2 * E + Ce
    const2d = const_embs.reshape(N, Ce)

    tn = _choose_point_tile(N, point_tile_cap)
    num_j = N // tn
    # Batch axis INNERMOST so the const tile (index (j, 0)) is resident across
    # consecutive grid steps -> its DMA is skipped for b > 0.
    grid = (num_j, B)

    dt_bytes = jnp.dtype(jnp.float32).itemsize
    cost = pl.CostEstimate(
        flops=2 * B * N * 2 * E,            # the (TN,2)x(2,E) projection
        transcendentals=2 * B * N * E,      # sin + cos
        bytes_accessed=(raw_coords.size + basis_all.size + const2d.size
                        + B * N * D) * dt_bytes,
    )

    return pl.pallas_call(
        _embed_kernel,
        grid=grid,
        in_specs=[
            pl.BlockSpec((None, tn, 2), lambda j, b: (b, j, 0)),   # coords tile
            pl.BlockSpec((2, E), lambda j, b: (0, 0)),             # resident basis
            pl.BlockSpec((tn, Ce), lambda j, b: (j, 0)),           # const rows (resident over b)
        ],
        out_specs=pl.BlockSpec((None, tn, D), lambda j, b: (b, j, 0)),
        out_shape=jax.ShapeDtypeStruct((B, N, D), raw_coords.dtype),
        compiler_params=pltpu.CompilerParams(
            dimension_semantics=("parallel", "parallel")),
        cost_estimate=cost,
    )(raw_coords, basis_all, const2d)


# --------------------------------------------------------------------------
# Pure-JAX reference of the PyTorch forward (for correctness check)
# --------------------------------------------------------------------------

def _ref_forward(params, raw_coords):
    B = raw_coords.shape[0]
    raw_log = raw_coords @ jnp.transpose(params["log_basis"])        # (B, N, L)
    raw_rand = raw_coords @ params["random_basis"]                   # (B, N, R)
    raw_embs = jnp.concatenate([raw_log, raw_rand], axis=-1)
    out = jnp.concatenate([jnp.sin(raw_embs), jnp.cos(raw_embs)], axis=-1)
    const = jnp.broadcast_to(params["const_embs"],
                             (B,) + params["const_embs"].shape[1:])
    out = jnp.concatenate([out, const], axis=-1)
    return jnp.concatenate([raw_coords, out], axis=-1)


if __name__ == "__main__":
    key = jax.random.PRNGKey(0)
    k_rand, k_const, k_coord = jax.random.split(key, 3)

    resolution = 16                       # small demo resolution
    B = 2
    N = resolution ** 2                   # forward expects img_size == resolution**2
    log_emb_size, random_emb_size, const_emb_size = 32, 32, 64
    fourier_scale = float(np.sqrt(10.0))

    log_basis_np = generate_logarithmic_basis(
        resolution, log_emb_size, use_diagonal=False)                 # (8, 2)

    params = {
        "log_basis": jnp.asarray(log_basis_np),
        "random_basis": fourier_scale * jax.random.normal(
            k_rand, (2, random_emb_size), jnp.float32),
        "const_embs": jax.random.normal(
            k_const, (1, N, const_emb_size), jnp.float32),
    }

    raw_coords = jax.random.uniform(k_coord, (B, N, 2), jnp.float32, -1.0, 1.0)

    out = jax.block_until_ready(inrgan_embed_forward(params, raw_coords))
    ref = _ref_forward(params, raw_coords)

    L = log_basis_np.shape[0]
    expected_D = 2 + 2 * (L + random_emb_size) + const_emb_size       # == module out_dim
    assert out.shape == (B, N, expected_D), out.shape
    err = float(jnp.max(jnp.abs(out - ref)))
    assert jnp.allclose(out, ref, atol=1e-4, rtol=1e-4), f"max abs err {err}"

    print("KERNEL_OK")
</pallas_src>

<mosaic_0001>
module attributes {stable_mosaic.version = 11 : i64} {
  func.func @_embed_kernel(%arg0: i32, %arg1: i32, %arg2: memref<1x256x2xf32, #tpu.memory_space<vmem>>, %arg3: memref<2x40xf32, #tpu.memory_space<vmem>>, %arg4: memref<256x64xf32, #tpu.memory_space<vmem>>, %arg5: memref<1x256x146xf32, #tpu.memory_space<vmem>>) attributes {dimension_semantics = [#tpu.dimension_semantics<parallel>, #tpu.dimension_semantics<parallel>], iteration_bounds = array<i64: 1, 2>, scalar_prefetch = 0 : i64, scratch_operands = 0 : i64, tpu.core_type = #tpu.core_type<tc>, window_params = [{transform_indices = @transform_0, window_bounds = array<i64: 1, 256, 2>}, {pipeline_mode = #tpu.pipeline_mode<synchronous>, transform_indices = @transform_1, window_bounds = array<i64: 2, 40>}, {transform_indices = @transform_2, window_bounds = array<i64: 256, 64>}, {transform_indices = @transform_3, window_bounds = array<i64: 1, 256, 146>}]} {
    %c0 = arith.constant 0 : index
    %c0_0 = arith.constant 0 : index
    %c0_1 = arith.constant 0 : index
    %0 = vector.load %arg2[%c0, %c0_0, %c0_1] : memref<1x256x2xf32, #tpu.memory_space<vmem>>, vector<1x256x2xf32>
    %1 = vector.shape_cast %0 : vector<1x256x2xf32> to vector<256x2xf32>
    %c0_2 = arith.constant 0 : index
    %c0_3 = arith.constant 0 : index
    %2 = vector.load %arg3[%c0_2, %c0_3] : memref<2x40xf32, #tpu.memory_space<vmem>>, vector<2x40xf32>
    %3 = vector.extract_strided_slice %1 {offsets = [0, 0], sizes = [256, 1], strides = [1, 1]} : vector<256x2xf32> to vector<256x1xf32>
    %4 = vector.extract_strided_slice %2 {offsets = [0, 0], sizes = [1, 40], strides = [1, 1]} : vector<2x40xf32> to vector<1x40xf32>
    %5 = vector.broadcast %3 : vector<256x1xf32> to vector<256x40xf32>
    %6 = vector.broadcast %4 : vector<1x40xf32> to vector<256x40xf32>
    %7 = arith.mulf %5, %6 : vector<256x40xf32>
    %8 = vector.extract_strided_slice %1 {offsets = [0, 1], sizes = [256, 1], strides = [1, 1]} : vector<256x2xf32> to vector<256x1xf32>
    %9 = vector.extract_strided_slice %2 {offsets = [1, 0], sizes = [1, 40], strides = [1, 1]} : vector<2x40xf32> to vector<1x40xf32>
    %10 = vector.broadcast %8 : vector<256x1xf32> to vector<256x40xf32>
    %11 = vector.broadcast %9 : vector<1x40xf32> to vector<256x40xf32>
    %12 = arith.mulf %10, %11 : vector<256x40xf32>
    %13 = arith.addf %7, %12 : vector<256x40xf32>
    %14 = math.sin %13 : vector<256x40xf32>
    %15 = math.cos %13 : vector<256x40xf32>
    %c0_4 = arith.constant 0 : index
    %c0_5 = arith.constant 0 : index
    %16 = vector.load %arg4[%c0_4, %c0_5] : memref<256x64xf32, #tpu.memory_space<vmem>>, vector<256x64xf32>
    %17 = tpu.concatenate %1, %14, %15, %16 in 1 : vector<256x2xf32>, vector<256x40xf32>, vector<256x40xf32>, vector<256x64xf32> -> vector<256x146xf32>
    %c0_6 = arith.constant 0 : index
    %c0_7 = arith.constant 0 : index
    %c0_8 = arith.constant 0 : index
    %18 = vector.load %arg5[%c0_6, %c0_7, %c0_8] : memref<1x256x146xf32, #tpu.memory_space<vmem>>, vector<1x256x146xf32>
    %19 = vector.shape_cast %18 : vector<1x256x146xf32> to vector<256x146xf32>
    %20 = vector.shape_cast %17 : vector<256x146xf32> to vector<1x256x146xf32>
    tpu.vector_store %arg5[%c0_6, %c0_7, %c0_8], %20 {strides = array<i32>} : memref<1x256x146xf32, #tpu.memory_space<vmem>>, vector<1x256x146xf32>,
    return
  }
  func.func @transform_0(%arg0: i32, %arg1: i32) -> (i32, i32, i32) {
    %c0_i32 = arith.constant 0 : i32
    %c0_i32_0 = arith.constant 0 : i32
    return %arg1, %arg0, %c0_i32 : i32, i32, i32
  }
  func.func @transform_1(%arg0: i32, %arg1: i32) -> (i32, i32) {
    %c0_i32 = arith.constant 0 : i32
    %c0_i32_0 = arith.constant 0 : i32
    %c0_i32_1 = arith.constant 0 : i32
    return %c0_i32, %c0_i32_0 : i32, i32
  }
  func.func @transform_2(%arg0: i32, %arg1: i32) -> (i32, i32) {
    %c0_i32 = arith.constant 0 : i32
    %c0_i32_0 = arith.constant 0 : i32
    return %arg0, %c0_i32 : i32, i32
  }
  func.func @transform_3(%arg0: i32, %arg1: i32) -> (i32, i32, i32) {
    %c0_i32 = arith.constant 0 : i32
    %c0_i32_0 = arith.constant 0 : i32
    return %arg1, %arg0, %c0_i32 : i32, i32, i32
  }
}

</mosaic_0001>

<bundles_post_ra>
// kernel: tpu_custom_call.1
= control target key start
LH: loop header
LB: loop body
LE: loop exit
PB: predicated region body
PF: predicated region fallthrough
CT: control target
= control target key end

     0   :  { %s8623_s12 = smov 0   ;;  %s8625_s13 = smov 0   ;;  %s13997_s0 = inlined_call_operand.vmem [shape: f32[2,256,2], index: 0, kind: input, shape index: {}]   ;;  %s13998_s1 = inlined_call_operand.vmem [shape: f32[2,40], index: 1, kind: input, shape index: {}]   ;;  %s13999_s2 = inlined_call_operand.vmem [shape: f32[256,64], index: 2, kind: input, shape index: {}]   ;;  %s14000_s3 = inlined_call_operand.vmem [shape: f32[2,256,146], index: 3, kind: output, shape index: {}]  }
   0x1   :  { %s8627_s14 = smov 0  }
   0x2 LB: > { %s22_s15 = sadd.s32 1, %s8586_s13  ;;  %p7976_p0 = scmp.ge.s32.totalorder %s8590_s14, 1  ;;  %s8590_s14 = sphi %s8627_s14, %s13_s14   ;;  %s8586_s13 = sphi %s8625_s13, %s14917_s13   ;;  %s8582_s12 = sphi %s8623_s12, %s14916_s12  }
   0x3   : > { %p23_p1 = scmp.ge.s32.totalorder %s22_s15, 2  ;;  %p169_p2 = scmp.lt.s32.totalorder %s8590_s14, 3 }
   0x5   : > { %s14919_s15 = smov (%p23_p1, %s22_s15), 0  ;;  %p170_p3 = pnand %p7976_p0, %p169_p2 }
   0x7   : > { %173 = sbr.rel (%p170_p3) target bundleno = 1318 (0x526), region = 32 }
   0xe   : > { %p208_p4 = scmp.lt.s32.totalorder %s8582_s12, 1  ;;  %v8592_v0 = vmov 0   ;;  %v8593_v33 = vmov 1   ;;  %s8600_s22 = smov 2  }
   0xf   : > { %8405 = vset.pattern.permute.xlu1 %v8592_v0  ;;  %8404 = vset.pattern.permute.xlu0 %v8592_v0  ;;  %v427_v0 = vlaneseq  ;;  %s8601_s23 = smov 42   ;;  %s8602_s26 = smov 82  }
  0x10   : > { %s14921_s12 = smov (!%p208_p4, %s8582_s12), 1 }
  0x11   : > { %s8239_s16 = sshll.u32 %s14921_s12, 8 }
  0x12   : > { %s8647_s19 = scalar_lea.vmem %s13997_s0, %s8239_s16 }
  0x13   : > { %v8650_v1 = vld [vmem:[%s8647_s19 + $0x10] sm:$0xff]  ;;  %v8653_v2 = vld [vmem:[%s8647_s19] sm:$0xff]  ;;  %v8658_v3 = vld [vmem:[%s8647_s19 + $0x18] sm:$0xff] }
  0x14   : > { %279 = vperm.xlu1 %8405, %v8650_v1   ;;  %269 = vperm.xlu0 %8404, %v8653_v2   ;;  %v235_v4 = vld [vmem:[%s8647_s19 + $0x8] sm:$0xff]  ;;  %v238_v6 = vld [vmem:[%s8647_s19 + $0x20] sm:$0xff]  ;;  %v241_v7 = vld [vmem:[%s8647_s19 + $0x38] sm:$0xff] }
  0x15   : > { %v8663_v5 = vld [vmem:[%s8647_s19 + $0x28] sm:$0xff]  ;;  %v240_v8 = vld [vmem:[%s8647_s19 + $0x30] sm:$0xff]  ;;  %v242_v10 = vld [vmem:[%s8647_s19 + $0x40] sm:$0xff] }
  0x16   : > { %v243_v9 = vld [vmem:[%s8647_s19 + $0x48] sm:$0xff]  ;;  %v245_v11 = vld [vmem:[%s8647_s19 + $0x58] sm:$0xff]  ;;  %v244_v12 = vld [vmem:[%s8647_s19 + $0x50] sm:$0xff] }
  0x17   : > { %v247_v13 = vld [vmem:[%s8647_s19 + $0x68] sm:$0xff]  ;;  %v246_v14 = vld [vmem:[%s8647_s19 + $0x60] sm:$0xff]  ;;  %v249_v15 = vld [vmem:[%s8647_s19 + $0x78] sm:$0xff] }
  0x18   : > { %284 = vperm.xlu1 %8405, %v8658_v3   ;;  %274 = vperm.xlu0 %8404, %v235_v4   ;;  %v248_v16 = vld [vmem:[%s8647_s19 + $0x70] sm:$0xff]  ;;  %v251_v17 = vld [vmem:[%s8647_s19 + $0x88] sm:$0xff]  ;;  %v250_v18 = vld [vmem:[%s8647_s19 + $0x80] sm:$0xff] }
  0x19   : > { %v253_v19 = vld [vmem:[%s8647_s19 + $0x98] sm:$0xff]  ;;  %v252_v20 = vld [vmem:[%s8647_s19 + $0x90] sm:$0xff]  ;;  %v255_v21 = vld [vmem:[%s8647_s19 + $0xa8] sm:$0xff] }
  0x1a   : > { %v254_v22 = vld [vmem:[%s8647_s19 + $0xa0] sm:$0xff]  ;;  %v257_v23 = vld [vmem:[%s8647_s19 + $0xb8] sm:$0xff]  ;;  %v256_v24 = vld [vmem:[%s8647_s19 + $0xb0] sm:$0xff] }
  0x1b   : > { %v259_v25 = vld [vmem:[%s8647_s19 + $0xc8] sm:$0xff]  ;;  %v258_v26 = vld [vmem:[%s8647_s19 + $0xc0] sm:$0xff]  ;;  %v261_v27 = vld [vmem:[%s8647_s19 + $0xd8] sm:$0xff] }
  0x1c   : > { %294 = vperm.xlu1 %8405, %v8663_v5   ;;  %289 = vperm.xlu0 %8404, %v238_v6   ;;  %v260_v28 = vld [vmem:[%s8647_s19 + $0xd0] sm:$0xff]  ;;  %v263_v29 = vld [vmem:[%s8647_s19 + $0xe8] sm:$0xff]  ;;  %v262_v30 = vld [vmem:[%s8647_s19 + $0xe0] sm:$0xff] }
  0x1d   : > { %v265_v31 = vld [vmem:[%s8647_s19 + $0xf8] sm:$0xff]  ;;  %v264_v32 = vld [vmem:[%s8647_s19 + $0xf0] sm:$0xff] }
  0x20   : > { %304 = vperm.xlu1 %8405, %v241_v7   ;;  %299 = vperm.xlu0 %8404, %v240_v8  }
  0x24   : > { %314 = vperm.xlu1 %8405, %v243_v9   ;;  %309 = vperm.xlu0 %8404, %v242_v10  }
  0x28   : > { %324 = vperm.xlu1 %8405, %v245_v11   ;;  %319 = vperm.xlu0 %8404, %v244_v12  }
  0x2c   : > { %334 = vperm.xlu1 %8405, %v247_v13   ;;  %329 = vperm.xlu0 %8404, %v246_v14  }
  0x30   : > { %344 = vperm.xlu1 %8405, %v249_v15   ;;  %339 = vperm.xlu0 %8404, %v248_v16  }
  0x34   : > { %354 = vperm.xlu1 %8405, %v251_v17   ;;  %349 = vperm.xlu0 %8404, %v250_v18  }
  0x38   : > { %364 = vperm.xlu1 %8405, %v253_v19   ;;  %359 = vperm.xlu0 %8404, %v252_v20  }
  0x3c   : > { %374 = vperm.xlu1 %8405, %v255_v21   ;;  %369 = vperm.xlu0 %8404, %v254_v22  }
  0x40   : > { %384 = vperm.xlu1 %8405, %v257_v23   ;;  %379 = vperm.xlu0 %8404, %v256_v24  }
  0x44   : > { %394 = vperm.xlu1 %8405, %v259_v25   ;;  %389 = vperm.xlu0 %8404, %v258_v26  }
  0x48   : > { %404 = vperm.xlu1 %8405, %v261_v27   ;;  %399 = vperm.xlu0 %8404, %v260_v28  }
  0x4c   : > { %414 = vperm.xlu1 %8405, %v263_v29   ;;  %409 = vperm.xlu0 %8404, %v262_v30  }
  0x50   : > { %424 = vperm.xlu1 %8405, %v265_v31   ;;  %419 = vperm.xlu0 %8404, %v264_v32  }
  0x54   : > { %8407 = vset.pattern.permute.xlu1 %v8593_v33  ;;  %8406 = vset.pattern.permute.xlu0 %v8593_v33 }
  0x55   : > { %468 = vperm.xlu1 %8407, %v235_v4   ;;  %464 = vperm.xlu0 %8406, %v8653_v2  }
  0x59   : > { %472 = vperm.xlu1 %8407, %v8650_v1   ;;  %476 = vperm.xlu0 %8406, %v8658_v3   ;;  %v428_v3 = vshrl.u32 %v427_v0, 7 }
  0x5b   : > { %v593_v4 = vsub.s32 1, %v428_v3 }
  0x5d   : > { %480 = vperm.xlu1 %8407, %v238_v6   ;;  %484 = vperm.xlu0 %8406, %v8663_v5  }
  0x61   : > { %488 = vperm.xlu1 %8407, %v240_v8   ;;  %492 = vperm.xlu0 %8406, %v241_v7   ;;  %v429_v7 = vsub.s32 0, %v428_v3  ;;  %v266_v8 = vld [vmem:[%s13998_s1] sm:$0x3] }
  0x65   : > { %496 = vperm.xlu1 %8407, %v242_v10   ;;  %500 = vperm.xlu0 %8406, %v243_v9   ;;  %v8752_v9 = vrot.slane %v266_v8, %v593_v4  ;;  %v8754_v10 = vrot.slane %v266_v8, %v429_v7 }
  0x69   : > { %504 = vperm.xlu1 %8407, %v244_v12   ;;  %508 = vperm.xlu0 %8406, %v245_v11  }
  0x6d   : > { %512 = vperm.xlu1 %8407, %v246_v14   ;;  %516 = vperm.xlu0 %8406, %v247_v13  }
  0x71   : > { %520 = vperm.xlu1 %8407, %v248_v16   ;;  %524 = vperm.xlu0 %8406, %v249_v15  }
  0x75   : > { %528 = vperm.xlu1 %8407, %v250_v18   ;;  %532 = vperm.xlu0 %8406, %v251_v17  }
  0x79   : > { %536 = vperm.xlu1 %8407, %v252_v20   ;;  %540 = vperm.xlu0 %8406, %v253_v19  }
  0x7d   : > { %544 = vperm.xlu1 %8407, %v254_v22   ;;  %548 = vperm.xlu0 %8406, %v255_v21  }
  0x81   : > { %552 = vperm.xlu1 %8407, %v256_v24   ;;  %556 = vperm.xlu0 %8406, %v257_v23  }
  0x85   : > { %560 = vperm.xlu1 %8407, %v258_v26   ;;  %564 = vperm.xlu0 %8406, %v259_v25  }
  0x89   : > { %568 = vperm.xlu1 %8407, %v260_v28   ;;  %572 = vperm.xlu0 %8406, %v261_v27  }
  0x8d   : > { %576 = vperm.xlu1 %8407, %v262_v30   ;;  %580 = vperm.xlu0 %8406, %v263_v29  }
  0x91   : > { %584 = vperm.xlu1 %8407, %v264_v32   ;;  %588 = vperm.xlu0 %8406, %v265_v31  }
  0x93   : > { %v280_v34 = vpop.permute.xlu1 %279  ;;  %v270_v35 = vpop.permute.xlu0 %269 }
  0x94   : > { %v431_v15 = vmul.f32 %v8754_v10, %v270_v35  ;;  %v433_v26 = vmul.f32 %v8754_v10, %v280_v34 }
  0x97   : > { %v285_v36 = vpop.permute.xlu1 %284  ;;  %v275_v37 = vpop.permute.xlu0 %274 }
  0x98   : > { %v432_v16 = vmul.f32 %v8754_v10, %v275_v37  ;;  %v434_v27 = vmul.f32 %v8754_v10, %v285_v36 }
  0x9b   : > { %v295_v38 = vpop.permute.xlu1 %294  ;;  %v290_v39 = vpop.permute.xlu0 %289 }
  0x9c   : > { %v436_v33 = vmul.f32 %v8754_v10, %v295_v38  ;;  %v435_v35 = vmul.f32 %v8754_v10, %v290_v39 }
  0x9f   : > { %v8697_v40 = vpop.permute.xlu1 %304  ;;  %v8699_v41 = vpop.permute.xlu0 %299 }
  0xa0   : > { %v438_v34 = vmul.f32 %v8754_v10, %v8697_v40  ;;  %v437_v38 = vmul.f32 %v8754_v10, %v8699_v41 }
  0xa3   : > { %v8701_v42 = vpop.permute.xlu1 %314  ;;  %v8703_v43 = vpop.permute.xlu0 %309 }
  0xa4   : > { %v8786_v39 = vmul.f32 %v8754_v10, %v8701_v42  ;;  %v439_v8 = vmul.f32 %v8754_v10, %v8703_v43 }
  0xa7   : > { %v8705_v44 = vpop.permute.xlu1 %324  ;;  %v8707_v45 = vpop.permute.xlu0 %319 }
  0xa8   : > { %v8792_v40 = vmul.f32 %v8754_v10, %v8705_v44 }
  0xab   : > { %v8709_v46 = vpop.permute.xlu1 %334  ;;  %v8711_v47 = vpop.permute.xlu0 %329 }
  0xac   : > { %v8804_v41 = vmul.f32 %v8754_v10, %v8711_v47 }
  0xaf   : > { %v8713_v48 = vpop.permute.xlu1 %344  ;;  %v8715_v49 = vpop.permute.xlu0 %339 }
  0xb0   : > { %v8808_v42 = vmul.f32 %v8754_v10, %v8713_v48 }
  0xb3   : > { %v8717_v50 = vpop.permute.xlu1 %354  ;;  %v8719_v51 = vpop.permute.xlu0 %349 }
  0xb4   : > { %v8821_v47 = vmul.f32 %v8754_v10, %v8717_v50  ;;  %v8825_v48 = vmul.f32 %v8754_v10, %v8719_v51 }
  0xb7   : > { %v8721_v52 = vpop.permute.xlu1 %364  ;;  %v8723_v53 = vpop.permute.xlu0 %359 }
  0xbb   : > { %v8725_v54 = vpop.permute.xlu1 %374  ;;  %v8727_v55 = vpop.permute.xlu0 %369 }
  0xbc   : > { %v8842_v50 = vmul.f32 %v8754_v10, %v8727_v55 }
  0xbf   : > { %v8729_v56 = vpop.permute.xlu1 %384  ;;  %v8731_v57 = vpop.permute.xlu0 %379 }
  0xc0   : > { %v8846_v51 = vmul.f32 %v8754_v10, %v8729_v56  ;;  %v8855_v55 = vmul.f32 %v8754_v10, %v8731_v57 }
  0xc3   : > { %v8733_v58 = vpop.permute.xlu1 %394  ;;  %v8735_v59 = vpop.permute.xlu0 %389 }
  0xc4   : > { %v8859_v56 = vmul.f32 %v8754_v10, %v8733_v58 }
  0xc7   : > { %v8737_v60 = vpop.permute.xlu1 %404  ;;  %v8739_v61 = vpop.permute.xlu0 %399 }
  0xc8   : > { %v8874_v57 = vmul.f32 %v8754_v10, %v8739_v61 }
  0xca   : > { %14388 = vst [vmem:[#allocation10_spill] sm:$0xff] %v8874_v57 }
  0xcb   : > { %v8741_v62 = vpop.permute.xlu1 %414  ;;  %v8743_v63 = vpop.permute.xlu0 %409 }
  0xcf   : > { %v8745_v1 = vpop.permute.xlu1 %424  ;;  %v8747_v2 = vpop.permute.xlu0 %419 }
  0xd4   : > { %v469_v5 = vpop.permute.xlu1 %468  ;;  %v465_v6 = vpop.permute.xlu0 %464 }
  0xd5   : > { %v596_v13 = vmul.f32 %v8752_v9, %v469_v5  ;;  %v595_v14 = vmul.f32 %v8752_v9, %v465_v6 }
  0xd7   : > { %v8760_v17 = vadd.f32 %v596_v13, %v432_v16  ;;  %v8762_v18 = vadd.f32 %v595_v14, %v431_v15 }
  0xd8   : > { %v473_v11 = vpop.permute.xlu1 %472  ;;  %v477_v12 = vpop.permute.xlu0 %476 }
  0xd9   : > { %14380 = vst [vmem:[#allocation2_spill] sm:$0xff] %v8760_v17  ;;  %14381 = vst [vmem:[#allocation3_spill] sm:$0xff] %v8762_v18  ;;  %v766_v21 = vand.u32 2139095040, %v8760_v17  ;;  %v662_v22 = vand.u32 2139095040, %v8762_v18  ;;  %v597_v23 = vmul.f32 %v8752_v9, %v473_v11  ;;  %v598_v24 = vmul.f32 %v8752_v9, %v477_v12 }
  0xda   : > { %v8796_v11 = vmul.f32 %v8754_v10, %v8707_v45  ;;  %v8800_v12 = vmul.f32 %v8754_v10, %v8709_v46  ;;  %v14002_v14 = vand.u32 2147483647, %v8760_v17  ;;  %v8815_v45 = vmul.f32 %v8754_v10, %v8715_v49 }
  0xdb   : > { %v767_v29 = vshrl.u32 %v766_v21, 23  ;;  %v663_v30 = vshrl.u32 %v662_v22, 23  ;;  %v8770_v31 = vadd.f32 %v597_v23, %v433_v26  ;;  %v8772_v32 = vadd.f32 %v598_v24, %v434_v27 }
  0xdc   : > { %v481_v19 = vpop.permute.xlu1 %480  ;;  %v485_v20 = vpop.permute.xlu0 %484  ;;  %v8834_v21 = vmul.f32 %v8754_v10, %v8723_v53  ;;  %v8838_v22 = vmul.f32 %v8754_v10, %v8725_v54  ;;  %v770_v53 = vand.u32 8388607, %v14002_v14 }
  0xdd   : > { %14382 = vst [vmem:[#allocation4_spill] sm:$0xff] %v8770_v31  ;;  %14383 = vst [vmem:[#allocation5_spill] sm:$0xff] %v8772_v32  ;;  %v7985_v37 = vadd.s32 4294967169, %v767_v29  ;;  %v7981_v0 = vadd.s32 4294967169, %v663_v30  ;;  %v599_v3 = vmul.f32 %v8752_v9, %v481_v19  ;;  %v870_v36 = vand.u32 2139095040, %v8770_v31 }
  0xde   : > { %v974_v5 = vand.u32 2139095040, %v8772_v32  ;;  %v600_v6 = vmul.f32 %v8752_v9, %v485_v20  ;;  %v8829_v19 = vmul.f32 %v8754_v10, %v8721_v52  ;;  %v8866_v30 = vmul.f32 %v8754_v10, %v8735_v59 }
  0xdf   : > { %v773_v43 = vadd.s32 1, %v7985_v37  ;;  %v669_v13 = vadd.s32 1, %v7981_v0  ;;  %v8810_v44 = vadd.f32 %v599_v3, %v435_v35  ;;  %v871_v46 = vshrl.u32 %v870_v36, 23 }
  0xe0   : > { %v489_v25 = vpop.permute.xlu1 %488  ;;  %v493_v28 = vpop.permute.xlu0 %492  ;;  %v975_v15 = vshrl.u32 %v974_v5, 23  ;;  %v8817_v16 = vadd.f32 %v600_v6, %v436_v33  ;;  %v8870_v33 = vmul.f32 %v8754_v10, %v8737_v60  ;;  %v771_v3 = vor.u32 8388608, %v770_v53 }
  0xe1   : > { %14384 = vst [vmem:[#allocation6_spill] sm:$0xff] %v8810_v44  ;;  %v601_v20 = vmul.f32 %v8752_v9, %v489_v25  ;;  %vm774_vm0 = vcmp.gt.s32.totalorder %v773_v43, 0  ;;  %vm670_vm1 = vcmp.gt.s32.totalorder %v669_v13, 0  ;;  %v1078_v23 = vand.u32 2139095040, %v8810_v44 }
  0xe2   : > { %14385 = vst [vmem:[#allocation7_spill] sm:$0xff] %v8817_v16  ;;  %v7989_v24 = vadd.s32 4294967169, %v871_v46  ;;  %v7993_v25 = vadd.s32 4294967169, %v975_v15  ;;  %v1182_v54 = vand.u32 2139095040, %v8817_v16  ;;  %v602_v26 = vmul.f32 %v8752_v9, %v493_v28  ;;  %14387 = vst [vmem:[#allocation9_spill] sm:$0xff] %v8870_v33 }
  0xe3   : > { %v8861_v27 = vadd.f32 %v601_v20, %v437_v38  ;;  %v14001_v28 = vand.u32 2147483647, %v8762_v18  ;;  %v775_v58 = vsel %vm774_vm0, %v773_v43, 0  ;;  %v671_v35 = vsel %vm670_vm1, %v669_v13, 0 }
  0xe4   : > { %v497_v4 = vpop.permute.xlu1 %496  ;;  %v501_v7 = vpop.permute.xlu0 %500  ;;  %v1079_v37 = vshrl.u32 %v1078_v23, 23  ;;  %v981_v59 = vadd.s32 1, %v7993_v25  ;;  %v1183_v36 = vshrl.u32 %v1182_v54, 23  ;;  %v8879_v5 = vadd.f32 %v602_v26, %v438_v34 }
  0xe5   : > { %14386 = vst [vmem:[#allocation8_spill] sm:$0xff] %v8861_v27  ;;  %v603_v29 = vmul.f32 %v8752_v9, %v497_v4  ;;  %v877_v4 = vadd.s32 1, %v7989_v24  ;;  %v8883_v6 = vmul.f32 %v8754_v10, %v8741_v62  ;;  %v1286_v61 = vand.u32 2139095040, %v8861_v27 }
  0xe6   : > { %14389 = vst [vmem:[#allocation11_spill] sm:$0xff] %v8879_v5  ;;  %v604_v43 = vmul.f32 %v8752_v9, %v501_v7  ;;  %v8891_v13 = vmul.f32 %v8754_v10, %v8743_v63  ;;  %v8895_v46 = vmul.f32 %v8754_v10, %v8745_v1  ;;  %v8899_v34 = vmul.f32 %v8754_v10, %v8747_v2 }
  0xe7   : > { %14390 = vst [vmem:[#allocation12_spill] sm:$0xff] %v8883_v6  ;;  %v8886_v38 = vadd.f32 %v603_v29, %v439_v8  ;;  %v8901_v62 = vand.u32 31, %v775_v58  ;;  %v8903_v15 = vand.u32 31, %v671_v35  ;;  %v7997_v8 = vadd.s32 4294967169, %v1079_v37 }
  0xe8   : > { %v505_v49 = vpop.permute.xlu1 %504  ;;  %v509_v52 = vpop.permute.xlu0 %508  ;;  %14392 = vst [vmem:[#allocation14_spill] sm:$0xff] %v8891_v13  ;;  %14393 = vst [vmem:[#allocation15_spill] sm:$0xff] %v8895_v46  ;;  %v8905_v20 = vshll.u32 %v771_v3, 8  ;;  %v8909_v7 = vand.u32 8388607, %v14001_v28  ;;  %vm878_vm2 = vcmp.gt.s32.totalorder %v877_v4, 0  ;;  %v8916_v53 = vadd.f32 %v604_v43, %v8786_v39 }
  0xe9   : > { %14391 = vst [vmem:[#allocation13_spill] sm:$0xff] %v8886_v38  ;;  %14394 = vst [vmem:[#allocation16_spill] sm:$0xff] %v8899_v34  ;;  %vm982_vm3 = vcmp.gt.s32.totalorder %v981_v59, 0  ;;  %v8001_v63 = vadd.s32 4294967169, %v1183_v36  ;;  %v1390_v1 = vand.u32 2139095040, %v8879_v5  ;;  %v8912_v23 = vshrl.u32 %v775_v58, 5 }
  0xea   : > { %v1287_v2 = vshrl.u32 %v1286_v61, 23  ;;  %v1494_v10 = vand.u32 2139095040, %v8886_v38  ;;  %14395 = vst [vmem:[#allocation17_spill] sm:$0xff] %v8916_v53  ;;  %v8919_v25 = vsub.s32 32, %v8901_v62  ;;  %v8921_v54 = vshrl.u32 %v671_v35, 5 }
  0xeb   : > { %v605_v26 = vmul.f32 %v8752_v9, %v505_v49  ;;  %v606_v29 = vmul.f32 %v8752_v9, %v509_v52  ;;  %v8926_v58 = vsub.s32 32, %v8903_v15  ;;  %v879_v3 = vsel %vm878_vm2, %v877_v4, 0 }
  0xec   : > { %v513_v0 = vpop.permute.xlu1 %512  ;;  %v517_v60 = vpop.permute.xlu0 %516  ;;  %v983_v36 = vsel %vm982_vm3, %v981_v59, 0  ;;  %v1085_v61 = vadd.s32 1, %v7997_v8  ;;  %v1189_v28 = vadd.s32 1, %v8001_v63  ;;  %v1391_v39 = vshrl.u32 %v1390_v1, 23 }
  0xed   : > { %v607_v43 = vmul.f32 %v8752_v9, %v513_v0  ;;  %v608_v14 = vmul.f32 %v8752_v9, %v517_v60  ;;  %v8005_v46 = vadd.s32 4294967169, %v1287_v2  ;;  %v1495_v35 = vshrl.u32 %v1494_v10, 23 }
  0xee   : > { %v1598_v34 = vand.u32 2139095040, %v8916_v53  ;;  %v8932_v52 = vshrl.u32 %v879_v3, 5  ;;  %v8935_v6 = vadd.f32 %v605_v26, %v8796_v11  ;;  %v8938_v4 = vadd.f32 %v606_v29, %v8792_v40 }
  0xef   : > { %v8941_v8 = vand.u32 31, %v879_v3  ;;  %v8943_v0 = vshrl.u32 %v983_v36, 5  ;;  %v8945_v60 = vand.u32 31, %v983_v36  ;;  %vm1086_vm4 = vcmp.gt.s32.totalorder %v1085_v61, 0 }
  0xf0   : > { %v521_v24 = vpop.permute.xlu1 %520  ;;  %v525_v37 = vpop.permute.xlu0 %524  ;;  %14396 = vst [vmem:[#allocation18_spill] sm:$0xff] %v8935_v6  ;;  %14397 = vst [vmem:[#allocation19_spill] sm:$0xff] %v8938_v4  ;;  %vm1190_vm5 = vcmp.gt.s32.totalorder %v1189_v28, 0  ;;  %v8009_v1 = vadd.s32 4294967169, %v1391_v39  ;;  %v8948_v2 = vadd.f32 %v607_v43, %v8804_v41  ;;  %v8951_v11 = vadd.f32 %v608_v14, %v8800_v12 }
  0xf1   : > { %v609_v49 = vmul.f32 %v8752_v9, %v521_v24  ;;  %v610_v59 = vmul.f32 %v8752_v9, %v525_v37  ;;  %v1293_v10 = vadd.s32 1, %v8005_v46  ;;  %v8013_v24 = vadd.s32 4294967169, %v1495_v35 }
  0xf2   : > { %14398 = vst [vmem:[#allocation20_spill] sm:$0xff] %v8948_v2  ;;  %14399 = vst [vmem:[#allocation21_spill] sm:$0xff] %v8951_v11  ;;  %v1599_v26 = vshrl.u32 %v1598_v34, 23  ;;  %v1702_v37 = vand.u32 2139095040, %v8935_v6  ;;  %v1806_v3 = vand.u32 2139095040, %v8938_v4  ;;  %v8963_v39 = vsub.s32 32, %v8941_v8 }
  0xf3   : > { %v8954_v29 = vadd.f32 %v609_v49, %v8815_v45  ;;  %v8959_v36 = vadd.f32 %v610_v59, %v8808_v42  ;;  %v8966_v12 = vsub.s32 32, %v8945_v60  ;;  %v1087_v14 = vsel %vm1086_vm4, %v1085_v61, 0 }
  0xf4   : > { %v529_v63 = vpop.permute.xlu1 %528  ;;  %v533_v40 = vpop.permute.xlu0 %532  ;;  %v1191_v46 = vsel %vm1190_vm5, %v1189_v28, 0  ;;  %v1397_v34 = vadd.s32 1, %v8009_v1  ;;  %v1910_v43 = vand.u32 2139095040, %v8948_v2  ;;  %v2014_v42 = vand.u32 2139095040, %v8951_v11 }
  0xf5   : > { %14400 = vst [vmem:[#allocation22_spill] sm:$0xff] %v8954_v29  ;;  %14401 = vst [vmem:[#allocation23_spill] sm:$0xff] %v8959_v36  ;;  %v611_v41 = vmul.f32 %v8752_v9, %v529_v63  ;;  %v612_v45 = vmul.f32 %v8752_v9, %v533_v40  ;;  %vm1294_vm6 = vcmp.gt.s32.totalorder %v1293_v10, 0  ;;  %v1501_v35 = vadd.s32 1, %v8013_v24 }
  0xf6   : > { %v8017_v49 = vadd.s32 4294967169, %v1599_v26  ;;  %v2118_v59 = vand.u32 2139095040, %v8954_v29  ;;  %v1703_v63 = vshrl.u32 %v1702_v37, 23  ;;  %v1807_v13 = vshrl.u32 %v1806_v3, 23 }
  0xf7   : > { %v2222_v4 = vand.u32 2139095040, %v8959_v36  ;;  %v8976_v61 = vadd.f32 %v611_v41, %v8825_v48  ;;  %v8978_v40 = vshrl.u32 %v1087_v14, 5  ;;  %v8980_v28 = vand.u32 31, %v1087_v14 }
  0xf8   : > { %v8982_v1 = vand.u32 31, %v1191_v46  ;;  %v8985_v11 = vadd.f32 %v612_v45, %v8821_v47  ;;  %v8987_v24 = vshrl.u32 %v1191_v46, 5  ;;  %vm1398_vm7 = vcmp.gt.s32.totalorder %v1397_v34, 0  ;;  %v537_v41 = vpop.permute.xlu1 %536  ;;  %v541_v53 = vpop.permute.xlu0 %540 }
  0xf9   : > { %14402 = vst [vmem:[#allocation24_spill] sm:$0xff] %v8976_v61  ;;  %v1911_v26 = vshrl.u32 %v1910_v43, 23  ;;  %v2015_v37 = vshrl.u32 %v2014_v42, 23  ;;  %v1295_v3 = vsel %vm1294_vm6, %v1293_v10, 0  ;;  %vm1502_vm8 = vcmp.gt.s32.totalorder %v1501_v35, 0 }
  0xfa   : > { %14403 = vst [vmem:[#allocation25_spill] sm:$0xff] %v8985_v11  ;;  %v1605_v36 = vadd.s32 1, %v8017_v49  ;;  %v2119_v48 = vshrl.u32 %v2118_v59, 23  ;;  %v8021_v29 = vadd.s32 4294967169, %v1703_v63  ;;  %v8025_v2 = vadd.s32 4294967169, %v1807_v13 }
  0xfb   : > { %v2223_v14 = vshrl.u32 %v2222_v4, 23  ;;  %v2326_v6 = vand.u32 2139095040, %v8976_v61  ;;  %v8992_v47 = vsub.s32 32, %v8980_v28  ;;  %v8995_v45 = vsub.s32 32, %v8982_v1 }
  0xfc   : > { %v1399_v46 = vsel %vm1398_vm7, %v1397_v34, 0  ;;  %v2430_v43 = vand.u32 2139095040, %v8985_v11  ;;  %v8998_v10 = vand.u32 31, %v1295_v3  ;;  %v8029_v42 = vadd.s32 4294967169, %v1911_v26 }
  0xfd   : > { %v8033_v49 = vadd.s32 4294967169, %v2015_v37  ;;  %v613_v59 = vmul.f32 %v8752_v9, %v537_v41  ;;  %v1503_v13 = vsel %vm1502_vm8, %v1501_v35, 0  ;;  %vm1606_vm9 = vcmp.gt.s32.totalorder %v1605_v36, 0 }
  0xfe   : > { %14404 = vst [vmem:[#allocation26_spill] sm:$0xff] %v8998_v10  ;;  %v8037_v4 = vadd.s32 4294967169, %v2119_v48  ;;  %v614_v63 = vmul.f32 %v8752_v9, %v541_v53  ;;  %v1709_v61 = vadd.s32 1, %v8021_v29  ;;  %v1813_v38 = vadd.s32 1, %v8025_v2 }
  0xff   : > { %v8041_v5 = vadd.s32 4294967169, %v2223_v14  ;;  %v2327_v33 = vshrl.u32 %v2326_v6, 23  ;;  %v9003_v57 = vshrl.u32 %v1295_v3, 5  ;;  %v9005_v34 = vshrl.u32 %v1399_v46, 5 }
 0x100   : > { %v9007_v11 = vand.u32 31, %v1399_v46  ;;  %v2431_v26 = vshrl.u32 %v2430_v43, 23  ;;  %v1607_v37 = vsel %vm1606_vm9, %v1605_v36, 0  ;;  %v1917_v27 = vadd.s32 1, %v8029_v42  ;;  %v545_v43 = vpop.permute.xlu1 %544 }
 0x101   : > { %14405 = vst [vmem:[#allocation27_spill] sm:$0xff] %v9003_v57  ;;  %14406 = vst [vmem:[#allocation28_spill] sm:$0xff] %v9005_v34  ;;  %v2021_v41 = vadd.s32 1, %v8033_v49  ;;  %v9010_v35 = vadd.f32 %v613_v59, %v8834_v21  ;;  %v9013_v48 = vsub.s32 32, %v8998_v10  ;;  %v9015_v53 = vand.u32 31, %v1503_v13  ;;  %v549_v49 = vpop.permute.xlu0 %548 }
 0x102   : > { %14407 = vst [vmem:[#allocation29_spill] sm:$0xff] %v9007_v11  ;;  %v2125_v2 = vadd.s32 1, %v8037_v4  ;;  %v9018_v6 = vadd.f32 %v614_v63, %v8829_v19  ;;  %vm1710_vm10 = vcmp.gt.s32.totalorder %v1709_v61, 0  ;;  %vm1814_vm11 = vcmp.gt.s32.totalorder %v1813_v38, 0 }
 0x103   : > { %14408 = vst [vmem:[#allocation30_spill] sm:$0xff] %v9010_v35  ;;  %14409 = vst [vmem:[#allocation31_spill] sm:$0xff] %v9013_v48  ;;  %v2229_v29 = vadd.s32 1, %v8041_v5  ;;  %v8045_v3 = vadd.s32 4294967169, %v2327_v33  ;;  %v9021_v36 = vsub.s32 32, %v9007_v11  ;;  %v9023_v14 = vshrl.u32 %v1503_v13, 5 }
 0x104   : > { %14410 = vst [vmem:[#allocation32_spill] sm:$0xff] %v9015_v53  ;;  %14411 = vst [vmem:[#allocation33_spill] sm:$0xff] %v9018_v6  ;;  %v9025_v21 = vshrl.u32 %v1607_v37, 5  ;;  %v8049_v46 = vadd.s32 4294967169, %v2431_v26  ;;  %v9027_v42 = vand.u32 31, %v1607_v37  ;;  %vm1918_vm12 = vcmp.gt.s32.totalorder %v1917_v27, 0 }
 0x105   : > { %14412 = vst [vmem:[#allocation34_spill] sm:$0xff] %v9021_v36  ;;  %14413 = vst [vmem:[#allocation35_spill] sm:$0xff] %v9023_v14  ;;  %vm2022_vm13 = vcmp.gt.s32.totalorder %v2021_v41, 0  ;;  %v2534_v19 = vand.u32 2139095040, %v9010_v35  ;;  %v1711_v59 = vsel %vm1710_vm10, %v1709_v61, 0  ;;  %v1815_v4 = vsel %vm1814_vm11, %v1813_v38, 0 }
 0x106   : > { %14414 = vst [vmem:[#allocation36_spill] sm:$0xff] %v9025_v21  ;;  %14415 = vst [vmem:[#allocation37_spill] sm:$0xff] %v9027_v42  ;;  %vm2126_vm14 = vcmp.gt.s32.totalorder %v2125_v2, 0  ;;  %v2638_v33 = vand.u32 2139095040, %v9018_v6  ;;  %v9032_v5 = vsub.s32 32, %v9015_v53  ;;  %vm2230_vm15 = vcmp.gt.s32.totalorder %v2229_v29, 0 }
 0x107   : > { %v2333_v13 = vadd.s32 1, %v8045_v3  ;;  %v615_v63 = vmul.f32 %v8752_v9, %v545_v43  ;;  %v1919_v26 = vsel %vm1918_vm12, %v1917_v27, 0  ;;  %v2023_v37 = vsel %vm2022_vm13, %v2021_v41, 0 }
 0x108   : > { %14416 = vst [vmem:[#allocation38_spill] sm:$0xff] %v9032_v5  ;;  %v2437_v21 = vadd.s32 1, %v8049_v46  ;;  %v616_v14 = vmul.f32 %v8752_v9, %v549_v49  ;;  %v9036_v34 = vand.u32 31, %v1711_v59  ;;  %v9038_v35 = vand.u32 31, %v1815_v4 }
 0x109   : > { %v2127_v38 = vsel %vm2126_vm14, %v2125_v2, 0  ;;  %v2535_v61 = vshrl.u32 %v2534_v19, 23  ;;  %v9041_v6 = vsub.s32 32, %v9027_v42  ;;  %v9043_v53 = vshrl.u32 %v1711_v59, 5 }
 0x10a   : > { %14417 = vst [vmem:[#allocation39_spill] sm:$0xff] %v9036_v34  ;;  %14418 = vst [vmem:[#allocation40_spill] sm:$0xff] %v9038_v35  ;;  %v2231_v5 = vsel %vm2230_vm15, %v2229_v29, 0  ;;  %v2639_v3 = vshrl.u32 %v2638_v33, 23  ;;  %v9045_v11 = vand.u32 31, %v1919_v26  ;;  %v9047_v27 = vand.u32 31, %v2023_v37 }
 0x10b   : > { %14419 = vst [vmem:[#allocation41_spill] sm:$0xff] %v9041_v6  ;;  %14420 = vst [vmem:[#allocation42_spill] sm:$0xff] %v9043_v53  ;;  %vm2334_vm0 = vcmp.gt.s32.totalorder %v2333_v13, 0  ;;  %v9050_v41 = vadd.f32 %v615_v63, %v8842_v50  ;;  %v9052_v46 = vshrl.u32 %v1815_v4, 5  ;;  %v9054_v43 = vand.u32 31, %v2127_v38 }
 0x10c   : > { %14421 = vst [vmem:[#allocation43_spill] sm:$0xff] %v9045_v11  ;;  %14422 = vst [vmem:[#allocation44_spill] sm:$0xff] %v9047_v27  ;;  %vm2438_vm1 = vcmp.gt.s32.totalorder %v2437_v21, 0  ;;  %v9057_v2 = vadd.f32 %v616_v14, %v8838_v22  ;;  %v9060_v19 = vsub.s32 32, %v9036_v34  ;;  %v9063_v29 = vsub.s32 32, %v9038_v35 }
 0x10d   : > { %14423 = vst [vmem:[#allocation45_spill] sm:$0xff] %v9050_v41  ;;  %14424 = vst [vmem:[#allocation46_spill] sm:$0xff] %v9052_v46  ;;  %v9065_v49 = vand.u32 31, %v2231_v5  ;;  %v8053_v59 = vadd.s32 4294967169, %v2535_v61  ;;  %v9067_v33 = vshrl.u32 %v1919_v26, 5  ;;  %v9069_v50 = vshrl.u32 %v2023_v37, 5 }
 0x10e   : > { %14425 = vst [vmem:[#allocation47_spill] sm:$0xff] %v9054_v43  ;;  %14426 = vst [vmem:[#allocation48_spill] sm:$0xff] %v9057_v2  ;;  %v2335_v4 = vsel %vm2334_vm0, %v2333_v13, 0  ;;  %v8057_v63 = vadd.s32 4294967169, %v2639_v3  ;;  %v9072_v46 = vsub.s32 32, %v9045_v11  ;;  %v9075_v22 = vsub.s32 32, %v9047_v27 }
 0x10f   : > { %14427 = vst [vmem:[#allocation49_spill] sm:$0xff] %v9060_v19  ;;  %14428 = vst [vmem:[#allocation50_spill] sm:$0xff] %v9063_v29  ;;  %v2439_v14 = vsel %vm2438_vm1, %v2437_v21, 0  ;;  %v2742_v53 = vand.u32 2139095040, %v9050_v41  ;;  %v9078_v35 = vshrl.u32 %v2127_v38, 5  ;;  %v9081_v29 = vsub.s32 32, %v9054_v43  ;;  %v553_v38 = vpop.permute.xlu1 %552 }
 0x110   : > { %14429 = vst [vmem:[#allocation51_spill] sm:$0xff] %v9065_v49  ;;  %14430 = vst [vmem:[#allocation52_spill] sm:$0xff] %v9067_v33  ;;  %v9083_v26 = vshrl.u32 %v2231_v5, 5  ;;  %v2846_v37 = vand.u32 2139095040, %v9057_v2  ;;  %v9087_v13 = vsub.s32 32, %v9065_v49  ;;  %v9089_v61 = vshrl.u32 %v2335_v4, 5 }
 0x111   : > { %14431 = vst [vmem:[#allocation53_spill] sm:$0xff] %v9069_v50  ;;  %14432 = vst [vmem:[#allocation54_spill] sm:$0xff] %v9072_v46  ;;  %v9091_v3 = vand.u32 31, %v2335_v4  ;;  %v2541_v50 = vadd.s32 1, %v8053_v59  ;;  %v9093_v21 = vshrl.u32 %v2439_v14, 5  ;;  %v2645_v41 = vadd.s32 1, %v8057_v63 }
 0x112   : > { %14433 = vst [vmem:[#allocation55_spill] sm:$0xff] %v9075_v22  ;;  %14434 = vst [vmem:[#allocation56_spill] sm:$0xff] %v9078_v35  ;;  %v14059_v35 = vmov 2475754826   ;;  %v14062_v5 = vmov 2131351028  }
 0x113   : > { %14435 = vst [vmem:[#allocation57_spill] sm:$0xff] %v9081_v29  ;;  %14436 = vst [vmem:[#allocation58_spill] sm:$0xff] %v9083_v26  ;;  %v781_v43 = vshrl.u32 %v14059_v35, %v8919_v25  ;;  %v784_v2 = vshrl.u32 %v14062_v5, %v8919_v25  ;;  %v9099_v26 = vand.u32 31, %v2439_v14  ;;  %v2743_v49 = vshrl.u32 %v2742_v53, 23 }
 0x114   : > { %14437 = vst [vmem:[#allocation59_spill] sm:$0xff] %v9087_v13  ;;  %14438 = vst [vmem:[#allocation60_spill] sm:$0xff] %v9089_v61  ;;  %v14077_v13 = vmov 2102212464   ;;  %v14069_v59 = vmov 920167782   ;;  %v557_v61 = vpop.permute.xlu0 %556  ;;  %v617_v14 = vmul.f32 %v8752_v9, %v553_v38 }
 0x115   : > { %14439 = vst [vmem:[#allocation61_spill] sm:$0xff] %v9091_v3  ;;  %14440 = vst [vmem:[#allocation62_spill] sm:$0xff] %v9093_v21  ;;  %v787_v4 = vshrl.u32 %v14077_v13, %v8919_v25  ;;  %v790_v63 = vshrl.u32 %v14069_v59, %v8919_v25  ;;  %v2847_v21 = vshrl.u32 %v2846_v37, 23  ;;  %v14072_v29 = vmov 683565275  }
 0x116   : > { %14441 = vst [vmem:[#allocation63_spill] sm:$0xff] %v9099_v26  ;;  %v780_v35 = vshll.u32 %v14072_v29, %v8901_v62  ;;  %v14442_v22 = vmov 2475754826   ;;  %v789_v53 = vshll.u32 %v14077_v13, %v8901_v62  ;;  %vm2542_vm2 = vcmp.gt.s32.totalorder %v2541_v50, 0 }
 0x117   : > { %v783_v5 = vshll.u32 %v14442_v22, %v8901_v62  ;;  %v14443_v27 = vmov 2131351028   ;;  %v14086_v11 = vmov 1326507024   ;;  %vm2646_vm3 = vcmp.gt.s32.totalorder %v2645_v41, 0 }
 0x118   : > { %v786_v33 = vshll.u32 %v14443_v27, %v8901_v62  ;;  %v793_v37 = vshrl.u32 %v14086_v11, %v8919_v25  ;;  %v782_v59 = vor.u32 %v781_v43, %v780_v35  ;;  %v791_v29 = vor.u32 %v790_v63, %v789_v53 }
 0x119   : > { %v785_v46 = vor.u32 %v784_v2, %v783_v5  ;;  %v9117_v34 = vsub.s32 32, %v9091_v3  ;;  %v618_v19 = vmul.f32 %v8752_v9, %v557_v61  ;;  %v14445_v6 = vmov 920167782  }
 0x11a   : > { %v788_v13 = vor.u32 %v787_v4, %v786_v33  ;;  %v792_v38 = vshll.u32 %v14445_v6, %v8901_v62  ;;  %v9123_v42 = vsub.s32 32, %v9099_v26  ;;  %v2543_v36 = vsel %vm2542_vm2, %v2541_v50, 0 }
 0x11b   : > { %14444 = vst [vmem:[#allocation64_spill] sm:$0xff] %v9117_v34  ;;  %v8061_v57 = vadd.s32 4294967169, %v2743_v49  ;;  %v8065_v10 = vadd.s32 4294967169, %v2847_v21  ;;  %v2647_v11 = vsel %vm2646_vm3, %v2645_v41, 0  ;;  %vm795_vm4 = vcmp.lt.s32.totalorder %v8912_v23, 1 }
 0x11c   : > { %14446 = vst [vmem:[#allocation65_spill] sm:$0xff] %v9123_v42  ;;  %v794_v48 = vor.u32 %v793_v37, %v792_v38  ;;  %vm798_vm5 = vcmp.lt.s32.totalorder %v8912_v23, 4  ;;  %v9128_v35 = vadd.f32 %v617_v14, %v8855_v55  ;;  %vm797_vm6 = vcmp.lt.s32.totalorder %v8912_v23, 3 }
 0x11d   : > { %v803_v62 = vsel %vm795_vm4, %v782_v59, %v785_v46  ;;  %v804_v43 = vsel %vm798_vm5, %v791_v29, 920167782  ;;  %v9135_v2 = vshrl.u32 %v2543_v36, 5  ;;  %v9138_v41 = vadd.f32 %v618_v19, %v8846_v51 }
 0x11e   : > { %14447 = vst [vmem:[#allocation66_spill] sm:$0xff] %v9128_v35  ;;  %v800_v49 = vsel %vm798_vm5, %v788_v13, 2102212464  ;;  %v805_v55 = vsel %vm797_vm6, %v788_v13, %v804_v43  ;;  %v9144_v33 = vand.u32 31, %v2543_v36  ;;  %v9146_v50 = vshrl.u32 %v2647_v11, 5 }
 0x11f   : > { %14448 = vst [vmem:[#allocation67_spill] sm:$0xff] %v9135_v2  ;;  %14449 = vst [vmem:[#allocation68_spill] sm:$0xff] %v9138_v41  ;;  %v14452_v61 = vmov 683565275   ;;  %vm796_vm7 = vcmp.lt.s32.totalorder %v8912_v23, 2  ;;  %v9151_v5 = vand.u32 31, %v2647_v11  ;;  %v807_v51 = vsel %vm795_vm4, %v785_v46, %v788_v13 }
 0x120   : > { %14450 = vst [vmem:[#allocation69_spill] sm:$0xff] %v9144_v33  ;;  %14451 = vst [vmem:[#allocation70_spill] sm:$0xff] %v9146_v50  ;;  %v779_v21 = vshrl.u32 %v14452_v61, %v8919_v25  ;;  %v806_v4 = vsel %vm796_vm7, %v803_v62, %v805_v55  ;;  %v808_v19 = vsel %vm798_vm5, %v794_v48, 1326507024  ;;  %v9157_v63 = vadd.s32 1, %v8061_v57 }
 0x121   : > { %14453 = vst [vmem:[#allocation71_spill] sm:$0xff] %v9151_v5  ;;  %v801_v53 = vsel %vm797_vm6, %v785_v46, %v800_v49  ;;  %v809_v25 = vsel %vm797_vm6, %v791_v29, %v808_v19  ;;  %v9165_v11 = vadd.s32 1, %v8065_v10  ;;  %v2950_v14 = vand.u32 2139095040, %v9128_v35 }
 0x122   : > { %v799_v36 = vsel %vm795_vm4, %v779_v21, %v782_v59  ;;  %v810_v37 = vsel %vm796_vm7, %v807_v51, %v809_v25  ;;  %v9174_v38 = vmul.u32.u64.low %v8905_v20, %v806_v4  ;;  %v9175_v59 = vmul.u32.u64.high %v8905_v20, %v806_v4, %v9174_v38 }
 0x123   : > { %v9170_v48 = vmul.u32.u64.low %v8905_v20, %v810_v37  ;;  %v9171_v57 = vmul.u32.u64.high %v8905_v20, %v810_v37, %v9170_v48  ;;  %v802_v46 = vsel %vm796_vm7, %v799_v36, %v801_v53  ;;  %v676_v23 = vshll.u32 %v14452_v61, %v8903_v15 }
 0x124   : > { %v677_v10 = vshrl.u32 %v14442_v22, %v8926_v58  ;;  %v679_v29 = vshll.u32 %v14442_v22, %v8903_v15  ;;  %v680_v62 = vshrl.u32 %v14443_v27, %v8926_v58  ;;  %v682_v43 = vshll.u32 %v14443_v27, %v8903_v15 }
 0x125   : > { %v14454_v49 = vmov 2102212464   ;;  %v686_v51 = vshrl.u32 %v14445_v6, %v8926_v58  ;;  %v688_v19 = vshll.u32 %v14445_v6, %v8903_v15  ;;  %v14455_v36 = vmov 1326507024  }
 0x126   : > { %v683_v55 = vshrl.u32 %v14454_v49, %v8926_v58  ;;  %v685_v21 = vshll.u32 %v14454_v49, %v8903_v15  ;;  %v678_v4 = vor.u32 %v677_v10, %v676_v23  ;;  %v689_v53 = vshrl.u32 %v14455_v36, %v8926_v58 }
 0x127   : > { %v9199_v25 = vsub.s32 32, %v9144_v33  ;;  %vm820_vm8 = vc.u32 %v9171_v57, %v9174_v38  ;;  %v821_v37 = vadd.s32 1, %v9175_v59  ;;  %v681_v48 = vor.u32 %v680_v62, %v679_v29 }
 0x128   : > { %v818_v23 = vmul.u32 %v8905_v20, %v802_v46  ;;  %v684_v10 = vor.u32 %v683_v55, %v682_v43  ;;  %v687_v13 = vor.u32 %v686_v51, %v685_v21  ;;  %v690_v35 = vor.u32 %v689_v53, %v688_v19  ;;  %v561_v55 = vpop.permute.xlu1 %560  ;;  %v565_v21 = vpop.permute.xlu0 %564 }
 0x129   : > { %14456 = vst [vmem:[#allocation72_spill] sm:$0xff] %v9199_v25  ;;  %v822_v50 = vsel %vm820_vm8, %v821_v37, %v9175_v59  ;;  %v667_v15 = vor.u32 8388608, %v8909_v7  ;;  %v675_v2 = vshrl.u32 %v14452_v61, %v8926_v58  ;;  %vm691_vm9 = vcmp.lt.s32.totalorder %v8921_v54, 1 }
 0x12a   : > { %v823_v33 = vadd.s32 %v822_v50, %v818_v23  ;;  %vm693_vm10 = vcmp.lt.s32.totalorder %v8921_v54, 3  ;;  %vm694_vm11 = vcmp.lt.s32.totalorder %v8921_v54, 4  ;;  %v699_v20 = vsel %vm691_vm9, %v678_v4, %v681_v48 }
 0x12b   : > { %v696_v46 = vsel %vm694_vm11, %v684_v10, 2102212464  ;;  %v700_v29 = vsel %vm694_vm11, %v687_v13, 920167782  ;;  %v703_v59 = vsel %vm691_vm9, %v681_v48, %v684_v10  ;;  %v704_v62 = vsel %vm694_vm11, %v690_v35, 1326507024 }
 0x12c   : > { %vm765_vm12 = vcmp.lt.s32.totalorder %v8760_v17, 0  ;;  %v824_v7 = vadd.s32 536870912, %v823_v33  ;;  %vm692_vm13 = vcmp.lt.s32.totalorder %v8921_v54, 2  ;;  %v701_v58 = vsel %vm693_vm10, %v684_v10, %v700_v29 }
 0x12d   : > { %v705_v50 = vsel %vm693_vm10, %v687_v13, %v704_v62  ;;  %v9223_v43 = vsub.s32 32, %v9151_v5  ;;  %v702_v51 = vsel %vm692_vm13, %v699_v20, %v701_v58  ;;  %v707_v19 = vshll.u32 %v667_v15, 8 }
 0x12e   : > { %v706_v35 = vsel %vm692_vm13, %v703_v59, %v705_v50  ;;  %vm2750_vm14 = vcmp.gt.s32.totalorder %v9157_v63, 0  ;;  %v825_v53 = vshrl.u32 %v824_v7, 30  ;;  %v695_v37 = vsel %vm691_vm9, %v675_v2, %v678_v4 }
 0x12f   : > { %14457 = vst [vmem:[#allocation73_spill] sm:$0xff] %v9223_v43  ;;  %v697_v13 = vsel %vm693_vm10, %v681_v48, %v696_v46  ;;  %v14458_v23 = vand.u32 2147483647, %v8760_v17  ;;  %v9240_v20 = vmul.u32.u64.low %v707_v19, %v706_v35  ;;  %v9241_v29 = vmul.u32.u64.high %v707_v19, %v706_v35, %v9240_v20 }
 0x130   : > { %v9243_v59 = vmul.u32.u64.low %v707_v19, %v702_v51  ;;  %v9244_v15 = vmul.u32.u64.high %v707_v19, %v702_v51, %v9243_v59  ;;  %v9248_v62 = vmul.f32 %v8752_v9, %v561_v55  ;;  %v9251_v2 = vmul.f32 %v8752_v9, %v565_v21 }
 0x131   : > { %vm9236_vm15 = vcmp.le.f32.partialorder %v14458_v23, 0.7853982  ;;  %v826_v4 = vshll.u32 %v825_v53, 30  ;;  %v14097_v48 = vand.u32 2147483647, %v8770_v31  ;;  %v9254_v46 = vshrl.u32 %v2950_v14, 23 }
 0x132   : > { %v849_v7 = vsub.s32 4, %v825_v53  ;;  %v698_v58 = vsel %vm692_vm13, %v695_v37, %v697_v13  ;;  %v885_v50 = vshrl.u32 %v14442_v22, %v8963_v39  ;;  %v9263_v55 = vsel %vm2750_vm14, %v9157_v63, 0 }
 0x133   : > { %v819_v21 = vadd.s32 %v9174_v38, %v9171_v57  ;;  %v9267_v51 = vsub.s32 %v823_v33, %v826_v4  ;;  %v888_v14 = vshrl.u32 %v14443_v27, %v8963_v39  ;;  %vm716_vm0 = vc.u32 %v9241_v29, %v9243_v59 }
 0x134   : > { %v717_v54 = vadd.s32 1, %v9244_v15  ;;  %v884_v35 = vshll.u32 %v14452_v61, %v8941_v8  ;;  %v891_v63 = vshrl.u32 %v14454_v49, %v8963_v39  ;;  %v714_v13 = vmul.u32 %v707_v19, %v698_v58 }
 0x135   : > { %v829_v37 = vsub.s32 0, %v9267_v51  ;;  %v874_v33 = vand.u32 8388607, %v14097_v48  ;;  %v887_v57 = vshll.u32 %v14442_v22, %v8941_v8  ;;  %v850_v38 = vsel %vm765_vm12, %v849_v7, %v825_v53 }
 0x136   : > { %v718_v23 = vsel %vm716_vm0, %v717_v54, %v9244_v15  ;;  %v886_v20 = vor.u32 %v885_v50, %v884_v35  ;;  %v890_v4 = vshll.u32 %v14443_v27, %v8941_v8  ;;  %vm661_vm1 = vcmp.lt.s32.totalorder %v8762_v18, 0 }
 0x137   : > { %v7986_v5 = vmin.u32 %v829_v37, %v9267_v51  ;;  %v719_v19 = vadd.s32 %v718_v23, %v714_v13  ;;  %v889_v58 = vor.u32 %v888_v14, %v887_v57  ;;  %v894_v48 = vshrl.u32 %v14445_v6, %v8963_v39 }
 0x138   : > { %v892_v43 = vor.u32 %v891_v63, %v890_v4  ;;  %v893_v25 = vshll.u32 %v14454_v49, %v8941_v8  ;;  %v896_v53 = vshll.u32 %v14445_v6, %v8941_v8  ;;  %v897_v15 = vshrl.u32 %v14455_v36, %v8963_v39 }
 0x139   : > { %vm2854_vm2 = vcmp.gt.s32.totalorder %v9165_v11, 0  ;;  %v831_v7 = vclz %v7986_v5  ;;  %v9301_v50 = vsel %vm9236_vm15, 0, %v850_v38  ;;  %v14462_v14 = vand.u32 2147483647, %v8762_v18 }
 0x13a   : > { %14461 = vst [vmem:[#allocation74_spill] sm:$0xff] %v9301_v50  ;;  %v875_v35 = vor.u32 8388608, %v874_v33  ;;  %v883_v8 = vshrl.u32 %v14452_v61, %v8963_v39  ;;  %v720_v63 = vadd.s32 536870912, %v719_v19  ;;  %v895_v37 = vor.u32 %v894_v48, %v893_v25 }
 0x13b   : > { %vm9305_vm3 = vcmp.le.f32.partialorder %v14462_v14, 0.7853982  ;;  %v898_v13 = vor.u32 %v897_v15, %v896_v53  ;;  %vm899_vm4 = vcmp.lt.s32.totalorder %v8932_v52, 1  ;;  %v7987_v5 = vadd.s32 4294967294, %v831_v7 }
 0x13c   : > { %vm900_vm5 = vcmp.lt.s32.totalorder %v8932_v52, 2  ;;  %vm901_vm6 = vcmp.lt.s32.totalorder %v8932_v52, 3  ;;  %vm902_vm7 = vcmp.lt.s32.totalorder %v8932_v52, 4  ;;  %v721_v57 = vshrl.u32 %v720_v63, 30 }
 0x13d   : > { %v904_v38 = vsel %vm902_vm7, %v892_v43, 2102212464  ;;  %v907_v33 = vsel %vm899_vm4, %v886_v20, %v889_v58  ;;  %v908_v23 = vsel %vm902_vm7, %v895_v37, 920167782  ;;  %vm7988_vm8 = vcmp.lt.s32.totalorder %v7987_v5, 0 }
 0x13e   : > { %v903_v39 = vsel %vm899_vm4, %v883_v8, %v886_v20  ;;  %v909_v25 = vsel %vm901_vm6, %v892_v43, %v908_v23  ;;  %v912_v48 = vsel %vm902_vm7, %v898_v13, 1326507024  ;;  %v834_v4 = vsel %vm7988_vm8, 0, %v7987_v5 }
 0x13f   : > { %v722_v53 = vshll.u32 %v721_v57, 30  ;;  %v745_v15 = vsub.s32 4, %v721_v57  ;;  %v911_v7 = vsel %vm899_vm4, %v889_v58, %v892_v43  ;;  %v835_v14 = vsub.s32 32, %v834_v4 }
 0x140   : > { %v839_v63 = vsub.s32 4294967266, %v834_v4  ;;  %v905_v42 = vsel %vm901_vm6, %v889_v58, %v904_v38  ;;  %v910_v26 = vsel %vm900_vm5, %v907_v33, %v909_v25  ;;  %v913_v8 = vsel %vm901_vm6, %v895_v37, %v912_v48 }
 0x141   : > { %v9327_v3 = vsub.s32 %v719_v19, %v722_v53  ;;  %v746_v20 = vsel %vm661_vm1, %v745_v15, %v721_v57  ;;  %v915_v13 = vshll.u32 %v875_v35, 8  ;;  %v836_v5 = vshll.u32 %v9267_v51, %v834_v4 }
 0x142   : > { %v837_v43 = vshrl.u32 %v819_v21, %v835_v14  ;;  %v840_v23 = vadd.s32 127, %v839_v63  ;;  %v914_v34 = vsel %vm900_vm5, %v911_v7, %v913_v8  ;;  %v9339_v19 = vsel %vm9305_vm3, 0, %v746_v20 }
 0x143   : > { %v725_v58 = vsub.s32 0, %v9327_v3  ;;  %14465 = vst [vmem:[#allocation75_spill] sm:$0xff] %v9339_v19  ;;  %v9341_v38 = vmul.u32.u64.low %v915_v13, %v914_v34  ;;  %v9342_v33 = vmul.u32.u64.high %v915_v13, %v914_v34, %v9341_v38  ;;  %v2855_v21 = vsel %vm2854_vm2, %v9165_v11, 0 }
 0x144   : > { %v838_v57 = vor.u32 %v837_v43, %v836_v5  ;;  %v841_v25 = vshll.u32 %v840_v23, 23  ;;  %v9344_v37 = vmul.u32.u64.low %v915_v13, %v910_v26  ;;  %v9345_v35 = vmul.u32.u64.high %v915_v13, %v910_v26, %v9344_v37 }
 0x145   : > { %v14466_v51 = vand.u32 2139095040, %v9138_v41  ;;  %v9356_v4 = vadd.f32 %v9248_v62, %v8866_v30  ;;  %v7982_v34 = vmin.u32 %v725_v58, %v9327_v3  ;;  %v9361_v53 = vadd.f32 %v9251_v2, %v8859_v56 }
 0x146   : > { %v842_v26 = vor.u32 4788187, %v841_v25  ;;  %v856_v15 = vadd.s32 3, %v9301_v50  ;;  %v906_v11 = vsel %vm900_vm5, %v903_v39, %v905_v42  ;;  %v9367_v7 = vshrl.u32 %v9263_v55, 5 }
 0x147   : > { %v9352_v48 = vshrl.u32 %v14466_v51, 23  ;;  %14467 = vst [vmem:[#allocation76_spill] sm:$0xff] %v9356_v4  ;;  %14468 = vst [vmem:[#allocation77_spill] sm:$0xff] %v9361_v53  ;;  %v9370_v14 = vand.u32 31, %v9263_v55  ;;  %v727_v30 = vclz %v7982_v34  ;;  %v752_v62 = vadd.s32 3, %v9339_v19 }
 0x148   : > { %v843_v63 = vand.u32 2147483647, %v842_v26  ;;  %v845_v20 = vcvt.s32.f32 %v838_v57  ;;  %vm924_vm9 = vc.u32 %v9342_v33, %v9344_v37  ;;  %v925_v56 = vadd.s32 1, %v9345_v35 }
 0x149   : > { %v9375_v2 = vshrl.u32 %v2855_v21, 5  ;;  %v9377_v8 = vand.u32 31, %v2855_v21  ;;  %v7983_v52 = vadd.s32 4294967294, %v727_v30  ;;  %v922_v42 = vmul.u32 %v915_v13, %v906_v11 }
 0x14a   : > { %v846_v39 = vmul.f32 %v845_v20, %v843_v63  ;;  %v9379_v5 = vand.u32 3, %v856_v15  ;;  %v715_v55 = vadd.s32 %v9243_v59, %v9241_v29  ;;  %v926_v43 = vsel %vm924_vm9, %v925_v56, %v9345_v35 }
 0x14b   : > { %vm7984_vm10 = vcmp.lt.s32.totalorder %v7983_v52, 0  ;;  %v9384_v23 = vand.u32 3, %v752_v62  ;;  %vm869_vm11 = vcmp.lt.s32.totalorder %v8770_v31, 0  ;;  %v927_v58 = vadd.s32 %v926_v43, %v922_v42 }
 0x14c   : > { %v14109_v38 = vand.u32 2147483647, %v8772_v32  ;;  %v847_v57 = vxor.u32 2147483648, %v846_v39  ;;  %v730_v25 = vsel %vm7984_vm10, 0, %v7983_v52  ;;  %v9389_v13 = vadd.s32 %v9344_v37, %v9342_v33 }
 0x14d   : > { %v988_v21 = vshll.u32 %v14452_v61, %v8945_v60  ;;  %v731_v51 = vsub.s32 32, %v730_v25  ;;  %v735_v29 = vsub.s32 4294967266, %v730_v25  ;;  %v928_v59 = vadd.s32 536870912, %v927_v58 }
 0x14e   : > { %v989_v35 = vshrl.u32 %v14442_v22, %v8966_v12  ;;  %v848_v34 = vsel %vm765_vm12, %v847_v57, %v846_v39  ;;  %v732_v26 = vshll.u32 %v9327_v3, %v730_v25  ;;  %v992_v15 = vshrl.u32 %v14443_v27, %v8966_v12 }
 0x14f   : > { %v995_v33 = vshrl.u32 %v14454_v49, %v8966_v12  ;;  %v851_v37 = vsel %vm9236_vm15, %v8760_v17, %v848_v34  ;;  %v733_v11 = vshrl.u32 %v715_v55, %v731_v51  ;;  %v736_v30 = vadd.s32 127, %v735_v29 }
 0x150   : > { %v14469_v62 = vand.u32 2147483647, %v8770_v31  ;;  %v929_v20 = vshrl.u32 %v928_v59, 30  ;;  %8408 = vcosq.f32 %v851_v37  ;;  %v994_v3 = vshll.u32 %v14443_v27, %v8945_v60 }
 0x151   : > { %v997_v56 = vshll.u32 %v14454_v49, %v8945_v60  ;;  %v998_v10 = vshrl.u32 %v14445_v6, %v8966_v12  ;;  %8410 = vsinq.f32 %v851_v37  ;;  %v734_v52 = vor.u32 %v733_v11, %v732_v26 }
 0x152   : > { %vm9407_vm13 = vcmp.le.f32.partialorder %v14469_v62, 0.7853982  ;;  %v737_v42 = vshll.u32 %v736_v30, 23  ;;  %v930_v39 = vshll.u32 %v929_v20, 30  ;;  %v953_v55 = vsub.s32 4, %v929_v20 }
 0x153   : > { %v991_v43 = vshll.u32 %v14442_v22, %v8945_v60  ;;  %v996_v57 = vor.u32 %v995_v33, %v994_v3  ;;  %v1001_v25 = vshrl.u32 %v14455_v36, %v8966_v12  ;;  %v999_v59 = vor.u32 %v998_v10, %v997_v56 }
 0x154   : > { %v738_v51 = vor.u32 4788187, %v737_v42  ;;  %v9421_v29 = vsub.s32 %v927_v58, %v930_v39  ;;  %v1000_v34 = vshll.u32 %v14445_v6, %v8945_v60  ;;  %vm862_vm12 = vcmp.eq.s32.totalorder %v9379_v5, 2 }
 0x155   : > { %v741_v26 = vcvt.s32.f32 %v734_v52  ;;  %v954_v37 = vsel %vm869_vm11, %v953_v55, %v929_v20  ;;  %v990_v11 = vor.u32 %v989_v35, %v988_v21  ;;  %v993_v30 = vor.u32 %v992_v15, %v991_v43 }
 0x156   : > { %vm859_vm14 = vcmp.eq.s32.totalorder %v9379_v5, 0  ;;  %v739_v33 = vand.u32 2147483647, %v738_v51  ;;  %v933_v62 = vsub.s32 0, %v9421_v29  ;;  %v1002_v3 = vor.u32 %v1001_v25, %v1000_v34 }
 0x157   : > { %vm1006_vm15 = vcmp.lt.s32.totalorder %v8943_v0, 4  ;;  %vm858_vm0 = vcmp.lt.s32.totalorder %v9379_v5, 2  ;;  %v978_v60 = vand.u32 8388607, %v14109_v38  ;;  %v987_v58 = vshrl.u32 %v14452_v61, %v8966_v12 }
 0x158   : > { %vm1003_vm2 = vcmp.lt.s32.totalorder %v8943_v0, 1  ;;  %v1008_v21 = vsel %vm1006_vm15, %v996_v57, 2102212464  ;;  %vm855_vm4 = vweird.f32 %v8760_v17  ;;  %v742_v35 = vmul.f32 %v741_v26, %v739_v33 }
 0x159   : > { %v7990_v15 = vmin.u32 %v933_v62, %v9421_v29  ;;  %vm1005_vm5 = vcmp.lt.s32.totalorder %v8943_v0, 3  ;;  %v1012_v20 = vsel %vm1006_vm15, %v999_v59, 920167782  ;;  %v9446_v56 = vsel %vm9407_vm13, 0, %v954_v37 }
 0x15a   : > { %14472 = vst [vmem:[#allocation78_spill] sm:$0xff] %v9446_v56  ;;  %v1007_v12 = vsel %vm1003_vm2, %v987_v58, %v990_v11  ;;  %v1009_v10 = vsel %vm1005_vm5, %v993_v30, %v1008_v21  ;;  %v1011_v52 = vsel %vm1003_vm2, %v990_v11, %v993_v30  ;;  %v743_v42 = vxor.u32 2147483648, %v742_v35  ;;  %v9454_v25 = vpop.eup %8408 }
 0x15b   : > { %v935_v39 = vclz %v7990_v15  ;;  %v1013_v55 = vsel %vm1005_vm5, %v996_v57, %v1012_v20  ;;  %v1016_v43 = vsel %vm1006_vm15, %v1002_v3, 1326507024  ;;  %14473 = vst [vmem:[#allocation79_spill] sm:$0xff] %v9454_v25  ;;  %v979_v51 = vor.u32 8388608, %v978_v60  ;;  %v9459_v37 = vpop.eup %8410 }
 0x15c   : > { %vm1004_vm6 = vcmp.lt.s32.totalorder %v8943_v0, 2  ;;  %v1015_v34 = vsel %vm1003_vm2, %v993_v30, %v996_v57  ;;  %v1017_v26 = vsel %vm1005_vm5, %v999_v59, %v1016_v43  ;;  %14474 = vst [vmem:[#allocation80_spill] sm:$0xff] %v9459_v37  ;;  %v14106_v33 = vxor.u32 2147483648, %v9454_v25 }
 0x15d   : > { %v744_v11 = vsel %vm661_vm1, %v743_v42, %v742_v35  ;;  %v7991_v62 = vadd.s32 4294967294, %v935_v39  ;;  %v960_v58 = vadd.s32 3, %v9446_v56  ;;  %v14107_v3 = vxor.u32 2147483648, %v9459_v37 }
 0x15e   : > { %v747_v60 = vsel %vm9305_vm3, %v8762_v18, %v744_v11  ;;  %v1010_v21 = vsel %vm1004_vm6, %v1007_v12, %v1009_v10  ;;  %v1014_v0 = vsel %vm1004_vm6, %v1011_v52, %v1013_v55  ;;  %v864_v57 = vsel %vm862_vm12, %v14106_v33, %v9459_v37 }
 0x15f   : > { %8412 = vcosq.f32 %v747_v60  ;;  %vm7992_vm7 = vcmp.lt.s32.totalorder %v7991_v62, 0  ;;  %v1018_v59 = vsel %vm1004_vm6, %v1015_v34, %v1017_v26  ;;  %v861_v30 = vsel %vm859_vm14, %v9454_v25, %v14107_v3 }
 0x160   : > { %8414 = vsinq.f32 %v747_v60  ;;  %v938_v54 = vsel %vm7992_vm7, 0, %v7991_v62  ;;  %v1019_v35 = vshll.u32 %v979_v51, 8  ;;  %v865_v15 = vsel %vm858_vm0, %v861_v30, %v864_v57 }
 0x161   : > { %v939_v20 = vsub.s32 32, %v938_v54  ;;  %v943_v12 = vsub.s32 4294967266, %v938_v54  ;;  %v14108_v10 = vand.u32 2147483647, %v8810_v44  ;;  %v866_v52 = vsel %vm855_vm4, nan, %v865_v15 }
 0x162   : > { %v940_v42 = vshll.u32 %v9421_v29, %v938_v54  ;;  %v9485_v39 = vmul.u32.u64.low %v1019_v35, %v1018_v59  ;;  %v9486_v55 = vmul.u32.u64.high %v1019_v35, %v1018_v59, %v9485_v39  ;;  %7349 = vrot.lane.b32.xlu0 %v866_v52, %s8600_s22  ;;  %v9495_v26 = vadd.s32 4294967169, %v9254_v46 }
 0x163   : > { %v941_v43 = vshrl.u32 %v9389_v13, %v939_v20  ;;  %v944_v51 = vadd.s32 127, %v943_v12  ;;  %v9490_v5 = vmul.u32.u64.low %v1019_v35, %v1014_v0  ;;  %v9491_v34 = vmul.u32.u64.high %v1019_v35, %v1014_v0, %v9490_v5 }
 0x164   : > { %v9498_v11 = vadd.s32 4294967169, %v9352_v48  ;;  %vm755_vm1 = vcmp.eq.s32.totalorder %v9384_v23, 0  ;;  %vm754_vm3 = vcmp.lt.s32.totalorder %v9384_v23, 2  ;;  %vm758_vm8 = vcmp.eq.s32.totalorder %v9384_v23, 2 }
 0x165   : > { %v942_v13 = vor.u32 %v941_v43, %v940_v42  ;;  %v945_v62 = vshll.u32 %v944_v51, 23  ;;  %v1093_v60 = vshrl.u32 %v14442_v22, %v8992_v47  ;;  %vm751_vm9 = vweird.f32 %v8762_v18 }
 0x166   : > { %v9507_v46 = vand.u32 3, %v960_v58  ;;  %v1026_v0 = vmul.u32 %v1019_v35, %v1010_v21  ;;  %vm1028_vm10 = vc.u32 %v9486_v55, %v9490_v5  ;;  %v1082_v48 = vand.u32 8388607, %v14108_v10 }
 0x167   : > { %v946_v57 = vor.u32 4788187, %v945_v62  ;;  %v1029_v59 = vadd.s32 1, %v9491_v34  ;;  %v1091_v30 = vshrl.u32 %v14452_v61, %v8992_v47  ;;  %v1092_v54 = vshll.u32 %v14452_v61, %v8980_v28 }
 0x168   : > { %v949_v15 = vcvt.s32.f32 %v942_v13  ;;  %v1095_v58 = vshll.u32 %v14442_v22, %v8980_v28  ;;  %v1096_v21 = vshrl.u32 %v14443_v27, %v8992_v47  ;;  %v1099_v35 = vshrl.u32 %v14454_v49, %v8992_v47 }
 0x169   : > { %v9524_v20 = vpop.eup %8412  ;;  %v947_v12 = vand.u32 2147483647, %v946_v57  ;;  %v1030_v52 = vsel %vm1028_vm10, %v1029_v59, %v9491_v34  ;;  %v1094_v42 = vor.u32 %v1093_v60, %v1092_v54  ;;  %v1102_v39 = vshrl.u32 %v14445_v6, %v8992_v47 }
 0x16a   : > { %14475 = vst [vmem:[#allocation81_spill] sm:$0xff] %v9524_v20  ;;  %v9529_v43 = vpop.eup %8414  ;;  %v14110_v51 = vxor.u32 2147483648, %v9524_v20  ;;  %v1031_v13 = vadd.s32 %v1030_v52, %v1026_v0  ;;  %v1098_v62 = vshll.u32 %v14443_v27, %v8980_v28  ;;  %v1105_v33 = vshrl.u32 %v14455_v36, %v8992_v47 }
 0x16b   : > { %14476 = vst [vmem:[#allocation82_spill] sm:$0xff] %v9529_v43  ;;  %v14111_v3 = vxor.u32 2147483648, %v9529_v43  ;;  %v950_v57 = vmul.f32 %v949_v15, %v947_v12  ;;  %v1101_v34 = vshll.u32 %v14454_v49, %v8980_v28  ;;  %v1104_v60 = vshll.u32 %v14445_v6, %v8980_v28 }
 0x16c   : > { %v760_v0 = vsel %vm758_vm8, %v14110_v51, %v9529_v43  ;;  %v1032_v59 = vadd.s32 536870912, %v1031_v13  ;;  %v1097_v54 = vor.u32 %v1096_v21, %v1095_v58  ;;  %v1100_v52 = vor.u32 %v1099_v35, %v1098_v62 }
 0x16d   : > { %v757_v47 = vsel %vm755_vm1, %v9524_v20, %v14111_v3  ;;  %v951_v15 = vxor.u32 2147483648, %v950_v57  ;;  %v1103_v12 = vor.u32 %v1102_v39, %v1101_v34  ;;  %v1106_v29 = vor.u32 %v1105_v33, %v1104_v60 }
 0x16e   : > { %v761_v28 = vsel %vm754_vm3, %v757_v47, %v760_v0  ;;  %v1033_v10 = vshrl.u32 %v1032_v59, 30  ;;  %v1083_v38 = vor.u32 8388608, %v1082_v48  ;;  %vm1107_vm12 = vcmp.lt.s32.totalorder %v8978_v40, 1 }
 0x16f   : > { %v762_v58 = vsel %vm751_vm9, nan, %v761_v28  ;;  %v952_v21 = vsel %vm869_vm11, %v951_v15, %v950_v57  ;;  %vm1109_vm14 = vcmp.lt.s32.totalorder %v8978_v40, 3  ;;  %vm1110_vm15 = vcmp.lt.s32.totalorder %v8978_v40, 4  ;;  %v569_v15 = vpop.permute.xlu1 %568 }
 0x170   : > { %7347 = vrot.lane.b32.xlu1 %v762_v58, %s8600_s22  ;;  %v955_v23 = vsel %vm9407_vm13, %v8770_v31, %v952_v21  ;;  %v1034_v33 = vshll.u32 %v1033_v10, 30  ;;  %v1112_v48 = vsel %vm1110_vm15, %v1100_v52, 2102212464  ;;  %v1115_v35 = vsel %vm1107_vm12, %v1094_v42, %v1097_v54 }
 0x171   : > { %8416 = vcosq.f32 %v955_v23  ;;  %v1116_v39 = vsel %vm1110_vm15, %v1103_v12, 920167782  ;;  %v1119_v62 = vsel %vm1107_vm12, %v1097_v54, %v1100_v52  ;;  %v1120_v57 = vsel %vm1110_vm15, %v1106_v29, 1326507024  ;;  %v573_v29 = vpop.permute.xlu0 %572 }
 0x172   : > { %8418 = vsinq.f32 %v955_v23  ;;  %v9568_v34 = vsub.s32 %v1031_v13, %v1034_v33  ;;  %vm1108_vm11 = vcmp.lt.s32.totalorder %v8978_v40, 2  ;;  %v1117_v63 = vsel %vm1109_vm14, %v1100_v52, %v1116_v39 }
 0x173   : > { %v1111_v60 = vsel %vm1107_vm12, %v1091_v30, %v1094_v42  ;;  %v1118_v0 = vsel %vm1108_vm11, %v1115_v35, %v1117_v63  ;;  %v1121_v59 = vsel %vm1109_vm14, %v1103_v12, %v1120_v57  ;;  %v1123_v47 = vshll.u32 %v1083_v38, 8 }
 0x174   : > { %v1037_v13 = vsub.s32 0, %v9568_v34  ;;  %v1057_v28 = vsub.s32 4, %v1033_v10  ;;  %v1113_v58 = vsel %vm1109_vm14, %v1097_v54, %v1112_v48  ;;  %v1122_v52 = vsel %vm1108_vm11, %v1119_v62, %v1121_v59 }
 0x175   : > { %v9584_v21 = vmul.u32.u64.low %v1123_v47, %v1122_v52  ;;  %v9585_v30 = vmul.u32.u64.high %v1123_v47, %v1122_v52, %v9584_v21  ;;  %v9587_v42 = vmul.u32.u64.low %v1123_v47, %v1118_v0  ;;  %v9588_v23 = vmul.u32.u64.high %v1123_v47, %v1118_v0, %v9587_v42 }
 0x176   : > { %v9592_v38 = vsub.s32 32, %v9370_v14  ;;  %v9595_v12 = vsub.s32 32, %v9377_v8  ;;  %v7994_v54 = vmin.u32 %v1037_v13, %v9568_v34  ;;  %v9600_v48 = vmul.f32 %v8752_v9, %v569_v15 }
 0x177   : > { %v9603_v35 = vmul.f32 %v8752_v9, %v573_v29  ;;  %vm973_vm13 = vcmp.lt.s32.totalorder %v8772_v32, 0  ;;  %v1114_v39 = vsel %vm1108_vm11, %v1111_v60, %v1113_v58  ;;  %vm959_vm0 = vweird.f32 %v8770_v31 }
 0x178   : > { %v14477_v62 = vand.u32 2147483647, %v8772_v32  ;;  %v1039_v63 = vclz %v7994_v54  ;;  %v1058_v0 = vsel %vm973_vm13, %v1057_v28, %v1033_v10  ;;  %v14113_v59 = vand.u32 2147483647, %v8817_v16 }
 0x179   : > { %vm962_vm5 = vcmp.lt.s32.totalorder %v9507_v46, 2  ;;  %vm963_vm6 = vcmp.eq.s32.totalorder %v9507_v46, 0  ;;  %vm1132_vm7 = vc.u32 %v9585_v30, %v9587_v42  ;;  %v1133_v40 = vadd.s32 1, %v9588_v23 }
 0x17a   : > { %vm9611_vm2 = vcmp.le.f32.partialorder %v14477_v62, 0.7853982  ;;  %vm966_vm1 = vcmp.eq.s32.totalorder %v9507_v46, 2  ;;  %v1027_v60 = vadd.s32 %v9490_v5, %v9486_v55  ;;  %v7995_v15 = vadd.s32 4294967294, %v1039_v63 }
 0x17b   : > { %v1130_v29 = vmul.u32 %v1123_v47, %v1114_v39  ;;  %v9626_v13 = vpop.eup %8416  ;;  %v9630_v10 = vsel %vm9611_vm2, 0, %v1058_v0  ;;  %v1134_v28 = vsel %vm1132_vm7, %v1133_v40, %v9588_v23  ;;  %v1196_v58 = vshll.u32 %v14452_v61, %v8982_v1 }
 0x17c   : > { %14480 = vst [vmem:[#allocation83_spill] sm:$0xff] %v9626_v13  ;;  %14481 = vst [vmem:[#allocation84_spill] sm:$0xff] %v9630_v10  ;;  %v1197_v52 = vshrl.u32 %v14442_v22, %v8995_v45  ;;  %v9637_v21 = vpop.eup %8418  ;;  %v14112_v55 = vxor.u32 2147483648, %v9626_v13  ;;  %vm7996_vm3 = vcmp.lt.s32.totalorder %v7995_v15, 0  ;;  %v1186_v47 = vand.u32 8388607, %v14113_v59 }
 0x17d   : > { %14482 = vst [vmem:[#allocation85_spill] sm:$0xff] %v9637_v21  ;;  %v1135_v5 = vadd.s32 %v1134_v28, %v1130_v29  ;;  %v14116_v54 = vxor.u32 2147483648, %v9637_v21  ;;  %v1042_v39 = vsel %vm7996_vm3, 0, %v7995_v15  ;;  %v1199_v23 = vshll.u32 %v14442_v22, %v8982_v1 }
 0x17e   : > { %v1200_v62 = vshrl.u32 %v14443_v27, %v8995_v45  ;;  %v968_v63 = vsel %vm966_vm1, %v14112_v55, %v9637_v21  ;;  %v1043_v0 = vsub.s32 32, %v1042_v39  ;;  %v1047_v40 = vsub.s32 4294967266, %v1042_v39 }
 0x17f   : > { %v1203_v29 = vshrl.u32 %v14454_v49, %v8995_v45  ;;  %v965_v15 = vsel %vm963_vm6, %v9626_v13, %v14116_v54  ;;  %v1044_v28 = vshll.u32 %v9568_v34, %v1042_v39  ;;  %v1136_v51 = vadd.s32 536870912, %v1135_v5 }
 0x180   : > { %v1206_v3 = vshrl.u32 %v14445_v6, %v8995_v45  ;;  %v969_v55 = vsel %vm962_vm5, %v965_v15, %v968_v63  ;;  %v1045_v59 = vshrl.u32 %v1027_v60, %v1043_v0  ;;  %v1048_v33 = vadd.s32 127, %v1047_v40 }
 0x181   : > { %vm1077_vm8 = vcmp.lt.s32.totalorder %v8810_v44, 0  ;;  %v1205_v17 = vshll.u32 %v14454_v49, %v8982_v1  ;;  %v970_v18 = vsel %vm959_vm0, nan, %v969_v55  ;;  %v1137_v54 = vshrl.u32 %v1136_v51, 30 }
 0x182   : > { %v1202_v34 = vshll.u32 %v14443_v27, %v8982_v1  ;;  %v1209_v39 = vshrl.u32 %v14455_v36, %v8995_v45  ;;  %7351 = vrot.lane.b32.xlu1 %v970_v18, %s8600_s22  ;;  %v1046_v46 = vor.u32 %v1045_v59, %v1044_v28  ;;  %v1049_v60 = vshll.u32 %v1048_v33, 23 }
 0x183   : > { %v1207_v63 = vor.u32 %v1206_v3, %v1205_v17  ;;  %v1208_v0 = vshll.u32 %v14445_v6, %v8982_v1  ;;  %v1138_v40 = vshll.u32 %v1137_v54, 30  ;;  %v1198_v15 = vor.u32 %v1197_v52, %v1196_v58 }
 0x184   : > { %v1201_v25 = vor.u32 %v1200_v62, %v1199_v23  ;;  %v1204_v31 = vor.u32 %v1203_v29, %v1202_v34  ;;  %v1050_v55 = vor.u32 4788187, %v1049_v60  ;;  %v1064_v51 = vadd.s32 3, %v9630_v10 }
 0x185   : > { %v1187_v37 = vor.u32 8388608, %v1186_v47  ;;  %v1210_v13 = vor.u32 %v1209_v39, %v1208_v0  ;;  %v9677_v21 = vsub.s32 %v1135_v5, %v1138_v40  ;;  %v1161_v56 = vsub.s32 4, %v1137_v54 }
 0x186   : > { %vm1211_vm10 = vcmp.lt.s32.totalorder %v8987_v24, 1  ;;  %vm1214_vm12 = vcmp.lt.s32.totalorder %v8987_v24, 4  ;;  %v1051_v17 = vand.u32 2147483647, %v1050_v55  ;;  %v1053_v18 = vcvt.s32.f32 %v1046_v46 }
 0x187   : > { %vm1213_vm14 = vcmp.lt.s32.totalorder %v8987_v24, 3  ;;  %v1220_v1 = vsel %vm1214_vm12, %v1207_v63, 920167782  ;;  %v1141_v3 = vsub.s32 0, %v9677_v21  ;;  %v1195_v33 = vshrl.u32 %v14452_v61, %v8995_v45 }
 0x188   : > { %v1219_v59 = vsel %vm1211_vm10, %v1198_v15, %v1201_v25  ;;  %v1221_v58 = vsel %vm1213_vm14, %v1204_v31, %v1220_v1  ;;  %v1054_v52 = vmul.f32 %v1053_v18, %v1051_v17  ;;  %v1216_v5 = vsel %vm1214_vm12, %v1204_v31, 2102212464 }
 0x189   : > { %v1223_v47 = vsel %vm1211_vm10, %v1201_v25, %v1204_v31  ;;  %v1224_v23 = vsel %vm1214_vm12, %v1210_v13, 1326507024  ;;  %v7998_v62 = vmin.u32 %v1141_v3, %v9677_v21  ;;  %v1162_v29 = vsel %vm1077_vm8, %v1161_v56, %v1137_v54  ;;  %v14487_v3 = vld [vmem:[#allocation8_spill] sm:$0xff] }
 0x18a   : > { %vm1212_vm15 = vcmp.lt.s32.totalorder %v8987_v24, 2  ;;  %v1225_v45 = vsel %vm1213_vm14, %v1207_v63, %v1224_v23  ;;  %v1055_v28 = vxor.u32 2147483648, %v1054_v52  ;;  %v1227_v46 = vshll.u32 %v1187_v37, 8 }
 0x18b   : > { %v1222_v34 = vsel %vm1212_vm15, %v1219_v59, %v1221_v58  ;;  %v1226_v39 = vsel %vm1212_vm15, %v1223_v47, %v1225_v45  ;;  %v14483_v31 = vand.u32 2147483647, %v8810_v44  ;;  %v1143_v56 = vclz %v7998_v62 }
 0x18c   : > { %v1215_v54 = vsel %vm1211_vm10, %v1195_v33, %v1198_v15  ;;  %v1217_v60 = vsel %vm1213_vm14, %v1201_v25, %v1216_v5  ;;  %v1056_v63 = vsel %vm973_vm13, %v1055_v28, %v1054_v52  ;;  %v9727_v25 = vand.u32 3, %v1064_v51 }
 0x18d   : > { %vm9703_vm11 = vcmp.le.f32.partialorder %v14483_v31, 0.7853982  ;;  %v9717_v37 = vmul.u32.u64.low %v1227_v46, %v1226_v39  ;;  %v9718_v40 = vmul.u32.u64.high %v1227_v46, %v1226_v39, %v9717_v37  ;;  %v1059_v55 = vsel %vm9611_vm2, %v8772_v32, %v1056_v63 }
 0x18e   : > { %v9715_v0 = vsel %vm9703_vm11, 0, %v1162_v29  ;;  %v7999_v17 = vadd.s32 4294967294, %v1143_v56  ;;  %v9723_v18 = vmul.u32.u64.low %v1227_v46, %v1222_v34  ;;  %v9724_v15 = vmul.u32.u64.high %v1227_v46, %v1222_v34, %v9723_v18 }
 0x18f   : > { %14486 = vst [vmem:[#allocation86_spill] sm:$0xff] %v9715_v0  ;;  %8420 = vcosq.f32 %v1059_v55  ;;  %v1218_v1 = vsel %vm1212_vm15, %v1215_v54, %v1217_v60  ;;  %v14127_v33 = vand.u32 2147483647, %v14487_v3  ;;  %v9733_v59 = vadd.s32 1, %v9495_v26 }
 0x190   : > { %v9736_v58 = vadd.s32 1, %v9498_v11  ;;  %8422 = vsinq.f32 %v1059_v55  ;;  %vm8000_vm13 = vcmp.lt.s32.totalorder %v7999_v17, 0  ;;  %v1131_v57 = vadd.s32 %v9587_v42, %v9585_v30  ;;  %v14488_v30 = vld [vmem:[#allocation31_spill] sm:$0xff] }
 0x191   : > { %v1146_v52 = vsel %vm8000_vm13, 0, %v7999_v17  ;;  %v9741_v51 = vadd.s32 3, %v9715_v0  ;;  %vm1236_vm2 = vc.u32 %v9718_v40, %v9723_v18  ;;  %v1234_v47 = vmul.u32 %v1227_v46, %v1218_v1  ;;  %v14489_v46 = vld [vmem:[#allocation26_spill] sm:$0xff] }
 0x192   : > { %v1147_v24 = vsub.s32 32, %v1146_v52  ;;  %v1151_v5 = vsub.s32 4294967266, %v1146_v52  ;;  %v1237_v26 = vadd.s32 1, %v9724_v15  ;;  %vm1070_vm5 = vcmp.eq.s32.totalorder %v9727_v25, 2 }
 0x193   : > { %v1148_v11 = vshll.u32 %v9677_v21, %v1146_v52  ;;  %v1290_v23 = vand.u32 8388607, %v14127_v33  ;;  %v1301_v42 = vshrl.u32 %v14442_v22, %v14488_v30  ;;  %v1304_v62 = vshrl.u32 %v14443_v27, %v14488_v30 }
 0x194   : > { %vm1067_vm6 = vcmp.eq.s32.totalorder %v9727_v25, 0  ;;  %v1149_v29 = vshrl.u32 %v1131_v57, %v1147_v24  ;;  %v1152_v45 = vadd.s32 127, %v1151_v5  ;;  %v1238_v28 = vsel %vm1236_vm2, %v1237_v26, %v9724_v15 }
 0x195   : > { %v1307_v34 = vshrl.u32 %v14454_v49, %v14488_v30  ;;  %vm1066_vm7 = vcmp.lt.s32.totalorder %v9727_v25, 2  ;;  %v1239_v21 = vadd.s32 %v1238_v28, %v1234_v47  ;;  %v1299_v39 = vshrl.u32 %v14452_v61, %v14488_v30 }
 0x196   : > { %v1300_v31 = vshll.u32 %v14452_v61, %v14489_v46  ;;  %v1303_v56 = vshll.u32 %v14442_v22, %v14489_v46  ;;  %vm14262_vm1 = vweird.f32 %v8772_v32  ;;  %v1150_v54 = vor.u32 %v1149_v29, %v1148_v11 }
 0x197   : > { %v1153_v60 = vshll.u32 %v1152_v45, 23  ;;  %v1306_v63 = vshll.u32 %v14443_v27, %v14489_v46  ;;  %v1310_v37 = vshrl.u32 %v14445_v6, %v14488_v30  ;;  %v1240_v55 = vadd.s32 536870912, %v1239_v21  ;;  %v14491_v45 = vld [vmem:[#allocation27_spill] sm:$0xff] }
 0x198   : > { %v1291_v17 = vor.u32 8388608, %v1290_v23  ;;  %v1309_v15 = vshll.u32 %v14454_v49, %v14489_v46  ;;  %v1313_v1 = vshrl.u32 %v14455_v36, %v14488_v30  ;;  %v1302_v52 = vor.u32 %v1301_v42, %v1300_v31 }
 0x199   : > { %v1154_v57 = vor.u32 4788187, %v1153_v60  ;;  %v1305_v24 = vor.u32 %v1304_v62, %v1303_v56  ;;  %v1308_v5 = vor.u32 %v1307_v34, %v1306_v63  ;;  %v9774_v47 = vpop.eup %8420  ;;  %v1241_v26 = vshrl.u32 %v1240_v55, 30 }
 0x19a   : > { %14490 = vst [vmem:[#allocation31_spill] sm:$0xff] %v9774_v47  ;;  %v1311_v11 = vor.u32 %v1310_v37, %v1309_v15  ;;  %v1312_v29 = vshll.u32 %v14445_v6, %v14489_v46  ;;  %vm1315_vm3 = vcmp.lt.s32.totalorder %v14491_v45, 1  ;;  %v9779_v23 = vpop.eup %8422  ;;  %v14129_v28 = vxor.u32 2147483648, %v9774_v47 }
 0x19b   : > { %14492 = vst [vmem:[#allocation26_spill] sm:$0xff] %v9779_v23  ;;  %v1155_v33 = vand.u32 2147483647, %v1154_v57  ;;  %v1157_v10 = vcvt.s32.f32 %v1150_v54  ;;  %vm1316_vm10 = vcmp.lt.s32.totalorder %v14491_v45, 2  ;;  %v14130_v30 = vxor.u32 2147483648, %v9779_v23 }
 0x19c   : > { %v1242_v42 = vshll.u32 %v1241_v26, 30  ;;  %v1314_v62 = vor.u32 %v1313_v1, %v1312_v29  ;;  %vm1317_vm12 = vcmp.lt.s32.totalorder %v14491_v45, 3  ;;  %v1072_v34 = vsel %vm1070_vm5, %v14129_v28, %v9779_v23 }
 0x19d   : > { %v1158_v46 = vmul.f32 %v1157_v10, %v1155_v33  ;;  %vm1318_vm14 = vcmp.lt.s32.totalorder %v14491_v45, 4  ;;  %v1323_v31 = vsel %vm1315_vm3, %v1302_v52, %v1305_v24  ;;  %v1069_v56 = vsel %vm1067_vm6, %v9774_v47, %v14130_v30 }
 0x19e   : > { %v9798_v54 = vsub.s32 %v1239_v21, %v1242_v42  ;;  %v1319_v60 = vsel %vm1315_vm3, %v1299_v39, %v1302_v52  ;;  %v1324_v63 = vsel %vm1318_vm14, %v1311_v11, 920167782  ;;  %v1073_v10 = vsel %vm1066_vm7, %v1069_v56, %v1072_v34 }
 0x19f   : > { %v1159_v33 = vxor.u32 2147483648, %v1158_v46  ;;  %v1320_v37 = vsel %vm1318_vm14, %v1308_v5, 2102212464  ;;  %v1325_v55 = vsel %vm1317_vm12, %v1308_v5, %v1324_v63  ;;  %v1074_v21 = vsel %vm14262_vm1, nan, %v1073_v10 }
 0x1a0   : > { %v1245_v15 = vsub.s32 0, %v9798_v54  ;;  %v1265_v1 = vsub.s32 4, %v1241_v26  ;;  %v1326_v39 = vsel %vm1316_vm10, %v1323_v31, %v1325_v55  ;;  %7353 = vrot.lane.b32.xlu0 %v1074_v21, %s8600_s22  ;;  %v1327_v57 = vsel %vm1315_vm3, %v1305_v24, %v1308_v5  ;;  %v14495_v21 = vld [vmem:[#allocation10_spill] sm:$0xff] }
 0x1a1   : > { %v1160_v25 = vsel %vm1077_vm8, %v1159_v33, %v1158_v46  ;;  %v1328_v52 = vsel %vm1318_vm14, %v1314_v62, 1326507024  ;;  %v1331_v29 = vshll.u32 %v1291_v17, 8  ;;  %v1321_v31 = vsel %vm1317_vm12, %v1305_v24, %v1320_v37 }
 0x1a2   : > { %v1163_v42 = vsel %vm9703_vm11, %v8810_v44, %v1160_v25  ;;  %v8002_v34 = vmin.u32 %v1245_v15, %v9798_v54  ;;  %v1329_v56 = vsel %vm1317_vm12, %v1311_v11, %v1328_v52  ;;  %v9837_v13 = vand.u32 3, %v9741_v51  ;;  %v14497_v25 = vld [vmem:[#allocation9_spill] sm:$0xff] }
 0x1a3   : > { %8424 = vcosq.f32 %v1163_v42  ;;  %v1330_v5 = vsel %vm1316_vm10, %v1327_v57, %v1329_v56  ;;  %v9832_v46 = vmul.u32.u64.low %v1331_v29, %v1326_v39  ;;  %v9833_v63 = vmul.u32.u64.high %v1331_v29, %v1326_v39, %v9832_v46 }
 0x1a4   : > { %8426 = vsinq.f32 %v1163_v42  ;;  %vm1181_vm8 = vcmp.lt.s32.totalorder %v8817_v16, 0  ;;  %v1247_v17 = vclz %v8002_v34  ;;  %v14493_v24 = vand.u32 2139095040, %v9356_v4  ;;  %v14502_v42 = vld [vmem:[#allocation11_spill] sm:$0xff] }
 0x1a5   : > { %v1266_v11 = vsel %vm1181_vm8, %v1265_v1, %v1241_v26  ;;  %v9846_v10 = vmul.u32.u64.low %v1331_v29, %v1330_v5  ;;  %v9847_v33 = vmul.u32.u64.high %v1331_v29, %v1330_v5, %v9846_v10  ;;  %v14494_v37 = vand.u32 2139095040, %v9361_v53 }
 0x1a6   : > { %v9842_v62 = vshrl.u32 %v14493_v24, 23  ;;  %v9855_v51 = vadd.f32 %v9600_v48, %v14495_v21  ;;  %v8003_v15 = vadd.s32 4294967294, %v1247_v17  ;;  %v1322_v39 = vsel %vm1316_vm10, %v1319_v60, %v1321_v31  ;;  %v14504_v60 = vld [vmem:[#allocation34_spill] sm:$0xff] }
 0x1a7   : > { %v9851_v55 = vshrl.u32 %v14494_v37, 23  ;;  %v9861_v57 = vadd.f32 %v9603_v35, %v14497_v25  ;;  %v14499_v26 = vand.u32 2147483647, %v8817_v16  ;;  %v1341_v52 = vadd.s32 1, %v9833_v63  ;;  %v14505_v37 = vld [vmem:[#allocation29_spill] sm:$0xff] }
 0x1a8   : > { %14496 = vst [vmem:[#allocation27_spill] sm:$0xff] %v9855_v51  ;;  %v14131_v34 = vand.u32 2147483647, %v14502_v42  ;;  %vm1171_vm11 = vcmp.eq.s32.totalorder %v9837_v13, 0  ;;  %vm1174_vm13 = vcmp.eq.s32.totalorder %v9837_v13, 2  ;;  %vm8004_vm2 = vcmp.lt.s32.totalorder %v8003_v15, 0 }
 0x1a9   : > { %14498 = vst [vmem:[#allocation10_spill] sm:$0xff] %v9861_v57  ;;  %vm9865_vm15 = vcmp.le.f32.partialorder %v14499_v26, 0.7853982  ;;  %vm1170_vm5 = vcmp.lt.s32.totalorder %v9837_v13, 2  ;;  %v1250_v35 = vsel %vm8004_vm2, 0, %v8003_v15  ;;  %v1338_v45 = vmul.u32 %v1331_v29, %v1322_v39 }
 0x1aa   : > { %v9875_v48 = vsel %vm9865_vm15, 0, %v1266_v11  ;;  %vm1340_vm6 = vc.u32 %v9847_v33, %v9832_v46  ;;  %v1405_v31 = vshrl.u32 %v14442_v22, %v14504_v60  ;;  %vm1167_vm7 = vweird.f32 %v8810_v44 }
 0x1ab   : > { %14503 = vst [vmem:[#allocation9_spill] sm:$0xff] %v9875_v48  ;;  %v1235_v56 = vadd.s32 %v9723_v18, %v9718_v40  ;;  %v1251_v5 = vsub.s32 32, %v1250_v35  ;;  %v1255_v17 = vsub.s32 4294967266, %v1250_v35  ;;  %v1342_v24 = vsel %vm1340_vm6, %v1341_v52, %v9833_v63 }
 0x1ac   : > { %v1272_v11 = vadd.s32 3, %v9875_v48  ;;  %v1343_v10 = vadd.s32 %v1342_v24, %v1338_v45  ;;  %v9889_v29 = vand.u32 8388607, %v14131_v34  ;;  %v1404_v21 = vshll.u32 %v14452_v61, %v14505_v37 }
 0x1ad   : > { %v1252_v15 = vshll.u32 %v9798_v54, %v1250_v35  ;;  %v1253_v39 = vshrl.u32 %v1235_v56, %v1251_v5  ;;  %v1256_v25 = vadd.s32 127, %v1255_v17  ;;  %v1408_v40 = vshrl.u32 %v14443_v27, %v14504_v60  ;;  %v9896_v18 = vpop.eup %8424 }
 0x1ae   : > { %14506 = vst [vmem:[#allocation34_spill] sm:$0xff] %v9896_v18  ;;  %v1344_v63 = vadd.s32 536870912, %v1343_v10  ;;  %v1406_v26 = vor.u32 %v1405_v31, %v1404_v21  ;;  %v1407_v52 = vshll.u32 %v14442_v22, %v14505_v37  ;;  %v1411_v45 = vshrl.u32 %v14454_v49, %v14504_v60  ;;  %v9902_v24 = vpop.eup %8426 }
 0x1af   : > { %14507 = vst [vmem:[#allocation29_spill] sm:$0xff] %v9902_v24  ;;  %v14136_v28 = vxor.u32 2147483648, %v9896_v18  ;;  %v1254_v54 = vor.u32 %v1253_v39, %v1252_v15  ;;  %v1257_v35 = vshll.u32 %v1256_v25, 23  ;;  %v1414_v56 = vshrl.u32 %v14445_v6, %v14504_v60 }
 0x1b0   : > { %v14141_v5 = vxor.u32 2147483648, %v9902_v24  ;;  %vm1285_vm3 = vcmp.lt.s32.totalorder %v14487_v3, 0  ;;  %v1345_v31 = vshrl.u32 %v1344_v63, 30  ;;  %v1410_v17 = vshll.u32 %v14443_v27, %v14505_v37 }
 0x1b1   : > { %v1417_v21 = vshrl.u32 %v14455_v36, %v14504_v60  ;;  %v1176_v15 = vsel %vm1174_vm13, %v14136_v28, %v9902_v24  ;;  %v1258_v39 = vor.u32 4788187, %v1257_v35  ;;  %v1409_v25 = vor.u32 %v1408_v40, %v1407_v52 }
 0x1b2   : > { %v1413_v30 = vshll.u32 %v14454_v49, %v14505_v37  ;;  %v1173_v63 = vsel %vm1171_vm11, %v9896_v18, %v14141_v5  ;;  %v1346_v34 = vshll.u32 %v1345_v31, 30  ;;  %v1412_v32 = vor.u32 %v1411_v45, %v1410_v17 }
 0x1b3   : > { %v1416_v48 = vshll.u32 %v14445_v6, %v14505_v37  ;;  %v1177_v47 = vsel %vm1170_vm5, %v1173_v63, %v1176_v15  ;;  %v1259_v28 = vand.u32 2147483647, %v1258_v39  ;;  %v1261_v35 = vcvt.s32.f32 %v1254_v54  ;;  %v14511_v54 = vld [vmem:[#allocation28_spill] sm:$0xff] }
 0x1b4   : > { %v1415_v40 = vor.u32 %v1414_v56, %v1413_v30  ;;  %v1178_v52 = vsel %vm1167_vm7, nan, %v1177_v47  ;;  %v9931_v23 = vand.u32 3, %v1272_v11  ;;  %v14508_v24 = vand.u32 2147483647, %v14487_v3 }
 0x1b5   : > { %v9939_v45 = vsub.s32 %v1343_v10, %v1346_v34  ;;  %v1418_v37 = vor.u32 %v1417_v21, %v1416_v48  ;;  %7355 = vrot.lane.b32.xlu1 %v1178_v52, %s8600_s22  ;;  %v1262_v13 = vmul.f32 %v1261_v35, %v1259_v28  ;;  %v1369_v17 = vsub.s32 4, %v1345_v31 }
 0x1b6   : > { %vm9935_vm10 = vcmp.le.f32.partialorder %v14508_v24, 0.7853982  ;;  %v1395_v30 = vor.u32 8388608, %v9889_v29  ;;  %v1403_v47 = vshrl.u32 %v14452_v61, %v14504_v60  ;;  %vm1419_vm12 = vcmp.lt.s32.totalorder %v14511_v54, 1 }
 0x1b7   : > { %v1349_v11 = vsub.s32 0, %v9939_v45  ;;  %vm1421_vm14 = vcmp.lt.s32.totalorder %v14511_v54, 3  ;;  %vm1422_vm11 = vcmp.lt.s32.totalorder %v14511_v54, 4  ;;  %v1263_v34 = vxor.u32 2147483648, %v1262_v13 }
 0x1b8   : > { %v1424_v10 = vsel %vm1422_vm11, %v1412_v32, 2102212464  ;;  %v1427_v48 = vsel %vm1419_vm12, %v1406_v26, %v1409_v25  ;;  %v1428_v28 = vsel %vm1422_vm11, %v1415_v40, 920167782  ;;  %v1431_v60 = vsel %vm1419_vm12, %v1409_v25, %v1412_v32 }
 0x1b9   : > { %v8006_v24 = vmin.u32 %v1349_v11, %v9939_v45  ;;  %v1429_v29 = vsel %vm1421_vm14, %v1412_v32, %v1428_v28  ;;  %v1432_v56 = vsel %vm1422_vm11, %v1418_v37, 1326507024  ;;  %v1264_v21 = vsel %vm1181_vm8, %v1263_v34, %v1262_v13  ;;  %v577_v37 = vpop.permute.xlu1 %576  ;;  %v581_v11 = vpop.permute.xlu0 %580 }
 0x1ba   : > { %v1370_v15 = vsel %vm1285_vm3, %v1369_v17, %v1345_v31  ;;  %vm1420_vm13 = vcmp.lt.s32.totalorder %v14511_v54, 2  ;;  %v1433_v39 = vsel %vm1421_vm14, %v1415_v40, %v1432_v56  ;;  %v1267_v63 = vsel %vm9865_vm15, %v8817_v16, %v1264_v21  ;;  %v14514_v56 = vld [vmem:[#allocation38_spill] sm:$0xff] }
 0x1bb   : > { %v1351_v35 = vclz %v8006_v24  ;;  %v1430_v32 = vsel %vm1420_vm13, %v1427_v48, %v1429_v29  ;;  %v1435_v52 = vshll.u32 %v1395_v30, 8  ;;  %8428 = vcosq.f32 %v1267_v63 }
 0x1bc   : > { %v1423_v31 = vsel %vm1419_vm12, %v1403_v47, %v1406_v26  ;;  %v1425_v13 = vsel %vm1421_vm14, %v1409_v25, %v1424_v10  ;;  %v1434_v40 = vsel %vm1420_vm13, %v1431_v60, %v1433_v39  ;;  %8430 = vsinq.f32 %v1267_v63  ;;  %v14513_v26 = vld [vmem:[#allocation13_spill] sm:$0xff] }
 0x1bd   : > { %v8007_v1 = vadd.s32 4294967294, %v1351_v35  ;;  %v9974_v17 = vmul.u32.u64.low %v1435_v52, %v1434_v40  ;;  %v9975_v34 = vmul.u32.u64.high %v1435_v52, %v1434_v40, %v9974_v17  ;;  %v9979_v30 = vsel %vm9935_vm10, 0, %v1370_v15 }
 0x1be   : > { %14512 = vst [vmem:[#allocation28_spill] sm:$0xff] %v9979_v30  ;;  %v9981_v48 = vmul.u32.u64.low %v1435_v52, %v1430_v32  ;;  %v9982_v28 = vmul.u32.u64.high %v1435_v52, %v1430_v32, %v9981_v48  ;;  %v14142_v47 = vand.u32 2147483647, %v14513_v26  ;;  %v9987_v25 = vmul.f32 %v8752_v9, %v577_v37  ;;  %v14515_v37 = vld [vmem:[#allocation32_spill] sm:$0xff] }
 0x1bf   : > { %v9990_v10 = vmul.f32 %v8752_v9, %v581_v11  ;;  %vm8008_vm8 = vcmp.lt.s32.totalorder %v8007_v1, 0  ;;  %v1426_v24 = vsel %vm1420_vm13, %v1423_v31, %v1425_v13  ;;  %vm1278_vm15 = vcmp.eq.s32.totalorder %v9931_v23, 2 }
 0x1c0   : > { %v1354_v29 = vsel %vm8008_vm8, 0, %v8007_v1  ;;  %v9997_v60 = vand.u32 8388607, %v14142_v47  ;;  %v1509_v21 = vshrl.u32 %v14442_v22, %v14514_v56  ;;  %vm1275_vm2 = vcmp.eq.s32.totalorder %v9931_v23, 0 }
 0x1c1   : > { %v1339_v15 = vadd.s32 %v9832_v46, %v9847_v33  ;;  %v1355_v39 = vsub.s32 32, %v1354_v29  ;;  %v1359_v63 = vsub.s32 4294967266, %v1354_v29  ;;  %v1376_v54 = vadd.s32 3, %v9979_v30 }
 0x1c2   : > { %vm1274_vm5 = vcmp.lt.s32.totalorder %v9931_v23, 2  ;;  %v1442_v35 = vmul.u32 %v1435_v52, %v1426_v24  ;;  %vm1444_vm6 = vc.u32 %v9975_v34, %v9981_v48  ;;  %v1445_v32 = vadd.s32 1, %v9982_v28 }
 0x1c3   : > { %v1508_v11 = vshll.u32 %v14452_v61, %v14515_v37  ;;  %vm14192_vm12 = vweird.f32 %v8817_v16  ;;  %v1356_v31 = vshll.u32 %v9939_v45, %v1354_v29  ;;  %v1357_v46 = vshrl.u32 %v1339_v15, %v1355_v39 }
 0x1c4   : > { %v1360_v33 = vadd.s32 127, %v1359_v63  ;;  %v1507_v13 = vshrl.u32 %v14452_v61, %v14514_v56  ;;  %v1446_v40 = vsel %vm1444_vm6, %v1445_v32, %v9982_v28  ;;  %v1499_v52 = vor.u32 8388608, %v9997_v60 }
 0x1c5   : > { %v1510_v1 = vor.u32 %v1509_v21, %v1508_v11  ;;  %v1512_v17 = vshrl.u32 %v14443_v27, %v14514_v56  ;;  %v1358_v24 = vor.u32 %v1357_v46, %v1356_v31  ;;  %v1447_v44 = vadd.s32 %v1446_v40, %v1442_v35  ;;  %v10021_v45 = vpop.eup %8428 }
 0x1c6   : > { %v1361_v47 = vshll.u32 %v1360_v33, 23  ;;  %v1511_v18 = vshll.u32 %v14442_v22, %v14515_v37  ;;  %14516 = vst [vmem:[#allocation38_spill] sm:$0xff] %v10021_v45  ;;  %v1515_v29 = vshrl.u32 %v14454_v49, %v14514_v56  ;;  %v1517_v28 = vshll.u32 %v14454_v49, %v14515_v37  ;;  %v10031_v15 = vpop.eup %8430 }
 0x1c7   : > { %v1518_v60 = vshrl.u32 %v14445_v6, %v14514_v56  ;;  %v1521_v21 = vshrl.u32 %v14455_v36, %v14514_v56  ;;  %14517 = vst [vmem:[#allocation32_spill] sm:$0xff] %v10031_v15  ;;  %v14147_v39 = vxor.u32 2147483648, %v10021_v45  ;;  %vm1389_vm14 = vcmp.lt.s32.totalorder %v14502_v42, 0 }
 0x1c8   : > { %v1362_v63 = vor.u32 4788187, %v1361_v47  ;;  %v1448_v35 = vadd.s32 536870912, %v1447_v44  ;;  %v1514_v32 = vshll.u32 %v14443_v27, %v14515_v37  ;;  %v14150_v11 = vxor.u32 2147483648, %v10031_v15 }
 0x1c9   : > { %v1513_v31 = vor.u32 %v1512_v17, %v1511_v18  ;;  %v1519_v46 = vor.u32 %v1518_v60, %v1517_v28  ;;  %v1520_v33 = vshll.u32 %v14445_v6, %v14515_v37  ;;  %v1280_v56 = vsel %vm1278_vm15, %v14147_v39, %v10031_v15  ;;  %v14518_v28 = vld [vmem:[#allocation35_spill] sm:$0xff] }
 0x1ca   : > { %v1363_v47 = vand.u32 2147483647, %v1362_v63  ;;  %v1365_v40 = vcvt.s32.f32 %v1358_v24  ;;  %v1449_v30 = vshrl.u32 %v1448_v35, 30  ;;  %vm2958_vm11 = vcmp.gt.s32.totalorder %v9733_v59, 0 }
 0x1cb   : > { %vm3062_vm13 = vcmp.gt.s32.totalorder %v9736_v58, 0  ;;  %v1277_v18 = vsel %vm1275_vm2, %v10021_v45, %v14150_v11  ;;  %v1516_v37 = vor.u32 %v1515_v29, %v1514_v32  ;;  %v1522_v17 = vor.u32 %v1521_v21, %v1520_v33 }
 0x1cc   : > { %vm1523_vm8 = vcmp.lt.s32.totalorder %v14518_v28, 1  ;;  %v1281_v60 = vsel %vm1274_vm5, %v1277_v18, %v1280_v56  ;;  %v1366_v63 = vmul.f32 %v1365_v40, %v1363_v47  ;;  %v1450_v24 = vshll.u32 %v1449_v30, 30 }
 0x1cd   : > { %vm1526_vm15 = vcmp.lt.s32.totalorder %v14518_v28, 4  ;;  %v1282_v35 = vsel %vm14192_vm12, nan, %v1281_v60  ;;  %v1473_v39 = vsub.s32 4, %v1449_v30  ;;  %v1531_v15 = vsel %vm1523_vm8, %v1510_v1, %v1513_v31 }
 0x1ce   : > { %v1532_v29 = vsel %vm1526_vm15, %v1519_v46, 920167782  ;;  %7357 = vrot.lane.b32.xlu0 %v1282_v35, %s8600_s22  ;;  %v1367_v21 = vxor.u32 2147483648, %v1366_v63  ;;  %v10063_v32 = vand.u32 3, %v1376_v54  ;;  %v10065_v23 = vsub.s32 %v1447_v44, %v1450_v24 }
 0x1cf   : > { %vm1525_vm2 = vcmp.lt.s32.totalorder %v14518_v28, 3  ;;  %vm1524_vm5 = vcmp.lt.s32.totalorder %v14518_v28, 2  ;;  %v1527_v33 = vsel %vm1523_vm8, %v1507_v13, %v1510_v1  ;;  %v1528_v56 = vsel %vm1526_vm15, %v1516_v37, 2102212464 }
 0x1d0   : > { %v1533_v47 = vsel %vm1525_vm2, %v1516_v37, %v1532_v29  ;;  %v1368_v40 = vsel %vm1285_vm3, %v1367_v21, %v1366_v63  ;;  %v1453_v54 = vsub.s32 0, %v10065_v23  ;;  %v1535_v18 = vsel %vm1523_vm8, %v1513_v31, %v1516_v37 }
 0x1d1   : > { %v1534_v44 = vsel %vm1524_vm5, %v1531_v15, %v1533_v47  ;;  %v1371_v13 = vsel %vm9935_vm10, %v14487_v3, %v1368_v40  ;;  %v1474_v1 = vsel %vm1389_vm14, %v1473_v39, %v1449_v30  ;;  %v1536_v60 = vsel %vm1526_vm15, %v1522_v17, 1326507024 }
 0x1d2   : > { %v1539_v24 = vshll.u32 %v1499_v52, 8  ;;  %8432 = vcosq.f32 %v1371_v13  ;;  %v8010_v63 = vmin.u32 %v1453_v54, %v10065_v23  ;;  %v1529_v15 = vsel %vm1525_vm2, %v1513_v31, %v1528_v56 }
 0x1d3   : > { %v1537_v37 = vsel %vm1525_vm2, %v1519_v46, %v1536_v60  ;;  %8434 = vsinq.f32 %v1371_v13  ;;  %v10101_v30 = vadd.s32 4294967169, %v9842_v62  ;;  %v10104_v52 = vadd.s32 4294967169, %v9851_v55 }
 0x1d4   : > { %v1538_v5 = vsel %vm1524_vm5, %v1535_v18, %v1537_v37  ;;  %v10096_v35 = vmul.u32.u64.low %v1539_v24, %v1534_v44  ;;  %v10097_v29 = vmul.u32.u64.high %v1539_v24, %v1534_v44, %v10096_v35  ;;  %v14519_v39 = vand.u32 2147483647, %v14502_v42 }
 0x1d5   : > { %v1455_v46 = vclz %v8010_v63  ;;  %v1530_v21 = vsel %vm1524_vm5, %v1527_v33, %v1529_v15  ;;  %v10118_v56 = vmul.u32.u64.low %v1539_v24, %v1538_v5  ;;  %v10119_v62 = vmul.u32.u64.high %v1539_v24, %v1538_v5, %v10118_v56  ;;  %v14523_v33 = vld [vmem:[#allocation17_spill] sm:$0xff] }
 0x1d6   : > { %vm10108_vm3 = vcmp.le.f32.partialorder %v14519_v39, 0.7853982  ;;  %v10124_v55 = vsel %vm2958_vm11, %v9733_v59, 0  ;;  %v10129_v47 = vsel %vm3062_vm13, %v9736_v58, 0  ;;  %vm1379_vm10 = vcmp.eq.s32.totalorder %v10063_v32, 0  ;;  %v14525_v63 = vld [vmem:[#allocation41_spill] sm:$0xff] }
 0x1d7   : > { %v10114_v17 = vsel %vm10108_vm3, 0, %v1474_v1  ;;  %v8011_v54 = vadd.s32 4294967294, %v1455_v46  ;;  %vm1382_vm6 = vcmp.eq.s32.totalorder %v10063_v32, 2  ;;  %v1549_v28 = vadd.s32 1, %v10097_v29  ;;  %v14524_v1 = vld [vmem:[#allocation37_spill] sm:$0xff] }
 0x1d8   : > { %14522 = vst [vmem:[#allocation35_spill] sm:$0xff] %v10114_v17  ;;  %v14151_v44 = vand.u32 2147483647, %v14523_v33  ;;  %vm1378_vm8 = vcmp.lt.s32.totalorder %v10063_v32, 2  ;;  %v1443_v59 = vadd.s32 %v9981_v48, %v9975_v34  ;;  %v1480_v58 = vadd.s32 3, %v10114_v17 }
 0x1d9   : > { %vm8012_vm11 = vcmp.lt.s32.totalorder %v8011_v54, 0  ;;  %v1546_v18 = vmul.u32 %v1539_v24, %v1530_v21  ;;  %vm1375_vm13 = vweird.f32 %v14487_v3  ;;  %vm1548_vm15 = vc.u32 %v10119_v62, %v10096_v35 }
 0x1da   : > { %v1458_v13 = vsel %vm8012_vm11, 0, %v8011_v54  ;;  %v1612_v60 = vshll.u32 %v14452_v61, %v14524_v1  ;;  %v1613_v15 = vshrl.u32 %v14442_v22, %v14525_v63  ;;  %v1550_v34 = vsel %vm1548_vm15, %v1549_v28, %v10097_v29 }
 0x1db   : > { %v1459_v37 = vsub.s32 32, %v1458_v13  ;;  %v1463_v5 = vsub.s32 4294967266, %v1458_v13  ;;  %v1616_v48 = vshrl.u32 %v14443_v27, %v14525_v63  ;;  %v1551_v24 = vadd.s32 %v1550_v34, %v1546_v18 }
 0x1dc   : > { %v1602_v39 = vand.u32 8388607, %v14151_v44  ;;  %v1615_v46 = vshll.u32 %v14442_v22, %v14524_v1  ;;  %v1618_v21 = vshll.u32 %v14443_v27, %v14524_v1  ;;  %v10156_v56 = vpop.eup %8432  ;;  %v1460_v54 = vshll.u32 %v10065_v23, %v1458_v13 }
 0x1dd   : > { %14526 = vst [vmem:[#allocation37_spill] sm:$0xff] %v10156_v56  ;;  %v1461_v11 = vshrl.u32 %v1443_v59, %v1459_v37  ;;  %v1464_v40 = vadd.s32 127, %v1463_v5  ;;  %vm1493_vm2 = vcmp.lt.s32.totalorder %v14513_v26, 0  ;;  %v1619_v29 = vshrl.u32 %v14454_v49, %v14525_v63  ;;  %v10162_v28 = vpop.eup %8434 }
 0x1de   : > { %14527 = vst [vmem:[#allocation41_spill] sm:$0xff] %v10162_v28  ;;  %v14156_v18 = vxor.u32 2147483648, %v10156_v56  ;;  %v1552_v34 = vadd.s32 536870912, %v1551_v24  ;;  %v1614_v44 = vor.u32 %v1613_v15, %v1612_v60  ;;  %v1622_v16 = vshrl.u32 %v14445_v6, %v14525_v63 }
 0x1df   : > { %v14160_v45 = vxor.u32 2147483648, %v10162_v28  ;;  %v1462_v17 = vor.u32 %v1461_v11, %v1460_v54  ;;  %v1465_v23 = vshll.u32 %v1464_v40, 23  ;;  %v1617_v59 = vor.u32 %v1616_v48, %v1615_v46 }
 0x1e0   : > { %v1384_v13 = vsel %vm1382_vm6, %v14156_v18, %v10162_v28  ;;  %v1553_v37 = vshrl.u32 %v1552_v34, 30  ;;  %v1621_v5 = vshll.u32 %v14454_v49, %v14524_v1  ;;  %v1625_v60 = vshrl.u32 %v14455_v36, %v14525_v63 }
 0x1e1   : > { %v1381_v11 = vsel %vm1379_vm10, %v10156_v56, %v14160_v45  ;;  %v1466_v40 = vor.u32 4788187, %v1465_v23  ;;  %v14528_v15 = vand.u32 2147483647, %v14513_v26  ;;  %v1620_v46 = vor.u32 %v1619_v29, %v1618_v21 }
 0x1e2   : > { %v1624_v54 = vshll.u32 %v14445_v6, %v14524_v1  ;;  %v1385_v34 = vsel %vm1378_vm8, %v1381_v11, %v1384_v13  ;;  %v1554_v18 = vshll.u32 %v1553_v37, 30  ;;  %v1577_v28 = vsub.s32 4, %v1553_v37  ;;  %v14531_v13 = vld [vmem:[#allocation36_spill] sm:$0xff] }
 0x1e3   : > { %vm10184_vm5 = vcmp.le.f32.partialorder %v14528_v15, 0.7853982  ;;  %v1623_v0 = vor.u32 %v1622_v16, %v1621_v5  ;;  %v1386_v45 = vsel %vm1375_vm13, nan, %v1385_v34  ;;  %v1467_v23 = vand.u32 2147483647, %v1466_v40 }
 0x1e4   : > { %v1469_v56 = vcvt.s32.f32 %v1462_v17  ;;  %v1626_v20 = vor.u32 %v1625_v60, %v1624_v54  ;;  %7359 = vrot.lane.b32.xlu1 %v1386_v45, %s8600_s22  ;;  %v10195_v15 = vand.u32 3, %v1480_v58  ;;  %v10197_v21 = vsub.s32 %v1551_v24, %v1554_v18 }
 0x1e5   : > { %v1603_v29 = vor.u32 8388608, %v1602_v39  ;;  %v1611_v32 = vshrl.u32 %v14452_v61, %v14525_v63  ;;  %vm1627_vm10 = vcmp.lt.s32.totalorder %v14531_v13, 1  ;;  %vm1629_vm6 = vcmp.lt.s32.totalorder %v14531_v13, 3 }
 0x1e6   : > { %v1470_v1 = vmul.f32 %v1469_v56, %v1467_v23  ;;  %vm1630_vm8 = vcmp.lt.s32.totalorder %v14531_v13, 4  ;;  %v1557_v16 = vsub.s32 0, %v10197_v21  ;;  %v1578_v45 = vsel %vm1493_vm2, %v1577_v28, %v1553_v37 }
 0x1e7   : > { %v1635_v17 = vsel %vm1627_vm10, %v1614_v44, %v1617_v59  ;;  %v1636_v58 = vsel %vm1630_vm8, %v1623_v0, 920167782  ;;  %v1639_v39 = vsel %vm1627_vm10, %v1617_v59, %v1620_v46  ;;  %v1640_v56 = vsel %vm1630_vm8, %v1626_v20, 1326507024 }
 0x1e8   : > { %v1471_v24 = vxor.u32 2147483648, %v1470_v1  ;;  %v1637_v63 = vsel %vm1629_vm6, %v1620_v46, %v1636_v58  ;;  %v8014_v18 = vmin.u32 %v1557_v16, %v10197_v21  ;;  %vm1628_vm11 = vcmp.lt.s32.totalorder %v14531_v13, 2  ;;  %v14534_v13 = vld [vmem:[#allocation49_spill] sm:$0xff] }
 0x1e9   : > { %v1632_v5 = vsel %vm1630_vm8, %v1620_v46, 2102212464  ;;  %v1641_v28 = vsel %vm1629_vm6, %v1623_v0, %v1640_v56  ;;  %v1638_v60 = vsel %vm1628_vm11, %v1635_v17, %v1637_v63  ;;  %v1643_v40 = vshll.u32 %v1603_v29, 8 }
 0x1ea   : > { %v1472_v37 = vsel %vm1389_vm14, %v1471_v24, %v1470_v1  ;;  %v1642_v11 = vsel %vm1628_vm11, %v1639_v39, %v1641_v28  ;;  %v1559_v54 = vclz %v8014_v18  ;;  %v10228_v46 = vsel %vm10184_vm5, 0, %v1578_v45 }
 0x1eb   : > { %v1475_v20 = vsel %vm10108_vm3, %v14502_v42, %v1472_v37  ;;  %14532 = vst [vmem:[#allocation36_spill] sm:$0xff] %v10228_v46  ;;  %v1631_v0 = vsel %vm1627_vm10, %v1611_v32, %v1614_v44  ;;  %v1633_v34 = vsel %vm1629_vm6, %v1617_v59, %v1632_v5  ;;  %v10242_v17 = vshrl.u32 %v10124_v55, 5  ;;  %v14533_v32 = vld [vmem:[#allocation18_spill] sm:$0xff] }
 0x1ec   : > { %8436 = vcosq.f32 %v1475_v20  ;;  %v10234_v23 = vmul.u32.u64.low %v1643_v40, %v1642_v11  ;;  %v10235_v1 = vmul.u32.u64.high %v1643_v40, %v1642_v11, %v10234_v23  ;;  %v8015_v29 = vadd.s32 4294967294, %v1559_v54 }
 0x1ed   : > { %8438 = vsinq.f32 %v1475_v20  ;;  %v10237_v16 = vmul.u32.u64.low %v1643_v40, %v1638_v60  ;;  %v10238_v31 = vmul.u32.u64.high %v1643_v40, %v1638_v60, %v10237_v16  ;;  %v10245_v45 = vand.u32 31, %v10124_v55  ;;  %v14535_v60 = vld [vmem:[#allocation39_spill] sm:$0xff] }
 0x1ee   : > { %v14165_v58 = vand.u32 2147483647, %v14533_v32  ;;  %v10250_v59 = vshrl.u32 %v10129_v47, 5  ;;  %v10253_v24 = vand.u32 31, %v10129_v47  ;;  %vm8016_vm14 = vcmp.lt.s32.totalorder %v8015_v29, 0 }
 0x1ef   : > { %v1634_v63 = vsel %vm1628_vm11, %v1631_v0, %v1633_v34  ;;  %vm1486_vm3 = vcmp.eq.s32.totalorder %v10195_v15, 2  ;;  %v1547_v55 = vadd.s32 %v10096_v35, %v10119_v62  ;;  %v1562_v39 = vsel %vm8016_vm14, 0, %v8015_v29 }
 0x1f0   : > { %v10261_v56 = vadd.s32 3, %v10228_v46  ;;  %vm1652_vm15 = vc.u32 %v10235_v1, %v10237_v16  ;;  %vm1483_vm10 = vcmp.eq.s32.totalorder %v10195_v15, 0  ;;  %v1563_v47 = vsub.s32 32, %v1562_v39 }
 0x1f1   : > { %v1567_v18 = vsub.s32 4294967266, %v1562_v39  ;;  %v1653_v5 = vadd.s32 1, %v10238_v31  ;;  %v1717_v28 = vshrl.u32 %v14442_v22, %v14534_v13  ;;  %vm1482_vm6 = vcmp.lt.s32.totalorder %v10195_v15, 2 }
 0x1f2   : > { %v1564_v35 = vshll.u32 %v10197_v21, %v1562_v39  ;;  %v1650_v62 = vmul.u32 %v1643_v40, %v1634_v63  ;;  %v1706_v37 = vand.u32 8388607, %v14165_v58  ;;  %v1716_v11 = vshll.u32 %v14452_v61, %v14535_v60 }
 0x1f3   : > { %vm14186_vm8 = vweird.f32 %v14502_v42  ;;  %v1565_v20 = vshrl.u32 %v1547_v55, %v1563_v47  ;;  %v1568_v54 = vadd.s32 127, %v1567_v18  ;;  %v1654_v0 = vsel %vm1652_vm15, %v1653_v5, %v10238_v31 }
 0x1f4   : > { %v1720_v34 = vshrl.u32 %v14443_v27, %v14534_v13  ;;  %v1655_v23 = vadd.s32 %v1654_v0, %v1650_v62  ;;  %v1715_v21 = vshrl.u32 %v14452_v61, %v14534_v13  ;;  %v1719_v40 = vshll.u32 %v14442_v22, %v14535_v60 }
 0x1f5   : > { %v1723_v29 = vshrl.u32 %v14454_v49, %v14534_v13  ;;  %v1566_v63 = vor.u32 %v1565_v20, %v1564_v35  ;;  %v1569_v39 = vshll.u32 %v1568_v54, 23  ;;  %v1718_v58 = vor.u32 %v1717_v28, %v1716_v11 }
 0x1f6   : > { %v1726_v55 = vshrl.u32 %v14445_v6, %v14534_v13  ;;  %v10287_v31 = vpop.eup %8436  ;;  %v1656_v47 = vadd.s32 536870912, %v1655_v23  ;;  %v1707_v18 = vor.u32 8388608, %v1706_v37  ;;  %v1722_v5 = vshll.u32 %v14443_v27, %v14535_v60 }
 0x1f7   : > { %14536 = vst [vmem:[#allocation49_spill] sm:$0xff] %v10287_v31  ;;  %v1729_v62 = vshrl.u32 %v14455_v36, %v14534_v13  ;;  %v10293_v0 = vpop.eup %8438  ;;  %v14170_v44 = vxor.u32 2147483648, %v10287_v31  ;;  %v1570_v35 = vor.u32 4788187, %v1569_v39  ;;  %v1721_v20 = vor.u32 %v1720_v34, %v1719_v40 }
 0x1f8   : > { %14537 = vst [vmem:[#allocation39_spill] sm:$0xff] %v10293_v0  ;;  %v1725_v28 = vshll.u32 %v14454_v49, %v14535_v60  ;;  %v14171_v11 = vxor.u32 2147483648, %v10293_v0  ;;  %v1657_v54 = vshrl.u32 %v1656_v47, 30  ;;  %v1724_v3 = vor.u32 %v1723_v29, %v1722_v5  ;;  %v14538_v47 = vld [vmem:[#allocation42_spill] sm:$0xff] }
 0x1f9   : > { %v1728_v37 = vshll.u32 %v14445_v6, %v14535_v60  ;;  %v1488_v13 = vsel %vm1486_vm3, %v14170_v44, %v10293_v0  ;;  %v1571_v46 = vand.u32 2147483647, %v1570_v35  ;;  %v1573_v43 = vcvt.s32.f32 %v1566_v63 }
 0x1fa   : > { %v1727_v39 = vor.u32 %v1726_v55, %v1725_v28  ;;  %v1485_v34 = vsel %vm1483_vm10, %v10287_v31, %v14171_v11  ;;  %v1658_v40 = vshll.u32 %v1657_v54, 30  ;;  %vm1731_vm11 = vcmp.lt.s32.totalorder %v14538_v47, 1 }
 0x1fb   : > { %v1730_v29 = vor.u32 %v1729_v62, %v1728_v37  ;;  %v1489_v60 = vsel %vm1482_vm6, %v1485_v34, %v1488_v13  ;;  %v1574_v5 = vmul.f32 %v1573_v43, %v1571_v46  ;;  %vm1732_vm14 = vcmp.lt.s32.totalorder %v14538_v47, 2 }
 0x1fc   : > { %vm1733_vm3 = vcmp.lt.s32.totalorder %v14538_v47, 3  ;;  %v1490_v63 = vsel %vm14186_vm8, nan, %v1489_v60  ;;  %v10318_v55 = vsub.s32 %v1655_v23, %v1658_v40  ;;  %vm1734_vm15 = vcmp.lt.s32.totalorder %v14538_v47, 4 }
 0x1fd   : > { %v1739_v62 = vsel %vm1731_vm11, %v1718_v58, %v1721_v20  ;;  %7361 = vrot.lane.b32.xlu0 %v1490_v63, %s8600_s22  ;;  %v1575_v35 = vxor.u32 2147483648, %v1574_v5  ;;  %v1681_v15 = vsub.s32 4, %v1657_v54  ;;  %v1736_v28 = vsel %vm1734_vm15, %v1724_v3, 2102212464 }
 0x1fe   : > { %v1740_v43 = vsel %vm1734_vm15, %v1727_v39, 920167782  ;;  %v1661_v46 = vsub.s32 0, %v10318_v55  ;;  %v1735_v37 = vsel %vm1731_vm11, %v1715_v21, %v1718_v58  ;;  %v1743_v13 = vsel %vm1731_vm11, %v1721_v20, %v1724_v3 }
 0x1ff   : > { %v1741_v23 = vsel %vm1733_vm3, %v1724_v3, %v1740_v43  ;;  %v1576_v34 = vsel %vm1493_vm2, %v1575_v35, %v1574_v5  ;;  %v1744_v60 = vsel %vm1734_vm15, %v1730_v29, 1326507024  ;;  %v1747_v63 = vshll.u32 %v1707_v18, 8 }
 0x200   : > { %v1742_v40 = vsel %vm1732_vm14, %v1739_v62, %v1741_v23  ;;  %v1579_v44 = vsel %vm10184_vm5, %v14513_v26, %v1576_v34  ;;  %v8018_v58 = vmin.u32 %v1661_v46, %v10318_v55  ;;  %v1737_v21 = vsel %vm1733_vm3, %v1721_v20, %v1736_v28  ;;  %v14544_v34 = vld [vmem:[#allocation19_spill] sm:$0xff] }
 0x201   : > { %v1745_v3 = vsel %vm1733_vm3, %v1727_v39, %v1744_v60  ;;  %8440 = vcosq.f32 %v1579_v44  ;;  %v10345_v35 = vmul.u32.u64.low %v1747_v63, %v1742_v40  ;;  %v10346_v62 = vmul.u32.u64.high %v1747_v63, %v1742_v40, %v10345_v35 }
 0x202   : > { %v1746_v5 = vsel %vm1732_vm14, %v1743_v13, %v1745_v3  ;;  %8442 = vsinq.f32 %v1579_v44  ;;  %v10350_v48 = vand.u32 3, %v10261_v56  ;;  %vm1597_vm2 = vcmp.lt.s32.totalorder %v14523_v33, 0 }
 0x203   : > { %v1663_v18 = vclz %v8018_v58  ;;  %v10354_v20 = vadd.s32 1, %v10101_v30  ;;  %v1682_v39 = vsel %vm1597_vm2, %v1681_v15, %v1657_v54  ;;  %v10362_v43 = vadd.s32 1, %v10104_v52  ;;  %v14546_v58 = vld [vmem:[#allocation50_spill] sm:$0xff] }
 0x204   : > { %v10358_v29 = vmul.u32.u64.low %v1747_v63, %v1746_v5  ;;  %v10359_v28 = vmul.u32.u64.high %v1747_v63, %v1746_v5, %v10358_v29  ;;  %v14539_v44 = vand.u32 2139095040, %v9855_v51  ;;  %v1738_v23 = vsel %vm1732_vm14, %v1735_v37, %v1737_v21 }
 0x205   : > { %v8019_v56 = vadd.s32 4294967294, %v1663_v18  ;;  %v14540_v30 = vand.u32 2139095040, %v9861_v57  ;;  %v14541_v54 = vand.u32 2147483647, %v14523_v33  ;;  %v1757_v52 = vadd.s32 1, %v10346_v62 }
 0x206   : > { %v10366_v46 = vshrl.u32 %v14539_v44, 23  ;;  %v14172_v40 = vand.u32 2147483647, %v14544_v34  ;;  %vm1587_vm10 = vcmp.eq.s32.totalorder %v10350_v48, 0  ;;  %vm1590_vm6 = vcmp.eq.s32.totalorder %v10350_v48, 2 }
 0x207   : > { %v10372_v13 = vshrl.u32 %v14540_v30, 23  ;;  %vm10376_vm5 = vcmp.le.f32.partialorder %v14541_v54, 0.7853982  ;;  %vm8020_vm11 = vcmp.lt.s32.totalorder %v8019_v56, 0  ;;  %vm1586_vm14 = vcmp.lt.s32.totalorder %v10350_v48, 2 }
 0x208   : > { %v10386_v47 = vsel %vm10376_vm5, 0, %v1682_v39  ;;  %v1666_v37 = vsel %vm8020_vm11, 0, %v8019_v56  ;;  %v1754_v60 = vmul.u32 %v1747_v63, %v1738_v23  ;;  %vm1756_vm3 = vc.u32 %v10359_v28, %v10345_v35  ;;  %v14547_v56 = vld [vmem:[#allocation40_spill] sm:$0xff] }
 0x209   : > { %14545 = vst [vmem:[#allocation42_spill] sm:$0xff] %v10386_v47  ;;  %v1821_v21 = vshrl.u32 %v14442_v22, %v14546_v58  ;;  %vm1583_vm15 = vweird.f32 %v14513_v26  ;;  %v1651_v3 = vadd.s32 %v10237_v16, %v10235_v1  ;;  %v1667_v5 = vsub.s32 32, %v1666_v37 }
 0x20a   : > { %v1671_v18 = vsub.s32 4294967266, %v1666_v37  ;;  %v1758_v39 = vsel %vm1756_vm3, %v1757_v52, %v10346_v62  ;;  %v1688_v29 = vadd.s32 3, %v10386_v47  ;;  %v10400_v63 = vand.u32 8388607, %v14172_v40 }
 0x20b   : > { %v1759_v44 = vadd.s32 %v1758_v39, %v1754_v60  ;;  %v1820_v23 = vshll.u32 %v14452_v61, %v14547_v56  ;;  %v1668_v30 = vshll.u32 %v10318_v55, %v1666_v37  ;;  %v1669_v54 = vshrl.u32 %v1651_v3, %v1667_v5  ;;  %v10407_v16 = vpop.eup %8440 }
 0x20c   : > { %v1672_v11 = vadd.s32 127, %v1671_v18  ;;  %v1824_v1 = vshrl.u32 %v14443_v27, %v14546_v58  ;;  %14548 = vst [vmem:[#allocation50_spill] sm:$0xff] %v10407_v16  ;;  %v1823_v60 = vshll.u32 %v14442_v22, %v14547_v56  ;;  %v1827_v39 = vshrl.u32 %v14454_v49, %v14546_v58  ;;  %v10413_v40 = vpop.eup %8442 }
 0x20d   : > { %v1760_v62 = vadd.s32 536870912, %v1759_v44  ;;  %v1822_v52 = vor.u32 %v1821_v21, %v1820_v23  ;;  %14549 = vst [vmem:[#allocation40_spill] sm:$0xff] %v10413_v40  ;;  %v14181_v42 = vxor.u32 2147483648, %v10407_v16  ;;  %v1670_v55 = vor.u32 %v1669_v54, %v1668_v30 }
 0x20e   : > { %v1673_v37 = vshll.u32 %v1672_v11, 23  ;;  %v1830_v3 = vshrl.u32 %v14445_v6, %v14546_v58  ;;  %vm1701_vm11 = vcmp.lt.s32.totalorder %v14533_v32, 0  ;;  %v1826_v18 = vshll.u32 %v14443_v27, %v14547_v56 }
 0x20f   : > { %v1761_v21 = vshrl.u32 %v1760_v62, 30  ;;  %v1833_v23 = vshrl.u32 %v14455_v36, %v14546_v58  ;;  %v1592_v11 = vsel %vm1590_vm6, %v14181_v42, %v10413_v40  ;;  %v1825_v54 = vor.u32 %v1824_v1, %v1823_v60 }
 0x210   : > { %v1674_v30 = vor.u32 4788187, %v1673_v37  ;;  %v1829_v5 = vshll.u32 %v14454_v49, %v14547_v56  ;;  %v14550_v31 = vxor.u32 2147483648, %v10413_v40  ;;  %v1828_v47 = vor.u32 %v1827_v39, %v1826_v18 }
 0x211   : > { %v1762_v0 = vshll.u32 %v1761_v21, 30  ;;  %v1832_v50 = vshll.u32 %v14445_v6, %v14547_v56  ;;  %v1677_v37 = vcvt.s32.f32 %v1670_v55  ;;  %v10442_v57 = vand.u32 3, %v1688_v29 }
 0x212   : > { %v1589_v62 = vsel %vm1587_vm10, %v10407_v16, %v14550_v31  ;;  %v1675_v42 = vand.u32 2147483647, %v1674_v30  ;;  %v1831_v1 = vor.u32 %v1830_v3, %v1829_v5  ;;  %v14551_v40 = vand.u32 2147483647, %v14533_v32  ;;  %v14554_v3 = vld [vmem:[#allocation46_spill] sm:$0xff] }
 0x213   : > { %v1593_v19 = vsel %vm1586_vm14, %v1589_v62, %v1592_v11  ;;  %v10450_v39 = vsub.s32 %v1759_v44, %v1762_v0  ;;  %v1834_v56 = vor.u32 %v1833_v23, %v1832_v50  ;;  %v1785_v18 = vsub.s32 4, %v1761_v21 }
 0x214   : > { %v1594_v60 = vsel %vm1583_vm15, nan, %v1593_v19  ;;  %vm10446_vm6 = vcmp.le.f32.partialorder %v14551_v40, 0.7853982  ;;  %v1678_v48 = vmul.f32 %v1677_v37, %v1675_v42  ;;  %v1811_v55 = vor.u32 8388608, %v10400_v63 }
 0x215   : > { %7363 = vrot.lane.b32.xlu1 %v1594_v60, %s8600_s22  ;;  %v1819_v19 = vshrl.u32 %v14452_v61, %v14546_v58  ;;  %v1765_v29 = vsub.s32 0, %v10450_v39  ;;  %vm1835_vm10 = vcmp.lt.s32.totalorder %v14554_v3, 1  ;;  %vm1837_vm14 = vcmp.lt.s32.totalorder %v14554_v3, 3 }
 0x216   : > { %vm1838_vm3 = vcmp.lt.s32.totalorder %v14554_v3, 4  ;;  %v1679_v0 = vxor.u32 2147483648, %v1678_v48  ;;  %v1843_v50 = vsel %vm1835_vm10, %v1822_v52, %v1825_v54  ;;  %v1847_v58 = vsel %vm1835_vm10, %v1825_v54, %v1828_v47 }
 0x217   : > { %v1840_v40 = vsel %vm1838_vm3, %v1828_v47, 2102212464  ;;  %v1844_v42 = vsel %vm1838_vm3, %v1831_v1, 920167782  ;;  %v8022_v44 = vmin.u32 %v1765_v29, %v10450_v39  ;;  %v1848_v5 = vsel %vm1838_vm3, %v1834_v56, 1326507024 }
 0x218   : > { %v1845_v63 = vsel %vm1837_vm14, %v1828_v47, %v1844_v42  ;;  %v1680_v23 = vsel %vm1597_vm2, %v1679_v0, %v1678_v48  ;;  %v1786_v11 = vsel %vm1701_vm11, %v1785_v18, %v1761_v21  ;;  %vm1836_vm8 = vcmp.lt.s32.totalorder %v14554_v3, 2 }
 0x219   : > { %v1849_v30 = vsel %vm1837_vm14, %v1831_v1, %v1848_v5  ;;  %v1683_v62 = vsel %vm10376_vm5, %v14523_v33, %v1680_v23  ;;  %v1767_v37 = vclz %v8022_v44  ;;  %v1846_v47 = vsel %vm1836_vm8, %v1843_v50, %v1845_v63  ;;  %v14557_v63 = vld [vmem:[#allocation54_spill] sm:$0xff] }
 0x21a   : > { %v1851_v60 = vshll.u32 %v1811_v55, 8  ;;  %8444 = vcosq.f32 %v1683_v62  ;;  %v1839_v56 = vsel %vm1835_vm10, %v1819_v19, %v1822_v52  ;;  %v1841_v21 = vsel %vm1837_vm14, %v1825_v54, %v1840_v40  ;;  %v14556_v52 = vld [vmem:[#allocation20_spill] sm:$0xff] }
 0x21b   : > { %v1850_v48 = vsel %vm1836_vm8, %v1847_v58, %v1849_v30  ;;  %8446 = vsinq.f32 %v1683_v62  ;;  %v8023_v1 = vadd.s32 4294967294, %v1767_v37  ;;  %v10490_v29 = vsel %vm10446_vm6, 0, %v1786_v11  ;;  %v14558_v37 = vld [vmem:[#allocation43_spill] sm:$0xff] }
 0x21c   : > { %v10485_v18 = vmul.u32.u64.low %v1851_v60, %v1850_v48  ;;  %v10486_v15 = vmul.u32.u64.high %v1851_v60, %v1850_v48, %v10485_v18  ;;  %14555 = vst [vmem:[#allocation46_spill] sm:$0xff] %v10490_v29  ;;  %v10492_v55 = vmul.u32.u64.low %v1851_v60, %v1846_v47  ;;  %v10493_v0 = vmul.u32.u64.high %v1851_v60, %v1846_v47, %v10492_v55 }
 0x21d   : > { %v14187_v19 = vand.u32 2147483647, %v14556_v52  ;;  %v10498_v54 = vsub.s32 32, %v10245_v45  ;;  %v10501_v40 = vsub.s32 32, %v10253_v24  ;;  %vm8024_vm2 = vcmp.lt.s32.totalorder %v8023_v1, 0 }
 0x21e   : > { %v1842_v50 = vsel %vm1836_vm8, %v1839_v56, %v1841_v21  ;;  %vm1694_vm5 = vcmp.eq.s32.totalorder %v10442_v57, 2  ;;  %v1770_v42 = vsel %vm8024_vm2, 0, %v8023_v1  ;;  %v1925_v58 = vshrl.u32 %v14442_v22, %v14557_v63 }
 0x21f   : > { %v10508_v44 = vand.u32 8388607, %v14187_v19  ;;  %vm1691_vm10 = vcmp.eq.s32.totalorder %v10442_v57, 0  ;;  %v1755_v5 = vadd.s32 %v10345_v35, %v10359_v28  ;;  %v1771_v23 = vsub.s32 32, %v1770_v42 }
 0x220   : > { %v1775_v11 = vsub.s32 4294967266, %v1770_v42  ;;  %v1792_v3 = vadd.s32 3, %v10490_v29  ;;  %vm1690_vm8 = vcmp.lt.s32.totalorder %v10442_v57, 2  ;;  %v1858_v30 = vmul.u32 %v1851_v60, %v1842_v50 }
 0x221   : > { %vm1860_vm14 = vc.u32 %v10486_v15, %v10492_v55  ;;  %v1861_v62 = vadd.s32 1, %v10493_v0  ;;  %v1924_v47 = vshll.u32 %v14452_v61, %v14558_v37  ;;  %vm14211_vm3 = vweird.f32 %v14523_v33 }
 0x222   : > { %v1772_v56 = vshll.u32 %v10450_v39, %v1770_v42  ;;  %v1773_v35 = vshrl.u32 %v1755_v5, %v1771_v23  ;;  %v1776_v28 = vadd.s32 127, %v1775_v11  ;;  %v1923_v21 = vshrl.u32 %v14452_v61, %v14557_v63 }
 0x223   : > { %v1862_v48 = vsel %vm1860_vm14, %v1861_v62, %v10493_v0  ;;  %v1915_v60 = vor.u32 8388608, %v10508_v44  ;;  %v1926_v1 = vor.u32 %v1925_v58, %v1924_v47  ;;  %v1928_v18 = vshrl.u32 %v14443_v27, %v14557_v63 }
 0x224   : > { %v1774_v50 = vor.u32 %v1773_v35, %v1772_v56  ;;  %v1777_v19 = vshll.u32 %v1776_v28, 23  ;;  %v1863_v26 = vadd.s32 %v1862_v48, %v1858_v30  ;;  %v1927_v29 = vshll.u32 %v14442_v22, %v14558_v37  ;;  %v10532_v39 = vpop.eup %8444 }
 0x225   : > { %14559 = vst [vmem:[#allocation54_spill] sm:$0xff] %v10532_v39  ;;  %v1931_v42 = vshrl.u32 %v14454_v49, %v14557_v63  ;;  %v1933_v0 = vshll.u32 %v14454_v49, %v14558_v37  ;;  %v1934_v44 = vshrl.u32 %v14445_v6, %v14557_v63  ;;  %v1937_v58 = vshrl.u32 %v14455_v36, %v14557_v63  ;;  %v10542_v5 = vpop.eup %8446 }
 0x226   : > { %14560 = vst [vmem:[#allocation43_spill] sm:$0xff] %v10542_v5  ;;  %v14195_v23 = vxor.u32 2147483648, %v10532_v39  ;;  %v1778_v11 = vor.u32 4788187, %v1777_v19  ;;  %vm1805_vm2 = vcmp.lt.s32.totalorder %v14544_v34, 0  ;;  %v1864_v30 = vadd.s32 536870912, %v1863_v26 }
 0x227   : > { %v1930_v62 = vshll.u32 %v14443_v27, %v14558_v37  ;;  %v14196_v47 = vxor.u32 2147483648, %v10542_v5  ;;  %v1929_v56 = vor.u32 %v1928_v18, %v1927_v29  ;;  %v1935_v35 = vor.u32 %v1934_v44, %v1933_v0 }
 0x228   : > { %v1936_v28 = vshll.u32 %v14445_v6, %v14558_v37  ;;  %v1696_v63 = vsel %vm1694_vm5, %v14195_v23, %v10542_v5  ;;  %v1779_v19 = vand.u32 2147483647, %v1778_v11  ;;  %v1781_v48 = vcvt.s32.f32 %v1774_v50  ;;  %v14561_v37 = vld [vmem:[#allocation52_spill] sm:$0xff] }
 0x229   : > { %v1865_v16 = vshrl.u32 %v1864_v30, 30  ;;  %vm3166_vm14 = vcmp.gt.s32.totalorder %v10354_v20, 0  ;;  %v1693_v29 = vsel %vm1691_vm10, %v10532_v39, %v14196_v47  ;;  %v1932_v18 = vor.u32 %v1931_v42, %v1930_v62 }
 0x22a   : > { %v1938_v0 = vor.u32 %v1937_v58, %v1936_v28  ;;  %vm1939_vm12 = vcmp.lt.s32.totalorder %v14561_v37, 1  ;;  %v1697_v44 = vsel %vm1690_vm8, %v1693_v29, %v1696_v63  ;;  %v1782_v51 = vmul.f32 %v1781_v48, %v1779_v19 }
 0x22b   : > { %v1866_v23 = vshll.u32 %v1865_v16, 30  ;;  %vm1942_vm5 = vcmp.lt.s32.totalorder %v14561_v37, 4  ;;  %v1698_v50 = vsel %vm14211_vm3, nan, %v1697_v44  ;;  %v1889_v11 = vsub.s32 4, %v1865_v16 }
 0x22c   : > { %v1947_v30 = vsel %vm1939_vm12, %v1926_v1, %v1929_v56  ;;  %v1948_v42 = vsel %vm1942_vm5, %v1935_v35, 920167782  ;;  %7365 = vrot.lane.b32.xlu0 %v1698_v50, %s8600_s22  ;;  %v1783_v58 = vxor.u32 2147483648, %v1782_v51  ;;  %v10573_v62 = vand.u32 3, %v1792_v3 }
 0x22d   : > { %v10575_v57 = vsub.s32 %v1863_v26, %v1866_v23  ;;  %vm1941_vm10 = vcmp.lt.s32.totalorder %v14561_v37, 3  ;;  %vm1940_vm8 = vcmp.lt.s32.totalorder %v14561_v37, 2  ;;  %v1943_v28 = vsel %vm1939_vm12, %v1923_v21, %v1926_v1 }
 0x22e   : > { %v1944_v63 = vsel %vm1942_vm5, %v1932_v18, 2102212464  ;;  %v1949_v19 = vsel %vm1941_vm10, %v1932_v18, %v1948_v42  ;;  %v1784_v48 = vsel %vm1701_vm11, %v1783_v58, %v1782_v51  ;;  %v1951_v23 = vsel %vm1939_vm12, %v1929_v56, %v1932_v18 }
 0x22f   : > { %v1869_v3 = vsub.s32 0, %v10575_v57  ;;  %v1950_v26 = vsel %vm1940_vm8, %v1947_v30, %v1949_v19  ;;  %v1787_v21 = vsel %vm10446_vm6, %v14533_v32, %v1784_v48  ;;  %v1890_v1 = vsel %vm1805_vm2, %v1889_v11, %v1865_v16  ;;  %v14562_v16 = vld [vmem:[#allocation14_spill] sm:$0xff] }
 0x230   : > { %v1952_v29 = vsel %vm1942_vm5, %v1938_v0, 1326507024  ;;  %v1955_v44 = vshll.u32 %v1915_v60, 8  ;;  %8448 = vcosq.f32 %v1787_v21  ;;  %v1945_v50 = vsel %vm1941_vm10, %v1929_v56, %v1944_v63  ;;  %v14564_v0 = vld [vmem:[#allocation12_spill] sm:$0xff] }
 0x231   : > { %v8026_v51 = vmin.u32 %v1869_v3, %v10575_v57  ;;  %v1953_v18 = vsel %vm1941_vm10, %v1935_v35, %v1952_v29  ;;  %8450 = vsinq.f32 %v1787_v21  ;;  %v10612_v60 = vadd.f32 %v9987_v25, %v14562_v16  ;;  %v14571_v29 = vld [vmem:[#allocation44_spill] sm:$0xff] }
 0x232   : > { %v1954_v31 = vsel %vm1940_vm8, %v1951_v23, %v1953_v18  ;;  %v10606_v30 = vmul.u32.u64.low %v1955_v44, %v1950_v26  ;;  %v10607_v42 = vmul.u32.u64.high %v1955_v44, %v1950_v26, %v10606_v30  ;;  %v10616_v11 = vadd.f32 %v9990_v10, %v14564_v0 }
 0x233   : > { %14563 = vst [vmem:[#allocation52_spill] sm:$0xff] %v10612_v60  ;;  %v14566_v56 = vand.u32 2147483647, %v14544_v34  ;;  %v1871_v58 = vclz %v8026_v51  ;;  %v1946_v19 = vsel %vm1940_vm8, %v1943_v28, %v1945_v50  ;;  %v10636_v10 = vsel %vm3166_vm14, %v10354_v20, 0  ;;  %v14570_v28 = vld [vmem:[#allocation21_spill] sm:$0xff]  ;;  %v14572_v50 = vld [vmem:[#allocation55_spill] sm:$0xff] }
 0x234   : > { %14565 = vst [vmem:[#allocation14_spill] sm:$0xff] %v10616_v11  ;;  %v10630_v25 = vmul.u32.u64.low %v1955_v44, %v1954_v31  ;;  %v10631_v48 = vmul.u32.u64.high %v1955_v44, %v1954_v31, %v10630_v25  ;;  %v10639_v3 = vadd.s32 4294967169, %v10366_v46  ;;  %v10642_v26 = vadd.s32 4294967169, %v10372_v13 }
 0x235   : > { %vm10620_vm12 = vcmp.le.f32.partialorder %v14566_v56, 0.7853982  ;;  %v8027_v23 = vadd.s32 4294967294, %v1871_v58  ;;  %vm1795_vm11 = vcmp.eq.s32.totalorder %v10573_v62, 0  ;;  %vm1798_vm6 = vcmp.eq.s32.totalorder %v10573_v62, 2 }
 0x236   : > { %v10626_v63 = vsel %vm10620_vm12, 0, %v1890_v1  ;;  %v1965_v37 = vadd.s32 1, %v10607_v42  ;;  %v14197_v21 = vand.u32 2147483647, %v14570_v28  ;;  %vm1794_vm5 = vcmp.lt.s32.totalorder %v10573_v62, 2 }
 0x237   : > { %14569 = vst [vmem:[#allocation12_spill] sm:$0xff] %v10626_v63  ;;  %v1859_v20 = vadd.s32 %v10492_v55, %v10486_v15  ;;  %vm8028_vm14 = vcmp.lt.s32.totalorder %v8027_v23, 0  ;;  %v1896_v46 = vadd.s32 3, %v10626_v63  ;;  %v1962_v1 = vmul.u32 %v1955_v44, %v1946_v19 }
 0x238   : > { %vm14210_vm10 = vweird.f32 %v14533_v32  ;;  %v1874_v13 = vsel %vm8028_vm14, 0, %v8027_v23  ;;  %vm1964_vm8 = vc.u32 %v10631_v48, %v10606_v30  ;;  %v2028_v51 = vshll.u32 %v14452_v61, %v14571_v29 }
 0x239   : > { %v2029_v18 = vshrl.u32 %v14442_v22, %v14572_v50  ;;  %v1875_v31 = vsub.s32 32, %v1874_v13  ;;  %v1879_v16 = vsub.s32 4294967266, %v1874_v13  ;;  %v1966_v15 = vsel %vm1964_vm8, %v1965_v37, %v10607_v42 }
 0x23a   : > { %v2032_v55 = vshrl.u32 %v14443_v27, %v14572_v50  ;;  %v1967_v44 = vadd.s32 %v1966_v15, %v1962_v1  ;;  %v2018_v0 = vand.u32 8388607, %v14197_v21  ;;  %v2031_v56 = vshll.u32 %v14442_v22, %v14571_v29  ;;  %v10668_v19 = vpop.eup %8448 }
 0x23b   : > { %v2034_v58 = vshll.u32 %v14443_v27, %v14571_v29  ;;  %14573 = vst [vmem:[#allocation44_spill] sm:$0xff] %v10668_v19  ;;  %v1876_v25 = vshll.u32 %v10575_v57, %v1874_v13  ;;  %v1877_v23 = vshrl.u32 %v1859_v20, %v1875_v31  ;;  %v1880_v47 = vadd.s32 127, %v1879_v16  ;;  %v10674_v37 = vpop.eup %8450 }
 0x23c   : > { %vm1909_vm14 = vcmp.lt.s32.totalorder %v14556_v52, 0  ;;  %v2035_v42 = vshrl.u32 %v14454_v49, %v14572_v50  ;;  %14574 = vst [vmem:[#allocation55_spill] sm:$0xff] %v10674_v37  ;;  %v14202_v1 = vxor.u32 2147483648, %v10668_v19  ;;  %v1968_v15 = vadd.s32 536870912, %v1967_v44 }
 0x23d   : > { %v2030_v21 = vor.u32 %v2029_v18, %v2028_v51  ;;  %v2038_v33 = vshrl.u32 %v14445_v6, %v14572_v50  ;;  %v14207_v63 = vxor.u32 2147483648, %v10674_v37  ;;  %v1878_v39 = vor.u32 %v1877_v23, %v1876_v25 }
 0x23e   : > { %v1881_v57 = vshll.u32 %v1880_v47, 23  ;;  %v2033_v20 = vor.u32 %v2032_v55, %v2031_v56  ;;  %v1800_v13 = vsel %vm1798_vm6, %v14202_v1, %v10674_v37  ;;  %v1969_v31 = vshrl.u32 %v1968_v15, 30 }
 0x23f   : > { %v2037_v16 = vshll.u32 %v14454_v49, %v14571_v29  ;;  %v2041_v51 = vshrl.u32 %v14455_v36, %v14572_v50  ;;  %v1797_v47 = vsel %vm1795_vm11, %v10668_v19, %v14207_v63  ;;  %v14575_v55 = vand.u32 2147483647, %v14556_v52 }
 0x240   : > { %v1882_v18 = vor.u32 4788187, %v1881_v57  ;;  %v2036_v25 = vor.u32 %v2035_v42, %v2034_v58  ;;  %v2040_v23 = vshll.u32 %v14445_v6, %v14571_v29  ;;  %vm3270_vm6 = vcmp.gt.s32.totalorder %v10362_v43, 0 }
 0x241   : > { %vm10696_vm8 = vcmp.le.f32.partialorder %v14575_v55, 0.7853982  ;;  %v1801_v15 = vsel %vm1794_vm5, %v1797_v47, %v1800_v13  ;;  %v1970_v1 = vshll.u32 %v1969_v31, 30  ;;  %v1993_v37 = vsub.s32 4, %v1969_v31  ;;  %v14578_v47 = vld [vmem:[#allocation53_spill] sm:$0xff] }
 0x242   : > { %v2039_v5 = vor.u32 %v2038_v33, %v2037_v16  ;;  %v1802_v57 = vsel %vm14210_vm10, nan, %v1801_v15  ;;  %v1883_v63 = vand.u32 2147483647, %v1882_v18  ;;  %v1885_v55 = vcvt.s32.f32 %v1878_v39 }
 0x243   : > { %v2042_v19 = vor.u32 %v2041_v51, %v2040_v23  ;;  %7367 = vrot.lane.b32.xlu1 %v1802_v57, %s8600_s22  ;;  %v10708_v58 = vand.u32 3, %v1896_v46  ;;  %v10710_v42 = vsub.s32 %v1967_v44, %v1970_v1  ;;  %v2019_v29 = vor.u32 8388608, %v2018_v0 }
 0x244   : > { %v2027_v62 = vshrl.u32 %v14452_v61, %v14572_v50  ;;  %v1886_v13 = vmul.f32 %v1885_v55, %v1883_v63  ;;  %vm2043_vm11 = vcmp.lt.s32.totalorder %v14578_v47, 1  ;;  %vm2045_vm5 = vcmp.lt.s32.totalorder %v14578_v47, 3 }
 0x245   : > { %vm2046_vm10 = vcmp.lt.s32.totalorder %v14578_v47, 4  ;;  %v1973_v33 = vsub.s32 0, %v10710_v42  ;;  %v1994_v39 = vsel %vm1909_vm14, %v1993_v37, %v1969_v31  ;;  %v2051_v46 = vsel %vm2043_vm11, %v2030_v21, %v2033_v20 }
 0x246   : > { %v2052_v44 = vsel %vm2046_vm10, %v2039_v5, 920167782  ;;  %v1887_v0 = vxor.u32 2147483648, %v1886_v13  ;;  %v2055_v63 = vsel %vm2043_vm11, %v2033_v20, %v2036_v25  ;;  %v2056_v1 = vsel %vm2046_vm10, %v2042_v19, 1326507024 }
 0x247   : > { %v2053_v50 = vsel %vm2045_vm5, %v2036_v25, %v2052_v44  ;;  %v8030_v16 = vmin.u32 %v1973_v33, %v10710_v42  ;;  %vm2044_vm3 = vcmp.lt.s32.totalorder %v14578_v47, 2  ;;  %v2048_v51 = vsel %vm2046_vm10, %v2036_v25, 2102212464  ;;  %v14580_v44 = vld [vmem:[#allocation22_spill] sm:$0xff]  ;;  %v14583_v47 = vld [vmem:[#allocation57_spill] sm:$0xff] }
 0x248   : > { %v2057_v37 = vsel %vm2045_vm5, %v2039_v5, %v2056_v1  ;;  %v1888_v31 = vsel %vm1805_vm2, %v1887_v0, %v1886_v13  ;;  %v2054_v18 = vsel %vm2044_vm3, %v2051_v46, %v2053_v50  ;;  %v2059_v15 = vshll.u32 %v2019_v29, 8 }
 0x249   : > { %v2058_v23 = vsel %vm2044_vm3, %v2055_v63, %v2057_v37  ;;  %v1891_v19 = vsel %vm10620_vm12, %v14544_v34, %v1888_v31  ;;  %v1975_v57 = vclz %v8030_v16  ;;  %v10741_v25 = vsel %vm10696_vm8, 0, %v1994_v39 }
 0x24a   : > { %14579 = vst [vmem:[#allocation53_spill] sm:$0xff] %v10741_v25  ;;  %v2047_v5 = vsel %vm2043_vm11, %v2027_v62, %v2030_v21  ;;  %8452 = vcosq.f32 %v1891_v19  ;;  %v2049_v55 = vsel %vm2045_vm5, %v2033_v20, %v2048_v51  ;;  %v10757_v39 = vsel %vm3270_vm6, %v10362_v43, 0 }
 0x24b   : > { %v10747_v13 = vmul.u32.u64.low %v2059_v15, %v2058_v23  ;;  %v10748_v33 = vmul.u32.u64.high %v2059_v15, %v2058_v23, %v10747_v13  ;;  %8454 = vsinq.f32 %v1891_v19  ;;  %v8031_v29 = vadd.s32 4294967294, %v1975_v57  ;;  %v14584_v23 = vld [vmem:[#allocation47_spill] sm:$0xff] }
 0x24c   : > { %v10750_v46 = vmul.u32.u64.low %v2059_v15, %v2054_v18  ;;  %v10751_v35 = vmul.u32.u64.high %v2059_v15, %v2054_v18, %v10750_v46  ;;  %v14212_v20 = vand.u32 2147483647, %v14580_v44  ;;  %v10763_v0 = vshrl.u32 %v10636_v10, 5 }
 0x24d   : > { %v10766_v50 = vand.u32 31, %v10636_v10  ;;  %vm8032_vm2 = vcmp.lt.s32.totalorder %v8031_v29, 0  ;;  %v2050_v63 = vsel %vm2044_vm3, %v2047_v5, %v2049_v55  ;;  %vm1902_vm12 = vcmp.eq.s32.totalorder %v10708_v58, 2 }
 0x24e   : > { %14581 = vst [vmem:[#allocation87_spill] sm:$0xff] %v10763_v0  ;;  %v1963_v43 = vadd.s32 %v10606_v30, %v10631_v48  ;;  %v1978_v1 = vsel %vm8032_vm2, 0, %v8031_v29  ;;  %v10774_v16 = vadd.s32 3, %v10741_v25  ;;  %vm2068_vm10 = vc.u32 %v10748_v33, %v10750_v46 }
 0x24f   : > { %14582 = vst [vmem:[#allocation88_spill] sm:$0xff] %v10766_v50  ;;  %vm1899_vm6 = vcmp.eq.s32.totalorder %v10708_v58, 0  ;;  %v1979_v10 = vsub.s32 32, %v1978_v1  ;;  %v1983_v51 = vsub.s32 4294967266, %v1978_v1  ;;  %v2069_v37 = vadd.s32 1, %v10751_v35 }
 0x250   : > { %v2133_v31 = vshrl.u32 %v14442_v22, %v14583_v47  ;;  %vm1898_vm3 = vcmp.lt.s32.totalorder %v10708_v58, 2  ;;  %v1980_v30 = vshll.u32 %v10710_v42, %v1978_v1  ;;  %v2066_v48 = vmul.u32 %v2059_v15, %v2050_v63 }
 0x251   : > { %v2122_v18 = vand.u32 8388607, %v14212_v20  ;;  %v2132_v19 = vshll.u32 %v14452_v61, %v14584_v23  ;;  %vm14231_vm11 = vweird.f32 %v14544_v34  ;;  %v1981_v57 = vshrl.u32 %v1963_v43, %v1979_v10 }
 0x252   : > { %v1984_v5 = vadd.s32 127, %v1983_v51  ;;  %v2070_v55 = vsel %vm2068_vm10, %v2069_v37, %v10751_v35  ;;  %v2136_v13 = vshrl.u32 %v14443_v27, %v14583_v47  ;;  %v2131_v42 = vshrl.u32 %v14452_v61, %v14583_v47 }
 0x253   : > { %v2071_v29 = vadd.s32 %v2070_v55, %v2066_v48  ;;  %v2135_v15 = vshll.u32 %v14442_v22, %v14584_v23  ;;  %v2139_v63 = vshrl.u32 %v14454_v49, %v14583_v47  ;;  %v1982_v1 = vor.u32 %v1981_v57, %v1980_v30 }
 0x254   : > { %v1985_v62 = vshll.u32 %v1984_v5, 23  ;;  %v2134_v21 = vor.u32 %v2133_v31, %v2132_v19  ;;  %v2142_v43 = vshrl.u32 %v14445_v6, %v14583_v47  ;;  %v10800_v35 = vpop.eup %8452  ;;  %v2123_v51 = vor.u32 8388608, %v2122_v18 }
 0x255   : > { %14585 = vst [vmem:[#allocation57_spill] sm:$0xff] %v10800_v35  ;;  %v2072_v10 = vadd.s32 536870912, %v2071_v29  ;;  %v2138_v37 = vshll.u32 %v14443_v27, %v14584_v23  ;;  %v2145_v48 = vshrl.u32 %v14455_v36, %v14583_v47  ;;  %v10806_v55 = vpop.eup %8454  ;;  %v14217_v20 = vxor.u32 2147483648, %v10800_v35 }
 0x256   : > { %14586 = vst [vmem:[#allocation47_spill] sm:$0xff] %v10806_v55  ;;  %v1986_v30 = vor.u32 4788187, %v1985_v62  ;;  %v2137_v57 = vor.u32 %v2136_v13, %v2135_v15  ;;  %v2141_v31 = vshll.u32 %v14454_v49, %v14584_v23  ;;  %v14218_v19 = vxor.u32 2147483648, %v10806_v55 }
 0x257   : > { %v2073_v5 = vshrl.u32 %v2072_v10, 30  ;;  %v2140_v32 = vor.u32 %v2139_v63, %v2138_v37  ;;  %v2144_v18 = vshll.u32 %v14445_v6, %v14584_v23  ;;  %v1904_v47 = vsel %vm1902_vm12, %v14217_v20, %v10806_v55  ;;  %v14587_v10 = vld [vmem:[#allocation56_spill] sm:$0xff] }
 0x258   : > { %v1987_v25 = vand.u32 2147483647, %v1986_v30  ;;  %v1989_v53 = vcvt.s32.f32 %v1982_v1  ;;  %v2143_v62 = vor.u32 %v2142_v43, %v2141_v31  ;;  %v1901_v13 = vsel %vm1899_vm6, %v10800_v35, %v14218_v19 }
 0x259   : > { %v2074_v15 = vshll.u32 %v2073_v5, 30  ;;  %v2146_v63 = vor.u32 %v2145_v48, %v2144_v18  ;;  %vm2147_vm5 = vcmp.lt.s32.totalorder %v14587_v10, 1  ;;  %v1905_v23 = vsel %vm1898_vm3, %v1901_v13, %v1904_v47 }
 0x25a   : > { %v1990_v37 = vmul.f32 %v1989_v53, %v1987_v25  ;;  %vm2148_vm2 = vcmp.lt.s32.totalorder %v14587_v10, 2  ;;  %vm2149_vm12 = vcmp.lt.s32.totalorder %v14587_v10, 3  ;;  %v1906_v1 = vsel %vm14231_vm11, nan, %v1905_v23 }
 0x25b   : > { %v10831_v43 = vsub.s32 %v2071_v29, %v2074_v15  ;;  %vm2150_vm10 = vcmp.lt.s32.totalorder %v14587_v10, 4  ;;  %v2155_v48 = vsel %vm2147_vm5, %v2134_v21, %v2137_v57  ;;  %7369 = vrot.lane.b32.xlu0 %v1906_v1, %s8600_s22  ;;  %v2097_v58 = vsub.s32 4, %v2073_v5 }
 0x25c   : > { %v1991_v30 = vxor.u32 2147483648, %v1990_v37  ;;  %v2152_v31 = vsel %vm2150_vm10, %v2140_v32, 2102212464  ;;  %v2156_v53 = vsel %vm2150_vm10, %v2143_v62, 920167782  ;;  %v2151_v18 = vsel %vm2147_vm5, %v2131_v42, %v2134_v21 }
 0x25d   : > { %v2077_v25 = vsub.s32 0, %v10831_v43  ;;  %v2157_v29 = vsel %vm2149_vm12, %v2140_v32, %v2156_v53  ;;  %v2159_v47 = vsel %vm2147_vm5, %v2137_v57, %v2140_v32  ;;  %v2160_v23 = vsel %vm2150_vm10, %v2146_v63, 1326507024 }
 0x25e   : > { %v1992_v13 = vsel %vm1909_vm14, %v1991_v30, %v1990_v37  ;;  %v2158_v15 = vsel %vm2148_vm2, %v2155_v48, %v2157_v29  ;;  %v2163_v1 = vshll.u32 %v2123_v51, 8  ;;  %v2153_v42 = vsel %vm2149_vm12, %v2137_v57, %v2152_v31 }
 0x25f   : > { %v1995_v20 = vsel %vm10696_vm8, %v14556_v52, %v1992_v13  ;;  %v8034_v21 = vmin.u32 %v2077_v25, %v10831_v43  ;;  %v2161_v32 = vsel %vm2149_vm12, %v2143_v62, %v2160_v23  ;;  %v10863_v56 = vand.u32 3, %v10774_v16 }
 0x260   : > { %8456 = vcosq.f32 %v1995_v20  ;;  %v2162_v37 = vsel %vm2148_vm2, %v2159_v47, %v2161_v32  ;;  %v10858_v30 = vmul.u32.u64.low %v2163_v1, %v2158_v15  ;;  %v10859_v48 = vmul.u32.u64.high %v2163_v1, %v2158_v15, %v10858_v30 }
 0x261   : > { %8458 = vsinq.f32 %v1995_v20  ;;  %vm2013_vm14 = vcmp.lt.s32.totalorder %v14570_v28, 0  ;;  %v2079_v51 = vclz %v8034_v21  ;;  %v10867_v57 = vshrl.u32 %v10757_v39, 5 }
 0x262   : > { %v2098_v62 = vsel %vm2013_vm14, %v2097_v58, %v2073_v5  ;;  %v10871_v63 = vmul.u32.u64.low %v2163_v1, %v2162_v37  ;;  %v10872_v31 = vmul.u32.u64.high %v2163_v1, %v2162_v37, %v10871_v63  ;;  %v10875_v53 = vand.u32 31, %v10757_v39  ;;  %v14593_v39 = vld [vmem:[#allocation23_spill] sm:$0xff] }
 0x263   : > { %14588 = vst [vmem:[#allocation56_spill] sm:$0xff] %v10867_v57  ;;  %v10878_v20 = vadd.s32 1, %v10639_v3  ;;  %v8035_v16 = vadd.s32 4294967294, %v2079_v51  ;;  %v2154_v25 = vsel %vm2148_vm2, %v2151_v18, %v2153_v42  ;;  %v10883_v29 = vadd.s32 1, %v10642_v26  ;;  %v14595_v18 = vld [vmem:[#allocation59_spill] sm:$0xff] }
 0x264   : > { %14589 = vst [vmem:[#allocation89_spill] sm:$0xff] %v10875_v53  ;;  %v14590_v47 = vand.u32 2147483647, %v14570_v28  ;;  %v2173_v58 = vadd.s32 1, %v10859_v48  ;;  %v14219_v13 = vand.u32 2147483647, %v14593_v39  ;;  %v2170_v10 = vmul.u32 %v2163_v1, %v2154_v25 }
 0x265   : > { %vm2003_vm6 = vcmp.eq.s32.totalorder %v10863_v56, 0  ;;  %vm2006_vm3 = vcmp.eq.s32.totalorder %v10863_v56, 2  ;;  %vm8036_vm5 = vcmp.lt.s32.totalorder %v8035_v16, 0  ;;  %vm2002_vm2 = vcmp.lt.s32.totalorder %v10863_v56, 2 }
 0x266   : > { %vm10887_vm8 = vcmp.le.f32.partialorder %v14590_v47, 0.7853982  ;;  %v2082_v26 = vsel %vm8036_vm5, 0, %v8035_v16  ;;  %vm2172_vm12 = vc.u32 %v10872_v31, %v10858_v30  ;;  %v2237_v15 = vshrl.u32 %v14442_v22, %v14595_v18 }
 0x267   : > { %v10897_v3 = vsel %vm10887_vm8, 0, %v2098_v62  ;;  %vm14252_vm10 = vweird.f32 %v14556_v52  ;;  %v2067_v23 = vadd.s32 %v10750_v46, %v10748_v33  ;;  %v2083_v21 = vsub.s32 32, %v2082_v26  ;;  %v14596_v62 = vld [vmem:[#allocation51_spill] sm:$0xff] }
 0x268   : > { %14594 = vst [vmem:[#allocation90_spill] sm:$0xff] %v10897_v3  ;;  %v2087_v42 = vsub.s32 4294967266, %v2082_v26  ;;  %v2174_v32 = vsel %vm2172_vm12, %v2173_v58, %v10859_v48  ;;  %v2104_v37 = vadd.s32 3, %v10897_v3  ;;  %v10911_v1 = vand.u32 8388607, %v14219_v13 }
 0x269   : > { %v2175_v51 = vadd.s32 %v2174_v32, %v2170_v10  ;;  %v2236_v63 = vshll.u32 %v14452_v61, %v14596_v62  ;;  %v2084_v16 = vshll.u32 %v10831_v43, %v2082_v26  ;;  %v2085_v25 = vshrl.u32 %v2067_v23, %v2083_v21 }
 0x26a   : > { %v2088_v47 = vadd.s32 127, %v2087_v42  ;;  %v2240_v33 = vshrl.u32 %v14443_v27, %v14595_v18  ;;  %v10918_v46 = vpop.eup %8456  ;;  %v2239_v10 = vshll.u32 %v14442_v22, %v14596_v62  ;;  %v2243_v32 = vshrl.u32 %v14454_v49, %v14595_v18 }
 0x26b   : > { %14597 = vst [vmem:[#allocation59_spill] sm:$0xff] %v10918_v46  ;;  %v2176_v48 = vadd.s32 536870912, %v2175_v51  ;;  %v2238_v58 = vor.u32 %v2237_v15, %v2236_v63  ;;  %v10924_v19 = vpop.eup %8458  ;;  %v14227_v13 = vxor.u32 2147483648, %v10918_v46  ;;  %v2086_v43 = vor.u32 %v2085_v25, %v2084_v16 }
 0x26c   : > { %14598 = vst [vmem:[#allocation51_spill] sm:$0xff] %v10924_v19  ;;  %v2089_v26 = vshll.u32 %v2088_v47, 23  ;;  %v2246_v23 = vshrl.u32 %v14445_v6, %v14595_v18  ;;  %vm2117_vm5 = vcmp.lt.s32.totalorder %v14580_v44, 0  ;;  %v2242_v42 = vshll.u32 %v14443_v27, %v14596_v62 }
 0x26d   : > { %v2177_v15 = vshrl.u32 %v2176_v48, 30  ;;  %v2249_v63 = vshrl.u32 %v14455_v36, %v14595_v18  ;;  %v2008_v16 = vsel %vm2006_vm3, %v14227_v13, %v10924_v19  ;;  %v2241_v47 = vor.u32 %v2240_v33, %v2239_v10 }
 0x26e   : > { %v2090_v25 = vor.u32 4788187, %v2089_v26  ;;  %v2245_v21 = vshll.u32 %v14454_v49, %v14596_v62  ;;  %v14599_v34 = vxor.u32 2147483648, %v10924_v19  ;;  %v2244_v55 = vor.u32 %v2243_v32, %v2242_v42 }
 0x26f   : > { %v2178_v35 = vshll.u32 %v2177_v15, 30  ;;  %v2248_v3 = vshll.u32 %v14445_v6, %v14596_v62  ;;  %v2093_v26 = vcvt.s32.f32 %v2086_v43  ;;  %v10953_v0 = vand.u32 3, %v2104_v37 }
 0x270   : > { %v2005_v48 = vsel %vm2003_vm6, %v10918_v46, %v14599_v34  ;;  %v2091_v13 = vand.u32 2147483647, %v2090_v25  ;;  %v2247_v33 = vor.u32 %v2246_v23, %v2245_v21  ;;  %v14600_v19 = vand.u32 2147483647, %v14580_v44  ;;  %v14603_v23 = vld [vmem:[#allocation58_spill] sm:$0xff] }
 0x271   : > { %v2009_v57 = vsel %vm2002_vm2, %v2005_v48, %v2008_v16  ;;  %v10961_v32 = vsub.s32 %v2175_v51, %v2178_v35  ;;  %v2250_v62 = vor.u32 %v2249_v63, %v2248_v3  ;;  %v2201_v42 = vsub.s32 4, %v2177_v15 }
 0x272   : > { %v2010_v10 = vsel %vm14252_vm10, nan, %v2009_v57  ;;  %vm10957_vm3 = vcmp.le.f32.partialorder %v14600_v19, 0.7853982  ;;  %v2094_v56 = vmul.f32 %v2093_v26, %v2091_v13  ;;  %v2227_v43 = vor.u32 8388608, %v10911_v1 }
 0x273   : > { %7371 = vrot.lane.b32.xlu1 %v2010_v10, %s8600_s22  ;;  %v2235_v57 = vshrl.u32 %v14452_v61, %v14595_v18  ;;  %v2181_v37 = vsub.s32 0, %v10961_v32  ;;  %vm2251_vm6 = vcmp.lt.s32.totalorder %v14603_v23, 1  ;;  %vm2253_vm2 = vcmp.lt.s32.totalorder %v14603_v23, 3 }
 0x274   : > { %vm2254_vm12 = vcmp.lt.s32.totalorder %v14603_v23, 4  ;;  %v2095_v35 = vxor.u32 2147483648, %v2094_v56  ;;  %v2259_v3 = vsel %vm2251_vm6, %v2238_v58, %v2241_v47  ;;  %v2263_v18 = vsel %vm2251_vm6, %v2241_v47, %v2244_v55 }
 0x275   : > { %v2256_v19 = vsel %vm2254_vm12, %v2244_v55, 2102212464  ;;  %v2260_v13 = vsel %vm2254_vm12, %v2247_v33, 920167782  ;;  %v8038_v51 = vmin.u32 %v2181_v37, %v10961_v32  ;;  %v2264_v21 = vsel %vm2254_vm12, %v2250_v62, 1326507024 }
 0x276   : > { %v2261_v1 = vsel %vm2253_vm2, %v2244_v55, %v2260_v13  ;;  %v2096_v63 = vsel %vm2013_vm14, %v2095_v35, %v2094_v56  ;;  %v2202_v16 = vsel %vm2117_vm5, %v2201_v42, %v2177_v15  ;;  %vm2252_vm11 = vcmp.lt.s32.totalorder %v14603_v23, 2 }
 0x277   : > { %v2265_v25 = vsel %vm2253_vm2, %v2247_v33, %v2264_v21  ;;  %v2099_v48 = vsel %vm10887_vm8, %v14570_v28, %v2096_v63  ;;  %v2183_v26 = vclz %v8038_v51  ;;  %v2262_v55 = vsel %vm2252_vm11, %v2259_v3, %v2261_v1  ;;  %v14608_v21 = vld [vmem:[#allocation64_spill] sm:$0xff] }
 0x278   : > { %v2267_v10 = vshll.u32 %v2227_v43, 8  ;;  %8460 = vcosq.f32 %v2099_v48  ;;  %v2255_v62 = vsel %vm2251_vm6, %v2235_v57, %v2238_v58  ;;  %v2257_v15 = vsel %vm2253_vm2, %v2241_v47, %v2256_v19  ;;  %v14605_v58 = vld [vmem:[#allocation24_spill] sm:$0xff] }
 0x279   : > { %v2266_v56 = vsel %vm2252_vm11, %v2263_v18, %v2265_v25  ;;  %8462 = vsinq.f32 %v2099_v48  ;;  %v8039_v33 = vadd.s32 4294967294, %v2183_v26  ;;  %v11001_v37 = vsel %vm10957_vm3, 0, %v2202_v16 }
 0x27a   : > { %v10996_v42 = vmul.u32.u64.low %v2267_v10, %v2266_v56  ;;  %v10997_v5 = vmul.u32.u64.high %v2267_v10, %v2266_v56, %v10996_v42  ;;  %14604 = vst [vmem:[#allocation58_spill] sm:$0xff] %v11001_v37  ;;  %v11003_v43 = vmul.u32.u64.low %v2267_v10, %v2262_v55  ;;  %v11004_v35 = vmul.u32.u64.high %v2267_v10, %v2262_v55, %v11003_v43 }
 0x27b   : > { %v14232_v57 = vand.u32 2147483647, %v14605_v58  ;;  %v14606_v47 = vand.u32 2139095040, %v10612_v60  ;;  %v14607_v3 = vand.u32 2139095040, %v10616_v11  ;;  %vm8040_vm14 = vcmp.lt.s32.totalorder %v8039_v33, 0 }
 0x27c   : > { %v2258_v51 = vsel %vm2252_vm11, %v2255_v62, %v2257_v15  ;;  %vm2110_vm8 = vcmp.eq.s32.totalorder %v10953_v0, 2  ;;  %v2186_v1 = vsel %vm8040_vm14, 0, %v8039_v33  ;;  %v2341_v63 = vshrl.u32 %v14442_v22, %v14608_v21  ;;  %v14609_v62 = vld [vmem:[#allocation61_spill] sm:$0xff] }
 0x27d   : > { %v11010_v19 = vshrl.u32 %v14606_v47, 23  ;;  %v11014_v13 = vshrl.u32 %v14607_v3, 23  ;;  %v11021_v18 = vand.u32 8388607, %v14232_v57  ;;  %vm2107_vm6 = vcmp.eq.s32.totalorder %v10953_v0, 0 }
 0x27e   : > { %v2171_v16 = vadd.s32 %v10858_v30, %v10872_v31  ;;  %v2187_v25 = vsub.s32 32, %v2186_v1  ;;  %v2191_v48 = vsub.s32 4294967266, %v2186_v1  ;;  %v2208_v23 = vadd.s32 3, %v11001_v37 }
 0x27f   : > { %vm2106_vm11 = vcmp.lt.s32.totalorder %v10953_v0, 2  ;;  %v2274_v26 = vmul.u32 %v2267_v10, %v2258_v51  ;;  %vm2276_vm2 = vc.u32 %v10997_v5, %v11003_v43  ;;  %v2277_v55 = vadd.s32 1, %v11004_v35 }
 0x280   : > { %v2340_v15 = vshll.u32 %v14452_v61, %v14609_v62  ;;  %vm14241_vm12 = vweird.f32 %v14570_v28  ;;  %v2188_v56 = vshll.u32 %v10961_v32, %v2186_v1  ;;  %v2189_v30 = vshrl.u32 %v2171_v16, %v2187_v25 }
 0x281   : > { %v2192_v31 = vadd.s32 127, %v2191_v48  ;;  %v2339_v33 = vshrl.u32 %v14452_v61, %v14608_v21  ;;  %v2278_v42 = vsel %vm2276_vm2, %v2277_v55, %v11004_v35  ;;  %v2331_v10 = vor.u32 8388608, %v11021_v18 }
 0x282   : > { %v2342_v47 = vor.u32 %v2341_v63, %v2340_v15  ;;  %v2344_v3 = vshrl.u32 %v14443_v27, %v14608_v21  ;;  %v2190_v51 = vor.u32 %v2189_v30, %v2188_v56  ;;  %v2279_v52 = vadd.s32 %v2278_v42, %v2274_v26  ;;  %v11045_v32 = vpop.eup %8460 }
 0x283   : > { %v2193_v57 = vshll.u32 %v2192_v31, 23  ;;  %v2343_v46 = vshll.u32 %v14442_v22, %v14609_v62  ;;  %14610 = vst [vmem:[#allocation64_spill] sm:$0xff] %v11045_v32  ;;  %v2347_v1 = vshrl.u32 %v14454_v49, %v14608_v21  ;;  %v2349_v35 = vshll.u32 %v14454_v49, %v14609_v62  ;;  %v11055_v16 = vpop.eup %8462 }
 0x284   : > { %v2350_v18 = vshrl.u32 %v14445_v6, %v14608_v21  ;;  %v2353_v63 = vshrl.u32 %v14455_v36, %v14608_v21  ;;  %14611 = vst [vmem:[#allocation61_spill] sm:$0xff] %v11055_v16  ;;  %v14242_v25 = vxor.u32 2147483648, %v11045_v32  ;;  %vm2221_vm14 = vcmp.lt.s32.totalorder %v14593_v39, 0 }
 0x285   : > { %v2194_v48 = vor.u32 4788187, %v2193_v57  ;;  %v2280_v26 = vadd.s32 536870912, %v2279_v52  ;;  %v2346_v55 = vshll.u32 %v14443_v27, %v14609_v62  ;;  %v14243_v15 = vxor.u32 2147483648, %v11055_v16 }
 0x286   : > { %v2345_v56 = vor.u32 %v2344_v3, %v2343_v46  ;;  %v2351_v30 = vor.u32 %v2350_v18, %v2349_v35  ;;  %v2352_v31 = vshll.u32 %v14445_v6, %v14609_v62  ;;  %v2112_v21 = vsel %vm2110_vm8, %v14242_v25, %v11055_v16  ;;  %v14612_v35 = vld [vmem:[#allocation60_spill] sm:$0xff] }
 0x287   : > { %v2195_v57 = vand.u32 2147483647, %v2194_v48  ;;  %v2197_v42 = vcvt.s32.f32 %v2190_v51  ;;  %v2281_v37 = vshrl.u32 %v2280_v26, 30  ;;  %v2109_v11 = vsel %vm2107_vm6, %v11045_v32, %v14243_v15 }
 0x288   : > { %v2348_v46 = vor.u32 %v2347_v1, %v2346_v55  ;;  %v2354_v3 = vor.u32 %v2353_v63, %v2352_v31  ;;  %vm2355_vm2 = vcmp.lt.s32.totalorder %v14612_v35, 1  ;;  %v2113_v62 = vsel %vm2106_vm11, %v2109_v11, %v2112_v21 }
 0x289   : > { %v2198_v18 = vmul.f32 %v2197_v42, %v2195_v57  ;;  %v2282_v60 = vshll.u32 %v2281_v37, 30  ;;  %vm2358_vm8 = vcmp.lt.s32.totalorder %v14612_v35, 4  ;;  %v2114_v51 = vsel %vm14241_vm12, nan, %v2113_v62 }
 0x28a   : > { %v2305_v48 = vsub.s32 4, %v2281_v37  ;;  %v2363_v26 = vsel %vm2355_vm2, %v2342_v47, %v2345_v56  ;;  %v2364_v1 = vsel %vm2358_vm8, %v2351_v30, 920167782  ;;  %7373 = vrot.lane.b32.xlu0 %v2114_v51, %s8600_s22  ;;  %v11085_v55 = vand.u32 3, %v2208_v23 }
 0x28b   : > { %v2199_v63 = vxor.u32 2147483648, %v2198_v18  ;;  %v11087_v11 = vsub.s32 %v2279_v52, %v2282_v60  ;;  %vm2357_vm6 = vcmp.lt.s32.totalorder %v14612_v35, 3  ;;  %vm2356_vm11 = vcmp.lt.s32.totalorder %v14612_v35, 2 }
 0x28c   : > { %v2359_v0 = vsel %vm2355_vm2, %v2339_v33, %v2342_v47  ;;  %v2360_v31 = vsel %vm2358_vm8, %v2348_v46, 2102212464  ;;  %v2365_v21 = vsel %vm2357_vm6, %v2348_v46, %v2364_v1  ;;  %v2367_v60 = vsel %vm2355_vm2, %v2345_v56, %v2348_v46  ;;  %v589_v1 = vpop.permute.xlu0 %588 }
 0x28d   : > { %v2200_v57 = vsel %vm2117_vm5, %v2199_v63, %v2198_v18  ;;  %v2285_v23 = vsub.s32 0, %v11087_v11  ;;  %v2366_v52 = vsel %vm2356_vm11, %v2363_v26, %v2365_v21  ;;  %v2306_v47 = vsel %vm2221_vm14, %v2305_v48, %v2281_v37  ;;  %v585_v26 = vpop.permute.xlu1 %584 }
 0x28e   : > { %v2203_v33 = vsel %vm10957_vm3, %v14580_v44, %v2200_v57  ;;  %v2368_v42 = vsel %vm2358_vm8, %v2354_v3, 1326507024  ;;  %v2371_v62 = vshll.u32 %v2331_v10, 8  ;;  %v2361_v51 = vsel %vm2357_vm6, %v2345_v56, %v2360_v31 }
 0x28f   : > { %8464 = vcosq.f32 %v2203_v33  ;;  %v8042_v18 = vmin.u32 %v2285_v23, %v11087_v11  ;;  %v2369_v46 = vsel %vm2357_vm6, %v2351_v30, %v2368_v42  ;;  %v11123_v10 = vsub.s32 32, %v10766_v50 }
 0x290   : > { %8466 = vsinq.f32 %v2203_v33  ;;  %v2370_v34 = vsel %vm2356_vm11, %v2367_v60, %v2369_v46  ;;  %v11118_v37 = vmul.u32.u64.low %v2371_v62, %v2366_v52  ;;  %v11119_v48 = vmul.u32.u64.high %v2371_v62, %v2366_v52, %v11118_v37  ;;  %v14619_v46 = vld [vmem:[#allocation63_spill] sm:$0xff] }
 0x291   : > { %v11126_v3 = vsub.s32 32, %v10875_v53  ;;  %v14614_v56 = vand.u32 2147483647, %v14593_v39  ;;  %v2287_v63 = vclz %v8042_v18  ;;  %v2362_v21 = vsel %vm2356_vm11, %v2359_v0, %v2361_v51  ;;  %v14618_v0 = vld [vmem:[#allocation25_spill] sm:$0xff] }
 0x292   : > { %v11140_v57 = vmul.u32.u64.low %v2371_v62, %v2370_v34  ;;  %v11141_v23 = vmul.u32.u64.high %v2371_v62, %v2370_v34, %v11140_v57  ;;  %v11144_v52 = vadd.s32 4294967169, %v11010_v19  ;;  %v11147_v60 = vmul.f32 %v8752_v9, %v585_v26 }
 0x293   : > { %14613 = vst [vmem:[#allocation60_spill] sm:$0xff] %v11126_v3  ;;  %vm11130_vm5 = vcmp.le.f32.partialorder %v14614_v56, 0.7853982  ;;  %v11150_v33 = vmul.f32 %v8752_v9, %v589_v1  ;;  %v8043_v42 = vadd.s32 4294967294, %v2287_v63  ;;  %vm2211_vm3 = vcmp.eq.s32.totalorder %v11085_v55, 0  ;;  %v14620_v1 = vld [vmem:[#allocation65_spill] sm:$0xff] }
 0x294   : > { %v11136_v31 = vsel %vm11130_vm5, 0, %v2306_v47  ;;  %vm2214_vm2 = vcmp.eq.s32.totalorder %v11085_v55, 2  ;;  %v2381_v35 = vadd.s32 1, %v11119_v48  ;;  %v14247_v47 = vand.u32 2147483647, %v14618_v0 }
 0x295   : > { %14617 = vst [vmem:[#allocation91_spill] sm:$0xff] %v11136_v31  ;;  %vm2210_vm8 = vcmp.lt.s32.totalorder %v11085_v55, 2  ;;  %v2275_v19 = vadd.s32 %v11003_v43, %v10997_v5  ;;  %vm8044_vm6 = vcmp.lt.s32.totalorder %v8043_v42, 0  ;;  %v2312_v18 = vadd.s32 3, %v11136_v31 }
 0x296   : > { %v2378_v51 = vmul.u32 %v2371_v62, %v2362_v21  ;;  %vm14261_vm11 = vweird.f32 %v14580_v44  ;;  %v2290_v9 = vsel %vm8044_vm6, 0, %v8043_v42  ;;  %vm2380_vm12 = vc.u32 %v11141_v23, %v11118_v37 }
 0x297   : > { %v2444_v26 = vshll.u32 %v14452_v61, %v14619_v46  ;;  %v2445_v34 = vshrl.u32 %v14442_v22, %v14620_v1  ;;  %v2291_v56 = vsub.s32 32, %v2290_v9  ;;  %v2295_v63 = vsub.s32 4294967266, %v2290_v9 }
 0x298   : > { %v2382_v5 = vsel %vm2380_vm12, %v2381_v35, %v11119_v48  ;;  %v2448_v43 = vshrl.u32 %v14443_v27, %v14620_v1  ;;  %v2434_v21 = vand.u32 8388607, %v14247_v47  ;;  %v2447_v57 = vshll.u32 %v14442_v22, %v14619_v46 }
 0x299   : > { %v2383_v62 = vadd.s32 %v2382_v5, %v2378_v51  ;;  %v2450_v42 = vshll.u32 %v14443_v27, %v14619_v46  ;;  %v11176_v25 = vpop.eup %8464  ;;  %v2292_v15 = vshll.u32 %v11087_v11, %v2290_v9  ;;  %v2293_v28 = vshrl.u32 %v2275_v19, %v2291_v56 }
 0x29a   : > { %14621 = vst [vmem:[#allocation63_spill] sm:$0xff] %v11176_v25  ;;  %v2296_v32 = vadd.s32 127, %v2295_v63  ;;  %vm2325_vm12 = vcmp.lt.s32.totalorder %v14605_v58, 0  ;;  %v2451_v48 = vshrl.u32 %v14454_v49, %v14620_v1  ;;  %v11182_v35 = vpop.eup %8466  ;;  %v14253_v51 = vxor.u32 2147483648, %v11176_v25 }
 0x29b   : > { %14622 = vst [vmem:[#allocation65_spill] sm:$0xff] %v11182_v35  ;;  %v2384_v5 = vadd.s32 536870912, %v2383_v62  ;;  %v2446_v47 = vor.u32 %v2445_v34, %v2444_v26  ;;  %v2454_v16 = vshrl.u32 %v14445_v6, %v14620_v1  ;;  %v14254_v31 = vxor.u32 2147483648, %v11182_v35 }
 0x29c   : > { %v2294_v3 = vor.u32 %v2293_v28, %v2292_v15  ;;  %v2297_v11 = vshll.u32 %v2296_v32, 23  ;;  %v2449_v19 = vor.u32 %v2448_v43, %v2447_v57  ;;  %v2216_v9 = vsel %vm2214_vm2, %v14253_v51, %v11182_v35 }
 0x29d   : > { %v2385_v56 = vshrl.u32 %v2384_v5, 30  ;;  %v2453_v63 = vshll.u32 %v14454_v49, %v14619_v46  ;;  %v2457_v26 = vshrl.u32 %v14455_v36, %v14620_v1  ;;  %v2213_v28 = vsel %vm2211_vm3, %v11176_v25, %v14254_v31 }
 0x29e   : > { %v2298_v32 = vor.u32 4788187, %v2297_v11  ;;  %v14623_v15 = vand.u32 2147483647, %v14605_v58  ;;  %v2452_v43 = vor.u32 %v2451_v48, %v2450_v42  ;;  %v2456_v57 = vshll.u32 %v14445_v6, %v14619_v46 }
 0x29f   : > { %vm3374_vm2 = vcmp.gt.s32.totalorder %v10878_v20, 0  ;;  %vm3478_vm10 = vcmp.gt.s32.totalorder %v10883_v29, 0  ;;  %v2217_v5 = vsel %vm2210_vm8, %v2213_v28, %v2216_v9  ;;  %v2386_v51 = vshll.u32 %v2385_v56, 30  ;;  %v14626_v28 = vld [vmem:[#allocation62_spill] sm:$0xff] }
 0x2a0   : > { %vm11204_vm6 = vcmp.le.f32.partialorder %v14623_v15, 0.7853982  ;;  %v2409_v31 = vsub.s32 4, %v2385_v56  ;;  %v2455_v11 = vor.u32 %v2454_v16, %v2453_v63  ;;  %v2218_v15 = vsel %vm14261_vm11, nan, %v2217_v5 }
 0x2a1   : > { %v2299_v25 = vand.u32 2147483647, %v2298_v32  ;;  %v2301_v35 = vcvt.s32.f32 %v2294_v3  ;;  %v2458_v53 = vor.u32 %v2457_v26, %v2456_v57  ;;  %7375 = vrot.lane.b32.xlu1 %v2218_v15, %s8600_s22  ;;  %v11217_v42 = vand.u32 3, %v2312_v18 }
 0x2a2   : > { %v11219_v46 = vsub.s32 %v2383_v62, %v2386_v51  ;;  %v2435_v48 = vor.u32 8388608, %v2434_v21  ;;  %v2443_v55 = vshrl.u32 %v14452_v61, %v14620_v1  ;;  %vm2459_vm3 = vcmp.lt.s32.totalorder %v14626_v28, 1 }
 0x2a3   : > { %v2302_v9 = vmul.f32 %v2301_v35, %v2299_v25  ;;  %vm2461_vm8 = vcmp.lt.s32.totalorder %v14626_v28, 3  ;;  %vm2462_vm11 = vcmp.lt.s32.totalorder %v14626_v28, 4  ;;  %v2410_v3 = vsel %vm2325_vm12, %v2409_v31, %v2385_v56 }
 0x2a4   : > { %v2389_v16 = vsub.s32 0, %v11219_v46  ;;  %v2467_v18 = vsel %vm2459_vm3, %v2446_v47, %v2449_v19  ;;  %v2468_v62 = vsel %vm2462_vm11, %v2455_v11, 920167782  ;;  %v2471_v25 = vsel %vm2459_vm3, %v2449_v19, %v2452_v43 }
 0x2a5   : > { %v2303_v21 = vxor.u32 2147483648, %v2302_v9  ;;  %v2469_v1 = vsel %vm2461_vm8, %v2452_v43, %v2468_v62  ;;  %v2472_v35 = vsel %vm2462_vm11, %v2458_v53, 1326507024  ;;  %vm2460_vm1 = vcmp.lt.s32.totalorder %v14626_v28, 2  ;;  %v14631_v28 = vld [vmem:[#allocation72_spill] sm:$0xff] }
 0x2a6   : > { %v8046_v51 = vmin.u32 %v2389_v16, %v11219_v46  ;;  %v2464_v63 = vsel %vm2462_vm11, %v2452_v43, 2102212464  ;;  %v2473_v31 = vsel %vm2461_vm8, %v2455_v11, %v2472_v35  ;;  %v2470_v26 = vsel %vm2460_vm1, %v2467_v18, %v2469_v1 }
 0x2a7   : > { %v2304_v56 = vsel %vm2221_vm14, %v2303_v21, %v2302_v9  ;;  %v2474_v32 = vsel %vm2460_vm1, %v2471_v25, %v2473_v31  ;;  %v2475_v57 = vshll.u32 %v2435_v48, 8  ;;  %v11250_v43 = vsel %vm11204_vm6, 0, %v2410_v3  ;;  %v14629_v21 = vld [vmem:[#allocation16_spill] sm:$0xff]  ;;  %v14630_v25 = vld [vmem:[#allocation15_spill] sm:$0xff] }
 0x2a8   : > { %v2307_v53 = vsel %vm11130_vm5, %v14593_v39, %v2304_v56  ;;  %v2391_v5 = vclz %v8046_v51  ;;  %14627 = vst [vmem:[#allocation62_spill] sm:$0xff] %v11250_v43  ;;  %v2463_v11 = vsel %vm2459_vm3, %v2443_v55, %v2446_v47  ;;  %v2465_v15 = vsel %vm2461_vm8, %v2449_v19, %v2464_v63  ;;  %v14628_v55 = vld [vmem:[#allocation30_spill] sm:$0xff] }
 0x2a9   : > { %8468 = vcosq.f32 %v2307_v53  ;;  %v11256_v9 = vmul.u32.u64.low %v2475_v57, %v2474_v32  ;;  %v11257_v16 = vmul.u32.u64.high %v2475_v57, %v2474_v32, %v11256_v9  ;;  %v11266_v3 = vsel %vm3374_vm2, %v10878_v20, 0 }
 0x2aa   : > { %8470 = vsinq.f32 %v2307_v53  ;;  %v8047_v48 = vadd.s32 4294967294, %v2391_v5  ;;  %v11259_v18 = vmul.u32.u64.low %v2475_v57, %v2470_v26  ;;  %v11260_v30 = vmul.u32.u64.high %v2475_v57, %v2470_v26, %v11259_v18  ;;  %v14632_v26 = vld [vmem:[#allocation69_spill] sm:$0xff] }
 0x2ab   : > { %v11271_v47 = vsel %vm3478_vm10, %v10883_v29, 0  ;;  %v11274_v19 = vadd.s32 4294967169, %v11014_v13  ;;  %v14263_v62 = vand.u32 2147483647, %v14628_v55  ;;  %v11279_v1 = vadd.f32 %v11147_v60, %v14629_v21 }
 0x2ac   : > { %v11283_v35 = vadd.f32 %v11150_v33, %v14630_v25  ;;  %vm8048_vm14 = vcmp.lt.s32.totalorder %v8047_v48, 0  ;;  %v2466_v20 = vsel %vm2460_vm1, %v2463_v11, %v2465_v15  ;;  %vm2318_vm10 = vcmp.eq.s32.totalorder %v11217_v42, 2 }
 0x2ad   : > { %v2379_v29 = vadd.s32 %v11118_v37, %v11141_v23  ;;  %v2394_v13 = vsel %vm8048_vm14, 0, %v8047_v48  ;;  %v11291_v51 = vadd.s32 3, %v11250_v43  ;;  %vm2484_vm5 = vc.u32 %v11257_v16, %v11259_v18 }
 0x2ae   : > { %vm2315_vm11 = vcmp.eq.s32.totalorder %v11217_v42, 0  ;;  %v2395_v60 = vsub.s32 32, %v2394_v13  ;;  %v2399_v33 = vsub.s32 4294967266, %v2394_v13  ;;  %v2485_v63 = vadd.s32 1, %v11260_v30 }
 0x2af   : > { %v2549_v31 = vshrl.u32 %v14442_v22, %v14631_v28  ;;  %vm2314_vm1 = vcmp.lt.s32.totalorder %v11217_v42, 2  ;;  %v2396_v37 = vshll.u32 %v11219_v46, %v2394_v13  ;;  %v2482_v23 = vmul.u32 %v2475_v57, %v2466_v20 }
 0x2b0   : > { %v2538_v56 = vand.u32 8388607, %v14263_v62  ;;  %v2548_v32 = vshll.u32 %v14452_v61, %v14632_v26  ;;  %vm14283_vm2 = vweird.f32 %v14593_v39  ;;  %v2397_v53 = vshrl.u32 %v2379_v29, %v2395_v60 }
 0x2b1   : > { %v2400_v5 = vadd.s32 127, %v2399_v33  ;;  %v2486_v11 = vsel %vm2484_vm5, %v2485_v63, %v11260_v30  ;;  %v2552_v15 = vshrl.u32 %v14443_v27, %v14631_v28  ;;  %v2547_v46 = vshrl.u32 %v14452_v61, %v14631_v28 }
 0x2b2   : > { %v2487_v9 = vadd.s32 %v2486_v11, %v2482_v23  ;;  %v2551_v57 = vshll.u32 %v14442_v22, %v14632_v26  ;;  %v2555_v48 = vshrl.u32 %v14454_v49, %v14631_v28  ;;  %v2398_v21 = vor.u32 %v2397_v53, %v2396_v37 }
 0x2b3   : > { %v2401_v25 = vshll.u32 %v2400_v5, 23  ;;  %v2550_v20 = vor.u32 %v2549_v31, %v2548_v32  ;;  %v2558_v29 = vshrl.u32 %v14445_v6, %v14631_v28  ;;  %v11317_v30 = vpop.eup %8468  ;;  %v2539_v60 = vor.u32 8388608, %v2538_v56 }
 0x2b4   : > { %14633 = vst [vmem:[#allocation16_spill] sm:$0xff] %v11317_v30  ;;  %v2488_v13 = vadd.s32 536870912, %v2487_v9  ;;  %v2554_v33 = vshll.u32 %v14443_v27, %v14632_v26  ;;  %v2561_v63 = vshrl.u32 %v14455_v36, %v14631_v28  ;;  %v11323_v23 = vpop.eup %8470  ;;  %v14266_v11 = vxor.u32 2147483648, %v11317_v30 }
 0x2b5   : > { %14634 = vst [vmem:[#allocation15_spill] sm:$0xff] %v11323_v23  ;;  %v2402_v37 = vor.u32 4788187, %v2401_v25  ;;  %v2553_v53 = vor.u32 %v2552_v15, %v2551_v57  ;;  %v2557_v31 = vshll.u32 %v14454_v49, %v14632_v26  ;;  %v14267_v32 = vxor.u32 2147483648, %v11323_v23 }
 0x2b6   : > { %v2489_v5 = vshrl.u32 %v2488_v13, 30  ;;  %v2556_v62 = vor.u32 %v2555_v48, %v2554_v33  ;;  %v2560_v56 = vshll.u32 %v14445_v6, %v14632_v26  ;;  %v2320_v28 = vsel %vm2318_vm10, %v14266_v11, %v11323_v23  ;;  %v14635_v13 = vld [vmem:[#allocation67_spill] sm:$0xff] }
 0x2b7   : > { %v2403_v44 = vand.u32 2147483647, %v2402_v37  ;;  %v2405_v43 = vcvt.s32.f32 %v2398_v21  ;;  %v2559_v25 = vor.u32 %v2558_v29, %v2557_v31  ;;  %v2317_v15 = vsel %vm2315_vm11, %v11317_v30, %v14267_v32 }
 0x2b8   : > { %v2490_v57 = vshll.u32 %v2489_v5, 30  ;;  %v2562_v48 = vor.u32 %v2561_v63, %v2560_v56  ;;  %vm2563_vm3 = vcmp.lt.s32.totalorder %v14635_v13, 1  ;;  %v2321_v26 = vsel %vm2314_vm1, %v2317_v15, %v2320_v28 }
 0x2b9   : > { %v2406_v33 = vmul.f32 %v2405_v43, %v2403_v44  ;;  %vm2564_vm8 = vcmp.lt.s32.totalorder %v14635_v13, 2  ;;  %vm2565_vm14 = vcmp.lt.s32.totalorder %v14635_v13, 3  ;;  %v2322_v21 = vsel %vm14283_vm2, nan, %v2321_v26 }
 0x2ba   : > { %v11348_v29 = vsub.s32 %v2487_v9, %v2490_v57  ;;  %vm2566_vm10 = vcmp.lt.s32.totalorder %v14635_v13, 4  ;;  %v2571_v63 = vsel %vm2563_vm3, %v2550_v20, %v2553_v53  ;;  %7377 = vrot.lane.b32.xlu0 %v2322_v21, %s8600_s22  ;;  %v2513_v42 = vsub.s32 4, %v2489_v5 }
 0x2bb   : > { %v2407_v37 = vxor.u32 2147483648, %v2406_v33  ;;  %v2568_v31 = vsel %vm2566_vm10, %v2556_v62, 2102212464  ;;  %v2572_v44 = vsel %vm2566_vm10, %v2559_v25, 920167782  ;;  %v2567_v56 = vsel %vm2563_vm3, %v2547_v46, %v2550_v20 }
 0x2bc   : > { %v2493_v43 = vsub.s32 0, %v11348_v29  ;;  %v2573_v9 = vsel %vm2565_vm14, %v2556_v62, %v2572_v44  ;;  %v2575_v28 = vsel %vm2563_vm3, %v2553_v53, %v2556_v62  ;;  %v2576_v26 = vsel %vm2566_vm10, %v2562_v48, 1326507024 }
 0x2bd   : > { %v2408_v15 = vsel %vm2325_vm12, %v2407_v37, %v2406_v33  ;;  %v2574_v57 = vsel %vm2564_vm8, %v2571_v63, %v2573_v9  ;;  %v2579_v21 = vshll.u32 %v2539_v60, 8  ;;  %v2569_v20 = vsel %vm2565_vm14, %v2553_v53, %v2568_v31 }
 0x2be   : > { %v2411_v11 = vsel %vm11204_vm6, %v14605_v58, %v2408_v15  ;;  %v8050_v46 = vmin.u32 %v2493_v43, %v11348_v29  ;;  %v2577_v62 = vsel %vm2565_vm14, %v2559_v25, %v2576_v26  ;;  %v11380_v34 = vand.u32 3, %v11291_v51 }
 0x2bf   : > { %8472 = vcosq.f32 %v2411_v11  ;;  %v2578_v33 = vsel %vm2564_vm8, %v2575_v28, %v2577_v62  ;;  %v11375_v37 = vmul.u32.u64.low %v2579_v21, %v2574_v57  ;;  %v11376_v63 = vmul.u32.u64.high %v2579_v21, %v2574_v57, %v11375_v37  ;;  %v14643_v57 = vld [vmem:[#allocation73_spill] sm:$0xff] }
 0x2c0   : > { %8474 = vsinq.f32 %v2411_v11  ;;  %vm2429_vm12 = vcmp.lt.s32.totalorder %v14618_v0, 0  ;;  %v2495_v60 = vclz %v8050_v46  ;;  %v11384_v53 = vshrl.u32 %v11266_v3, 5 }
 0x2c1   : > { %v2514_v25 = vsel %vm2429_vm12, %v2513_v42, %v2489_v5  ;;  %v11388_v48 = vmul.u32.u64.low %v2579_v21, %v2578_v33  ;;  %v11389_v31 = vmul.u32.u64.high %v2579_v21, %v2578_v33, %v11388_v48  ;;  %v11392_v44 = vand.u32 31, %v11266_v3  ;;  %v14641_v3 = vld [vmem:[#allocation33_spill] sm:$0xff] }
 0x2c2   : > { %14636 = vst [vmem:[#allocation72_spill] sm:$0xff] %v11384_v53  ;;  %v11395_v11 = vshrl.u32 %v11271_v47, 5  ;;  %v8051_v51 = vadd.s32 4294967294, %v2495_v60  ;;  %v2570_v43 = vsel %vm2564_vm8, %v2567_v56, %v2569_v20  ;;  %v11400_v9 = vand.u32 31, %v11271_v47  ;;  %v14644_v48 = vld [vmem:[#allocation71_spill] sm:$0xff] }
 0x2c3   : > { %v14638_v28 = vand.u32 2147483647, %v14618_v0  ;;  %v2589_v42 = vadd.s32 1, %v11376_v63  ;;  %v14268_v15 = vand.u32 2147483647, %v14641_v3  ;;  %vm2419_vm5 = vcmp.eq.s32.totalorder %v11380_v34, 0 }
 0x2c4   : > { %14637 = vst [vmem:[#allocation69_spill] sm:$0xff] %v11395_v11  ;;  %vm2422_vm11 = vcmp.eq.s32.totalorder %v11380_v34, 2  ;;  %vm8052_vm1 = vcmp.lt.s32.totalorder %v8051_v51, 0  ;;  %vm2418_vm3 = vcmp.lt.s32.totalorder %v11380_v34, 2  ;;  %v2586_v56 = vmul.u32 %v2579_v21, %v2570_v43 }
 0x2c5   : > { %vm11404_vm6 = vcmp.le.f32.partialorder %v14638_v28, 0.7853982  ;;  %v2498_v47 = vsel %vm8052_vm1, 0, %v8051_v51  ;;  %vm2588_vm8 = vc.u32 %v11389_v31, %v11375_v37  ;;  %v2653_v26 = vshrl.u32 %v14442_v22, %v14643_v57 }
 0x2c6   : > { %v11414_v13 = vsel %vm11404_vm6, 0, %v2514_v25  ;;  %vm14376_vm14 = vweird.f32 %v14605_v58  ;;  %v2483_v46 = vadd.s32 %v11259_v18, %v11257_v16  ;;  %v2499_v20 = vsub.s32 32, %v2498_v47 }
 0x2c7   : > { %14642 = vst [vmem:[#allocation67_spill] sm:$0xff] %v11414_v13  ;;  %v2503_v62 = vsub.s32 4294967266, %v2498_v47  ;;  %v2590_v33 = vsel %vm2588_vm8, %v2589_v42, %v11376_v63  ;;  %v2520_v60 = vadd.s32 3, %v11414_v13  ;;  %v11428_v21 = vand.u32 8388607, %v14268_v15 }
 0x2c8   : > { %v2591_v25 = vadd.s32 %v2590_v33, %v2586_v56  ;;  %v2652_v51 = vshll.u32 %v14452_v61, %v14644_v48  ;;  %v2500_v43 = vshll.u32 %v11348_v29, %v2498_v47  ;;  %v2501_v28 = vshrl.u32 %v2483_v46, %v2499_v20 }
 0x2c9   : > { %v2504_v32 = vadd.s32 127, %v2503_v62  ;;  %v2656_v16 = vshrl.u32 %v14443_v27, %v14643_v57  ;;  %v11435_v18 = vpop.eup %8472  ;;  %v2655_v56 = vshll.u32 %v14442_v22, %v14644_v48  ;;  %v2659_v33 = vshrl.u32 %v14454_v49, %v14643_v57 }
 0x2ca   : > { %v2592_v63 = vadd.s32 536870912, %v2591_v25  ;;  %v2654_v42 = vor.u32 %v2653_v26, %v2652_v51  ;;  %v11441_v15 = vpop.eup %8474  ;;  %v14277_v39 = vxor.u32 2147483648, %v11435_v18  ;;  %v2502_v29 = vor.u32 %v2501_v28, %v2500_v43 }
 0x2cb   : > { %14645 = vst [vmem:[#allocation73_spill] sm:$0xff] %v11441_v15  ;;  %v2505_v47 = vshll.u32 %v2504_v32, 23  ;;  %v2662_v46 = vshrl.u32 %v14445_v6, %v14643_v57  ;;  %vm2533_vm10 = vcmp.lt.s32.totalorder %v14628_v55, 0  ;;  %v2658_v62 = vshll.u32 %v14443_v27, %v14644_v48 }
 0x2cc   : > { %v2593_v26 = vshrl.u32 %v2592_v63, 30  ;;  %v2665_v51 = vshrl.u32 %v14455_v36, %v14643_v57  ;;  %v2424_v32 = vsel %vm2422_vm11, %v14277_v39, %v11441_v15  ;;  %v2657_v28 = vor.u32 %v2656_v16, %v2655_v56 }
 0x2cd   : > { %v2506_v43 = vor.u32 4788187, %v2505_v47  ;;  %v2661_v20 = vshll.u32 %v14454_v49, %v14644_v48  ;;  %v14646_v30 = vxor.u32 2147483648, %v11441_v15  ;;  %v2660_v13 = vor.u32 %v2659_v33, %v2658_v62 }
 0x2ce   : > { %v2594_v23 = vshll.u32 %v2593_v26, 30  ;;  %v2664_v11 = vshll.u32 %v14445_v6, %v14644_v48  ;;  %v2509_v47 = vcvt.s32.f32 %v2502_v29  ;;  %v11470_v50 = vand.u32 3, %v2520_v60 }
 0x2cf   : > { %v2421_v63 = vsel %vm2419_vm5, %v11435_v18, %v14646_v30  ;;  %v2507_v39 = vand.u32 2147483647, %v2506_v43  ;;  %v2663_v16 = vor.u32 %v2662_v46, %v2661_v20  ;;  %v14647_v15 = vand.u32 2147483647, %v14628_v55  ;;  %v14650_v46 = vld [vmem:[#allocation70_spill] sm:$0xff] }
 0x2d0   : > { %v2425_v53 = vsel %vm2418_vm3, %v2421_v63, %v2424_v32  ;;  %v11478_v33 = vsub.s32 %v2591_v25, %v2594_v23  ;;  %v2666_v48 = vor.u32 %v2665_v51, %v2664_v11  ;;  %v2617_v62 = vsub.s32 4, %v2593_v26 }
 0x2d1   : > { %v2426_v56 = vsel %vm14376_vm14, nan, %v2425_v53  ;;  %vm11474_vm11 = vcmp.le.f32.partialorder %v14647_v15, 0.7853982  ;;  %v2510_v34 = vmul.f32 %v2509_v47, %v2507_v39  ;;  %v2643_v29 = vor.u32 8388608, %v11428_v21 }
 0x2d2   : > { %7379 = vrot.lane.b32.xlu1 %v2426_v56, %s8600_s22  ;;  %v2651_v53 = vshrl.u32 %v14452_v61, %v14643_v57  ;;  %v2597_v60 = vsub.s32 0, %v11478_v33  ;;  %vm2667_vm5 = vcmp.lt.s32.totalorder %v14650_v46, 1  ;;  %vm2669_vm1 = vcmp.lt.s32.totalorder %v14650_v46, 3 }
 0x2d3   : > { %vm2670_vm3 = vcmp.lt.s32.totalorder %v14650_v46, 4  ;;  %v2511_v23 = vxor.u32 2147483648, %v2510_v34  ;;  %v2675_v11 = vsel %vm2667_vm5, %v2654_v42, %v2657_v28  ;;  %v2679_v57 = vsel %vm2667_vm5, %v2657_v28, %v2660_v13 }
 0x2d4   : > { %v2672_v15 = vsel %vm2670_vm3, %v2660_v13, 2102212464  ;;  %v2676_v39 = vsel %vm2670_vm3, %v2663_v16, 920167782  ;;  %v8054_v25 = vmin.u32 %v2597_v60, %v11478_v33  ;;  %v2680_v20 = vsel %vm2670_vm3, %v2666_v48, 1326507024 }
 0x2d5   : > { %v2677_v21 = vsel %vm2669_vm1, %v2660_v13, %v2676_v39  ;;  %v2512_v51 = vsel %vm2429_vm12, %v2511_v23, %v2510_v34  ;;  %v2618_v32 = vsel %vm2533_vm10, %v2617_v62, %v2593_v26  ;;  %vm2668_vm8 = vcmp.lt.s32.totalorder %v14650_v46, 2 }
 0x2d6   : > { %v2681_v43 = vsel %vm2669_vm1, %v2663_v16, %v2680_v20  ;;  %v2515_v63 = vsel %vm11404_vm6, %v14618_v0, %v2512_v51  ;;  %v2599_v47 = vclz %v8054_v25  ;;  %v2678_v13 = vsel %vm2668_vm8, %v2675_v11, %v2677_v21 }
 0x2d7   : > { %v2683_v56 = vshll.u32 %v2643_v29, 8  ;;  %8476 = vcosq.f32 %v2515_v63  ;;  %v2671_v48 = vsel %vm2667_vm5, %v2651_v53, %v2654_v42  ;;  %v2673_v26 = vsel %vm2669_vm1, %v2657_v28, %v2672_v15  ;;  %v14651_v42 = vld [vmem:[#allocation45_spill] sm:$0xff] }
 0x2d8   : > { %v2682_v34 = vsel %vm2668_vm8, %v2679_v57, %v2681_v43  ;;  %8478 = vsinq.f32 %v2515_v63  ;;  %v8055_v16 = vadd.s32 4294967294, %v2599_v47  ;;  %v11518_v60 = vsel %vm11474_vm11, 0, %v2618_v32 }
 0x2d9   : > { %v11513_v62 = vmul.u32.u64.low %v2683_v56, %v2682_v34  ;;  %v11514_v5 = vmul.u32.u64.high %v2683_v56, %v2682_v34, %v11513_v62  ;;  %v11520_v29 = vmul.u32.u64.low %v2683_v56, %v2678_v13  ;;  %v11521_v23 = vmul.u32.u64.high %v2683_v56, %v2678_v13, %v11520_v29 }
 0x2da   : > { %v14282_v53 = vand.u32 2147483647, %v14651_v42  ;;  %v11526_v28 = vadd.s32 1, %v11144_v52  ;;  %v3782_v15 = vand.u32 2139095040, %v11279_v1  ;;  %vm8056_vm12 = vcmp.lt.s32.totalorder %v8055_v16, 0 }
 0x2db   : > { %v2674_v11 = vsel %vm2668_vm8, %v2671_v48, %v2673_v26  ;;  %vm2526_vm6 = vcmp.eq.s32.totalorder %v11470_v50, 2  ;;  %v2602_v39 = vsel %vm8056_vm12, 0, %v8055_v16  ;;  %v2757_v21 = vshrl.u32 %v14442_v22, %v9592_v38 }
 0x2dc   : > { %v11534_v25 = vand.u32 8388607, %v14282_v53  ;;  %vm2523_vm5 = vcmp.eq.s32.totalorder %v11470_v50, 0  ;;  %v2587_v52 = vadd.s32 %v11375_v37, %v11389_v31  ;;  %v2603_v57 = vsub.s32 32, %v2602_v39 }
 0x2dd   : > { %v2607_v20 = vsub.s32 4294967266, %v2602_v39  ;;  %v2624_v46 = vadd.s32 3, %v11518_v60  ;;  %vm2522_vm1 = vcmp.lt.s32.totalorder %v11470_v50, 2  ;;  %v2690_v51 = vmul.u32 %v2683_v56, %v2674_v11 }
 0x2de   : > { %vm2692_vm3 = vc.u32 %v11514_v5, %v11520_v29  ;;  %v2693_v32 = vadd.s32 1, %v11521_v23  ;;  %v2756_v43 = vshll.u32 %v14452_v61, %v9370_v14  ;;  %vm14296_vm8 = vweird.f32 %v14618_v0 }
 0x2df   : > { %v2604_v63 = vshll.u32 %v11478_v33, %v2602_v39  ;;  %v2605_v37 = vshrl.u32 %v2587_v52, %v2603_v57  ;;  %v2608_v31 = vadd.s32 127, %v2607_v20  ;;  %v2755_v47 = vshrl.u32 %v14452_v61, %v9592_v38 }
 0x2e0   : > { %v2694_v13 = vsel %vm2692_vm3, %v2693_v32, %v11521_v23  ;;  %v2747_v56 = vor.u32 8388608, %v11534_v25  ;;  %v2758_v48 = vor.u32 %v2757_v21, %v2756_v43  ;;  %v2760_v26 = vshrl.u32 %v14443_v27, %v9592_v38 }
 0x2e1   : > { %v2606_v34 = vor.u32 %v2605_v37, %v2604_v63  ;;  %v2609_v16 = vshll.u32 %v2608_v31, 23  ;;  %v2695_v62 = vadd.s32 %v2694_v13, %v2690_v51  ;;  %v2759_v11 = vshll.u32 %v14442_v22, %v9370_v14  ;;  %v11558_v33 = vpop.eup %8476 }
 0x2e2   : > { %14652 = vst [vmem:[#allocation71_spill] sm:$0xff] %v11558_v33  ;;  %v2763_v39 = vshrl.u32 %v14454_v49, %v9592_v38  ;;  %v2765_v23 = vshll.u32 %v14454_v49, %v9370_v14  ;;  %v2766_v25 = vshrl.u32 %v14445_v6, %v9592_v38  ;;  %v2769_v21 = vshrl.u32 %v14455_v36, %v9592_v38  ;;  %v11568_v52 = vpop.eup %8478 }
 0x2e3   : > { %14653 = vst [vmem:[#allocation70_spill] sm:$0xff] %v11568_v52  ;;  %v14284_v57 = vxor.u32 2147483648, %v11558_v33  ;;  %v2610_v20 = vor.u32 4788187, %v2609_v16  ;;  %vm2637_vm12 = vcmp.lt.s32.totalorder %v14641_v3, 0  ;;  %v2696_v51 = vadd.s32 536870912, %v2695_v62 }
 0x2e4   : > { %v2762_v32 = vshll.u32 %v14443_v27, %v9370_v14  ;;  %v14285_v43 = vxor.u32 2147483648, %v11568_v52  ;;  %v2761_v63 = vor.u32 %v2760_v26, %v2759_v11  ;;  %v2767_v37 = vor.u32 %v2766_v25, %v2765_v23 }
 0x2e5   : > { %v2768_v31 = vshll.u32 %v14445_v6, %v9370_v14  ;;  %v2528_v38 = vsel %vm2526_vm6, %v14284_v57, %v11568_v52  ;;  %v2611_v13 = vand.u32 2147483647, %v2610_v20  ;;  %v2613_v16 = vcvt.s32.f32 %v2606_v34 }
 0x2e6   : > { %v2697_v53 = vshrl.u32 %v2696_v51, 30  ;;  %vm3582_vm3 = vcmp.gt.s32.totalorder %v11526_v28, 0  ;;  %v2525_v26 = vsel %vm2523_vm5, %v11558_v33, %v14285_v43  ;;  %v2764_v11 = vor.u32 %v2763_v39, %v2762_v32 }
 0x2e7   : > { %v2770_v23 = vor.u32 %v2769_v21, %v2768_v31  ;;  %vm2771_vm2 = vcmp.lt.s32.totalorder %v9367_v7, 1  ;;  %v2529_v14 = vsel %vm2522_vm1, %v2525_v26, %v2528_v38  ;;  %v2614_v25 = vmul.f32 %v2613_v16, %v2611_v13 }
 0x2e8   : > { %v2698_v57 = vshll.u32 %v2697_v53, 30  ;;  %vm2774_vm6 = vcmp.lt.s32.totalorder %v9367_v7, 4  ;;  %v2530_v34 = vsel %vm14296_vm8, nan, %v2529_v14  ;;  %v2721_v20 = vsub.s32 4, %v2697_v53 }
 0x2e9   : > { %v2779_v51 = vsel %vm2771_vm2, %v2758_v48, %v2761_v63  ;;  %v2780_v39 = vsel %vm2774_vm6, %v2767_v37, 920167782  ;;  %7381 = vrot.lane.b32.xlu0 %v2530_v34, %s8600_s22  ;;  %v2615_v21 = vxor.u32 2147483648, %v2614_v25  ;;  %v11599_v32 = vand.u32 3, %v2624_v46 }
 0x2ea   : > { %v11601_v50 = vsub.s32 %v2695_v62, %v2698_v57  ;;  %vm2773_vm5 = vcmp.lt.s32.totalorder %v9367_v7, 3  ;;  %vm2772_vm1 = vcmp.lt.s32.totalorder %v9367_v7, 2  ;;  %v2775_v31 = vsel %vm2771_vm2, %v2755_v47, %v2758_v48 }
 0x2eb   : > { %v2776_v38 = vsel %vm2774_vm6, %v2764_v11, 2102212464  ;;  %v2781_v13 = vsel %vm2773_vm5, %v2764_v11, %v2780_v39  ;;  %v2616_v16 = vsel %vm2533_vm10, %v2615_v21, %v2614_v25  ;;  %v2783_v57 = vsel %vm2771_vm2, %v2761_v63, %v2764_v11 }
 0x2ec   : > { %v2701_v46 = vsub.s32 0, %v11601_v50  ;;  %v2782_v62 = vsel %vm2772_vm1, %v2779_v51, %v2781_v13  ;;  %v2619_v47 = vsel %vm11474_vm11, %v14628_v55, %v2616_v16  ;;  %v2722_v48 = vsel %vm2637_vm12, %v2721_v20, %v2697_v53 }
 0x2ed   : > { %v2784_v26 = vsel %vm2774_vm6, %v2770_v23, 1326507024  ;;  %v2787_v14 = vshll.u32 %v2747_v56, 8  ;;  %8480 = vcosq.f32 %v2619_v47  ;;  %v2777_v34 = vsel %vm2773_vm5, %v2761_v63, %v2776_v38 }
 0x2ee   : > { %v8058_v25 = vmin.u32 %v2701_v46, %v11601_v50  ;;  %v2785_v11 = vsel %vm2773_vm5, %v2767_v37, %v2784_v26  ;;  %8482 = vsinq.f32 %v2619_v47  ;;  %v11637_v53 = vadd.s32 1, %v11274_v19 }
 0x2ef   : > { %v2786_v30 = vsel %vm2772_vm1, %v2783_v57, %v2785_v11  ;;  %v11632_v51 = vmul.u32.u64.low %v2787_v14, %v2782_v62  ;;  %v11633_v39 = vmul.u32.u64.high %v2787_v14, %v2782_v62, %v11632_v51  ;;  %v14654_v23 = vand.u32 2147483647, %v14641_v3 }
 0x2f0   : > { %v2703_v37 = vclz %v8058_v25  ;;  %v2778_v21 = vsel %vm2772_vm1, %v2775_v31, %v2777_v34  ;;  %v11652_v38 = vmul.u32.u64.low %v2787_v14, %v2786_v30  ;;  %v11653_v13 = vmul.u32.u64.high %v2787_v14, %v2786_v30, %v11652_v38  ;;  %v14658_v31 = vld [vmem:[#allocation48_spill] sm:$0xff] }
 0x2f1   : > { %vm11642_vm2 = vcmp.le.f32.partialorder %v14654_v23, 0.7853982  ;;  %v11656_v19 = vsub.s32 32, %v11392_v44  ;;  %v11661_v16 = vsel %vm3582_vm3, %v11526_v28, 0  ;;  %v11665_v46 = vshrl.u32 %v3782_v15, 23 }
 0x2f2   : > { %v11648_v20 = vsel %vm11642_vm2, 0, %v2722_v48  ;;  %v8059_v62 = vadd.s32 4294967294, %v2703_v37  ;;  %vm2627_vm10 = vcmp.eq.s32.totalorder %v11599_v32, 0  ;;  %vm2630_vm11 = vcmp.eq.s32.totalorder %v11599_v32, 2 }
 0x2f3   : > { %14657 = vst [vmem:[#allocation92_spill] sm:$0xff] %v11648_v20  ;;  %v2797_v7 = vadd.s32 1, %v11633_v39  ;;  %v14286_v57 = vand.u32 2147483647, %v14658_v31  ;;  %vm2626_vm6 = vcmp.lt.s32.totalorder %v11599_v32, 2  ;;  %v2691_v47 = vadd.s32 %v11520_v29, %v11514_v5 }
 0x2f4   : > { %vm8060_vm3 = vcmp.lt.s32.totalorder %v8059_v62, 0  ;;  %v2728_v28 = vadd.s32 3, %v11648_v20  ;;  %v2794_v48 = vmul.u32 %v2787_v14, %v2778_v21  ;;  %vm14297_vm5 = vweird.f32 %v14628_v55 }
 0x2f5   : > { %v2706_v15 = vsel %vm8060_vm3, 0, %v8059_v62  ;;  %vm2796_vm1 = vc.u32 %v11653_v13, %v11632_v51  ;;  %v2860_v26 = vshll.u32 %v14452_v61, %v9377_v8  ;;  %v2861_v25 = vshrl.u32 %v14442_v22, %v9595_v12 }
 0x2f6   : > { %v2707_v34 = vsub.s32 32, %v2706_v15  ;;  %v2711_v11 = vsub.s32 4294967266, %v2706_v15  ;;  %v2798_v5 = vsel %vm2796_vm1, %v2797_v7, %v11633_v39  ;;  %v2864_v29 = vshrl.u32 %v14443_v27, %v9595_v12 }
 0x2f7   : > { %v2799_v14 = vadd.s32 %v2798_v5, %v2794_v48  ;;  %v2850_v30 = vand.u32 8388607, %v14286_v57  ;;  %v2863_v23 = vshll.u32 %v14442_v22, %v9377_v8  ;;  %v2866_v37 = vshll.u32 %v14443_v27, %v9377_v8  ;;  %v11691_v21 = vpop.eup %8480 }
 0x2f8   : > { %14659 = vst [vmem:[#allocation93_spill] sm:$0xff] %v11691_v21  ;;  %v2708_v38 = vshll.u32 %v11601_v50, %v2706_v15  ;;  %v2709_v62 = vshrl.u32 %v2691_v47, %v2707_v34  ;;  %v2712_v43 = vadd.s32 127, %v2711_v11  ;;  %vm2741_vm3 = vcmp.lt.s32.totalorder %v14651_v42, 0  ;;  %v11697_v7 = vpop.eup %8482 }
 0x2f9   : > { %v2867_v39 = vshrl.u32 %v14454_v49, %v9595_v12  ;;  %14660 = vst [vmem:[#allocation94_spill] sm:$0xff] %v11697_v7  ;;  %v14289_v48 = vxor.u32 2147483648, %v11691_v21  ;;  %v2800_v5 = vadd.s32 536870912, %v2799_v14  ;;  %v2862_v57 = vor.u32 %v2861_v25, %v2860_v26 }
 0x2fa   : > { %v2870_v56 = vshrl.u32 %v14445_v6, %v9595_v12  ;;  %v14294_v0 = vxor.u32 2147483648, %v11697_v7  ;;  %v2710_v20 = vor.u32 %v2709_v62, %v2708_v38  ;;  %v2713_v50 = vshll.u32 %v2712_v43, 23 }
 0x2fb   : > { %v2865_v47 = vor.u32 %v2864_v29, %v2863_v23  ;;  %v2632_v15 = vsel %vm2630_vm11, %v14289_v48, %v11697_v7  ;;  %v2801_v34 = vshrl.u32 %v2800_v5, 30  ;;  %v2869_v11 = vshll.u32 %v14454_v49, %v9377_v8 }
 0x2fc   : > { %v2873_v26 = vshrl.u32 %v14455_v36, %v9595_v12  ;;  %v2629_v43 = vsel %vm2627_vm10, %v11691_v21, %v14294_v0  ;;  %v2714_v25 = vor.u32 4788187, %v2713_v50  ;;  %v14661_v29 = vand.u32 2147483647, %v14651_v42 }
 0x2fd   : > { %v2868_v38 = vor.u32 %v2867_v39, %v2866_v37  ;;  %v2872_v62 = vshll.u32 %v14445_v6, %v9377_v8  ;;  %vm3686_vm11 = vcmp.gt.s32.totalorder %v11637_v53, 0  ;;  %v2633_v5 = vsel %vm2626_vm6, %v2629_v43, %v2632_v15 }
 0x2fe   : > { %vm11719_vm1 = vcmp.le.f32.partialorder %v14661_v29, 0.7853982  ;;  %v2802_v48 = vshll.u32 %v2801_v34, 30  ;;  %v2825_v33 = vsub.s32 4, %v2801_v34  ;;  %v2871_v52 = vor.u32 %v2870_v56, %v2869_v11 }
 0x2ff   : > { %v2634_v50 = vsel %vm14297_vm5, nan, %v2633_v5  ;;  %v2715_v0 = vand.u32 2147483647, %v2714_v25  ;;  %v2717_v29 = vcvt.s32.f32 %v2710_v20  ;;  %v2874_v58 = vor.u32 %v2873_v26, %v2872_v62 }
 0x300   : > { %7383 = vrot.lane.b32.xlu1 %v2634_v50, %s8600_s22  ;;  %v11731_v37 = vand.u32 3, %v2728_v28  ;;  %v11733_v39 = vsub.s32 %v2799_v14, %v2802_v48  ;;  %v2851_v8 = vor.u32 8388608, %v2850_v30  ;;  %v2859_v32 = vshrl.u32 %v14452_v61, %v9595_v12 }
 0x301   : > { %v2718_v15 = vmul.f32 %v2717_v29, %v2715_v0  ;;  %vm2875_vm10 = vcmp.lt.s32.totalorder %v9375_v2, 1  ;;  %vm2877_vm6 = vcmp.lt.s32.totalorder %v9375_v2, 3  ;;  %vm2878_vm8 = vcmp.lt.s32.totalorder %v9375_v2, 4 }
 0x302   : > { %v2805_v56 = vsub.s32 0, %v11733_v39  ;;  %v2826_v20 = vsel %vm2741_vm3, %v2825_v33, %v2801_v34  ;;  %v2883_v28 = vsel %vm2875_vm10, %v2862_v57, %v2865_v47  ;;  %v2884_v14 = vsel %vm2878_vm8, %v2871_v52, 920167782 }
 0x303   : > { %v2719_v30 = vxor.u32 2147483648, %v2718_v15  ;;  %v2885_v12 = vsel %vm2877_vm6, %v2868_v38, %v2884_v14  ;;  %v2887_v0 = vsel %vm2875_vm10, %v2865_v47, %v2868_v38  ;;  %v2888_v48 = vsel %vm2878_vm8, %v2874_v58, 1326507024 }
 0x304   : > { %v8062_v11 = vmin.u32 %v2805_v56, %v11733_v39  ;;  %vm2876_vm5 = vcmp.lt.s32.totalorder %v9375_v2, 2  ;;  %v2880_v26 = vsel %vm2878_vm8, %v2868_v38, 2102212464  ;;  %v2889_v33 = vsel %vm2877_vm6, %v2871_v52, %v2888_v48 }
 0x305   : > { %v2720_v34 = vsel %vm2637_vm12, %v2719_v30, %v2718_v15  ;;  %v2886_v43 = vsel %vm2876_vm5, %v2883_v28, %v2885_v12  ;;  %v2890_v25 = vsel %vm2876_vm5, %v2887_v0, %v2889_v33  ;;  %v2891_v62 = vshll.u32 %v2851_v8, 8 }
 0x306   : > { %v2723_v58 = vsel %vm11642_vm2, %v14641_v3, %v2720_v34  ;;  %v2807_v5 = vclz %v8062_v11  ;;  %v11764_v38 = vsel %vm11719_vm1, 0, %v2826_v20  ;;  %v2879_v52 = vsel %vm2875_vm10, %v2859_v32, %v2862_v57  ;;  %v14665_v20 = vld [vmem:[#allocation66_spill] sm:$0xff] }
 0x307   : > { %8484 = vcosq.f32 %v2723_v58  ;;  %v2881_v50 = vsel %vm2877_vm6, %v2865_v47, %v2880_v26  ;;  %v11770_v29 = vmul.u32.u64.low %v2891_v62, %v2890_v25  ;;  %v11771_v15 = vmul.u32.u64.high %v2891_v62, %v2890_v25, %v11770_v29 }
 0x308   : > { %8486 = vsinq.f32 %v2723_v58  ;;  %v8063_v8 = vadd.s32 4294967294, %v2807_v5  ;;  %v11773_v56 = vmul.u32.u64.low %v2891_v62, %v2886_v43  ;;  %v11774_v63 = vmul.u32.u64.high %v2891_v62, %v2886_v43, %v11773_v56 }
 0x309   : > { %v11778_v28 = vsub.s32 32, %v11400_v9  ;;  %v11783_v57 = vsel %vm3686_vm11, %v11637_v53, 0  ;;  %v14664_v32 = vand.u32 2139095040, %v11283_v35  ;;  %v14298_v14 = vand.u32 2147483647, %v14665_v20 }
 0x30a   : > { %v11791_v30 = vshrl.u32 %v11661_v16, 5  ;;  %v11794_v12 = vadd.s32 4294967169, %v11665_v46  ;;  %vm8064_vm8 = vcmp.lt.s32.totalorder %v8063_v8, 0  ;;  %v2882_v0 = vsel %vm2876_vm5, %v2879_v52, %v2881_v50 }
 0x30b   : > { %v11787_v47 = vshrl.u32 %v14664_v32, 23  ;;  %vm2734_vm12 = vcmp.eq.s32.totalorder %v11731_v37, 2  ;;  %v2795_v53 = vadd.s32 %v11632_v51, %v11653_v13  ;;  %v2810_v48 = vsel %vm8064_vm8, 0, %v8063_v8 }
 0x30c   : > { %v11802_v11 = vadd.s32 3, %v11764_v38  ;;  %vm2900_vm2 = vc.u32 %v11771_v15, %v11773_v56  ;;  %vm2731_vm11 = vcmp.eq.s32.totalorder %v11731_v37, 0  ;;  %v2811_v46 = vsub.s32 32, %v2810_v48 }
 0x30d   : > { %v2815_v26 = vsub.s32 4294967266, %v2810_v48  ;;  %v2901_v33 = vadd.s32 1, %v11774_v63  ;;  %v2965_v2 = vshrl.u32 %v14442_v22, %v10498_v54  ;;  %vm2730_vm5 = vcmp.lt.s32.totalorder %v11731_v37, 2 }
 0x30e   : > { %v2812_v51 = vshll.u32 %v11733_v39, %v2810_v48  ;;  %v2898_v13 = vmul.u32 %v2891_v62, %v2882_v0  ;;  %v2954_v34 = vand.u32 8388607, %v14298_v14  ;;  %v2964_v43 = vshll.u32 %v14452_v61, %v10245_v45 }
 0x30f   : > { %vm14310_vm10 = vweird.f32 %v14641_v3  ;;  %v2813_v25 = vshrl.u32 %v2795_v53, %v2811_v46  ;;  %v2816_v58 = vadd.s32 127, %v2815_v26  ;;  %v2902_v5 = vsel %vm2900_vm2, %v2901_v33, %v11774_v63 }
 0x310   : > { %v2968_v52 = vshrl.u32 %v14443_v27, %v10498_v54  ;;  %v2903_v50 = vadd.s32 %v2902_v5, %v2898_v13  ;;  %v2963_v39 = vshrl.u32 %v14452_v61, %v10498_v54  ;;  %v2967_v62 = vshll.u32 %v14442_v22, %v10245_v45 }
 0x311   : > { %v2971_v29 = vshrl.u32 %v14454_v49, %v10498_v54  ;;  %v2814_v8 = vor.u32 %v2813_v25, %v2812_v51  ;;  %v2817_v32 = vshll.u32 %v2816_v58, 23  ;;  %v2966_v0 = vor.u32 %v2965_v2, %v2964_v43  ;;  %v11828_v63 = vpop.eup %8484 }
 0x312   : > { %v2974_v53 = vshrl.u32 %v14445_v6, %v10498_v54  ;;  %14666 = vst [vmem:[#allocation95_spill] sm:$0xff] %v11828_v63  ;;  %v2904_v48 = vadd.s32 536870912, %v2903_v50  ;;  %v2955_v46 = vor.u32 8388608, %v2954_v34  ;;  %v2970_v26 = vshll.u32 %v14443_v27, %v10245_v45  ;;  %v11834_v13 = vpop.eup %8486 }
 0x313   : > { %v2977_v33 = vshrl.u32 %v14455_v36, %v10498_v54  ;;  %14667 = vst [vmem:[#allocation96_spill] sm:$0xff] %v11834_v13  ;;  %v14302_v5 = vxor.u32 2147483648, %v11828_v63  ;;  %v2818_v51 = vor.u32 4788187, %v2817_v32  ;;  %v2969_v25 = vor.u32 %v2968_v52, %v2967_v62 }
 0x314   : > { %v2973_v2 = vshll.u32 %v14454_v49, %v10245_v45  ;;  %v14303_v43 = vxor.u32 2147483648, %v11834_v13  ;;  %v2905_v58 = vshrl.u32 %v2904_v48, 30  ;;  %v2972_v14 = vor.u32 %v2971_v29, %v2970_v26 }
 0x315   : > { %v2976_v34 = vshll.u32 %v14445_v6, %v10245_v45  ;;  %v2736_v54 = vsel %vm2734_vm12, %v14302_v5, %v11834_v13  ;;  %v2819_v55 = vand.u32 2147483647, %v2818_v51  ;;  %v2821_v21 = vcvt.s32.f32 %v2814_v8 }
 0x316   : > { %v2975_v32 = vor.u32 %v2974_v53, %v2973_v2  ;;  %v2733_v52 = vsel %vm2731_vm11, %v11828_v63, %v14303_v43  ;;  %v2906_v62 = vshll.u32 %v2905_v58, 30  ;;  %vm2979_vm6 = vcmp.lt.s32.totalorder %v10242_v17, 1 }
 0x317   : > { %v2978_v29 = vor.u32 %v2977_v33, %v2976_v34  ;;  %v2737_v45 = vsel %vm2730_vm5, %v2733_v52, %v2736_v54  ;;  %v2822_v48 = vmul.f32 %v2821_v21, %v2819_v55  ;;  %vm2980_vm8 = vcmp.lt.s32.totalorder %v10242_v17, 2 }
 0x318   : > { %vm2981_vm12 = vcmp.lt.s32.totalorder %v10242_v17, 3  ;;  %v2738_v8 = vsel %vm14310_vm10, nan, %v2737_v45  ;;  %v11859_v53 = vsub.s32 %v2903_v50, %v2906_v62  ;;  %vm2982_vm2 = vcmp.lt.s32.totalorder %v10242_v17, 4 }
 0x319   : > { %v2987_v26 = vsel %vm2979_vm6, %v2966_v0, %v2969_v25  ;;  %7385 = vrot.lane.b32.xlu0 %v2738_v8, %s8600_s22  ;;  %v2823_v33 = vxor.u32 2147483648, %v2822_v48  ;;  %v2929_v37 = vsub.s32 4, %v2905_v58  ;;  %v2984_v51 = vsel %vm2982_vm2, %v2972_v14, 2102212464 }
 0x31a   : > { %v2988_v55 = vsel %vm2982_vm2, %v2975_v32, 920167782  ;;  %v2909_v21 = vsub.s32 0, %v11859_v53  ;;  %v2983_v2 = vsel %vm2979_vm6, %v2963_v39, %v2966_v0  ;;  %v2991_v34 = vsel %vm2979_vm6, %v2969_v25, %v2972_v14 }
 0x31b   : > { %v2989_v50 = vsel %vm2981_vm12, %v2972_v14, %v2988_v55  ;;  %v2824_v54 = vsel %vm2741_vm3, %v2823_v33, %v2822_v48  ;;  %v2992_v62 = vsel %vm2982_vm2, %v2978_v29, 1326507024  ;;  %v2995_v45 = vshll.u32 %v2955_v46, 8 }
 0x31c   : > { %v2990_v52 = vsel %vm2980_vm8, %v2987_v26, %v2989_v50  ;;  %v2827_v8 = vsel %vm11719_vm1, %v14651_v42, %v2824_v54  ;;  %v8066_v39 = vmin.u32 %v2909_v21, %v11859_v53  ;;  %v2985_v0 = vsel %vm2981_vm12, %v2969_v25, %v2984_v51 }
 0x31d   : > { %v2993_v14 = vsel %vm2981_vm12, %v2975_v32, %v2992_v62  ;;  %8488 = vcosq.f32 %v2827_v8  ;;  %v11886_v33 = vmul.u32.u64.low %v2995_v45, %v2990_v52  ;;  %v11887_v26 = vmul.u32.u64.high %v2995_v45, %v2990_v52, %v11886_v33 }
 0x31e   : > { %v2994_v48 = vsel %vm2980_vm8, %v2991_v34, %v2993_v14  ;;  %8490 = vsinq.f32 %v2827_v8  ;;  %v11891_v23 = vand.u32 3, %v11802_v11  ;;  %vm2845_vm3 = vcmp.lt.s32.totalorder %v14658_v31, 0 }
 0x31f   : > { %v2911_v46 = vclz %v8066_v39  ;;  %v11895_v25 = vand.u32 31, %v11661_v16  ;;  %v2930_v32 = vsel %vm2845_vm3, %v2929_v37, %v2905_v58  ;;  %v11903_v55 = vand.u32 31, %v11783_v57 }
 0x320   : > { %v11899_v29 = vmul.u32.u64.low %v2995_v45, %v2994_v48  ;;  %v11900_v51 = vmul.u32.u64.high %v2995_v45, %v2994_v48, %v11899_v29  ;;  %v11906_v21 = vadd.s32 4294967169, %v11787_v47  ;;  %v2986_v50 = vsel %vm2980_vm8, %v2983_v2, %v2985_v0 }
 0x321   : > { %v8067_v11 = vadd.s32 4294967294, %v2911_v46  ;;  %v11911_v34 = vadd.s32 1, %v11794_v12  ;;  %v14668_v16 = vand.u32 2147483647, %v14658_v31  ;;  %v3005_v37 = vadd.s32 1, %v11887_v26 }
 0x322   : > { %v14304_v54 = vand.u32 2147483647, %v9138_v41  ;;  %vm2835_vm11 = vcmp.eq.s32.totalorder %v11891_v23, 0  ;;  %vm2838_vm5 = vcmp.eq.s32.totalorder %v11891_v23, 2  ;;  %vm2834_vm8 = vcmp.lt.s32.totalorder %v11891_v23, 2 }
 0x323   : > { %vm11915_vm1 = vcmp.le.f32.partialorder %v14668_v16, 0.7853982  ;;  %vm8068_vm6 = vcmp.lt.s32.totalorder %v8067_v11, 0  ;;  %v3002_v12 = vmul.u32 %v2995_v45, %v2986_v50  ;;  %vm3004_vm12 = vc.u32 %v11900_v51, %v11886_v33 }
 0x324   : > { %v11925_v17 = vsel %vm11915_vm1, 0, %v2930_v32  ;;  %v2914_v47 = vsel %vm8068_vm6, 0, %v8067_v11  ;;  %v3069_v2 = vshrl.u32 %v14442_v22, %v10501_v40  ;;  %vm14311_vm2 = vweird.f32 %v14651_v42 }
 0x325   : > { %14671 = vst [vmem:[#allocation97_spill] sm:$0xff] %v11925_v17  ;;  %v2899_v52 = vadd.s32 %v11773_v56, %v11771_v15  ;;  %v2915_v62 = vsub.s32 32, %v2914_v47  ;;  %v2919_v8 = vsub.s32 4294967266, %v2914_v47  ;;  %v3006_v39 = vsel %vm3004_vm12, %v3005_v37, %v11887_v26 }
 0x326   : > { %v2936_v0 = vadd.s32 3, %v11925_v17  ;;  %v3007_v14 = vadd.s32 %v3006_v39, %v3002_v12  ;;  %v11939_v45 = vand.u32 8388607, %v14304_v54  ;;  %v3068_v48 = vshll.u32 %v14452_v61, %v10253_v24 }
 0x327   : > { %v2916_v46 = vshll.u32 %v11859_v53, %v2914_v47  ;;  %v2917_v32 = vshrl.u32 %v2899_v52, %v2915_v62  ;;  %v2920_v29 = vadd.s32 127, %v2919_v8  ;;  %v3072_v15 = vshrl.u32 %v14443_v27, %v10501_v40  ;;  %v11946_v56 = vpop.eup %8488 }
 0x328   : > { %14672 = vst [vmem:[#allocation98_spill] sm:$0xff] %v11946_v56  ;;  %v3008_v26 = vadd.s32 536870912, %v3007_v14  ;;  %v3070_v11 = vor.u32 %v3069_v2, %v3068_v48  ;;  %v3071_v50 = vshll.u32 %v14442_v22, %v10253_v24  ;;  %v3075_v16 = vshrl.u32 %v14454_v49, %v10501_v40  ;;  %v11952_v37 = vpop.eup %8490 }
 0x329   : > { %14673 = vst [vmem:[#allocation99_spill] sm:$0xff] %v11952_v37  ;;  %v14305_v12 = vxor.u32 2147483648, %v11946_v56  ;;  %v2918_v53 = vor.u32 %v2917_v32, %v2916_v46  ;;  %v2921_v47 = vshll.u32 %v2920_v29, 23  ;;  %v3078_v52 = vshrl.u32 %v14445_v6, %v10501_v40 }
 0x32a   : > { %v14309_v62 = vxor.u32 2147483648, %v11952_v37  ;;  %vm2949_vm6 = vcmp.lt.s32.totalorder %v14665_v20, 0  ;;  %v3009_v2 = vshrl.u32 %v3008_v26, 30  ;;  %v3074_v8 = vshll.u32 %v14443_v27, %v10253_v24 }
 0x32b   : > { %v3081_v39 = vshrl.u32 %v14455_v36, %v10501_v40  ;;  %v2840_v48 = vsel %vm2838_vm5, %v14305_v12, %v11952_v37  ;;  %v2922_v46 = vor.u32 4788187, %v2921_v47  ;;  %v3073_v32 = vor.u32 %v3072_v15, %v3071_v50 }
 0x32c   : > { %v3077_v29 = vshll.u32 %v14454_v49, %v10253_v24  ;;  %v2837_v26 = vsel %vm2835_vm11, %v11946_v56, %v14309_v62  ;;  %v3010_v5 = vshll.u32 %v3009_v2, 30  ;;  %v3076_v43 = vor.u32 %v3075_v16, %v3074_v8 }
 0x32d   : > { %v3080_v54 = vshll.u32 %v14445_v6, %v10253_v24  ;;  %vm3790_vm12 = vcmp.gt.s32.totalorder %v11911_v34, 0  ;;  %v2841_v47 = vsel %vm2834_vm8, %v2837_v26, %v2840_v48  ;;  %v2923_v15 = vand.u32 2147483647, %v2922_v46 }
 0x32e   : > { %v2925_v50 = vcvt.s32.f32 %v2918_v53  ;;  %v3079_v12 = vor.u32 %v3078_v52, %v3077_v29  ;;  %v2842_v3 = vsel %vm14311_vm2, nan, %v2841_v47  ;;  %v11982_v63 = vand.u32 3, %v2936_v0 }
 0x32f   : > { %v14674_v62 = vand.u32 2147483647, %v14665_v20  ;;  %v11990_v24 = vsub.s32 %v3007_v14, %v3010_v5  ;;  %v3082_v8 = vor.u32 %v3081_v39, %v3080_v54  ;;  %7387 = vrot.lane.b32.xlu1 %v2842_v3, %s8600_s22  ;;  %v3033_v48 = vsub.s32 4, %v3009_v2 }
 0x330   : > { %v2926_v23 = vmul.f32 %v2925_v50, %v2923_v15  ;;  %v3059_v53 = vor.u32 8388608, %v11939_v45  ;;  %v3067_v52 = vshrl.u32 %v14452_v61, %v10501_v40  ;;  %vm3083_vm5 = vcmp.lt.s32.totalorder %v10250_v59, 1 }
 0x331   : > { %vm11986_vm11 = vcmp.le.f32.partialorder %v14674_v62, 0.7853982  ;;  %v3013_v0 = vsub.s32 0, %v11990_v24  ;;  %vm3085_vm8 = vcmp.lt.s32.totalorder %v10250_v59, 3  ;;  %vm3086_vm10 = vcmp.lt.s32.totalorder %v10250_v59, 4 }
 0x332   : > { %v2927_v5 = vxor.u32 2147483648, %v2926_v23  ;;  %v3088_v14 = vsel %vm3086_vm10, %v3076_v43, 2102212464  ;;  %v3091_v3 = vsel %vm3083_vm5, %v3070_v11, %v3073_v32  ;;  %v3092_v54 = vsel %vm3086_vm10, %v3079_v12, 920167782 }
 0x333   : > { %v8070_v62 = vmin.u32 %v3013_v0, %v11990_v24  ;;  %v3093_v45 = vsel %vm3085_vm8, %v3076_v43, %v3092_v54  ;;  %v3095_v40 = vsel %vm3083_vm5, %v3073_v32, %v3076_v43  ;;  %v3096_v39 = vsel %vm3086_vm10, %v3082_v8, 1326507024 }
 0x334   : > { %v2928_v46 = vsel %vm2845_vm3, %v2927_v5, %v2926_v23  ;;  %v3034_v29 = vsel %vm2949_vm6, %v3033_v48, %v3009_v2  ;;  %vm3084_vm2 = vcmp.lt.s32.totalorder %v10250_v59, 2  ;;  %v3097_v26 = vsel %vm3085_vm8, %v3079_v12, %v3096_v39 }
 0x335   : > { %v2931_v47 = vsel %vm11915_vm1, %v14658_v31, %v2928_v46  ;;  %v3015_v15 = vclz %v8070_v62  ;;  %v3094_v43 = vsel %vm3084_vm2, %v3091_v3, %v3093_v45  ;;  %v3099_v50 = vshll.u32 %v3059_v53, 8  ;;  %v14678_v46 = vld [vmem:[#allocation88_spill] sm:$0xff] }
 0x336   : > { %8492 = vcosq.f32 %v2931_v47  ;;  %v3087_v8 = vsel %vm3083_vm5, %v3067_v52, %v3070_v11  ;;  %v3089_v2 = vsel %vm3085_vm8, %v3073_v32, %v3088_v14  ;;  %v3098_v23 = vsel %vm3084_vm2, %v3095_v40, %v3097_v26 }
 0x337   : > { %8494 = vsinq.f32 %v2931_v47  ;;  %v8071_v12 = vadd.s32 4294967294, %v3015_v15  ;;  %v12025_v48 = vmul.u32.u64.low %v3099_v50, %v3098_v23  ;;  %v12026_v58 = vmul.u32.u64.high %v3099_v50, %v3098_v23, %v12025_v48 }
 0x338   : > { %v12030_v0 = vsel %vm11986_vm11, 0, %v3034_v29  ;;  %v12032_v53 = vmul.u32.u64.low %v3099_v50, %v3094_v43  ;;  %v12033_v5 = vmul.u32.u64.high %v3099_v50, %v3094_v43, %v12032_v53  ;;  %v14312_v11 = vand.u32 2147483647, %v9356_v4 }
 0x339   : > { %14677 = vst [vmem:[#allocation100_spill] sm:$0xff] %v12030_v0  ;;  %v12040_v32 = vsel %vm3790_vm12, %v11911_v34, 0  ;;  %v12043_v52 = vadd.s32 1, %v11906_v21  ;;  %vm8072_vm10 = vcmp.lt.s32.totalorder %v8071_v12, 0  ;;  %v3090_v14 = vsel %vm3084_vm2, %v3087_v8, %v3089_v2 }
 0x33a   : > { %vm2942_vm3 = vcmp.eq.s32.totalorder %v11982_v63, 2  ;;  %v3018_v3 = vsel %vm8072_vm10, 0, %v8071_v12  ;;  %v12050_v54 = vand.u32 8388607, %v14312_v11  ;;  %v3173_v62 = vshrl.u32 %v14442_v22, %v11123_v10 }
 0x33b   : > { %vm2939_vm1 = vcmp.eq.s32.totalorder %v11982_v63, 0  ;;  %v3003_v21 = vadd.s32 %v11886_v33, %v11900_v51  ;;  %v3019_v34 = vsub.s32 32, %v3018_v3  ;;  %v3023_v45 = vsub.s32 4294967266, %v3018_v3 }
 0x33c   : > { %v3040_v59 = vadd.s32 3, %v12030_v0  ;;  %vm2938_vm2 = vcmp.lt.s32.totalorder %v11982_v63, 2  ;;  %v3106_v40 = vmul.u32 %v3099_v50, %v3090_v14  ;;  %vm3108_vm12 = vc.u32 %v12026_v58, %v12032_v53 }
 0x33d   : > { %v3109_v39 = vadd.s32 1, %v12033_v5  ;;  %v3172_v29 = vshll.u32 %v14452_v61, %v14678_v46  ;;  %vm14334_vm5 = vweird.f32 %v14658_v31  ;;  %v3020_v26 = vshll.u32 %v11990_v24, %v3018_v3 }
 0x33e   : > { %v3021_v33 = vshrl.u32 %v3003_v21, %v3019_v34  ;;  %v3024_v51 = vadd.s32 127, %v3023_v45  ;;  %v3171_v47 = vshrl.u32 %v14452_v61, %v11123_v10  ;;  %v3163_v43 = vor.u32 8388608, %v12050_v54 }
 0x33f   : > { %v3110_v15 = vsel %vm3108_vm12, %v3109_v39, %v12033_v5  ;;  %v3174_v50 = vor.u32 %v3173_v62, %v3172_v29  ;;  %v3176_v8 = vshrl.u32 %v14443_v27, %v11123_v10  ;;  %v3175_v48 = vshll.u32 %v14442_v22, %v14678_v46 }
 0x340   : > { %v3022_v2 = vor.u32 %v3021_v33, %v3020_v26  ;;  %v3025_v23 = vshll.u32 %v3024_v51, 23  ;;  %v3111_v12 = vadd.s32 %v3110_v15, %v3106_v40  ;;  %v12074_v24 = vpop.eup %8492  ;;  %v3179_v14 = vshrl.u32 %v14454_v49, %v11123_v10 }
 0x341   : > { %14679 = vst [vmem:[#allocation88_spill] sm:$0xff] %v12074_v24  ;;  %v3181_v5 = vshll.u32 %v14454_v49, %v14678_v46  ;;  %v3182_v3 = vshrl.u32 %v14445_v6, %v11123_v10  ;;  %v3185_v54 = vshrl.u32 %v14455_v36, %v11123_v10  ;;  %v12084_v62 = vpop.eup %8494  ;;  %v14313_v21 = vxor.u32 2147483648, %v12074_v24 }
 0x342   : > { %14680 = vst [vmem:[#allocation101_spill] sm:$0xff] %v12084_v62  ;;  %v3026_v34 = vor.u32 4788187, %v3025_v23  ;;  %vm3053_vm8 = vcmp.lt.s32.totalorder %v9138_v41, 0  ;;  %v3112_v45 = vadd.s32 536870912, %v3111_v12  ;;  %v3178_v40 = vshll.u32 %v14443_v27, %v14678_v46 }
 0x343   : > { %v14314_v39 = vxor.u32 2147483648, %v12084_v62  ;;  %v3177_v29 = vor.u32 %v3176_v8, %v3175_v48  ;;  %v3183_v26 = vor.u32 %v3182_v3, %v3181_v5  ;;  %v3184_v33 = vshll.u32 %v14445_v6, %v14678_v46  ;;  %v14681_v46 = vld [vmem:[#allocation87_spill] sm:$0xff] }
 0x344   : > { %v2944_v10 = vsel %vm2942_vm3, %v14313_v21, %v12084_v62  ;;  %v3027_v51 = vand.u32 2147483647, %v3026_v34  ;;  %v3029_v15 = vcvt.s32.f32 %v3022_v2  ;;  %v3113_v23 = vshrl.u32 %v3112_v45, 30 }
 0x345   : > { %vm3894_vm10 = vcmp.gt.s32.totalorder %v12043_v52, 0  ;;  %v2941_v8 = vsel %vm2939_vm1, %v12074_v24, %v14314_v39  ;;  %v3180_v48 = vor.u32 %v3179_v14, %v3178_v40  ;;  %v3186_v5 = vor.u32 %v3185_v54, %v3184_v33 }
 0x346   : > { %vm3187_vm12 = vcmp.lt.s32.totalorder %v14681_v46, 1  ;;  %v2945_v3 = vsel %vm2938_vm2, %v2941_v8, %v2944_v10  ;;  %v3030_v11 = vmul.f32 %v3029_v15, %v3027_v51  ;;  %v3114_v21 = vshll.u32 %v3113_v23, 30 }
 0x347   : > { %vm3190_vm3 = vcmp.lt.s32.totalorder %v14681_v46, 4  ;;  %v2946_v2 = vsel %vm14334_vm5, nan, %v2945_v3  ;;  %v3137_v34 = vsub.s32 4, %v3113_v23  ;;  %v3195_v45 = vsel %vm3187_vm12, %v3174_v50, %v3177_v29 }
 0x348   : > { %v3196_v14 = vsel %vm3190_vm3, %v3183_v26, 920167782  ;;  %7389 = vrot.lane.b32.xlu0 %v2946_v2, %s8600_s22  ;;  %v3031_v54 = vxor.u32 2147483648, %v3030_v11  ;;  %v12115_v40 = vand.u32 3, %v3040_v59  ;;  %v12117_v63 = vsub.s32 %v3111_v12, %v3114_v21 }
 0x349   : > { %vm3189_vm1 = vcmp.lt.s32.totalorder %v14681_v46, 3  ;;  %vm3188_vm2 = vcmp.lt.s32.totalorder %v14681_v46, 2  ;;  %v3191_v33 = vsel %vm3187_vm12, %v3171_v47, %v3174_v50  ;;  %v3192_v10 = vsel %vm3190_vm3, %v3180_v48, 2102212464 }
 0x34a   : > { %v3197_v51 = vsel %vm3189_vm1, %v3180_v48, %v3196_v14  ;;  %v3032_v15 = vsel %vm2949_vm6, %v3031_v54, %v3030_v11  ;;  %v3117_v59 = vsub.s32 0, %v12117_v63  ;;  %v3199_v21 = vsel %vm3187_vm12, %v3177_v29, %v3180_v48 }
 0x34b   : > { %v3198_v12 = vsel %vm3188_vm2, %v3195_v45, %v3197_v51  ;;  %v3035_v47 = vsel %vm11986_vm11, %v14665_v20, %v3032_v15  ;;  %v3138_v50 = vsel %vm3053_vm8, %v3137_v34, %v3113_v23  ;;  %v3200_v8 = vsel %vm3190_vm3, %v3186_v5, 1326507024 }
 0x34c   : > { %v3203_v3 = vshll.u32 %v3163_v43, 8  ;;  %8496 = vcosq.f32 %v3035_v47  ;;  %v8074_v11 = vmin.u32 %v3117_v59, %v12117_v63  ;;  %v3193_v2 = vsel %vm3189_vm1, %v3177_v29, %v3192_v10 }
 0x34d   : > { %v3201_v48 = vsel %vm3189_vm1, %v3183_v26, %v3200_v8  ;;  %8498 = vsinq.f32 %v3035_v47  ;;  %v12153_v23 = vsub.s32 32, %v11895_v25  ;;  %v12156_v43 = vshrl.u32 %v11783_v57, 5 }
 0x34e   : > { %v3202_v16 = vsel %vm3188_vm2, %v3199_v21, %v3201_v48  ;;  %v12148_v45 = vmul.u32.u64.low %v3203_v3, %v3198_v12  ;;  %v12149_v14 = vmul.u32.u64.high %v3203_v3, %v3198_v12, %v12148_v45  ;;  %v14682_v5 = vand.u32 2147483647, %v9138_v41  ;;  %v14688_v48 = vld [vmem:[#allocation60_spill] sm:$0xff] }
 0x34f   : > { %v3119_v26 = vclz %v8074_v11  ;;  %v3194_v54 = vsel %vm3188_vm2, %v3191_v33, %v3193_v2  ;;  %v12170_v10 = vmul.u32.u64.low %v3203_v3, %v3202_v16  ;;  %v12171_v51 = vmul.u32.u64.high %v3203_v3, %v3202_v16, %v12170_v10  ;;  %v14686_v33 = vld [vmem:[#allocation77_spill] sm:$0xff] }
 0x350   : > { %vm12160_vm6 = vcmp.le.f32.partialorder %v14682_v5, 0.7853982  ;;  %v12174_v57 = vsub.s32 32, %v11903_v55  ;;  %v12177_v15 = vand.u32 31, %v12040_v32  ;;  %v12182_v59 = vsel %vm3894_vm10, %v12043_v52, 0  ;;  %v14687_v11 = vld [vmem:[#allocation89_spill] sm:$0xff] }
 0x351   : > { %v12166_v34 = vsel %vm12160_vm6, 0, %v3138_v50  ;;  %v8075_v12 = vadd.s32 4294967294, %v3119_v26  ;;  %vm3043_vm11 = vcmp.eq.s32.totalorder %v12115_v40, 0  ;;  %vm3046_vm12 = vcmp.eq.s32.totalorder %v12115_v40, 2 }
 0x352   : > { %14685 = vst [vmem:[#allocation87_spill] sm:$0xff] %v12166_v34  ;;  %v3213_v46 = vadd.s32 1, %v12149_v14  ;;  %v14319_v21 = vand.u32 2147483647, %v14686_v33  ;;  %vm3042_vm3 = vcmp.lt.s32.totalorder %v12115_v40, 2  ;;  %v3107_v47 = vadd.s32 %v12032_v53, %v12026_v58 }
 0x353   : > { %vm8076_vm1 = vcmp.lt.s32.totalorder %v8075_v12, 0  ;;  %v3144_v50 = vadd.s32 3, %v12166_v34  ;;  %v3210_v8 = vmul.u32 %v3203_v3, %v3194_v54  ;;  %vm14338_vm10 = vweird.f32 %v14665_v20 }
 0x354   : > { %v3122_v52 = vsel %vm8076_vm1, 0, %v8075_v12  ;;  %vm3212_vm2 = vc.u32 %v12171_v51, %v12148_v45  ;;  %v3276_v2 = vshll.u32 %v14452_v61, %v14687_v11  ;;  %v3277_v16 = vshrl.u32 %v14442_v22, %v14688_v48 }
 0x355   : > { %v3123_v5 = vsub.s32 32, %v3122_v52  ;;  %v3127_v26 = vsub.s32 4294967266, %v3122_v52  ;;  %v3214_v58 = vsel %vm3212_vm2, %v3213_v46, %v12149_v14  ;;  %v3280_v53 = vshrl.u32 %v14443_v27, %v14688_v48 }
 0x356   : > { %v3215_v3 = vadd.s32 %v3214_v58, %v3210_v8  ;;  %v3266_v54 = vand.u32 8388607, %v14319_v21  ;;  %v3279_v10 = vshll.u32 %v14442_v22, %v14687_v11  ;;  %v3282_v12 = vshll.u32 %v14443_v27, %v14687_v11  ;;  %v12208_v39 = vpop.eup %8496 }
 0x357   : > { %14689 = vst [vmem:[#allocation89_spill] sm:$0xff] %v12208_v39  ;;  %v3124_v31 = vshll.u32 %v12117_v63, %v3122_v52  ;;  %v3125_v34 = vshrl.u32 %v3107_v47, %v3123_v5  ;;  %v3128_v24 = vadd.s32 127, %v3127_v26  ;;  %vm3157_vm1 = vcmp.lt.s32.totalorder %v9356_v4, 0  ;;  %v12214_v46 = vpop.eup %8498 }
 0x358   : > { %v3283_v14 = vshrl.u32 %v14454_v49, %v14688_v48  ;;  %14690 = vst [vmem:[#allocation60_spill] sm:$0xff] %v12214_v46  ;;  %v14325_v8 = vxor.u32 2147483648, %v12208_v39  ;;  %v3216_v58 = vadd.s32 536870912, %v3215_v3  ;;  %v3278_v21 = vor.u32 %v3277_v16, %v3276_v2 }
 0x359   : > { %v3286_v62 = vshrl.u32 %v14445_v6, %v14688_v48  ;;  %v14329_v13 = vxor.u32 2147483648, %v12214_v46  ;;  %v3126_v17 = vor.u32 %v3125_v34, %v3124_v31  ;;  %v3129_v63 = vshll.u32 %v3128_v24, 23 }
 0x35a   : > { %v3281_v47 = vor.u32 %v3280_v53, %v3279_v10  ;;  %v3048_v52 = vsel %vm3046_vm12, %v14325_v8, %v12214_v46  ;;  %v3217_v5 = vshrl.u32 %v3216_v58, 30  ;;  %v3285_v26 = vshll.u32 %v14454_v49, %v14687_v11 }
 0x35b   : > { %v3289_v2 = vshrl.u32 %v14455_v36, %v14688_v48  ;;  %v3045_v31 = vsel %vm3043_vm11, %v12208_v39, %v14329_v13  ;;  %v3130_v24 = vor.u32 4788187, %v3129_v63  ;;  %v14691_v34 = vand.u32 2147483647, %v9356_v4 }
 0x35c   : > { %v3284_v53 = vor.u32 %v3283_v14, %v3282_v12  ;;  %v3288_v10 = vshll.u32 %v14445_v6, %v14687_v11  ;;  %v3049_v58 = vsel %vm3042_vm3, %v3045_v31, %v3048_v52  ;;  %v3218_v8 = vshll.u32 %v3217_v5, 30  ;;  %v14694_v52 = vld [vmem:[#allocation56_spill] sm:$0xff] }
 0x35d   : > { %vm12236_vm2 = vcmp.le.f32.partialorder %v14691_v34, 0.7853982  ;;  %v3241_v42 = vsub.s32 4, %v3217_v5  ;;  %v3287_v46 = vor.u32 %v3286_v62, %v3285_v26  ;;  %v3050_v13 = vsel %vm14338_vm10, nan, %v3049_v58 }
 0x35e   : > { %v3131_v63 = vand.u32 2147483647, %v3130_v24  ;;  %v3133_v39 = vcvt.s32.f32 %v3126_v17  ;;  %v3290_v56 = vor.u32 %v3289_v2, %v3288_v10  ;;  %7391 = vrot.lane.b32.xlu1 %v3050_v13, %s8600_s22  ;;  %v12247_v34 = vand.u32 3, %v3144_v50 }
 0x35f   : > { %v12249_v12 = vsub.s32 %v3215_v3, %v3218_v8  ;;  %v3267_v14 = vor.u32 8388608, %v3266_v54  ;;  %v3275_v40 = vshrl.u32 %v14452_v61, %v14688_v48  ;;  %vm3291_vm11 = vcmp.lt.s32.totalorder %v14694_v52, 1 }
 0x360   : > { %v3134_v11 = vmul.f32 %v3133_v39, %v3131_v63  ;;  %vm3293_vm12 = vcmp.lt.s32.totalorder %v14694_v52, 3  ;;  %vm3294_vm3 = vcmp.lt.s32.totalorder %v14694_v52, 4  ;;  %v3242_v13 = vsel %vm3157_vm1, %v3241_v42, %v3217_v5 }
 0x361   : > { %v3221_v17 = vsub.s32 0, %v12249_v12  ;;  %v3299_v62 = vsel %vm3291_vm11, %v3278_v21, %v3281_v47  ;;  %v3300_v50 = vsel %vm3294_vm3, %v3287_v46, 920167782  ;;  %v3303_v39 = vsel %vm3291_vm11, %v3281_v47, %v3284_v53 }
 0x362   : > { %v3135_v3 = vxor.u32 2147483648, %v3134_v11  ;;  %v3301_v48 = vsel %vm3293_vm12, %v3284_v53, %v3300_v50  ;;  %v3304_v54 = vsel %vm3294_vm3, %v3290_v56, 1326507024  ;;  %vm3292_vm5 = vcmp.lt.s32.totalorder %v14694_v52, 2 }
 0x363   : > { %v8078_v8 = vmin.u32 %v3221_v17, %v12249_v12  ;;  %v3296_v26 = vsel %vm3294_vm3, %v3284_v53, 2102212464  ;;  %v3305_v42 = vsel %vm3293_vm12, %v3287_v46, %v3304_v54  ;;  %v3302_v2 = vsel %vm3292_vm5, %v3299_v62, %v3301_v48 }
 0x364   : > { %v3136_v5 = vsel %vm3053_vm8, %v3135_v3, %v3134_v11  ;;  %v3306_v31 = vsel %vm3292_vm5, %v3303_v39, %v3305_v42  ;;  %v3307_v24 = vshll.u32 %v3267_v14, 8  ;;  %v12280_v53 = vsel %vm12236_vm2, 0, %v3242_v13 }
 0x365   : > { %v3139_v56 = vsel %vm12160_vm6, %v9138_v41, %v3136_v5  ;;  %v3223_v10 = vclz %v8078_v8  ;;  %14695 = vst [vmem:[#allocation56_spill] sm:$0xff] %v12280_v53  ;;  %v3295_v46 = vsel %vm3291_vm11, %v3275_v40, %v3278_v21  ;;  %v3297_v58 = vsel %vm3293_vm12, %v3281_v47, %v3296_v26  ;;  %v14696_v40 = vld [vmem:[#allocation27_spill] sm:$0xff] }
 0x366   : > { %8500 = vcosq.f32 %v3139_v56  ;;  %v12286_v63 = vmul.u32.u64.low %v3307_v24, %v3306_v31  ;;  %v12287_v11 = vmul.u32.u64.high %v3307_v24, %v3306_v31, %v12286_v63  ;;  %v12294_v62 = vshrl.u32 %v12040_v32, 5 }
 0x367   : > { %8502 = vsinq.f32 %v3139_v56  ;;  %v8079_v14 = vadd.s32 4294967294, %v3223_v10  ;;  %v12289_v17 = vmul.u32.u64.low %v3307_v24, %v3302_v2  ;;  %v12290_v29 = vmul.u32.u64.high %v3307_v24, %v3302_v2, %v12289_v17 }
 0x368   : > { %v12297_v13 = vshrl.u32 %v12182_v59, 5  ;;  %v12300_v21 = vand.u32 31, %v12182_v59  ;;  %v14335_v47 = vand.u32 2147483647, %v14696_v40  ;;  %v12304_v50 = vsub.s32 32, %v12177_v15 }
 0x369   : > { %v12308_v3 = vshll.u32 %v14454_v49, %v12177_v15  ;;  %vm8080_vm8 = vcmp.lt.s32.totalorder %v8079_v14, 0  ;;  %v3298_v32 = vsel %vm3292_vm5, %v3295_v46, %v3297_v58  ;;  %vm3150_vm6 = vcmp.eq.s32.totalorder %v12247_v34, 2 }
 0x36a   : > { %v3211_v48 = vadd.s32 %v12148_v45, %v12171_v51  ;;  %v3226_v59 = vsel %vm8080_vm8, 0, %v8079_v14  ;;  %v12316_v39 = vadd.s32 3, %v12280_v53  ;;  %vm3316_vm11 = vc.u32 %v12287_v11, %v12289_v17 }
 0x36b   : > { %vm3147_vm12 = vcmp.eq.s32.totalorder %v12247_v34, 0  ;;  %v3227_v54 = vsub.s32 32, %v3226_v59  ;;  %v3231_v8 = vsub.s32 4294967266, %v3226_v59  ;;  %v3317_v26 = vadd.s32 1, %v12290_v29 }
 0x36c   : > { %v3381_v52 = vshrl.u32 %v14442_v22, %v11656_v19  ;;  %vm3146_vm5 = vcmp.lt.s32.totalorder %v12247_v34, 2  ;;  %v3228_v45 = vshll.u32 %v12249_v12, %v3226_v59  ;;  %v3314_v51 = vmul.u32 %v3307_v24, %v3298_v32 }
 0x36d   : > { %v3370_v42 = vand.u32 8388607, %v14335_v47  ;;  %v3380_v5 = vshll.u32 %v14452_v61, %v11392_v44  ;;  %vm14356_vm3 = vweird.f32 %v9138_v41  ;;  %v3229_v2 = vshrl.u32 %v3211_v48, %v3227_v54 }
 0x36e   : > { %v3232_v31 = vadd.s32 127, %v3231_v8  ;;  %v3318_v56 = vsel %vm3316_vm11, %v3317_v26, %v12290_v29  ;;  %v3384_v10 = vshrl.u32 %v14443_v27, %v11656_v19  ;;  %v3379_v12 = vshrl.u32 %v14452_v61, %v11656_v19 }
 0x36f   : > { %v3319_v46 = vadd.s32 %v3318_v56, %v3314_v51  ;;  %v3383_v24 = vshll.u32 %v14442_v22, %v11392_v44  ;;  %v3387_v58 = vshrl.u32 %v14454_v49, %v11656_v19  ;;  %v3230_v63 = vor.u32 %v3229_v2, %v3228_v45 }
 0x370   : > { %v3233_v14 = vshll.u32 %v3232_v31, 23  ;;  %v3382_v32 = vor.u32 %v3381_v52, %v3380_v5  ;;  %v3390_v48 = vshrl.u32 %v14445_v6, %v11656_v19  ;;  %v12342_v29 = vpop.eup %8500  ;;  %v3371_v54 = vor.u32 8388608, %v3370_v42 }
 0x371   : > { %14697 = vst [vmem:[#allocation27_spill] sm:$0xff] %v12342_v29  ;;  %v3320_v59 = vadd.s32 536870912, %v3319_v46  ;;  %v3386_v8 = vshll.u32 %v14443_v27, %v11392_v44  ;;  %v3393_v26 = vshrl.u32 %v14455_v36, %v11656_v19  ;;  %v12348_v51 = vpop.eup %8502  ;;  %v14339_v56 = vxor.u32 2147483648, %v12342_v29 }
 0x372   : > { %14698 = vst [vmem:[#allocation102_spill] sm:$0xff] %v12348_v51  ;;  %v3234_v45 = vor.u32 4788187, %v3233_v14  ;;  %v3385_v2 = vor.u32 %v3384_v10, %v3383_v24  ;;  %v3389_v52 = vshll.u32 %v14454_v49, %v11392_v44  ;;  %v14340_v5 = vxor.u32 2147483648, %v12348_v51 }
 0x373   : > { %v3321_v31 = vshrl.u32 %v3320_v59, 30  ;;  %v3388_v47 = vor.u32 %v3387_v58, %v3386_v8  ;;  %v3392_v42 = vshll.u32 %v14445_v6, %v11392_v44  ;;  %v3152_v19 = vsel %vm3150_vm6, %v14339_v56, %v12348_v51  ;;  %v14699_v59 = vld [vmem:[#allocation72_spill] sm:$0xff] }
 0x374   : > { %v3235_v20 = vand.u32 2147483647, %v3234_v45  ;;  %v3237_v53 = vcvt.s32.f32 %v3230_v63  ;;  %v3391_v14 = vor.u32 %v3390_v48, %v3389_v52  ;;  %v3149_v10 = vsel %vm3147_vm12, %v12342_v29, %v14340_v5 }
 0x375   : > { %v3322_v24 = vshll.u32 %v3321_v31, 30  ;;  %v3394_v58 = vor.u32 %v3393_v26, %v3392_v42  ;;  %vm3395_vm8 = vcmp.lt.s32.totalorder %v14699_v59, 1  ;;  %v3153_v44 = vsel %vm3146_vm5, %v3149_v10, %v3152_v19 }
 0x376   : > { %v3238_v8 = vmul.f32 %v3237_v53, %v3235_v20  ;;  %vm3396_vm11 = vcmp.lt.s32.totalorder %v14699_v59, 2  ;;  %vm3397_vm6 = vcmp.lt.s32.totalorder %v14699_v59, 3  ;;  %v3154_v63 = vsel %vm14356_vm3, nan, %v3153_v44 }
 0x377   : > { %v12373_v48 = vsub.s32 %v3319_v46, %v3322_v24  ;;  %vm3398_vm10 = vcmp.lt.s32.totalorder %v14699_v59, 4  ;;  %v3403_v26 = vsel %vm3395_vm8, %v3382_v32, %v3385_v2  ;;  %7393 = vrot.lane.b32.xlu0 %v3154_v63, %s8600_s22  ;;  %v3345_v34 = vsub.s32 4, %v3321_v31 }
 0x378   : > { %v3239_v45 = vxor.u32 2147483648, %v3238_v8  ;;  %v3400_v52 = vsel %vm3398_vm10, %v3388_v47, 2102212464  ;;  %v3404_v20 = vsel %vm3398_vm10, %v3391_v14, 920167782  ;;  %v3399_v42 = vsel %vm3395_vm8, %v3379_v12, %v3382_v32 }
 0x379   : > { %v3325_v53 = vsub.s32 0, %v12373_v48  ;;  %v3405_v46 = vsel %vm3397_vm6, %v3388_v47, %v3404_v20  ;;  %v3407_v19 = vsel %vm3395_vm8, %v3385_v2, %v3388_v47  ;;  %v3408_v44 = vsel %vm3398_vm10, %v3394_v58, 1326507024 }
 0x37a   : > { %v3240_v10 = vsel %vm3157_vm1, %v3239_v45, %v3238_v8  ;;  %v3406_v24 = vsel %vm3396_vm11, %v3403_v26, %v3405_v46  ;;  %v3411_v63 = vshll.u32 %v3371_v54, 8  ;;  %v3401_v32 = vsel %vm3397_vm6, %v3385_v2, %v3400_v52 }
 0x37b   : > { %v3243_v56 = vsel %vm12236_vm2, %v9356_v4, %v3240_v10  ;;  %v8082_v12 = vmin.u32 %v3325_v53, %v12373_v48  ;;  %v3409_v47 = vsel %vm3397_vm6, %v3391_v14, %v3408_v44  ;;  %v12405_v16 = vand.u32 3, %v12316_v39  ;;  %v14703_v10 = vld [vmem:[#allocation10_spill] sm:$0xff] }
 0x37c   : > { %8504 = vcosq.f32 %v3243_v56  ;;  %v3410_v8 = vsel %vm3396_vm11, %v3407_v19, %v3409_v47  ;;  %v12400_v45 = vmul.u32.u64.low %v3411_v63, %v3406_v24  ;;  %v12401_v26 = vmul.u32.u64.high %v3411_v63, %v3406_v24, %v12400_v45 }
 0x37d   : > { %8506 = vsinq.f32 %v3243_v56  ;;  %vm3261_vm10 = vcmp.lt.s32.totalorder %v14686_v33, 0  ;;  %v3327_v54 = vclz %v8082_v12  ;;  %v12410_v2 = vshll.u32 %v14445_v6, %v12177_v15 }
 0x37e   : > { %v3346_v14 = vsel %vm3261_vm10, %v3345_v34, %v3321_v31  ;;  %v12414_v58 = vmul.u32.u64.low %v3411_v63, %v3410_v8  ;;  %v12415_v52 = vmul.u32.u64.high %v3411_v63, %v3410_v8, %v12414_v58  ;;  %v12419_v20 = vshrl.u32 %v14445_v6, %v12304_v50 }
 0x37f   : > { %v12422_v39 = vsub.s32 32, %v12300_v21  ;;  %v8083_v56 = vadd.s32 4294967294, %v3327_v54  ;;  %v3402_v53 = vsel %vm3396_vm11, %v3399_v42, %v3401_v32  ;;  %v12428_v46 = vshrl.u32 %v14455_v36, %v12304_v50 }
 0x380   : > { %v14700_v31 = vand.u32 2147483647, %v14686_v33  ;;  %v3421_v19 = vadd.s32 1, %v12401_v26  ;;  %v14341_v24 = vand.u32 2147483647, %v14703_v10  ;;  %vm3251_vm2 = vcmp.eq.s32.totalorder %v12405_v16, 0 }
 0x381   : > { %vm3254_vm12 = vcmp.eq.s32.totalorder %v12405_v16, 2  ;;  %vm8084_vm5 = vcmp.lt.s32.totalorder %v8083_v56, 0  ;;  %vm3250_vm8 = vcmp.lt.s32.totalorder %v12405_v16, 2  ;;  %v3418_v44 = vmul.u32 %v3411_v63, %v3402_v53 }
 0x382   : > { %vm12432_vm1 = vcmp.le.f32.partialorder %v14700_v31, 0.7853982  ;;  %v3330_v42 = vsel %vm8084_vm5, 0, %v8083_v56  ;;  %vm3420_vm11 = vc.u32 %v12415_v52, %v12400_v45  ;;  %v3485_v12 = vshrl.u32 %v14442_v22, %v11778_v28 }
 0x383   : > { %v12442_v59 = vsel %vm12432_vm1, 0, %v3346_v14  ;;  %vm14358_vm6 = vweird.f32 %v9356_v4  ;;  %v3315_v32 = vadd.s32 %v12289_v17, %v12287_v11  ;;  %v3331_v47 = vsub.s32 32, %v3330_v42 }
 0x384   : > { %14704 = vst [vmem:[#allocation72_spill] sm:$0xff] %v12442_v59  ;;  %v3335_v8 = vsub.s32 4294967266, %v3330_v42  ;;  %v3422_v54 = vsel %vm3420_vm11, %v3421_v19, %v12401_v26  ;;  %v3352_v14 = vadd.s32 3, %v12442_v59  ;;  %v12456_v63 = vand.u32 8388607, %v14341_v24 }
 0x385   : > { %v3423_v58 = vadd.s32 %v3422_v54, %v3418_v44  ;;  %v3484_v56 = vshll.u32 %v14452_v61, %v11400_v9  ;;  %v3332_v53 = vshll.u32 %v12373_v48, %v3330_v42  ;;  %v3333_v31 = vshrl.u32 %v3315_v32, %v3331_v47 }
 0x386   : > { %v3336_v5 = vadd.s32 127, %v3335_v8  ;;  %v3488_v11 = vshrl.u32 %v14443_v27, %v11778_v28  ;;  %v12463_v17 = vpop.eup %8504  ;;  %v3487_v44 = vshll.u32 %v14442_v22, %v11400_v9  ;;  %v3491_v54 = vshrl.u32 %v14454_v49, %v11778_v28 }
 0x387   : > { %v3424_v26 = vadd.s32 536870912, %v3423_v58  ;;  %v3486_v19 = vor.u32 %v3485_v12, %v3484_v56  ;;  %v12469_v24 = vpop.eup %8506  ;;  %v14352_v41 = vxor.u32 2147483648, %v12463_v17  ;;  %v3334_v48 = vor.u32 %v3333_v31, %v3332_v53 }
 0x388   : > { %14705 = vst [vmem:[#allocation10_spill] sm:$0xff] %v12469_v24  ;;  %v3337_v42 = vshll.u32 %v3336_v5, 23  ;;  %v3494_v32 = vshrl.u32 %v14445_v6, %v11778_v28  ;;  %vm3365_vm5 = vcmp.lt.s32.totalorder %v14696_v40, 0  ;;  %v3490_v8 = vshll.u32 %v14443_v27, %v11400_v9 }
 0x389   : > { %v3425_v12 = vshrl.u32 %v3424_v26, 30  ;;  %v3497_v56 = vshrl.u32 %v14455_v36, %v11778_v28  ;;  %v3256_v5 = vsel %vm3254_vm12, %v14352_v41, %v12469_v24  ;;  %v3489_v31 = vor.u32 %v3488_v11, %v3487_v44 }
 0x38a   : > { %v3338_v53 = vor.u32 4788187, %v3337_v42  ;;  %v3493_v47 = vshll.u32 %v14454_v49, %v11400_v9  ;;  %v14706_v29 = vxor.u32 2147483648, %v12469_v24  ;;  %v3492_v59 = vor.u32 %v3491_v54, %v3490_v8 }
 0x38b   : > { %v3426_v51 = vshll.u32 %v3425_v12, 30  ;;  %v3496_v37 = vshll.u32 %v14445_v6, %v11400_v9  ;;  %v3341_v42 = vcvt.s32.f32 %v3334_v48  ;;  %v12498_v0 = vand.u32 3, %v3352_v14 }
 0x38c   : > { %v3253_v26 = vsel %vm3251_vm2, %v12463_v17, %v14706_v29  ;;  %v3339_v41 = vand.u32 2147483647, %v3338_v53  ;;  %v3495_v11 = vor.u32 %v3494_v32, %v3493_v47  ;;  %v14707_v24 = vand.u32 2147483647, %v14696_v40  ;;  %v14710_v32 = vld [vmem:[#allocation69_spill] sm:$0xff] }
 0x38d   : > { %v3257_v7 = vsel %vm3250_vm8, %v3253_v26, %v3256_v5  ;;  %v12506_v54 = vsub.s32 %v3423_v58, %v3426_v51  ;;  %v3498_v9 = vor.u32 %v3497_v56, %v3496_v37  ;;  %v3449_v8 = vsub.s32 4, %v3425_v12 }
 0x38e   : > { %v3258_v44 = vsel %vm14358_vm6, nan, %v3257_v7  ;;  %vm12502_vm12 = vcmp.le.f32.partialorder %v14707_v24, 0.7853982  ;;  %v3342_v16 = vmul.f32 %v3341_v42, %v3339_v41  ;;  %v3475_v48 = vor.u32 8388608, %v12456_v63 }
 0x38f   : > { %7395 = vrot.lane.b32.xlu1 %v3258_v44, %s8600_s22  ;;  %v3483_v7 = vshrl.u32 %v14452_v61, %v11778_v28  ;;  %v3429_v14 = vsub.s32 0, %v12506_v54  ;;  %vm3499_vm2 = vcmp.lt.s32.totalorder %v14710_v32, 1  ;;  %vm3501_vm8 = vcmp.lt.s32.totalorder %v14710_v32, 3 }
 0x390   : > { %vm3502_vm11 = vcmp.lt.s32.totalorder %v14710_v32, 4  ;;  %v3343_v51 = vxor.u32 2147483648, %v3342_v16  ;;  %v3507_v37 = vsel %vm3499_vm2, %v3486_v19, %v3489_v31  ;;  %v3511_v28 = vsel %vm3499_vm2, %v3489_v31, %v3492_v59 }
 0x391   : > { %v3504_v24 = vsel %vm3502_vm11, %v3492_v59, 2102212464  ;;  %v3508_v41 = vsel %vm3502_vm11, %v3495_v11, 920167782  ;;  %v8086_v58 = vmin.u32 %v3429_v14, %v12506_v54  ;;  %v3512_v47 = vsel %vm3502_vm11, %v3498_v9, 1326507024 }
 0x392   : > { %v3509_v63 = vsel %vm3501_vm8, %v3492_v59, %v3508_v41  ;;  %v3344_v56 = vsel %vm3261_vm10, %v3343_v51, %v3342_v16  ;;  %v3450_v5 = vsel %vm3365_vm5, %v3449_v8, %v3425_v12  ;;  %vm3500_vm3 = vcmp.lt.s32.totalorder %v14710_v32, 2 }
 0x393   : > { %v3513_v53 = vsel %vm3501_vm8, %v3495_v11, %v3512_v47  ;;  %v3347_v26 = vsel %vm12432_vm1, %v14686_v33, %v3344_v56  ;;  %v3431_v42 = vclz %v8086_v58  ;;  %v3510_v59 = vsel %vm3500_vm3, %v3507_v37, %v3509_v63 }
 0x394   : > { %v3515_v44 = vshll.u32 %v3475_v48, 8  ;;  %8508 = vcosq.f32 %v3347_v26  ;;  %v3503_v9 = vsel %vm3499_vm2, %v3483_v7, %v3486_v19  ;;  %v3505_v12 = vsel %vm3501_vm8, %v3489_v31, %v3504_v24  ;;  %v14712_v19 = vld [vmem:[#allocation52_spill] sm:$0xff] }
 0x395   : > { %v3514_v16 = vsel %vm3500_vm3, %v3511_v28, %v3513_v53  ;;  %8510 = vsinq.f32 %v3347_v26  ;;  %v8087_v11 = vadd.s32 4294967294, %v3431_v42  ;;  %v12546_v14 = vsel %vm12502_vm12, 0, %v3450_v5 }
 0x396   : > { %v12541_v8 = vmul.u32.u64.low %v3515_v44, %v3514_v16  ;;  %v12542_v34 = vmul.u32.u64.high %v3515_v44, %v3514_v16, %v12541_v8  ;;  %14711 = vst [vmem:[#allocation69_spill] sm:$0xff] %v12546_v14  ;;  %v12548_v48 = vmul.u32.u64.low %v3515_v44, %v3510_v59  ;;  %v12549_v51 = vmul.u32.u64.high %v3515_v44, %v3510_v59, %v12548_v48 }
 0x397   : > { %v14357_v7 = vand.u32 2147483647, %v14712_v19  ;;  %v12555_v31 = vor.u32 %v12419_v20, %v12308_v3  ;;  %v3810_v24 = vor.u32 %v12428_v46, %v12410_v2  ;;  %vm8088_vm10 = vcmp.lt.s32.totalorder %v8087_v11, 0 }
 0x398   : > { %v3506_v37 = vsel %vm3500_vm3, %v3503_v9, %v3505_v12  ;;  %vm3358_vm1 = vcmp.eq.s32.totalorder %v12498_v0, 2  ;;  %v3434_v41 = vsel %vm8088_vm10, 0, %v8087_v11  ;;  %v3589_v63 = vshrl.u32 %v14442_v22, %v12153_v23 }
 0x399   : > { %v12564_v58 = vand.u32 8388607, %v14357_v7  ;;  %vm3355_vm2 = vcmp.eq.s32.totalorder %v12498_v0, 0  ;;  %v3419_v3 = vadd.s32 %v12400_v45, %v12415_v52  ;;  %v3435_v20 = vsub.s32 32, %v3434_v41 }
 0x39a   : > { %v3439_v28 = vsub.s32 4294967266, %v3434_v41  ;;  %v3456_v32 = vadd.s32 3, %v12546_v14  ;;  %vm3354_vm3 = vcmp.lt.s32.totalorder %v12498_v0, 2  ;;  %v3522_v47 = vmul.u32 %v3515_v44, %v3506_v37 }
 0x39b   : > { %vm3524_vm8 = vc.u32 %v12542_v34, %v12548_v48  ;;  %v3525_v56 = vadd.s32 1, %v12549_v51  ;;  %v3588_v5 = vshll.u32 %v14452_v61, %v11895_v25  ;;  %vm14359_vm11 = vweird.f32 %v14686_v33 }
 0x39c   : > { %v3436_v53 = vshll.u32 %v12506_v54, %v3434_v41  ;;  %v3437_v45 = vshrl.u32 %v3419_v3, %v3435_v20  ;;  %v3440_v52 = vadd.s32 127, %v3439_v28  ;;  %v3587_v26 = vshrl.u32 %v14452_v61, %v12153_v23 }
 0x39d   : > { %v3526_v42 = vsel %vm3524_vm8, %v3525_v56, %v12549_v51  ;;  %v3579_v59 = vor.u32 8388608, %v12564_v58  ;;  %v3590_v44 = vor.u32 %v3589_v63, %v3588_v5  ;;  %v3592_v9 = vshrl.u32 %v14443_v27, %v12153_v23 }
 0x39e   : > { %v3438_v12 = vor.u32 %v3437_v45, %v3436_v53  ;;  %v3441_v16 = vshll.u32 %v3440_v52, 23  ;;  %v3527_v11 = vadd.s32 %v3526_v42, %v3522_v47  ;;  %v3591_v8 = vshll.u32 %v14442_v22, %v11895_v25  ;;  %v12588_v54 = vpop.eup %8508 }
 0x39f   : > { %14713 = vst [vmem:[#allocation52_spill] sm:$0xff] %v12588_v54  ;;  %v3595_v37 = vshrl.u32 %v14454_v49, %v12153_v23  ;;  %v3597_v51 = vshll.u32 %v14454_v49, %v11895_v25  ;;  %v3598_v41 = vshrl.u32 %v14445_v6, %v12153_v23  ;;  %v3601_v58 = vshrl.u32 %v14455_v36, %v12153_v23  ;;  %v12598_v63 = vpop.eup %8510 }
 0x3a0   : > { %14714 = vst [vmem:[#allocation103_spill] sm:$0xff] %v12598_v63  ;;  %v14360_v3 = vxor.u32 2147483648, %v12588_v54  ;;  %v3442_v20 = vor.u32 4788187, %v3441_v16  ;;  %vm3469_vm10 = vcmp.lt.s32.totalorder %v14703_v10, 0  ;;  %v3528_v28 = vadd.s32 536870912, %v3527_v11 }
 0x3a1   : > { %v3594_v47 = vshll.u32 %v14443_v27, %v11895_v25  ;;  %v14361_v56 = vxor.u32 2147483648, %v12598_v63  ;;  %v3593_v5 = vor.u32 %v3592_v9, %v3591_v8  ;;  %v3599_v53 = vor.u32 %v3598_v41, %v3597_v51 }
 0x3a2   : > { %v3600_v45 = vshll.u32 %v14445_v6, %v11895_v25  ;;  %v3360_v23 = vsel %vm3358_vm1, %v14360_v3, %v12598_v63  ;;  %v3443_v52 = vand.u32 2147483647, %v3442_v20  ;;  %v3445_v42 = vcvt.s32.f32 %v3438_v12 }
 0x3a3   : > { %v3529_v16 = vshrl.u32 %v3528_v28, 30  ;;  %v3357_v7 = vsel %vm3355_vm2, %v12588_v54, %v14361_v56  ;;  %v3596_v9 = vor.u32 %v3595_v37, %v3594_v47  ;;  %vm3603_vm8 = vcmp.lt.s32.totalorder %v11791_v30, 1 }
 0x3a4   : > { %v3602_v8 = vor.u32 %v3601_v58, %v3600_v45  ;;  %v3361_v25 = vsel %vm3354_vm3, %v3357_v7, %v3360_v23  ;;  %v3446_v51 = vmul.f32 %v3445_v42, %v3443_v52  ;;  %vm3606_vm1 = vcmp.lt.s32.totalorder %v11791_v30, 4 }
 0x3a5   : > { %v3530_v41 = vshll.u32 %v3529_v16, 30  ;;  %vm3814_vm6 = vcmp.lt.s32.totalorder %v12294_v62, 4  ;;  %v3362_v12 = vsel %vm14359_vm11, nan, %v3361_v25  ;;  %v3553_v20 = vsub.s32 4, %v3529_v16 }
 0x3a6   : > { %v3611_v28 = vsel %vm3603_vm8, %v3590_v44, %v3593_v5  ;;  %v3612_v37 = vsel %vm3606_vm1, %v3599_v53, 920167782  ;;  %7397 = vrot.lane.b32.xlu0 %v3362_v12, %s8600_s22  ;;  %v3447_v0 = vxor.u32 2147483648, %v3446_v51  ;;  %v12629_v7 = vand.u32 3, %v3456_v32 }
 0x3a7   : > { %v12631_v58 = vsub.s32 %v3527_v11, %v3530_v41  ;;  %vm3605_vm2 = vcmp.lt.s32.totalorder %v11791_v30, 3  ;;  %vm3604_vm3 = vcmp.lt.s32.totalorder %v11791_v30, 2  ;;  %v3607_v47 = vsel %vm3603_vm8, %v3587_v26, %v3590_v44 }
 0x3a8   : > { %v3608_v45 = vsel %vm3606_vm1, %v3596_v9, 2102212464  ;;  %v3613_v23 = vsel %vm3605_vm2, %v3596_v9, %v3612_v37  ;;  %v3448_v52 = vsel %vm3365_vm5, %v3447_v0, %v3446_v51  ;;  %v3615_v42 = vsel %vm3603_vm8, %v3593_v5, %v3596_v9 }
 0x3a9   : > { %v3533_v32 = vsub.s32 0, %v12631_v58  ;;  %v3614_v11 = vsel %vm3604_vm3, %v3611_v28, %v3613_v23  ;;  %v3451_v26 = vsel %vm12502_vm12, %v14696_v40, %v3448_v52  ;;  %v3554_v44 = vsel %vm3469_vm10, %v3553_v20, %v3529_v16 }
 0x3aa   : > { %v3616_v25 = vsel %vm3606_vm1, %v3602_v8, 1326507024  ;;  %v3619_v41 = vshll.u32 %v3579_v59, 8  ;;  %8512 = vcosq.f32 %v3451_v26  ;;  %v3609_v12 = vsel %vm3605_vm2, %v3593_v5, %v3608_v45 }
 0x3ab   : > { %v8090_v51 = vmin.u32 %v3533_v32, %v12631_v58  ;;  %v3617_v9 = vsel %vm3605_vm2, %v3599_v53, %v3616_v25  ;;  %8514 = vsinq.f32 %v3451_v26  ;;  %v12668_v59 = vshll.u32 %v14454_v49, %v12300_v21  ;;  %v14719_v25 = vld [vmem:[#allocation14_spill] sm:$0xff] }
 0x3ac   : > { %v3618_v29 = vsel %vm3604_vm3, %v3615_v42, %v3617_v9  ;;  %v12662_v28 = vmul.u32.u64.low %v3619_v41, %v3614_v11  ;;  %v12663_v37 = vmul.u32.u64.high %v3619_v41, %v3614_v11, %v12662_v28  ;;  %v12672_v16 = vshll.u32 %v14445_v6, %v12300_v21 }
 0x3ad   : > { %v14715_v5 = vand.u32 2147483647, %v14703_v10  ;;  %v3535_v8 = vclz %v8090_v51  ;;  %v12682_v20 = vshrl.u32 %v14445_v6, %v12422_v39  ;;  %v12694_v52 = vsel %vm3814_vm6, %v12555_v31, 920167782 }
 0x3ae   : > { %v12688_v45 = vmul.u32.u64.low %v3619_v41, %v3618_v29  ;;  %v12689_v23 = vmul.u32.u64.high %v3619_v41, %v3618_v29, %v12688_v45  ;;  %v12698_v32 = vshrl.u32 %v14455_v36, %v12422_v39  ;;  %v3610_v42 = vsel %vm3604_vm3, %v3607_v47, %v3609_v12 }
 0x3af   : > { %vm12676_vm5 = vcmp.le.f32.partialorder %v14715_v5, 0.7853982  ;;  %v8091_v11 = vadd.s32 4294967294, %v3535_v8  ;;  %v12707_v26 = vsel %vm3814_vm6, %v3810_v24, 1326507024  ;;  %vm3459_vm12 = vcmp.eq.s32.totalorder %v12629_v7, 0 }
 0x3b0   : > { %v12686_v0 = vsel %vm12676_vm5, 0, %v3554_v44  ;;  %v3629_v44 = vadd.s32 1, %v12663_v37  ;;  %v14362_v51 = vand.u32 2147483647, %v14719_v25  ;;  %vm3458_vm8 = vcmp.lt.s32.totalorder %v12629_v7, 2 }
 0x3b1   : > { %14718 = vst [vmem:[#allocation104_spill] sm:$0xff] %v12686_v0  ;;  %vm3462_vm1 = vcmp.eq.s32.totalorder %v12629_v7, 2  ;;  %v3523_v30 = vadd.s32 %v12548_v48, %v12542_v34  ;;  %vm8092_vm2 = vcmp.lt.s32.totalorder %v8091_v11, 0  ;;  %v12717_v2 = vadd.s32 3, %v12686_v0 }
 0x3b2   : > { %vm14375_vm3 = vweird.f32 %v14696_v40  ;;  %v3538_v46 = vsel %vm8092_vm2, 0, %v8091_v11  ;;  %v3626_v24 = vmul.u32 %v3619_v41, %v3610_v42  ;;  %vm3628_vm11 = vc.u32 %v12689_v23, %v12662_v28 }
 0x3b3   : > { %v3692_v47 = vshll.u32 %v14452_v61, %v11903_v55  ;;  %v3539_v12 = vsub.s32 32, %v3538_v46  ;;  %v3543_v9 = vsub.s32 4294967266, %v3538_v46  ;;  %v3630_v29 = vsel %vm3628_vm11, %v3629_v44, %v12663_v37 }
 0x3b4   : > { %v3693_v34 = vshrl.u32 %v14442_v22, %v12174_v57  ;;  %v3631_v48 = vadd.s32 %v3630_v29, %v3626_v24  ;;  %v3682_v5 = vand.u32 8388607, %v14362_v51  ;;  %v3695_v41 = vshll.u32 %v14442_v22, %v11903_v55  ;;  %v12733_v45 = vpop.eup %8512 }
 0x3b5   : > { %v3696_v8 = vshrl.u32 %v14443_v27, %v12174_v57  ;;  %v3540_v11 = vshll.u32 %v12631_v58, %v3538_v46  ;;  %v3541_v42 = vshrl.u32 %v3523_v30, %v3539_v12  ;;  %v3544_v3 = vadd.s32 127, %v3543_v9  ;;  %v12738_v44 = vpop.eup %8514 }
 0x3b6   : > { %v3699_v37 = vshrl.u32 %v14454_v49, %v12174_v57  ;;  %14720 = vst [vmem:[#allocation14_spill] sm:$0xff] %v12738_v44  ;;  %v14368_v24 = vxor.u32 2147483648, %v12733_v45  ;;  %v3632_v29 = vadd.s32 536870912, %v3631_v48  ;;  %v3698_v56 = vshll.u32 %v14443_v27, %v11903_v55 }
 0x3b7   : > { %v3702_v51 = vshrl.u32 %v14445_v6, %v12174_v57  ;;  %v14374_v33 = vxor.u32 2147483648, %v12738_v44  ;;  %v3542_v54 = vor.u32 %v3541_v42, %v3540_v11  ;;  %v3545_v58 = vshll.u32 %v3544_v3, 23 }
 0x3b8   : > { %v3694_v30 = vor.u32 %v3693_v34, %v3692_v47  ;;  %v3464_v46 = vsel %vm3462_vm1, %v14368_v24, %v12738_v44  ;;  %v3633_v12 = vshrl.u32 %v3632_v29, 30  ;;  %v3701_v9 = vshll.u32 %v14454_v49, %v11903_v55 }
 0x3b9   : > { %v3705_v63 = vshrl.u32 %v14455_v36, %v12174_v57  ;;  %v3461_v3 = vsel %vm3459_vm12, %v12733_v45, %v14374_v33  ;;  %v3546_v47 = vor.u32 4788187, %v3545_v58  ;;  %v3700_v34 = vor.u32 %v3699_v37, %v3698_v56 }
 0x3ba   : > { %v3704_v11 = vshll.u32 %v14445_v6, %v11903_v55  ;;  %v3465_v42 = vsel %vm3458_vm8, %v3461_v3, %v3464_v46  ;;  %v3634_v29 = vshll.u32 %v3633_v12, 30  ;;  %v3697_v24 = vor.u32 %v3696_v8, %v3695_v41 }
 0x3bb   : > { %v3703_v0 = vor.u32 %v3702_v51, %v3701_v9  ;;  %v3466_v36 = vsel %vm14375_vm3, nan, %v3465_v42  ;;  %v3547_v4 = vand.u32 2147483647, %v3546_v47  ;;  %v3549_v44 = vcvt.s32.f32 %v3542_v54 }
 0x3bc   : > { %v3706_v14 = vor.u32 %v3705_v63, %v3704_v11  ;;  %7399 = vrot.lane.b32.xlu1 %v3466_v36, %s8600_s22  ;;  %v12767_v33 = vsub.s32 %v3631_v48, %v3634_v29  ;;  %v3683_v56 = vor.u32 8388608, %v3682_v5  ;;  %v3691_v6 = vshrl.u32 %v14452_v61, %v12174_v57 }
 0x3bd   : > { %vm3710_vm11 = vcmp.lt.s32.totalorder %v12156_v43, 4  ;;  %v3550_v55 = vmul.f32 %v3549_v44, %v3547_v4  ;;  %vm3707_vm12 = vcmp.lt.s32.totalorder %v12156_v43, 1  ;;  %vm3708_vm8 = vcmp.lt.s32.totalorder %v12156_v43, 2 }
 0x3be   : > { %v3712_v7 = vsel %vm3710_vm11, %v3700_v34, 2102212464  ;;  %v3637_v51 = vsub.s32 0, %v12767_v33  ;;  %vm3709_vm1 = vcmp.lt.s32.totalorder %v12156_v43, 3  ;;  %v3715_v54 = vsel %vm3707_vm12, %v3694_v30, %v3697_v24 }
 0x3bf   : > { %v3716_v63 = vsel %vm3710_vm11, %v3703_v0, 920167782  ;;  %v3551_v48 = vxor.u32 2147483648, %v3550_v55  ;;  %v3719_v5 = vsel %vm3707_vm12, %v3697_v24, %v3700_v34  ;;  %v3720_v8 = vsel %vm3710_vm11, %v3706_v14, 1326507024 }
 0x3c0   : > { %v3717_v41 = vsel %vm3709_vm1, %v3700_v34, %v3716_v63  ;;  %v8094_v57 = vmin.u32 %v3637_v51, %v12767_v33  ;;  %v3711_v37 = vsel %vm3707_vm12, %v3691_v6, %v3694_v30  ;;  %v3713_v58 = vsel %vm3709_vm1, %v3697_v24, %v3712_v7 }
 0x3c1   : > { %v3721_v4 = vsel %vm3709_vm1, %v3703_v0, %v3720_v8  ;;  %v3552_v44 = vsel %vm3469_vm10, %v3551_v48, %v3550_v55  ;;  %v3718_v46 = vsel %vm3708_vm8, %v3715_v54, %v3717_v41  ;;  %v3723_v3 = vshll.u32 %v3683_v56, 8 }
 0x3c2   : > { %v3722_v9 = vsel %vm3708_vm8, %v3719_v5, %v3721_v4  ;;  %v3555_v47 = vsel %vm12676_vm5, %v14703_v10, %v3552_v44  ;;  %vm3573_vm2 = vcmp.lt.s32.totalorder %v14712_v19, 0  ;;  %v3639_v14 = vclz %v8094_v57 }
 0x3c3   : > { %v3657_v30 = vsub.s32 4, %v3633_v12  ;;  %8516 = vcosq.f32 %v3555_v47  ;;  %v3714_v0 = vsel %vm3708_vm8, %v3711_v37, %v3713_v58  ;;  %v3561_v53 = vand.u32 3, %v12717_v2 }
 0x3c4   : > { %v12789_v24 = vmul.u32.u64.low %v3723_v3, %v3722_v9  ;;  %v12790_v34 = vmul.u32.u64.high %v3723_v3, %v3722_v9, %v12789_v24  ;;  %8518 = vsinq.f32 %v3555_v47  ;;  %v8095_v11 = vadd.s32 4294967294, %v3639_v14 }
 0x3c5   : > { %v12792_v42 = vmul.u32.u64.low %v3723_v3, %v3718_v46  ;;  %v12793_v29 = vmul.u32.u64.high %v3723_v3, %v3718_v46, %v12792_v42  ;;  %v14721_v36 = vand.u32 2147483647, %v14712_v19  ;;  %v3627_v43 = vadd.s32 %v12662_v28, %v12689_v23 }
 0x3c6   : > { %v3779_v6 = vand.u32 2147483647, %v11279_v1  ;;  %vm8096_vm5 = vcmp.lt.s32.totalorder %v8095_v11, 0  ;;  %v3658_v55 = vsel %vm3573_vm2, %v3657_v30, %v3633_v12  ;;  %v3730_v7 = vmul.u32 %v3723_v3, %v3714_v0 }
 0x3c7   : > { %vm12799_vm10 = vcmp.le.f32.partialorder %v14721_v36, 0.7853982  ;;  %v3797_v51 = vshrl.u32 %v14442_v22, %v12304_v50  ;;  %v3642_v2 = vsel %vm8096_vm5, 0, %v8095_v11  ;;  %vm3732_vm11 = vc.u32 %v12790_v34, %v12792_v42 }
 0x3c8   : > { %v3796_v54 = vshll.u32 %v14452_v61, %v12177_v15  ;;  %v3799_v28 = vshll.u32 %v14442_v22, %v12177_v15  ;;  %v3643_v23 = vsub.s32 32, %v3642_v2  ;;  %v3644_v63 = vshll.u32 %v12767_v33, %v3642_v2 }
 0x3c9   : > { %v3647_v48 = vsub.s32 4294967266, %v3642_v2  ;;  %v3733_v12 = vadd.s32 1, %v12793_v29  ;;  %vm3562_vm12 = vcmp.lt.s32.totalorder %v3561_v53, 2  ;;  %v3786_v41 = vand.u32 8388607, %v3779_v6 }
 0x3ca   : > { %v3798_v5 = vor.u32 %v3797_v51, %v3796_v54  ;;  %v3800_v8 = vshrl.u32 %v14443_v27, %v12304_v50  ;;  %v3802_v57 = vshll.u32 %v14443_v27, %v12177_v15  ;;  %vm14377_vm8 = vweird.f32 %v14703_v10 }
 0x3cb   : > { %v3645_v37 = vshrl.u32 %v3627_v43, %v3643_v23  ;;  %v3648_v58 = vadd.s32 127, %v3647_v48  ;;  %v3734_v33 = vsel %vm3732_vm11, %v3733_v12, %v12793_v29  ;;  %v3803_v4 = vshrl.u32 %v14454_v49, %v12304_v50 }
 0x3cc   : > { %vm3563_vm1 = vcmp.eq.s32.totalorder %v3561_v53, 0  ;;  %vm3566_vm5 = vcmp.eq.s32.totalorder %v3561_v53, 2  ;;  %v3735_v44 = vadd.s32 %v3734_v33, %v3730_v7  ;;  %v3801_v46 = vor.u32 %v3800_v8, %v3799_v28 }
 0x3cd   : > { %v3646_v9 = vor.u32 %v3645_v37, %v3644_v63  ;;  %v3649_v3 = vshll.u32 %v3648_v58, 23  ;;  %v12830_v47 = vsel %vm12799_vm10, 0, %v3658_v55  ;;  %v3804_v15 = vor.u32 %v3803_v4, %v3802_v57  ;;  %v12832_v14 = vpop.eup %8516 }
 0x3ce   : > { %v3736_v30 = vadd.s32 536870912, %v3735_v44  ;;  %v3787_v0 = vor.u32 8388608, %v3786_v41  ;;  %v3795_v24 = vshrl.u32 %v14452_v61, %v12304_v50  ;;  %vm3811_vm11 = vcmp.lt.s32.totalorder %v12294_v62, 1  ;;  %v12837_v11 = vpop.eup %8518 }
 0x3cf   : > { %v3567_v29 = vxor.u32 2147483648, %v12832_v14  ;;  %v3650_v36 = vor.u32 4788187, %v3649_v3  ;;  %vm3813_vm3 = vcmp.lt.s32.totalorder %v12294_v62, 3  ;;  %v3819_v43 = vsel %vm3811_vm11, %v3798_v5, %v3801_v46 }
 0x3d0   : > { %v3564_v55 = vxor.u32 2147483648, %v12837_v11  ;;  %v12844_v7 = vshrl.u32 %v3736_v30, 30  ;;  %vm3812_vm14 = vcmp.lt.s32.totalorder %v12294_v62, 2  ;;  %v3821_v50 = vsel %vm3813_vm3, %v3804_v15, %v12694_v52 }
 0x3d1   : > { %v3568_v51 = vsel %vm3566_vm5, %v3567_v29, %v12837_v11  ;;  %v3651_v2 = vand.u32 2147483647, %v3650_v36  ;;  %v3653_v54 = vcvt.s32.f32 %v3646_v9  ;;  %v3816_v28 = vsel %vm3814_vm6, %v3804_v15, 2102212464 }
 0x3d2   : > { %v3565_v23 = vsel %vm3563_vm1, %v12832_v14, %v3564_v55  ;;  %v3738_v63 = vshll.u32 %v12844_v7, 30  ;;  %v3822_v52 = vsel %vm3812_vm14, %v3819_v43, %v3821_v50  ;;  %v3823_v48 = vsel %vm3811_vm11, %v3801_v46, %v3804_v15 }
 0x3d3   : > { %v3569_v12 = vsel %vm3562_vm12, %v3565_v23, %v3568_v51  ;;  %v3654_v41 = vmul.f32 %v3653_v54, %v3651_v2  ;;  %v3825_v8 = vsel %vm3813_vm3, %v12555_v31, %v12707_v26  ;;  %v3827_v57 = vshll.u32 %v3787_v0, 8 }
 0x3d4   : > { %v3570_v37 = vsel %vm14377_vm8, nan, %v3569_v12  ;;  %v3664_v58 = vadd.s32 3, %v12830_v47  ;;  %v12873_v33 = vsub.s32 %v3735_v44, %v3738_v63  ;;  %v3826_v4 = vsel %vm3812_vm14, %v3823_v48, %v3825_v8 }
 0x3d5   : > { %7401 = vrot.lane.b32.xlu0 %v3570_v37, %s8600_s22  ;;  %v3655_v53 = vxor.u32 2147483648, %v3654_v41  ;;  %v3815_v9 = vsel %vm3811_vm11, %v3795_v24, %v3798_v5  ;;  %v12880_v3 = vmul.u32.u64.low %v3827_v57, %v3826_v4  ;;  %v12881_v15 = vmul.u32.u64.high %v3827_v57, %v3826_v4, %v12880_v3 }
 0x3d6   : > { %v3741_v31 = vsub.s32 0, %v12873_v33  ;;  %v3817_v26 = vsel %vm3813_vm3, %v3801_v46, %v3816_v28  ;;  %v12886_v30 = vmul.u32.u64.low %v3827_v57, %v3822_v52  ;;  %v12887_v44 = vmul.u32.u64.high %v3827_v57, %v3822_v52, %v12886_v30 }
 0x3d7   : > { %v3911_v0 = vor.u32 %v12682_v20, %v12668_v59  ;;  %v3914_v36 = vor.u32 %v12698_v32, %v12672_v16  ;;  %v3656_v5 = vsel %vm3573_vm2, %v3655_v53, %v3654_v41  ;;  %v3883_v46 = vand.u32 2147483647, %v11283_v35 }
 0x3d8   : > { %v3659_v24 = vsel %vm12799_vm10, %v14712_v19, %v3656_v5  ;;  %v8098_v43 = vmin.u32 %v3741_v31, %v12873_v33  ;;  %v12901_v50 = vand.u32 3, %v3664_v58  ;;  %v3818_v59 = vsel %vm3812_vm14, %v3815_v9, %v3817_v26 }
 0x3d9   : > { %8520 = vcosq.f32 %v3659_v24  ;;  %vm3918_vm6 = vcmp.lt.s32.totalorder %v12297_v13, 4  ;;  %vm3836_vm3 = vc.u32 %v12881_v15, %v12886_v30  ;;  %v3837_v56 = vadd.s32 1, %v12887_v44 }
 0x3da   : > { %8522 = vsinq.f32 %v3659_v24  ;;  %v3743_v16 = vclz %v8098_v43  ;;  %v3924_v20 = vsel %vm3918_vm6, %v3911_v0, 920167782  ;;  %v3928_v32 = vsel %vm3918_vm6, %v3914_v36, 1326507024 }
 0x3db   : > { %v3834_v2 = vmul.u32 %v3827_v57, %v3818_v59  ;;  %v3890_v62 = vand.u32 8388607, %v3883_v46  ;;  %v3901_v54 = vshrl.u32 %v14442_v22, %v12422_v39  ;;  %vm3670_vm14 = vcmp.eq.s32.totalorder %v12901_v50, 2 }
 0x3dc   : > { %v8099_v51 = vadd.s32 4294967294, %v3743_v16  ;;  %v3838_v28 = vsel %vm3836_vm3, %v3837_v56, %v12887_v44  ;;  %v3900_v23 = vshll.u32 %v14452_v61, %v12300_v21  ;;  %v3903_v63 = vshll.u32 %v14442_v22, %v12300_v21 }
 0x3dd   : > { %v3904_v52 = vshrl.u32 %v14443_v27, %v12422_v39  ;;  %vm3667_vm2 = vcmp.eq.s32.totalorder %v12901_v50, 0  ;;  %v3731_v48 = vadd.s32 %v12792_v42, %v12790_v34  ;;  %v3839_v12 = vadd.s32 %v3838_v28, %v3834_v2 }
 0x3de   : > { %vm8100_vm10 = vcmp.lt.s32.totalorder %v8099_v51, 0  ;;  %v3907_v41 = vshrl.u32 %v14454_v49, %v12422_v39  ;;  %vm3666_vm12 = vcmp.lt.s32.totalorder %v12901_v50, 2  ;;  %v3902_v57 = vor.u32 %v3901_v54, %v3900_v23 }
 0x3df   : > { %v3746_v8 = vsel %vm8100_vm10, 0, %v8099_v51  ;;  %v3905_v37 = vor.u32 %v3904_v52, %v3903_v63  ;;  %v3906_v22 = vshll.u32 %v14443_v27, %v12300_v21  ;;  %vm14378_vm1 = vweird.f32 %v14712_v19 }
 0x3e0   : > { %v3747_v58 = vsub.s32 32, %v3746_v8  ;;  %v3751_v4 = vsub.s32 4294967266, %v3746_v8  ;;  %v3840_v53 = vadd.s32 536870912, %v3839_v12  ;;  %v3899_v34 = vshrl.u32 %v14452_v61, %v12422_v39 }
 0x3e1   : > { %v3748_v42 = vshll.u32 %v12873_v33, %v3746_v8  ;;  %v3891_v9 = vor.u32 8388608, %v3890_v62  ;;  %v3908_v49 = vor.u32 %v3907_v41, %v3906_v22  ;;  %vm3915_vm5 = vcmp.lt.s32.totalorder %v12297_v13, 1 }
 0x3e2   : > { %v3749_v3 = vshrl.u32 %v3731_v48, %v3747_v58  ;;  %v3752_v31 = vadd.s32 127, %v3751_v4  ;;  %v12938_v26 = vshrl.u32 %v3840_v53, 30  ;;  %vm3917_vm11 = vcmp.lt.s32.totalorder %v12297_v13, 3 }
 0x3e3   : > { %v12941_v27 = vpop.eup %8520  ;;  %v3923_v21 = vsel %vm3915_vm5, %v3902_v57, %v3905_v37  ;;  %v3925_v61 = vsel %vm3917_vm11, %v3908_v49, %v3924_v20  ;;  %v3927_v39 = vsel %vm3915_vm5, %v3905_v37, %v3908_v49  ;;  %v3929_v33 = vsel %vm3917_vm11, %v3911_v0, %v3928_v32 }
 0x3e4   : > { %v12951_v44 = vpop.eup %8522  ;;  %v3671_v36 = vxor.u32 2147483648, %v12941_v27  ;;  %v3750_v5 = vor.u32 %v3749_v3, %v3748_v42  ;;  %v3753_v24 = vshll.u32 %v3752_v31, 23  ;;  %v3842_v43 = vshll.u32 %v12938_v26, 30 }
 0x3e5   : > { %v3668_v59 = vxor.u32 2147483648, %v12951_v44  ;;  %v3761_v16 = vsub.s32 4, %v12844_v7  ;;  %vm3916_vm3 = vcmp.lt.s32.totalorder %v12297_v13, 2  ;;  %v3919_v20 = vsel %vm3915_vm5, %v3899_v34, %v3902_v57 }
 0x3e6   : > { %v3672_v0 = vsel %vm3670_vm14, %v3671_v36, %v12951_v44  ;;  %v3754_v32 = vor.u32 4788187, %v3753_v24  ;;  %v3843_v56 = vsub.s32 %v3839_v12, %v3842_v43  ;;  %v3920_v51 = vsel %vm3918_vm6, %v3908_v49, 2102212464 }
 0x3e7   : > { %v3669_v2 = vsel %vm3667_vm2, %v12941_v27, %v3668_v59  ;;  %v3926_v62 = vsel %vm3916_vm3, %v3923_v21, %v3925_v61  ;;  %v3930_v54 = vsel %vm3916_vm3, %v3927_v39, %v3929_v33  ;;  %v3931_v28 = vshll.u32 %v3891_v9, 8 }
 0x3e8   : > { %v3673_v23 = vsel %vm3666_vm12, %v3669_v2, %v3672_v0  ;;  %v3755_v63 = vand.u32 2147483647, %v3754_v32  ;;  %v3757_v52 = vcvt.s32.f32 %v3750_v5  ;;  %v3845_v48 = vsub.s32 0, %v3843_v56 }
 0x3e9   : > { %v3674_v12 = vsel %vm14378_vm1, nan, %v3673_v23  ;;  %v3921_v41 = vsel %vm3917_vm11, %v3905_v37, %v3920_v51  ;;  %v12982_v8 = vmul.u32.u64.low %v3931_v28, %v3930_v54  ;;  %v12983_v57 = vmul.u32.u64.high %v3931_v28, %v3930_v54, %v12982_v8 }
 0x3ea   : > { %7403 = vrot.lane.b32.xlu1 %v3674_v12, %s8600_s22  ;;  %v3758_v22 = vmul.f32 %v3757_v52, %v3755_v63  ;;  %v8102_v58 = vmin.u32 %v3845_v48, %v3843_v56  ;;  %v12986_v4 = vmul.u32.u64.low %v3931_v28, %v3926_v62  ;;  %v12987_v53 = vmul.u32.u64.high %v3931_v28, %v3926_v62, %v12986_v4 }
 0x3eb   : > { %vm3677_vm6 = vcmp.lt.s32.totalorder %v14719_v25, 0  ;;  %v3922_v42 = vsel %vm3916_vm3, %v3919_v20, %v3921_v41  ;;  %v14724_v37 = vand.u32 2147483647, %v14719_v25  ;;  %v3865_v12 = vsub.s32 4, %v12938_v26 }
 0x3ec   : > { %v3759_v50 = vxor.u32 2147483648, %v3758_v22  ;;  %v3847_v34 = vclz %v8102_v58  ;;  %v3762_v9 = vsel %vm3677_vm6, %v3761_v16, %v12844_v7  ;;  %vm3940_vm2 = vc.u32 %v12983_v57, %v12986_v4 }
 0x3ed   : > { %vm3676_vm14 = vcmp.le.f32.partialorder %v14724_v37, 0.7853982  ;;  %v3941_v31 = vadd.s32 1, %v12987_v53  ;;  %v3938_v61 = vmul.u32 %v3931_v28, %v3922_v42  ;;  %v3835_v7 = vadd.s32 %v12886_v30, %v12881_v15 }
 0x3ee   : > { %v3760_v49 = vsel %vm3677_vm6, %v3759_v50, %v3758_v22  ;;  %v8103_v3 = vadd.s32 4294967294, %v3847_v34  ;;  %v13001_v39 = vsel %vm3676_vm14, 0, %v3762_v9  ;;  %vm3781_vm11 = vcmp.lt.s32.totalorder %v11279_v1, 0 }
 0x3ef   : > { %v3763_v21 = vsel %vm3676_vm14, %v14719_v25, %v3760_v49  ;;  %v3942_v13 = vsel %vm3940_vm2, %v3941_v31, %v12987_v53  ;;  %v3768_v20 = vadd.s32 3, %v13001_v39  ;;  %v3866_v37 = vsel %vm3781_vm11, %v3865_v12, %v12938_v26 }
 0x3f0   : > { %8524 = vcosq.f32 %v3763_v21  ;;  %vm8104_vm10 = vcmp.lt.s32.totalorder %v8103_v3, 0  ;;  %v3943_v5 = vadd.s32 %v3942_v13, %v3938_v61  ;;  %vm14379_vm6 = vweird.f32 %v14719_v25 }
 0x3f1   : > { %8526 = vsinq.f32 %v3763_v21  ;;  %v3850_v33 = vsel %vm8104_vm10, 0, %v8103_v3  ;;  %v3769_v23 = vand.u32 3, %v3768_v20  ;;  %vm3780_vm14 = vcmp.le.f32.partialorder %v3779_v6, 0.7853982  ;;  %v14725_v6 = vld [vmem:[#allocation75_spill] sm:$0xff] }
 0x3f2   : > { %v3851_v24 = vsub.s32 32, %v3850_v33  ;;  %v3855_v43 = vsub.s32 4294967266, %v3850_v33  ;;  %v3944_v16 = vadd.s32 536870912, %v3943_v5  ;;  %v3852_v0 = vshll.u32 %v3843_v56, %v3850_v33 }
 0x3f3   : > { %vm3774_vm12 = vcmp.eq.s32.totalorder %v3769_v23, 2  ;;  %vm3771_vm5 = vcmp.eq.s32.totalorder %v3769_v23, 0  ;;  %vm3770_vm3 = vcmp.lt.s32.totalorder %v3769_v23, 2  ;;  %v13031_v61 = vsel %vm3780_vm14, 0, %v3866_v37  ;;  %v14727_v23 = vld [vmem:[#allocation82_spill] sm:$0xff] }
 0x3f4   : > { %v3853_v32 = vshrl.u32 %v3835_v7, %v3851_v24  ;;  %v3856_v51 = vadd.s32 127, %v3855_v43  ;;  %v13006_v2 = vshrl.u32 %v3944_v16, 30  ;;  %v3872_v26 = vadd.s32 3, %v13031_v61 }
 0x3f5   : > { %v4080_v43 = vand.u32 3, %v14725_v6  ;;  %vm3871_vm10 = vweird.f32 %v11279_v1 }
 0x3f6   : > { %v3854_v62 = vor.u32 %v3853_v32, %v3852_v0  ;;  %v3857_v54 = vshll.u32 %v3856_v51, 23  ;;  %v3946_v28 = vshll.u32 %v13006_v2, 30  ;;  %v3873_v32 = vand.u32 3, %v3872_v26  ;;  %v14734_v26 = vld [vmem:[#allocation85_spill] sm:$0xff] }
 0x3f7   : > { %vm4081_vm8 = vcmp.lt.s32.totalorder %v4080_v43, 2 }
 0x3f8   : > { %v3858_v63 = vor.u32 4788187, %v3857_v54  ;;  %v3947_v52 = vsub.s32 %v3943_v5, %v3946_v28  ;;  %v3861_v30 = vcvt.s32.f32 %v3854_v62  ;;  %v3939_v5 = vadd.s32 %v12986_v4, %v12983_v57  ;;  %v14726_v28 = vld [vmem:[#allocation74_spill] sm:$0xff] }
 0x3f9   : > { %v3969_v54 = vsub.s32 4, %v13006_v2  ;;  %v4183_v57 = vand.u32 3, %v14726_v28  ;;  %v14741_v28 = vld [vmem:[#allocation79_spill] sm:$0xff] }
 0x3fa   : > { %v13009_v48 = vpop.eup %8524  ;;  %v3859_v15 = vand.u32 2147483647, %v3858_v63  ;;  %v3949_v8 = vsub.s32 0, %v3947_v52  ;;  %v14728_v63 = vxor.u32 2147483648, %v14727_v23 }
 0x3fb   : > { %v13012_v41 = vpop.eup %8526  ;;  %v3775_v56 = vxor.u32 2147483648, %v13009_v48  ;;  %vm4188_vm1 = vcmp.eq.s32.totalorder %v4183_v57, 2 }
 0x3fc   : > { %v3772_v22 = vxor.u32 2147483648, %v13012_v41  ;;  %v3862_v58 = vmul.f32 %v3861_v30, %v3859_v15  ;;  %v8106_v50 = vmin.u32 %v3949_v8, %v3947_v52  ;;  %v14729_v15 = vld [vmem:[#allocation81_spill] sm:$0xff]  ;;  %v14731_v8 = vld [vmem:[#allocation78_spill] sm:$0xff] }
 0x3fd   : > { %v3776_v53 = vsel %vm3774_vm12, %v3775_v56, %v13012_v41  ;;  %vm3885_vm12 = vcmp.lt.s32.totalorder %v11283_v35, 0  ;;  %v14730_v30 = vxor.u32 2147483648, %v14729_v15 }
 0x3fe   : > { %v3773_v34 = vsel %vm3771_vm5, %v13009_v48, %v3772_v22  ;;  %v3863_v42 = vxor.u32 2147483648, %v3862_v58  ;;  %v3951_v49 = vclz %v8106_v50  ;;  %vm4082_vm5 = vcmp.eq.s32.totalorder %v4080_v43, 0 }
 0x3ff   : > { %v3777_v9 = vsel %vm3770_vm3, %v3773_v34, %v3776_v53  ;;  %vm3874_vm3 = vcmp.lt.s32.totalorder %v3873_v32, 2 }
 0x400   : > { %v3778_v3 = vsel %vm14379_vm6, nan, %v3777_v9  ;;  %v3864_v31 = vsel %vm3781_vm11, %v3863_v42, %v3862_v58  ;;  %v8107_v13 = vadd.s32 4294967294, %v3951_v49  ;;  %vm4085_vm11 = vcmp.eq.s32.totalorder %v4080_v43, 2 }
 0x401   : > { %7405 = vrot.lane.b32.xlu0 %v3778_v3, %s8600_s22  ;;  %v3867_v21 = vsel %vm3780_vm14, %v11279_v1, %v3864_v31  ;;  %v4087_v12 = vsel %vm4085_vm11, %v14730_v30, %v14727_v23  ;;  %v4286_v58 = vand.u32 3, %v14731_v8  ;;  %vm3875_vm14 = vcmp.eq.s32.totalorder %v3873_v32, 0  ;;  %v14868_v1 = vld [vmem:[#allocation97_spill] sm:$0xff] }
 0x402   : > { %8528 = vcosq.f32 %v3867_v21  ;;  %vm8108_vm2 = vcmp.lt.s32.totalorder %v8107_v13, 0  ;;  %v3970_v49 = vsel %vm3885_vm12, %v3969_v54, %v13006_v2  ;;  %vm4185_vm11 = vcmp.eq.s32.totalorder %v4183_v57, 0 }
 0x403   : > { %8530 = vsinq.f32 %v3867_v21  ;;  %v3954_v33 = vsel %vm8108_vm2, 0, %v8107_v13  ;;  %vm13052_vm2 = vcmp.le.f32.partialorder %v3883_v46, 0.7853982  ;;  %vm4288_vm6 = vcmp.eq.s32.totalorder %v4286_v58, 0 }
 0x404   : > { %v3955_v7 = vsub.s32 32, %v3954_v33  ;;  %v3959_v24 = vsub.s32 4294967266, %v3954_v33  ;;  %v3956_v16 = vshll.u32 %v3947_v52, %v3954_v33  ;;  %v4084_v52 = vsel %vm4082_vm5, %v14729_v15, %v14728_v63 }
 0x405   : > { %vm3878_vm5 = vcmp.eq.s32.totalorder %v3873_v32, 2  ;;  %v4088_v31 = vsel %vm4081_vm8, %v4084_v52, %v4087_v12  ;;  %v13072_v2 = vsel %vm13052_vm2, 0, %v3970_v49  ;;  %v14735_v33 = vxor.u32 2147483648, %v14734_v26  ;;  %v14743_v52 = vld [vmem:[#allocation84_spill] sm:$0xff] }
 0x406   : > { %v3957_v20 = vshrl.u32 %v3939_v5, %v3955_v7  ;;  %v3960_v0 = vadd.s32 127, %v3959_v24  ;;  %v14736_v5 = vld [vmem:[#allocation83_spill] sm:$0xff]  ;;  %vm4291_vm8 = vcmp.eq.s32.totalorder %v4286_v58, 2  ;;  %v14742_v23 = vxor.u32 2147483648, %v14741_v28  ;;  %v14745_v49 = vld [vmem:[#allocation28_spill] sm:$0xff] }
 0x407   : > { %v4290_v7 = vsel %vm4288_vm6, %v14736_v5, %v14735_v33  ;;  %v14737_v43 = vxor.u32 2147483648, %v14736_v5  ;;  %v3976_v15 = vadd.s32 3, %v13072_v2  ;;  %vm4287_vm6 = vcmp.lt.s32.totalorder %v4286_v58, 2  ;;  %v14746_v58 = vld [vmem:[#allocation29_spill] sm:$0xff] }
 0x408   : > { %v3958_v51 = vor.u32 %v3957_v20, %v3956_v16  ;;  %v3961_v62 = vshll.u32 %v3960_v0, 23  ;;  %v14738_v20 = vld [vmem:[#allocation86_spill] sm:$0xff]  ;;  %v4389_v30 = vand.u32 3, %v14743_v52 }
 0x409   : > { %v4293_v16 = vsel %vm4291_vm8, %v14737_v43, %v14734_v26  ;;  %v4492_v0 = vand.u32 3, %v14738_v20  ;;  %v14748_v26 = vld [vmem:[#allocation34_spill] sm:$0xff]  ;;  %v14753_v43 = vld [vmem:[#allocation31_spill] sm:$0xff] }
 0x40a   : > { %v3962_v4 = vor.u32 4788187, %v3961_v62  ;;  %v3965_v9 = vcvt.s32.f32 %v3958_v51  ;;  %v14739_v62 = vld [vmem:[#allocation80_spill] sm:$0xff]  ;;  %v14749_v50 = vxor.u32 2147483648, %v14748_v26  ;;  %v14754_v20 = vxor.u32 2147483648, %v14753_v43 }
 0x40b   : > { %v14740_v54 = vxor.u32 2147483648, %v14739_v62  ;;  %v4190_v63 = vsel %vm4188_vm1, %v14742_v23, %v14739_v62  ;;  %vm4494_vm1 = vcmp.eq.s32.totalorder %v4492_v0, 0  ;;  %v14755_v62 = vld [vmem:[#allocation9_spill] sm:$0xff] }
 0x40c   : > { %v13048_v53 = vpop.eup %8528  ;;  %v3963_v37 = vand.u32 2147483647, %v3962_v4 }
 0x40d   : > { %v13056_v34 = vpop.eup %8530  ;;  %v3879_v42 = vxor.u32 2147483648, %v13048_v53  ;;  %v4187_v4 = vsel %vm4185_vm11, %v14741_v28, %v14740_v54  ;;  %v4595_v54 = vand.u32 3, %v14755_v62 }
 0x40e   : > { %v3876_v3 = vxor.u32 2147483648, %v13056_v34  ;;  %v3966_v21 = vmul.f32 %v3965_v9, %v3963_v37  ;;  %v4089_v37 = vsel %vm751_vm9, nan, %v4088_v31  ;;  %v4294_v9 = vsel %vm4287_vm6, %v4290_v7, %v4293_v16  ;;  %v14751_v7 = vld [vmem:[#allocation26_spill] sm:$0xff] }
 0x40f   : > { %v3880_v46 = vsel %vm3878_vm5, %v3879_v42, %v13056_v34  ;;  %v4295_v31 = vsel %vm959_vm0, nan, %v4294_v9  ;;  %vm4391_vm9 = vcmp.eq.s32.totalorder %v4389_v30, 0  ;;  %vm4390_vm5 = vcmp.lt.s32.totalorder %v4389_v30, 2 }
 0x410   : > { %v3877_v13 = vsel %vm3875_vm14, %v13048_v53, %v3876_v3  ;;  %v3967_v6 = vxor.u32 2147483648, %v3966_v21  ;;  %vm4497_vm14 = vcmp.eq.s32.totalorder %v4492_v0, 2 }
 0x411   : > { %v3881_v24 = vsel %vm3874_vm3, %v3877_v13, %v3880_v46  ;;  %vm4184_vm3 = vcmp.lt.s32.totalorder %v4183_v57, 2  ;;  %v4698_v46 = vand.u32 3, %v14745_v49  ;;  %v14747_v13 = vxor.u32 2147483648, %v14746_v58 }
 0x412   : > { %v3882_v51 = vsel %vm3871_vm10, nan, %v3881_v24  ;;  %v3968_v32 = vsel %vm3885_vm12, %v3967_v6, %v3966_v21  ;;  %v13101_v21 = vsel %vm4184_vm3, %v4187_v4, %v4190_v63  ;;  %v4499_v5 = vsel %vm4497_vm14, %v14749_v50, %v14746_v58  ;;  %v14756_v4 = vld [vmem:[#allocation41_spill] sm:$0xff]  ;;  %v14763_v58 = vld [vmem:[#allocation32_spill] sm:$0xff] }
 0x413   : > { %7407 = vrot.lane.b32.xlu1 %v3882_v51, %s8600_s22  ;;  %v3971_v12 = vsel %vm13052_vm2, %v11283_v35, %v3968_v32  ;;  %v4496_v33 = vsel %vm4494_vm1, %v14748_v26, %v14747_v13  ;;  %v3977_v24 = vand.u32 3, %v3976_v15  ;;  %vm4394_vm12 = vcmp.eq.s32.totalorder %v4389_v30, 2  ;;  %v14758_v63 = vld [vmem:[#allocation37_spill] sm:$0xff]  ;;  %v14765_v26 = vld [vmem:[#allocation38_spill] sm:$0xff] }
 0x414   : > { %8532 = vcosq.f32 %v3971_v12  ;;  %v14752_v6 = vxor.u32 2147483648, %v14751_v7  ;;  %v4396_v51 = vsel %vm4394_vm12, %v14754_v20, %v14751_v7  ;;  %vm4493_vm2 = vcmp.lt.s32.totalorder %v4492_v0, 2 }
 0x415   : > { %8534 = vsinq.f32 %v3971_v12  ;;  %v4500_v28 = vsel %vm4493_vm2, %v4496_v33, %v4499_v5  ;;  %vm4700_vm11 = vcmp.eq.s32.totalorder %v4698_v46, 0  ;;  %vm4703_vm8 = vcmp.eq.s32.totalorder %v4698_v46, 2  ;;  %v14760_v12 = vld [vmem:[#allocation35_spill] sm:$0xff]  ;;  %v14766_v5 = vld [vmem:[#allocation42_spill] sm:$0xff] }
 0x416   : > { %v4393_v16 = vsel %vm4391_vm9, %v14753_v43, %v14752_v6  ;;  %v14757_v23 = vxor.u32 2147483648, %v14756_v4  ;;  %v14759_v15 = vxor.u32 2147483648, %v14758_v63  ;;  %v4801_v8 = vand.u32 3, %v14760_v12 }
 0x417   : > { %7475 = vrot.lane.b32.xlu1 %v4089_v37, %s8601_s23  ;;  %v14761_v37 = vld [vmem:[#allocation36_spill] sm:$0xff]  ;;  %vm3978_vm0 = vcmp.lt.s32.totalorder %v3977_v24, 2  ;;  %vm3979_vm6 = vcmp.eq.s32.totalorder %v3977_v24, 0  ;;  %vm3982_vm3 = vcmp.eq.s32.totalorder %v3977_v24, 2  ;;  %v4397_v0 = vsel %vm4390_vm5, %v4393_v16, %v4396_v51  ;;  %v14770_v16 = vld [vmem:[#allocation50_spill] sm:$0xff] }
 0x418   : > { %v4702_v32 = vsel %vm4700_vm11, %v14758_v63, %v14757_v23  ;;  %v4705_v52 = vsel %vm4703_vm8, %v14759_v15, %v14756_v4  ;;  %v4904_v9 = vand.u32 3, %v14761_v37  ;;  %vm3975_vm1 = vweird.f32 %v11283_v35  ;;  %v14776_v37 = vld [vmem:[#allocation49_spill] sm:$0xff]  ;;  %v14804_v24 = vld [vmem:[#allocation18_spill] sm:$0xff] }
 0x419   : > { %v4501_v49 = vsel %vm1167_vm7, nan, %v4500_v28  ;;  %vm4596_vm14 = vcmp.lt.s32.totalorder %v4595_v54, 2  ;;  %vm4597_vm9 = vcmp.eq.s32.totalorder %v4595_v54, 0  ;;  %vm4699_vm12 = vcmp.lt.s32.totalorder %v4698_v46, 2  ;;  %v14768_v46 = vld [vmem:[#allocation40_spill] sm:$0xff]  ;;  %v14772_v28 = vld [vmem:[#allocation46_spill] sm:$0xff] }
 0x41a   : > { %v14764_v13 = vxor.u32 2147483648, %v14763_v58  ;;  %vm4600_vm2 = vcmp.eq.s32.totalorder %v4595_v54, 2  ;;  %v4706_v50 = vsel %vm4699_vm12, %v4702_v32, %v4705_v52  ;;  %v5007_v57 = vand.u32 3, %v14766_v5  ;;  %v14774_v52 = vld [vmem:[#allocation39_spill] sm:$0xff] }
 0x41b   : > { %7479 = vrot.lane.b32.xlu1 %v4295_v31, %s8601_s23  ;;  %v14767_v31 = vxor.u32 2147483648, %v14765_v26  ;;  %vm4803_vm5 = vcmp.eq.s32.totalorder %v4801_v8, 0  ;;  %vm4906_vm11 = vcmp.eq.s32.totalorder %v4904_v9, 0  ;;  %vm4909_vm8 = vcmp.eq.s32.totalorder %v4904_v9, 2 }
 0x41c   : > { %v4599_v33 = vsel %vm4597_vm9, %v14765_v26, %v14764_v13  ;;  %vm4806_vm7 = vcmp.eq.s32.totalorder %v4801_v8, 2  ;;  %v14769_v43 = vxor.u32 2147483648, %v14768_v46  ;;  %v14771_v51 = vxor.u32 2147483648, %v14770_v16 }
 0x41d   : > { %v4602_v7 = vsel %vm4600_vm2, %v14767_v31, %v14763_v58  ;;  %v5110_v4 = vand.u32 3, %v14772_v28  ;;  %v4707_v15 = vsel %vm1375_vm13, nan, %v4706_v50  ;;  %v14775_v12 = vxor.u32 2147483648, %v14774_v52  ;;  %v14778_v50 = vld [vmem:[#allocation43_spill] sm:$0xff]  ;;  %v14782_v28 = vld [vmem:[#allocation53_spill] sm:$0xff] }
 0x41e   : > { %v13138_v6 = vpop.eup %8532  ;;  %v4908_v20 = vsel %vm4906_vm11, %v14770_v16, %v14769_v43  ;;  %v4911_v62 = vsel %vm4909_vm8, %v14771_v51, %v14768_v46  ;;  %vm4905_vm9 = vcmp.lt.s32.totalorder %v4904_v9, 2  ;;  %vm5009_vm12 = vcmp.eq.s32.totalorder %v5007_v57, 0  ;;  %v14780_v46 = vld [vmem:[#allocation54_spill] sm:$0xff] }
 0x41f   : > { %7483 = vrot.lane.b32.xlu1 %v4501_v49, %s8601_s23  ;;  %v13148_v23 = vpop.eup %8534  ;;  %v3983_v63 = vxor.u32 2147483648, %v13138_v6  ;;  %v4805_v30 = vsel %vm4803_vm5, %v14776_v37, %v14775_v12  ;;  %v14777_v49 = vxor.u32 2147483648, %v14776_v37  ;;  %vm5012_vm2 = vcmp.eq.s32.totalorder %v5007_v57, 2  ;;  %v14785_v12 = vld [vmem:[#allocation44_spill] sm:$0xff] }
 0x420   : > { %v3980_v13 = vxor.u32 2147483648, %v13148_v23  ;;  %v4912_v5 = vsel %vm4905_vm9, %v4908_v20, %v4911_v62  ;;  %v14779_v31 = vxor.u32 2147483648, %v14778_v50  ;;  %v14781_v16 = vxor.u32 2147483648, %v14780_v46  ;;  %v14783_v62 = vld [vmem:[#allocation55_spill] sm:$0xff] }
 0x421   : > { %v4808_v58 = vsel %vm4806_vm7, %v14777_v49, %v14774_v52  ;;  %v3984_v26 = vsel %vm3982_vm3, %v3983_v63, %v13148_v23  ;;  %vm5112_vm13 = vcmp.eq.s32.totalorder %v5110_v4, 0  ;;  %vm5115_vm5 = vcmp.eq.s32.totalorder %v5110_v4, 2 }
 0x422   : > { %v5011_v43 = vsel %vm5009_vm12, %v14780_v46, %v14779_v31  ;;  %v5014_v51 = vsel %vm5012_vm2, %v14781_v16, %v14778_v50  ;;  %v3981_v9 = vsel %vm3979_vm6, %v13138_v6, %v3980_v13  ;;  %v5316_v32 = vand.u32 3, %v14782_v28  ;;  %v14788_v16 = vld [vmem:[#allocation12_spill] sm:$0xff] }
 0x423   : > { %7487 = vrot.lane.b32.xlu1 %v4707_v15, %s8601_s23  ;;  %v3985_v20 = vsel %vm3978_vm0, %v3981_v9, %v3984_v26  ;;  %vm4802_vm3 = vcmp.lt.s32.totalorder %v4801_v8, 2  ;;  %v14784_v52 = vxor.u32 2147483648, %v14783_v62  ;;  %v14786_v49 = vxor.u32 2147483648, %v14785_v12 }
 0x424   : > { %v3986_v31 = vsel %vm3975_vm1, nan, %v3985_v20  ;;  %v4603_v15 = vsel %vm4596_vm14, %v4599_v33, %v4602_v7  ;;  %v4809_v46 = vsel %vm4802_vm3, %v4805_v30, %v4808_v58  ;;  %vm5008_vm6 = vcmp.lt.s32.totalorder %v5007_v57, 2  ;;  %v14791_v57 = vld [vmem:[#allocation5_spill] sm:$0xff]  ;;  %v14793_v30 = vld [vmem:[#allocation51_spill] sm:$0xff] }
 0x425   : > { %v5114_v37 = vsel %vm5112_vm13, %v14785_v12, %v14784_v52  ;;  %v5117_v50 = vsel %vm5115_vm5, %v14786_v49, %v14783_v62  ;;  %7409 = vrot.lane.b32.xlu0 %v3986_v31, %s8600_s22  ;;  %v4913_v8 = vsel %vm1583_vm15, nan, %v4912_v5  ;;  %v5015_v26 = vsel %vm5008_vm6, %v5011_v43, %v5014_v51  ;;  %v14789_v62 = vld [vmem:[#allocation58_spill] sm:$0xff]  ;;  %v14795_v5 = vld [vmem:[#allocation59_spill] sm:$0xff] }
 0x426   : > { %vm5111_vm0 = vcmp.lt.s32.totalorder %v5110_v4, 2  ;;  %v5213_v9 = vand.u32 3, %v14788_v16  ;;  %vm5318_vm11 = vcmp.eq.s32.totalorder %v5316_v32, 0  ;;  %vm5321_vm8 = vcmp.eq.s32.totalorder %v5316_v32, 2  ;;  %v14797_v52 = vld [vmem:[#allocation7_spill] sm:$0xff]  ;;  %v14803_v31 = vld [vmem:[#allocation90_spill] sm:$0xff] }
 0x427   : > { %7491 = vrot.lane.b32.xlu1 %v4913_v8, %s8601_s23  ;;  %v5118_v28 = vsel %vm5111_vm0, %v5114_v37, %v5117_v50  ;;  %v5522_v20 = vand.u32 3, %v14789_v62  ;;  %v4192_v33 = vsel %vm855_vm4, nan, %v13101_v21  ;;  %vm14792_vm14 = vweird.f32 %v14791_v57  ;;  %v14799_v37 = vld [vmem:[#allocation11_spill] sm:$0xff]  ;;  %v14801_v50 = vld [vmem:[#allocation17_spill] sm:$0xff]  ;;  %v13217_v62 = vpop.permute.xlu1 %7347 }
 0x428   : > { %v4398_v7 = vsel %vm14792_vm14, nan, %v4397_v0  ;;  %v14794_v58 = vxor.u32 2147483648, %v14793_v30  ;;  %v14796_v43 = vxor.u32 2147483648, %v14795_v5  ;;  %vm14798_vm15 = vweird.f32 %v14797_v52  ;;  %v14809_v57 = vld [vmem:[#allocation57_spill] sm:$0xff]  ;;  %v14815_v52 = vld [vmem:[#allocation91_spill] sm:$0xff] }
 0x429   : > { %v4604_v12 = vsel %vm14798_vm15, nan, %v4603_v15  ;;  %vm14800_vm7 = vweird.f32 %v14799_v37  ;;  %vm14802_vm9 = vweird.f32 %v14801_v50  ;;  %v5419_v0 = vand.u32 3, %v14803_v31  ;;  %7477 = vrot.lane.b32.xlu0 %v4192_v33, %s8601_s23  ;;  %v14810_v33 = vld [vmem:[#allocation65_spill] sm:$0xff]  ;;  %v14816_v50 = vld [vmem:[#allocation20_spill] sm:$0xff] }
 0x42a   : > { %v5320_v4 = vsel %vm5318_vm11, %v14795_v5, %v14794_v58  ;;  %v5323_v51 = vsel %vm5321_vm8, %v14796_v43, %v14793_v30  ;;  %v4810_v49 = vsel %vm14800_vm7, nan, %v4809_v46  ;;  %v13209_v21 = vsel %vm14802_vm9, nan, %v5015_v26  ;;  %v14806_v46 = vld [vmem:[#allocation62_spill] sm:$0xff]  ;;  %v14807_v26 = vld [vmem:[#allocation47_spill] sm:$0xff] }
 0x42b   : > { %vm14805_vm4 = vweird.f32 %v14804_v24  ;;  %vm5214_vm12 = vcmp.lt.s32.totalorder %v5213_v9, 2  ;;  %vm5215_vm2 = vcmp.eq.s32.totalorder %v5213_v9, 0  ;;  %vm5317_vm13 = vcmp.lt.s32.totalorder %v5316_v32, 2  ;;  %v14818_v24 = vld [vmem:[#allocation61_spill] sm:$0xff] }
 0x42c   : > { %v5119_v8 = vsel %vm14805_vm4, nan, %v5118_v28  ;;  %v5324_v15 = vsel %vm5317_vm13, %v5320_v4, %v5323_v51  ;;  %vm5524_vm5 = vcmp.eq.s32.totalorder %v5522_v20, 0  ;;  %vm5527_vm3 = vcmp.eq.s32.totalorder %v5522_v20, 2  ;;  %v14812_v28 = vld [vmem:[#allocation63_spill] sm:$0xff] }
 0x42d   : > { %7495 = vrot.lane.b32.xlu1 %v5119_v8, %s8601_s23  ;;  %v5728_v16 = vand.u32 3, %v14806_v46  ;;  %v14808_v54 = vxor.u32 2147483648, %v14807_v26  ;;  %vm5218_vm6 = vcmp.eq.s32.totalorder %v5213_v9, 2  ;;  %v14811_v58 = vxor.u32 2147483648, %v14810_v33  ;;  %7481 = vrot.lane.b32.xlu0 %v4398_v7, %s8601_s23  ;;  %v14820_v46 = vld [vmem:[#allocation64_spill] sm:$0xff]  ;;  %v14822_v7 = vld [vmem:[#allocation73_spill] sm:$0xff] }
 0x42e   : > { %v14813_v32 = vxor.u32 2147483648, %v14812_v28  ;;  %v14814_v4 = vxor.u32 2147483648, %v14809_v57  ;;  %vm5421_vm0 = vcmp.eq.s32.totalorder %v5419_v0, 0  ;;  %vm5424_vm11 = vcmp.eq.s32.totalorder %v5419_v0, 2  ;;  %v14831_v9 = vld [vmem:[#allocation16_spill] sm:$0xff] }
 0x42f   : > { %v5217_v30 = vsel %vm5215_vm2, %v14809_v57, %v14808_v54  ;;  %v5526_v5 = vsel %vm5524_vm5, %v14812_v28, %v14811_v58  ;;  %v5625_v37 = vand.u32 3, %v14815_v52  ;;  %vm14817_vm8 = vweird.f32 %v14816_v50 }
 0x430   : > { %v5529_v43 = vsel %vm5527_vm3, %v14813_v32, %v14810_v33  ;;  %v5220_v51 = vsel %vm5218_vm6, %v14814_v4, %v14807_v26  ;;  %v5325_v31 = vsel %vm14817_vm8, nan, %v5324_v15  ;;  %v14819_v8 = vxor.u32 2147483648, %v14818_v24 }
 0x431   : > { %v14821_v33 = vxor.u32 2147483648, %v14820_v46  ;;  %vm5523_vm14 = vcmp.lt.s32.totalorder %v5522_v20, 2  ;;  %7499 = vrot.lane.b32.xlu1 %v5325_v31, %s8601_s23  ;;  %vm5730_vm15 = vcmp.eq.s32.totalorder %v5728_v16, 0  ;;  %vm5733_vm7 = vcmp.eq.s32.totalorder %v5728_v16, 2  ;;  %v14825_v31 = vld [vmem:[#allocation67_spill] sm:$0xff]  ;;  %7485 = vrot.lane.b32.xlu0 %v4604_v12, %s8601_s23 }
 0x432   : > { %v5423_v54 = vsel %vm5421_vm0, %v14820_v46, %v14819_v8  ;;  %v5530_v26 = vsel %vm5523_vm14, %v5526_v5, %v5529_v43  ;;  %v5934_v57 = vand.u32 3, %v11518_v60  ;;  %vm5420_vm9 = vcmp.lt.s32.totalorder %v5419_v0, 2  ;;  %v14826_v43 = vld [vmem:[#allocation100_spill] sm:$0xff]  ;;  %v13255_v60 = vpop.permute.xlu1 %7351  ;;  %v14827_v0 = vld [vmem:[#allocation22_spill] sm:$0xff] }
 0x433   : > { %v5426_v58 = vsel %vm5424_vm11, %v14821_v33, %v14818_v24  ;;  %v14823_v28 = vxor.u32 2147483648, %v14822_v7  ;;  %v14824_v32 = vxor.u32 2147483648, %v11435_v18  ;;  %v6140_v52 = vand.u32 3, %v11764_v38  ;;  %v14832_v46 = vld [vmem:[#allocation94_spill] sm:$0xff]  ;;  %v14834_v33 = vld [vmem:[#allocation93_spill] sm:$0xff] }
 0x434   : > { %v5221_v20 = vsel %vm5214_vm12, %v5217_v30, %v5220_v51  ;;  %v5427_v50 = vsel %vm5420_vm9, %v5423_v54, %v5426_v58  ;;  %v13252_v5 = vand.u32 3, %v14825_v31  ;;  %v6346_v24 = vand.u32 3, %v14826_v43 }
 0x435   : > { %v5732_v15 = vsel %vm5730_vm15, %v11435_v18, %v14823_v28  ;;  %v5735_v4 = vsel %vm5733_vm7, %v14824_v32, %v14822_v7  ;;  %vm14828_vm4 = vweird.f32 %v14827_v0  ;;  %vm5627_vm2 = vcmp.eq.s32.totalorder %v5625_v37, 0  ;;  %v14829_v18 = vld [vmem:[#allocation15_spill] sm:$0xff]  ;;  %v14838_v28 = vld [vmem:[#allocation98_spill] sm:$0xff]  ;;  %7489 = vrot.lane.b32.xlu0 %v4810_v49, %s8601_s23  ;;  %v14842_v0 = vld [vmem:[#allocation60_spill] sm:$0xff] }
 0x436   : > { %v5531_v8 = vsel %vm14828_vm4, nan, %v5530_v26  ;;  %vm5630_vm13 = vcmp.eq.s32.totalorder %v5625_v37, 2  ;;  %vm5729_vm5 = vcmp.lt.s32.totalorder %v5728_v16, 2  ;;  %v14830_v38 = vxor.u32 2147483648, %v14829_v18  ;;  %v14836_v16 = vld [vmem:[#allocation99_spill] sm:$0xff] }
 0x437   : > { %7503 = vrot.lane.b32.xlu1 %v5531_v8, %s8601_s23  ;;  %v5736_v51 = vsel %vm5729_vm5, %v5732_v15, %v5735_v4  ;;  %vm5936_vm12 = vcmp.eq.s32.totalorder %v5934_v57, 0  ;;  %vm5939_vm3 = vcmp.eq.s32.totalorder %v5934_v57, 2  ;;  %v14833_v54 = vxor.u32 2147483648, %v14832_v46  ;;  %v14840_v4 = vld [vmem:[#allocation24_spill] sm:$0xff] }
 0x438   : > { %v5629_v30 = vsel %vm5627_vm2, %v14831_v9, %v14830_v38  ;;  %v14835_v12 = vxor.u32 2147483648, %v14834_v33  ;;  %vm6142_vm6 = vcmp.eq.s32.totalorder %v6140_v52, 0  ;;  %vm6145_vm0 = vcmp.eq.s32.totalorder %v6140_v52, 2  ;;  %v14844_v38 = vld [vmem:[#allocation89_spill] sm:$0xff] }
 0x439   : > { %v5938_v58 = vsel %vm5936_vm12, %v14834_v33, %v14833_v54  ;;  %v14837_v7 = vxor.u32 2147483648, %v14836_v16  ;;  %v14839_v31 = vxor.u32 2147483648, %v14838_v28  ;;  %vm6348_vm11 = vcmp.eq.s32.totalorder %v6346_v24, 0  ;;  %7493 = vrot.lane.b32.xlu0 %v13209_v21, %s8601_s23 }
 0x43a   : > { %v5941_v26 = vsel %vm5939_vm3, %v14835_v12, %v14832_v46  ;;  %vm6351_vm8 = vcmp.eq.s32.totalorder %v6346_v24, 2  ;;  %vm14841_vm14 = vweird.f32 %v14840_v4  ;;  %vm5935_vm15 = vcmp.lt.s32.totalorder %v5934_v57, 2  ;;  %v13291_v57 = vpop.permute.xlu1 %7355  ;;  %v14850_v4 = vld [vmem:[#allocation21_spill] sm:$0xff] }
 0x43b   : > { %v6144_v32 = vsel %vm6142_vm6, %v14838_v28, %v14837_v7  ;;  %v6147_v15 = vsel %vm6145_vm0, %v14839_v31, %v14836_v16  ;;  %v5737_v43 = vsel %vm14841_vm14, nan, %v5736_v51  ;;  %v14843_v8 = vxor.u32 2147483648, %v14842_v0  ;;  %v14847_v7 = vld [vmem:[#allocation56_spill] sm:$0xff]  ;;  %v14848_v28 = vld [vmem:[#allocation19_spill] sm:$0xff] }
 0x43c   : > { %v14845_v54 = vxor.u32 2147483648, %v14844_v38  ;;  %v14846_v12 = vxor.u32 2147483648, %v14831_v9  ;;  %7507 = vrot.lane.b32.xlu1 %v5737_v43, %s8601_s23  ;;  %v5942_v49 = vsel %vm5935_vm15, %v5938_v58, %v5941_v26  ;;  %vm6141_vm7 = vcmp.lt.s32.totalorder %v6140_v52, 2  ;;  %v14852_v9 = vld [vmem:[#allocation70_spill] sm:$0xff]  ;;  %v14854_v26 = vld [vmem:[#allocation71_spill] sm:$0xff] }
 0x43d   : > { %v6350_v46 = vsel %vm6348_vm11, %v14844_v38, %v14843_v8  ;;  %v6552_v51 = vand.u32 3, %v14847_v7  ;;  %vm14849_vm9 = vweird.f32 %v14848_v28  ;;  %vm14851_vm4 = vweird.f32 %v14850_v4  ;;  %v14859_v38 = vld [vmem:[#allocation45_spill] sm:$0xff] }
 0x43e   : > { %v6353_v33 = vsel %vm6351_vm8, %v14845_v54, %v14842_v0  ;;  %v5632_v16 = vsel %vm5630_vm13, %v14846_v12, %v14829_v18  ;;  %v5222_v31 = vsel %vm14849_vm9, nan, %v5221_v20  ;;  %v5428_v8 = vsel %vm14851_vm4, nan, %v5427_v50  ;;  %v14866_v4 = vld [vmem:[#allocation69_spill] sm:$0xff] }
 0x43f   : > { %v6148_v0 = vsel %vm6141_vm7, %v6144_v32, %v6147_v15  ;;  %vm6347_vm2 = vcmp.lt.s32.totalorder %v6346_v24, 2  ;;  %vm5626_vm5 = vcmp.lt.s32.totalorder %v5625_v37, 2  ;;  %vm5833_vm12 = vcmp.eq.s32.totalorder %v13252_v5, 0  ;;  %v14856_v32 = vld [vmem:[#allocation30_spill] sm:$0xff]  ;;  %v14858_v24 = vld [vmem:[#allocation92_spill] sm:$0xff]  ;;  %7497 = vrot.lane.b32.xlu0 %v5222_v31, %s8601_s23 }
 0x440   : > { %vm5836_vm13 = vcmp.eq.s32.totalorder %v13252_v5, 2  ;;  %v6354_v18 = vsel %vm6347_vm2, %v6350_v46, %v6353_v33  ;;  %v5633_v52 = vsel %vm5626_vm5, %v5629_v30, %v5632_v16  ;;  %v14853_v58 = vxor.u32 2147483648, %v14852_v9  ;;  %v14861_v46 = vld [vmem:[#allocation66_spill] sm:$0xff] }
 0x441   : > { %v14855_v20 = vxor.u32 2147483648, %v14854_v26  ;;  %vm14857_vm3 = vweird.f32 %v14856_v32  ;;  %v13311_v15 = vand.u32 3, %v14858_v24  ;;  %vm14860_vm6 = vweird.f32 %v14859_v38  ;;  %v14863_v33 = vld [vmem:[#allocation10_spill] sm:$0xff]  ;;  %v14876_v38 = vld [vmem:[#allocation95_spill] sm:$0xff] }
 0x442   : > { %v5835_v43 = vsel %vm5833_vm12, %v14854_v26, %v14853_v58  ;;  %v5943_v37 = vsel %vm14857_vm3, nan, %v5942_v49  ;;  %v6149_v21 = vsel %vm14860_vm6, nan, %v6148_v0  ;;  %vm6554_vm0 = vcmp.eq.s32.totalorder %v6552_v51, 0 }
 0x443   : > { %v5838_v50 = vsel %vm5836_vm13, %v14855_v20, %v14852_v9  ;;  %7511 = vrot.lane.b32.xlu1 %v5943_v37, %s8601_s23  ;;  %v7067_v30 = vand.u32 3, %v13001_v39  ;;  %vm5832_vm11 = vcmp.lt.s32.totalorder %v13252_v5, 2  ;;  %vm14862_vm8 = vweird.f32 %v14861_v46  ;;  %v13327_v39 = vpop.permute.xlu1 %7359  ;;  %7501 = vrot.lane.b32.xlu0 %v5428_v8, %s8601_s23  ;;  %v14878_v46 = vld [vmem:[#allocation76_spill] sm:$0xff] }
 0x444   : > { %v6355_v54 = vsel %vm14862_vm8, nan, %v6354_v18  ;;  %v14864_v12 = vxor.u32 2147483648, %v14863_v33  ;;  %vm6557_vm14 = vcmp.eq.s32.totalorder %v6552_v51, 2  ;;  %v7170_v49 = vand.u32 3, %v13031_v61  ;;  %v13330_v18 = vpop.permute.xlu0 %7349 }
 0x445   : > { %v14865_v7 = vxor.u32 2147483648, %v12463_v17  ;;  %v6758_v0 = vand.u32 3, %v14866_v4  ;;  %vm7069_vm15 = vcmp.eq.s32.totalorder %v7067_v30, 0  ;;  %vm7072_vm7 = vcmp.eq.s32.totalorder %v7067_v30, 2 }
 0x446   : > { %v6556_v16 = vsel %vm6554_vm0, %v12463_v17, %v14864_v12  ;;  %vm7068_vm9 = vcmp.lt.s32.totalorder %v7067_v30, 2  ;;  %v7071_v9 = vsel %vm7069_vm15, %v13009_v48, %v3772_v22  ;;  %v7074_v17 = vsel %vm7072_vm7, %v3775_v56, %v13012_v41 }
 0x447   : > { %v6559_v28 = vsel %vm6557_vm14, %v14865_v7, %v14863_v33  ;;  %vm7172_vm4 = vcmp.eq.s32.totalorder %v7170_v49, 0  ;;  %7515 = vrot.lane.b32.xlu1 %v6149_v21, %s8601_s23  ;;  %v7075_v61 = vsel %vm7068_vm9, %v7071_v9, %v7074_v17  ;;  %vm7175_vm2 = vcmp.eq.s32.totalorder %v7170_v49, 2  ;;  %v14884_v7 = vld [vmem:[#allocation88_spill] sm:$0xff]  ;;  %v14888_v17 = vld [vmem:[#allocation33_spill] sm:$0xff] }
 0x448   : > { %v7174_v58 = vsel %vm7172_vm4, %v13048_v53, %v3876_v3  ;;  %v7273_v31 = vand.u32 3, %v13072_v2  ;;  %vm6553_vm5 = vcmp.lt.s32.totalorder %v6552_v51, 2  ;;  %vm14867_vm12 = vweird.f32 %v14719_v25  ;;  %v13363_v3 = vpop.permute.xlu1 %7363  ;;  %v14869_v51 = vld [vmem:[#allocation14_spill] sm:$0xff] }
 0x449   : > { %v13345_v26 = vsel %vm14867_vm12, nan, %v7075_v61  ;;  %vm7171_vm13 = vcmp.lt.s32.totalorder %v7170_v49, 2  ;;  %v7177_v48 = vsel %vm7175_vm2, %v3879_v42, %v13056_v34  ;;  %v6560_v41 = vsel %vm6553_vm5, %v6556_v16, %v6559_v28  ;;  %v14882_v16 = vld [vmem:[#allocation101_spill] sm:$0xff] }
 0x44a   : > { %v7178_v56 = vsel %vm7171_vm13, %v7174_v58, %v7177_v48  ;;  %vm7275_vm3 = vcmp.eq.s32.totalorder %v7273_v31, 0  ;;  %vm7278_vm6 = vcmp.eq.s32.totalorder %v7273_v31, 2  ;;  %vm7274_vm0 = vcmp.lt.s32.totalorder %v7273_v31, 2  ;;  %v14890_v31 = vld [vmem:[#allocation72_spill] sm:$0xff] }
 0x44b   : > { %v13353_v22 = vsel %vm3871_vm10, nan, %v7178_v56  ;;  %v7277_v25 = vsel %vm7275_vm3, %v13138_v6, %v3980_v13  ;;  %v7280_v53 = vsel %vm7278_vm6, %v3983_v63, %v13148_v23  ;;  %7519 = vrot.lane.b32.xlu1 %v6355_v54, %s8601_s23  ;;  %vm6760_vm8 = vcmp.eq.s32.totalorder %v6758_v0, 0  ;;  %v13372_v23 = vpop.permute.xlu0 %7353  ;;  %v14880_v54 = vld [vmem:[#allocation25_spill] sm:$0xff] }
 0x44c   : > { %vm6763_vm14 = vcmp.eq.s32.totalorder %v6758_v0, 2  ;;  %v6964_v34 = vand.u32 3, %v12830_v47  ;;  %v7281_v42 = vsel %vm7274_vm0, %v7277_v25, %v7280_v53  ;;  %v6243_v2 = vand.u32 3, %v14868_v1  ;;  %v14872_v47 = vld [vmem:[#allocation23_spill] sm:$0xff]  ;;  %v13406_v4 = vpop.permute.xlu1 %7367 }
 0x44d   : > { %v14870_v8 = vxor.u32 2147483648, %v14869_v51  ;;  %v14871_v13 = vxor.u32 2147483648, %v12733_v45  ;;  %v13376_v63 = vsel %vm3975_vm1, nan, %v7281_v42  ;;  %vm14873_vm10 = vweird.f32 %v14872_v47  ;;  %v14894_v25 = vld [vmem:[#allocation27_spill] sm:$0xff] }
 0x44e   : > { %v5634_v32 = vsel %vm14873_vm10, nan, %v5633_v52  ;;  %v5839_v37 = vsel %vm5832_vm11, %v5835_v43, %v5838_v50  ;;  %vm6039_vm15 = vcmp.eq.s32.totalorder %v13311_v15, 0  ;;  %vm6042_vm7 = vcmp.eq.s32.totalorder %v13311_v15, 2 }
 0x44f   : > { %v6762_v20 = vsel %vm6760_vm8, %v12733_v45, %v14870_v8  ;;  %v6765_v6 = vsel %vm6763_vm14, %v14871_v13, %v14869_v51  ;;  %7505 = vrot.lane.b32.xlu0 %v5634_v32, %s8601_s23  ;;  %v14874_v45 = vld [vmem:[#allocation96_spill] sm:$0xff]  ;;  %v14877_v35 = vxor.u32 2147483648, %v14876_v38  ;;  %vm14879_vm1 = vweird.f32 %v14878_v46 }
 0x450   : > { %v14875_v24 = vxor.u32 2147483648, %v14874_v45  ;;  %v6561_v52 = vsel %vm14879_vm1, nan, %v6560_v41  ;;  %vm6759_vm9 = vcmp.lt.s32.totalorder %v6758_v0, 2  ;;  %vm6966_vm11 = vcmp.eq.s32.totalorder %v6964_v34, 0  ;;  %v14886_v0 = vld [vmem:[#allocation87_spill] sm:$0xff]  ;;  %v14892_v41 = vld [vmem:[#allocation102_spill] sm:$0xff]  ;;  %v13431_v1 = vpop.permute.xlu1 %7371 }
 0x451   : > { %v6044_v30 = vsel %vm6042_vm7, %v14877_v35, %v14874_v45  ;;  %7523 = vrot.lane.b32.xlu1 %v6561_v52, %s8601_s23  ;;  %v6766_v5 = vsel %vm6759_vm9, %v6762_v20, %v6765_v6  ;;  %vm6969_vm4 = vcmp.eq.s32.totalorder %v6964_v34, 2  ;;  %vm6038_vm2 = vcmp.lt.s32.totalorder %v13311_v15, 2  ;;  %v14896_v51 = vld [vmem:[#allocation48_spill] sm:$0xff]  ;;  %v14899_v6 = vld [vmem:[#allocation103_spill] sm:$0xff] }
 0x452   : > { %v6041_v21 = vsel %vm6039_vm15, %v14876_v38, %v14875_v24  ;;  %vm6245_vm5 = vcmp.eq.s32.totalorder %v6243_v2, 0  ;;  %v6968_v43 = vsel %vm6966_vm11, %v12941_v27, %v3668_v59  ;;  %v6971_v50 = vsel %vm6969_vm4, %v3671_v36, %v12951_v44  ;;  %v13415_v36 = vpop.permute.xlu0 %7357  ;;  %v14898_v20 = vld [vmem:[#allocation104_spill] sm:$0xff]  ;;  %v7283_v38 = vld [vmem:[%s13999_s2] sm:$0xff] }
 0x453   : > { %vm14881_vm12 = vweird.f32 %v14880_v54  ;;  %v6045_v12 = vsel %vm6038_vm2, %v6041_v21, %v6044_v30  ;;  %v14883_v49 = vxor.u32 2147483648, %v14882_v16  ;;  %vm6248_vm13 = vcmp.eq.s32.totalorder %v6243_v2, 2  ;;  %v14901_v32 = vld [vmem:[#allocation52_spill] sm:$0xff] }
 0x454   : > { %v5840_v33 = vsel %vm14881_vm12, nan, %v5839_v37  ;;  %v14885_v59 = vxor.u32 2147483648, %v14884_v7  ;;  %v6449_v27 = vand.u32 3, %v14886_v0  ;;  %vm14887_vm3 = vweird.f32 %v14696_v40  ;;  %v14903_v21 = vld [vmem:[#allocation68_spill] sm:$0xff]  ;;  %v13452_v30 = vpop.permute.xlu1 %7375 }
 0x455   : > { %v6247_v28 = vsel %vm6245_vm5, %v14884_v7, %v14883_v49  ;;  %7509 = vrot.lane.b32.xlu0 %v5840_v33, %s8601_s23  ;;  %v6767_v44 = vsel %vm14887_vm3, nan, %v6766_v5  ;;  %vm6965_vm6 = vcmp.lt.s32.totalorder %v6964_v34, 2  ;;  %vm6244_vm0 = vcmp.lt.s32.totalorder %v6243_v2, 2  ;;  %v7284_v7 = vld [vmem:[%s13999_s2 + $0x8] sm:$0xff] }
 0x456   : > { %v6250_v15 = vsel %vm6248_vm13, %v14885_v59, %v14882_v16  ;;  %7527 = vrot.lane.b32.xlu1 %v6767_v44, %s8601_s23  ;;  %v6972_v9 = vsel %vm6965_vm6, %v6968_v43, %v6971_v50  ;;  %vm14889_vm8 = vweird.f32 %v14888_v17  ;;  %vm6451_vm14 = vcmp.eq.s32.totalorder %v6449_v27, 0  ;;  %v13433_v2 = vpop.permute.xlu0 %7361  ;;  %v7285_v43 = vld [vmem:[%s13999_s2 + $0x10] sm:$0xff]  ;;  %v14905_v50 = vld [vmem:[#allocation77_spill] sm:$0xff]  ;;  %v7288_v44 = vld [vmem:[%s13999_s2 + $0x28] sm:$0xff] }
 0x457   : > { %v6046_v61 = vsel %vm14889_vm8, nan, %v6045_v12  ;;  %v6251_v58 = vsel %vm6244_vm0, %v6247_v28, %v6250_v15  ;;  %vm6454_vm10 = vcmp.eq.s32.totalorder %v6449_v27, 2  ;;  %v6655_v48 = vand.u32 3, %v14890_v31  ;;  %v7289_v12 = vld [vmem:[%s13999_s2 + $0x30] sm:$0xff]  ;;  %v7295_v15 = vld [vmem:[%s13999_s2 + $0x60] sm:$0xff]  ;;  %v7290_v17 = vld [vmem:[%s13999_s2 + $0x38] sm:$0xff] }
 0x458   : > { %vm14891_vm15 = vweird.f32 %v14712_v19  ;;  %v14893_v56 = vxor.u32 2147483648, %v14892_v41  ;;  %v14895_v34 = vxor.u32 2147483648, %v14894_v25  ;;  %vm14897_vm7 = vweird.f32 %v14896_v51  ;;  %v7293_v59 = vld [vmem:[%s13999_s2 + $0x50] sm:$0xff]  ;;  %v7299_v31 = vld [vmem:[%s13999_s2 + $0x80] sm:$0xff] }
 0x459   : > { %7513 = vrot.lane.b32.xlu0 %v6046_v61, %s8601_s23  ;;  %v6973_v40 = vsel %vm14891_vm15, nan, %v6972_v9  ;;  %v6252_v8 = vsel %vm14897_vm7, nan, %v6251_v58  ;;  %vm6450_vm1 = vcmp.lt.s32.totalorder %v6449_v27, 2  ;;  %vm6657_vm9 = vcmp.eq.s32.totalorder %v6655_v48, 0  ;;  %v7297_v9 = vld [vmem:[%s13999_s2 + $0x70] sm:$0xff] }
 0x45a   : > { %v6453_v53 = vsel %vm6451_vm14, %v14894_v25, %v14893_v56  ;;  %v6456_v42 = vsel %vm6454_vm10, %v14895_v34, %v14892_v41  ;;  %7531 = vrot.lane.b32.xlu1 %v6973_v40, %s8601_s23  ;;  %vm6660_vm11 = vcmp.eq.s32.totalorder %v6655_v48, 2  ;;  %v6861_v13 = vand.u32 3, %v14898_v20  ;;  %v13455_v52 = vpop.permute.xlu0 %7365  ;;  %v7301_v40 = vld [vmem:[%s13999_s2 + $0x90] sm:$0xff]  ;;  %v7294_v25 = vld [vmem:[%s13999_s2 + $0x58] sm:$0xff]  ;;  %v7296_v34 = vld [vmem:[%s13999_s2 + $0x68] sm:$0xff] }
 0x45b   : > { %v6457_v19 = vsel %vm6450_vm1, %v6453_v53, %v6456_v42  ;;  %v14900_v47 = vxor.u32 2147483648, %v14899_v6  ;;  %v14902_v45 = vxor.u32 2147483648, %v14901_v32  ;;  %vm14904_vm4 = vweird.f32 %v14903_v21  ;;  %v7303_v53 = vld [vmem:[%s13999_s2 + $0xa0] sm:$0xff] }
 0x45c   : > { %v6458_v35 = vsel %vm14904_vm4, nan, %v6457_v19  ;;  %vm6656_vm2 = vcmp.lt.s32.totalorder %v6655_v48, 2  ;;  %vm6863_vm5 = vcmp.eq.s32.totalorder %v6861_v13, 0  ;;  %vm6866_vm12 = vcmp.eq.s32.totalorder %v6861_v13, 2  ;;  %v7292_v48 = vld [vmem:[%s13999_s2 + $0x48] sm:$0xff]  ;;  %v7298_v19 = vld [vmem:[%s13999_s2 + $0x78] sm:$0xff] }
 0x45d   : > { %7517 = vrot.lane.b32.xlu0 %v6252_v8, %s8601_s23  ;;  %v6659_v37 = vsel %vm6657_vm9, %v14901_v32, %v14900_v47  ;;  %v6662_v24 = vsel %vm6660_vm11, %v14902_v45, %v14899_v6  ;;  %v6868_v5 = vsel %vm6866_vm12, %v3567_v29, %v12837_v11  ;;  %vm14906_vm13 = vweird.f32 %v14905_v50  ;;  %v7287_v11 = vld [vmem:[%s13999_s2 + $0x20] sm:$0xff]  ;;  %v7305_v8 = vld [vmem:[%s13999_s2 + $0xb0] sm:$0xff]  ;;  %v7300_v47 = vld [vmem:[%s13999_s2 + $0x88] sm:$0xff] }
 0x45e   : > { %7535 = vrot.lane.b32.xlu1 %v13353_v22, %s8601_s23  ;;  %v6663_v46 = vsel %vm6656_vm2, %v6659_v37, %v6662_v24  ;;  %v6865_v22 = vsel %vm6863_vm5, %v12832_v14, %v3564_v55  ;;  %vm6862_vm3 = vcmp.lt.s32.totalorder %v6861_v13, 2  ;;  %v13471_v55 = vpop.permute.xlu1 %7379  ;;  %v13473_v14 = vpop.permute.xlu0 %7369  ;;  %vm14907_vm6 = vweird.f32 %v14703_v10  ;;  %v7291_v10 = vld [vmem:[%s13999_s2 + $0x40] sm:$0xff]  ;;  %v7309_v32 = vld [vmem:[%s13999_s2 + $0xd0] sm:$0xff]  ;;  %v7302_v45 = vld [vmem:[%s13999_s2 + $0x98] sm:$0xff] }
 0x45f   : > { %v6664_v54 = vsel %vm14906_vm13, nan, %v6663_v46  ;;  %v6869_v33 = vsel %vm6862_vm3, %v6865_v22, %v6868_v5  ;;  %v7307_v20 = vld [vmem:[%s13999_s2 + $0xc0] sm:$0xff]  ;;  %v7313_v46 = vld [vmem:[%s13999_s2 + $0xf0] sm:$0xff]  ;;  %vm7699_vm0 = vcmask 15360   ;;  %vm7732_vm8 = vcmask 343040  }
 0x460   : > { %v6870_v29 = vsel %vm14907_vm6, nan, %v6869_v33  ;;  %vm7765_vm14 = vcmask 670720   ;;  %vm7799_vm10 = vcmask 146432  }
 0x461   : > { %7521 = vrot.lane.b32.xlu0 %v6458_v35, %s8601_s23  ;;  %v7304_v35 = vld [vmem:[%s13999_s2 + $0xa8] sm:$0xff] }
 0x462   : > { %7603 = vrot.lane.b32.xlu1 %v7283_v38, %s8602_s26  ;;  %v13485_v16 = vpop.permute.xlu1 %7383  ;;  %v13489_v49 = vpop.permute.xlu0 %7373  ;;  %v7311_v38 = vld [vmem:[%s13999_s2 + $0xe0] sm:$0xff] }
 0x465   : > { %7525 = vrot.lane.b32.xlu0 %v6664_v54, %s8601_s23  ;;  %v7308_v54 = vld [vmem:[%s13999_s2 + $0xc8] sm:$0xff] }
 0x466   : > { %7607 = vrot.lane.b32.xlu1 %v7285_v43, %s8602_s26  ;;  %v13501_v28 = vpop.permute.xlu1 %7387  ;;  %v7306_v43 = vld [vmem:[%s13999_s2 + $0xb8] sm:$0xff] }
 0x469   : > { %7529 = vrot.lane.b32.xlu0 %v6870_v29, %s8601_s23  ;;  %v7310_v29 = vld [vmem:[%s13999_s2 + $0xd8] sm:$0xff] }
 0x46a   : > { %7611 = vrot.lane.b32.xlu1 %v7287_v11, %s8602_s26  ;;  %v13516_v0 = vpop.permute.xlu1 %7391 }
 0x46d   : > { %7533 = vrot.lane.b32.xlu0 %v13345_v26, %s8601_s23  ;;  %v13503_v26 = vpop.permute.xlu0 %7377 }
 0x46e   : > { %7615 = vrot.lane.b32.xlu1 %v7289_v12, %s8602_s26  ;;  %v13533_v61 = vpop.permute.xlu1 %7395 }
 0x471   : > { %7537 = vrot.lane.b32.xlu0 %v13376_v63, %s8601_s23  ;;  %v7286_v63 = vld [vmem:[%s13999_s2 + $0x18] sm:$0xff]  ;;  %v13519_v27 = vpop.permute.xlu0 %7381 }
 0x472   : > { %7619 = vrot.lane.b32.xlu1 %v7291_v10, %s8602_s26  ;;  %v13548_v41 = vpop.permute.xlu1 %7399 }
 0x475   : > { %7605 = vrot.lane.b32.xlu0 %v7284_v7, %s8602_s26  ;;  %v13535_v58 = vpop.permute.xlu0 %7385  ;;  %v7312_v7 = vld [vmem:[%s13999_s2 + $0xe8] sm:$0xff] }
 0x476   : > { %7623 = vrot.lane.b32.xlu1 %v7293_v59, %s8602_s26  ;;  %v13565_v42 = vpop.permute.xlu1 %7403 }
 0x479   : > { %7609 = vrot.lane.b32.xlu0 %v7286_v63, %s8602_s26  ;;  %v13551_v56 = vpop.permute.xlu0 %7389 }
 0x47a   : > { %7627 = vrot.lane.b32.xlu1 %v7295_v15, %s8602_s26  ;;  %v7314_v15 = vld [vmem:[%s13999_s2 + $0xf8] sm:$0xff] }
 0x47d   : > { %7613 = vrot.lane.b32.xlu0 %v7288_v44, %s8602_s26  ;;  %v13567_v51 = vpop.permute.xlu0 %7393 }
 0x47e   : > { %7631 = vrot.lane.b32.xlu1 %v7297_v9, %s8602_s26 }
 0x481   : > { %7617 = vrot.lane.b32.xlu0 %v7290_v17, %s8602_s26  ;;  %v13583_v6 = vpop.permute.xlu0 %7397 }
 0x482   : > { %7635 = vrot.lane.b32.xlu1 %v7299_v31, %s8602_s26  ;;  %14908 = vst [vmem:[#allocation75_spill] sm:$0xff] %v13583_v6 }
 0x485   : > { %7621 = vrot.lane.b32.xlu0 %v7292_v48, %s8602_s26  ;;  %v13580_v13 = vpop.permute.xlu1 %7407  ;;  %v13597_v24 = vpop.permute.xlu0 %7401 }
 0x486   : > { %7639 = vrot.lane.b32.xlu1 %v7301_v40, %s8602_s26  ;;  %14909 = vst [vmem:[#allocation74_spill] sm:$0xff] %v13597_v24 }
 0x489   : > { %7625 = vrot.lane.b32.xlu0 %v7294_v25, %s8602_s26  ;;  %v7476_v37 = vpop.permute.xlu1 %7475  ;;  %v13613_v5 = vpop.permute.xlu0 %7405 }
 0x48a   : > { %7643 = vrot.lane.b32.xlu1 %v7303_v53, %s8602_s26  ;;  %14910 = vst [vmem:[#allocation82_spill] sm:$0xff] %v13613_v5  ;;  %v8537_v5 = vld [vmem:[%s8647_s19 + $0x10] sm:$0xff] }
 0x48b   : > { %v7702_v24 = vsel %vm7699_vm0, %v8537_v5, %v13255_v60 }
 0x48d   : > { %7629 = vrot.lane.b32.xlu0 %v7296_v34, %s8602_s26  ;;  %v7480_v21 = vpop.permute.xlu1 %7479 }
 0x48e   : > { %7647 = vrot.lane.b32.xlu1 %v7305_v8, %s8602_s26 }
 0x491   : > { %7633 = vrot.lane.b32.xlu0 %v7298_v19, %s8602_s26  ;;  %v13610_v22 = vpop.permute.xlu1 %7483 }
 0x492   : > { %7651 = vrot.lane.b32.xlu1 %v7307_v20, %s8602_s26 }
 0x495   : > { %7637 = vrot.lane.b32.xlu0 %v7300_v47, %s8602_s26  ;;  %v13619_v50 = vpop.permute.xlu1 %7487 }
 0x496   : > { %7655 = vrot.lane.b32.xlu1 %v7309_v32, %s8602_s26 }
 0x497   : > { %v13625_v33 = vpop.permute.xlu0 %7409 }
 0x498   : > { %14911 = vst [vmem:[#allocation81_spill] sm:$0xff] %v13625_v33 }
 0x499   : > { %7641 = vrot.lane.b32.xlu0 %v7302_v45, %s8602_s26  ;;  %v13627_v11 = vpop.permute.xlu1 %7491 }
 0x49a   : > { %7659 = vrot.lane.b32.xlu1 %v7311_v38, %s8602_s26 }
 0x49b   : > { %v13633_v12 = vpop.permute.xlu0 %7477 }
 0x49d   : > { %7645 = vrot.lane.b32.xlu0 %v7304_v35, %s8602_s26 }
 0x49e   : > { %7663 = vrot.lane.b32.xlu1 %v7313_v46, %s8602_s26 }
 0x49f   : > { %v13635_v10 = vpop.permute.xlu1 %7495  ;;  %v13641_v59 = vpop.permute.xlu0 %7481 }
 0x4a1   : > { %7649 = vrot.lane.b32.xlu0 %v7306_v43, %s8602_s26  ;;  %v8536_v43 = vld [vmem:[%s8647_s19] sm:$0xff] }
 0x4a3   : > { %v13643_v63 = vpop.permute.xlu1 %7499  ;;  %v13649_v44 = vpop.permute.xlu0 %7485 }
 0x4a5   : > { %7653 = vrot.lane.b32.xlu0 %v7308_v54, %s8602_s26  ;;  %v7700_v54 = vsel %vm7699_vm0, %v8536_v43, %v13217_v62  ;;  %v7735_v62 = vsel %vm7732_vm8, %v7702_v24, %v7480_v21  ;;  %v8539_v21 = vld [vmem:[%s8647_s19 + $0x30] sm:$0xff] }
 0x4a7   : > { %v13654_v17 = vpop.permute.xlu0 %7489 }
 0x4a9   : > { %7657 = vrot.lane.b32.xlu0 %v7310_v29, %s8602_s26  ;;  %v13651_v9 = vpop.permute.xlu1 %7503 }
 0x4ab   : > { %v13658_v48 = vpop.permute.xlu0 %7493 }
 0x4ad   : > { %7661 = vrot.lane.b32.xlu0 %v7312_v7, %s8602_s26  ;;  %v7733_v7 = vsel %vm7732_vm8, %v7700_v54, %v7476_v37  ;;  %v8538_v54 = vld [vmem:[%s8647_s19 + $0x20] sm:$0xff] }
 0x4ae   : > { %v13656_v31 = vpop.permute.xlu1 %7507 }
 0x4b1   : > { %7665 = vrot.lane.b32.xlu0 %v7314_v15, %s8602_s26  ;;  %v13662_v25 = vpop.permute.xlu0 %7497  ;;  %s8240_s26 = sshll.u32 %s14921_s12, 9 }
 0x4b2   : > { %s13690_s28 = scalar_lea.vmem %s14000_s3, %s8240_s26 }
 0x4b5   : > { %v13660_v40 = vpop.permute.xlu1 %7511  ;;  %v13666_v34 = vpop.permute.xlu0 %7501 }
 0x4b9   : > { %v13664_v53 = vpop.permute.xlu1 %7515 }
 0x4bd   : > { %v13668_v8 = vpop.permute.xlu1 %7519 }
 0x4c1   : > { %v13670_v19 = vpop.permute.xlu0 %7505 }
 0x4c3   : > { %v13672_v20 = vpop.permute.xlu1 %7523 }
 0x4c7   : > { %v13674_v47 = vpop.permute.xlu0 %7509 }
 0x4c8   : > { %v13676_v32 = vpop.permute.xlu1 %7527 }
 0x4cb   : > { %v13678_v45 = vpop.permute.xlu0 %7513 }
 0x4cc   : > { %v13680_v38 = vpop.permute.xlu1 %7531 }
 0x4cf   : > { %v13682_v35 = vpop.permute.xlu0 %7517 }
 0x4d0   : > { %v13685_v46 = vpop.permute.xlu1 %7535 }
 0x4d3   : > { %v13695_v29 = vpop.permute.xlu0 %7521 }
 0x4d4   : > { %v7604_v15 = vpop.permute.xlu1 %7603 }
 0x4d5   : > { %v7766_v33 = vsel %vm7765_vm14, %v7733_v7, %v7604_v15  ;;  %7800 = vst.msk [vmem:[%s13690_s28 + $0x8] sm:$0xff] %vm7799_vm10, %v7604_v15  ;;  %v7706_v15 = vsel %vm7699_vm0, %v8539_v21, %v13327_v39 }
 0x4d6   : > { %7798 = vst [vmem:[%s13690_s28] sm:$0xff] %v7766_v33  ;;  %v7704_v33 = vsel %vm7699_vm0, %v8538_v54, %v13291_v57  ;;  %v7739_v57 = vsel %vm7732_vm8, %v7706_v15, %v13619_v50 }
 0x4d7   : > { %v13705_v6 = vpop.permute.xlu0 %7525  ;;  %v7737_v60 = vsel %vm7732_vm8, %v7704_v33, %v13610_v22 }
 0x4d8   : > { %v7608_v43 = vpop.permute.xlu1 %7607 }
 0x4d9   : > { %v7768_v37 = vsel %vm7765_vm14, %v7735_v62, %v7608_v43  ;;  %7804 = vst.msk [vmem:[%s13690_s28 + $0x28] sm:$0xff] %vm7799_vm10, %v7608_v43 }
 0x4da   : > { %7803 = vst [vmem:[%s13690_s28 + $0x20] sm:$0xff] %v7768_v37  ;;  %v8540_v37 = vld [vmem:[%s8647_s19 + $0x40] sm:$0xff] }
 0x4db   : > { %v13715_v7 = vpop.permute.xlu0 %7529  ;;  %v7708_v54 = vsel %vm7699_vm0, %v8540_v37, %v13363_v3  ;;  %v8542_v3 = vld [vmem:[%s8647_s19 + $0x50] sm:$0xff] }
 0x4dc   : > { %v7612_v5 = vpop.permute.xlu1 %7611  ;;  %v7741_v39 = vsel %vm7732_vm8, %v7708_v54, %v13627_v11  ;;  %v7710_v21 = vsel %vm7699_vm0, %v8542_v3, %v13406_v4  ;;  %v8543_v4 = vld [vmem:[%s8647_s19 + $0x18] sm:$0xff] }
 0x4dd   : > { %v7770_v24 = vsel %vm7765_vm14, %v7737_v60, %v7612_v5  ;;  %7808 = vst.msk [vmem:[%s13690_s28 + $0x48] sm:$0xff] %vm7799_vm10, %v7612_v5  ;;  %v8541_v5 = vld [vmem:[%s8647_s19 + $0x8] sm:$0xff] }
 0x4de   : > { %7807 = vst [vmem:[%s13690_s28 + $0x40] sm:$0xff] %v7770_v24  ;;  %v7701_v24 = vsel %vm7699_vm0, %v8541_v5, %v13330_v18 }
 0x4df   : > { %v13726_v62 = vpop.permute.xlu0 %7533  ;;  %v7734_v11 = vsel %vm7732_vm8, %v7701_v24, %v13633_v12  ;;  %v7703_v12 = vsel %vm7699_vm0, %v8543_v4, %v13372_v23 }
 0x4e0   : > { %v7616_v22 = vpop.permute.xlu1 %7615  ;;  %v7736_v54 = vsel %vm7732_vm8, %v7703_v12, %v13641_v59 }
 0x4e1   : > { %v7772_v43 = vsel %vm7765_vm14, %v7739_v57, %v7616_v22  ;;  %7812 = vst.msk [vmem:[%s13690_s28 + $0x68] sm:$0xff] %vm7799_vm10, %v7616_v22  ;;  %v7743_v57 = vsel %vm7732_vm8, %v7710_v21, %v13635_v10  ;;  %v8544_v10 = vld [vmem:[%s8647_s19 + $0x60] sm:$0xff] }
 0x4e2   : > { %7811 = vst [vmem:[%s13690_s28 + $0x60] sm:$0xff] %v7772_v43  ;;  %v7712_v37 = vsel %vm7699_vm0, %v8544_v10, %v13431_v1  ;;  %v8545_v1 = vld [vmem:[%s8647_s19 + $0x28] sm:$0xff] }
 0x4e3   : > { %v13737_v33 = vpop.permute.xlu0 %7537  ;;  %v7705_v59 = vsel %vm7699_vm0, %v8545_v1, %v13415_v36 }
 0x4e4   : > { %v7620_v60 = vpop.permute.xlu1 %7619  ;;  %v7738_v3 = vsel %vm7732_vm8, %v7705_v59, %v13649_v44 }
 0x4e5   : > { %v7774_v50 = vsel %vm7765_vm14, %v7741_v39, %v7620_v60  ;;  %7816 = vst.msk [vmem:[%s13690_s28 + $0x88] sm:$0xff] %vm7799_vm10, %v7620_v60  ;;  %v7745_v60 = vsel %vm7732_vm8, %v7712_v37, %v13643_v63  ;;  %v8546_v63 = vld [vmem:[%s8647_s19 + $0x70] sm:$0xff] }
 0x4e6   : > { %7815 = vst [vmem:[%s13690_s28 + $0x80] sm:$0xff] %v7774_v50  ;;  %v7714_v24 = vsel %vm7699_vm0, %v8546_v63, %v13452_v30  ;;  %v8547_v30 = vld [vmem:[%s8647_s19 + $0x38] sm:$0xff] }
 0x4e7   : > { %v7606_v15 = vpop.permute.xlu0 %7605  ;;  %v7707_v44 = vsel %vm7699_vm0, %v8547_v30, %v13433_v2 }
 0x4e8   : > { %v7767_v22 = vsel %vm7765_vm14, %v7734_v11, %v7606_v15  ;;  %7802 = vst.msk [vmem:[%s13690_s28 + $0x18] sm:$0xff] %vm7799_vm10, %v7606_v15  ;;  %v7624_v18 = vpop.permute.xlu1 %7623  ;;  %v7747_v11 = vsel %vm7732_vm8, %v7714_v24, %v13651_v9  ;;  %v8548_v9 = vld [vmem:[%s8647_s19 + $0x80] sm:$0xff] }
 0x4e9   : > { %7801 = vst [vmem:[%s13690_s28 + $0x10] sm:$0xff] %v7767_v22  ;;  %v7776_v43 = vsel %vm7765_vm14, %v7743_v57, %v7624_v18  ;;  %7820 = vst.msk [vmem:[%s13690_s28 + $0xa8] sm:$0xff] %vm7799_vm10, %v7624_v18  ;;  %v7716_v22 = vsel %vm7699_vm0, %v8548_v9, %v13471_v55  ;;  %v7740_v18 = vsel %vm7732_vm8, %v7707_v44, %v13654_v17  ;;  %v8549_v55 = vld [vmem:[%s8647_s19 + $0x48] sm:$0xff] }
 0x4ea   : > { %7819 = vst [vmem:[%s13690_s28 + $0xa0] sm:$0xff] %v7776_v43  ;;  %v7749_v4 = vsel %vm7732_vm8, %v7716_v22, %v13656_v31  ;;  %v7709_v17 = vsel %vm7699_vm0, %v8549_v55, %v13455_v52  ;;  %v8550_v31 = vld [vmem:[%s8647_s19 + $0x90] sm:$0xff] }
 0x4eb   : > { %v7610_v39 = vpop.permute.xlu0 %7609  ;;  %v7718_v37 = vsel %vm7699_vm0, %v8550_v31, %v13485_v16  ;;  %v8551_v16 = vld [vmem:[%s8647_s19 + $0x58] sm:$0xff] }
 0x4ec   : > { %v7769_v50 = vsel %vm7765_vm14, %v7736_v54, %v7610_v39  ;;  %7806 = vst.msk [vmem:[%s13690_s28 + $0x38] sm:$0xff] %vm7799_vm10, %v7610_v39  ;;  %v7628_v23 = vpop.permute.xlu1 %7627  ;;  %v7742_v54 = vsel %vm7732_vm8, %v7709_v17, %v13658_v48  ;;  %v7711_v48 = vsel %vm7699_vm0, %v8551_v16, %v13473_v14 }
 0x4ed   : > { %7805 = vst [vmem:[%s13690_s28 + $0x30] sm:$0xff] %v7769_v50  ;;  %v7778_v5 = vsel %vm7765_vm14, %v7745_v60, %v7628_v23  ;;  %7824 = vst.msk [vmem:[%s13690_s28 + $0xc8] sm:$0xff] %vm7799_vm10, %v7628_v23  ;;  %v7751_v60 = vsel %vm7732_vm8, %v7718_v37, %v13660_v40  ;;  %v8552_v40 = vld [vmem:[%s8647_s19 + $0xa0] sm:$0xff]  ;;  %v7744_v1 = vsel %vm7732_vm8, %v7711_v48, %v13662_v25 }
 0x4ee   : > { %7823 = vst [vmem:[%s13690_s28 + $0xc0] sm:$0xff] %v7778_v5  ;;  %v7720_v5 = vsel %vm7699_vm0, %v8552_v40, %v13501_v28  ;;  %v8553_v28 = vld [vmem:[%s8647_s19 + $0x68] sm:$0xff] }
 0x4ef   : > { %v7614_v21 = vpop.permute.xlu0 %7613  ;;  %v7753_v63 = vsel %vm7732_vm8, %v7720_v5, %v13664_v53  ;;  %v7713_v25 = vsel %vm7699_vm0, %v8553_v28, %v13489_v49  ;;  %v8554_v53 = vld [vmem:[%s8647_s19 + $0xb0] sm:$0xff] }
 0x4f0   : > { %v7771_v15 = vsel %vm7765_vm14, %v7738_v3, %v7614_v21  ;;  %7810 = vst.msk [vmem:[%s13690_s28 + $0x58] sm:$0xff] %vm7799_vm10, %v7614_v21  ;;  %v7632_v36 = vpop.permute.xlu1 %7631  ;;  %v7722_v21 = vsel %vm7699_vm0, %v8554_v53, %v13516_v0  ;;  %v8555_v0 = vld [vmem:[%s8647_s19 + $0x78] sm:$0xff]  ;;  %v14913_v53 = vld [vmem:[#allocation74_spill] sm:$0xff] }
 0x4f1   : > { %7809 = vst [vmem:[%s13690_s28 + $0x50] sm:$0xff] %v7771_v15  ;;  %v7780_v57 = vsel %vm7765_vm14, %v7747_v11, %v7632_v36  ;;  %7828 = vst.msk [vmem:[%s13690_s28 + $0xe8] sm:$0xff] %vm7799_vm10, %v7632_v36  ;;  %v7746_v11 = vsel %vm7732_vm8, %v7713_v25, %v13666_v34  ;;  %v7755_v36 = vsel %vm7732_vm8, %v7722_v21, %v13668_v8  ;;  %v8556_v8 = vld [vmem:[%s8647_s19 + $0xc0] sm:$0xff]  ;;  %v8565_v25 = vld [vmem:[%s8647_s19 + $0xd8] sm:$0xff] }
 0x4f2   : > { %7827 = vst [vmem:[%s13690_s28 + $0xe0] sm:$0xff] %v7780_v57  ;;  %v7715_v34 = vsel %vm7699_vm0, %v8555_v0, %v13503_v26  ;;  %v7724_v44 = vsel %vm7699_vm0, %v8556_v8, %v13533_v61  ;;  %v8557_v61 = vld [vmem:[%s8647_s19 + $0x88] sm:$0xff]  ;;  %v7727_v21 = vsel %vm7699_vm0, %v8565_v25, %v14913_v53  ;;  %v14915_v8 = vld [vmem:[#allocation81_spill] sm:$0xff] }
 0x4f3   : > { %v7618_v43 = vpop.permute.xlu0 %7617  ;;  %v7748_v9 = vsel %vm7732_vm8, %v7715_v34, %v13670_v19  ;;  %v7717_v19 = vsel %vm7699_vm0, %v8557_v61, %v13519_v27 }
 0x4f4   : > { %v7773_v12 = vsel %vm7765_vm14, %v7740_v18, %v7618_v43  ;;  %7814 = vst.msk [vmem:[%s13690_s28 + $0x78] sm:$0xff] %vm7799_vm10, %v7618_v43  ;;  %v7636_v2 = vpop.permute.xlu1 %7635  ;;  %v7757_v18 = vsel %vm7732_vm8, %v7724_v44, %v13672_v20  ;;  %v8558_v20 = vld [vmem:[%s8647_s19 + $0xd0] sm:$0xff] }
 0x4f5   : > { %7813 = vst [vmem:[%s13690_s28 + $0x70] sm:$0xff] %v7773_v12  ;;  %v7782_v10 = vsel %vm7765_vm14, %v7749_v4, %v7636_v2  ;;  %7832 = vst.msk [vmem:[%s13690_s28 + $0x108] sm:$0xff] %vm7799_vm10, %v7636_v2  ;;  %v7726_v12 = vsel %vm7699_vm0, %v8558_v20, %v13548_v41  ;;  %v7750_v2 = vsel %vm7732_vm8, %v7717_v19, %v13674_v47  ;;  %v8559_v41 = vld [vmem:[%s8647_s19 + $0x98] sm:$0xff] }
 0x4f6   : > { %7831 = vst [vmem:[%s13690_s28 + $0x100] sm:$0xff] %v7782_v10  ;;  %v7759_v55 = vsel %vm7732_vm8, %v7726_v12, %v13676_v32  ;;  %v7719_v47 = vsel %vm7699_vm0, %v8559_v41, %v13535_v58  ;;  %v8560_v32 = vld [vmem:[%s8647_s19 + $0xe0] sm:$0xff] }
 0x4f7   : > { %v7622_v39 = vpop.permute.xlu0 %7621  ;;  %v7728_v37 = vsel %vm7699_vm0, %v8560_v32, %v13565_v42  ;;  %v8561_v42 = vld [vmem:[%s8647_s19 + $0xa8] sm:$0xff] }
 0x4f8   : > { %v7775_v50 = vsel %vm7765_vm14, %v7742_v54, %v7622_v39  ;;  %7818 = vst.msk [vmem:[%s13690_s28 + $0x98] sm:$0xff] %vm7799_vm10, %v7622_v39  ;;  %v7640_v52 = vpop.permute.xlu1 %7639  ;;  %v7752_v54 = vsel %vm7732_vm8, %v7719_v47, %v13678_v45  ;;  %v7721_v45 = vsel %vm7699_vm0, %v8561_v42, %v13551_v56 }
 0x4f9   : > { %7817 = vst [vmem:[%s13690_s28 + $0x90] sm:$0xff] %v7775_v50  ;;  %v7784_v23 = vsel %vm7765_vm14, %v7751_v60, %v7640_v52  ;;  %7836 = vst.msk [vmem:[%s13690_s28 + $0x128] sm:$0xff] %vm7799_vm10, %v7640_v52  ;;  %v7761_v60 = vsel %vm7732_vm8, %v7728_v37, %v13680_v38  ;;  %v8562_v38 = vld [vmem:[%s8647_s19 + $0xf0] sm:$0xff]  ;;  %v7754_v16 = vsel %vm7732_vm8, %v7721_v45, %v13682_v35 }
 0x4fa   : > { %7835 = vst [vmem:[%s13690_s28 + $0x120] sm:$0xff] %v7784_v23  ;;  %v7730_v23 = vsel %vm7699_vm0, %v8562_v38, %v13580_v13  ;;  %v8563_v13 = vld [vmem:[%s8647_s19 + $0xb8] sm:$0xff] }
 0x4fb   : > { %v7626_v59 = vpop.permute.xlu0 %7625  ;;  %v7763_v40 = vsel %vm7732_vm8, %v7730_v23, %v13685_v46  ;;  %v7723_v35 = vsel %vm7699_vm0, %v8563_v13, %v13567_v51 }
 0x4fc   : > { %v7777_v24 = vsel %vm7765_vm14, %v7744_v1, %v7626_v59  ;;  %7822 = vst.msk [vmem:[%s13690_s28 + $0xb8] sm:$0xff] %vm7799_vm10, %v7626_v59  ;;  %v7644_v14 = vpop.permute.xlu1 %7643  ;;  %v7756_v46 = vsel %vm7732_vm8, %v7723_v35, %v13695_v29 }
 0x4fd   : > { %7821 = vst [vmem:[%s13690_s28 + $0xb0] sm:$0xff] %v7777_v24  ;;  %v7786_v3 = vsel %vm7765_vm14, %v7753_v63, %v7644_v14  ;;  %7840 = vst.msk [vmem:[%s13690_s28 + $0x148] sm:$0xff] %vm7799_vm10, %v7644_v14  ;;  %v8564_v24 = vld [vmem:[%s8647_s19 + $0xc8] sm:$0xff] }
 0x4fe   : > { %7839 = vst [vmem:[%s13690_s28 + $0x140] sm:$0xff] %v7786_v3  ;;  %v14912_v14 = vld [vmem:[#allocation75_spill] sm:$0xff] }
 0x4ff   : > { %v7630_v15 = vpop.permute.xlu0 %7629  ;;  %v7725_v3 = vsel %vm7699_vm0, %v8564_v24, %v14912_v14 }
 0x500   : > { %v7779_v57 = vsel %vm7765_vm14, %v7746_v11, %v7630_v15  ;;  %7826 = vst.msk [vmem:[%s13690_s28 + $0xd8] sm:$0xff] %vm7799_vm10, %v7630_v15  ;;  %v7648_v49 = vpop.permute.xlu1 %7647  ;;  %v7758_v51 = vsel %vm7732_vm8, %v7725_v3, %v13705_v6  ;;  %v7760_v11 = vsel %vm7732_vm8, %v7727_v21, %v13715_v7  ;;  %v8567_v7 = vld [vmem:[%s8647_s19 + $0xf8] sm:$0xff] }
 0x501   : > { %7825 = vst [vmem:[%s13690_s28 + $0xd0] sm:$0xff] %v7779_v57  ;;  %v7788_v30 = vsel %vm7765_vm14, %v7755_v36, %v7648_v49  ;;  %7844 = vst.msk [vmem:[%s13690_s28 + $0x168] sm:$0xff] %vm7799_vm10, %v7648_v49  ;;  %v8566_v36 = vld [vmem:[%s8647_s19 + $0xe8] sm:$0xff]  ;;  %v14914_v57 = vld [vmem:[#allocation82_spill] sm:$0xff]  ;;  %v7731_v44 = vsel %vm7699_vm0, %v8567_v7, %v14915_v8 }
 0x502   : > { %7843 = vst [vmem:[%s13690_s28 + $0x160] sm:$0xff] %v7788_v30  ;;  %v7729_v49 = vsel %vm7699_vm0, %v8566_v36, %v14914_v57 }
 0x503   : > { %v7634_v22 = vpop.permute.xlu0 %7633  ;;  %v7762_v30 = vsel %vm7732_vm8, %v7729_v49, %v13726_v62 }
 0x504   : > { %v7781_v43 = vsel %vm7765_vm14, %v7748_v9, %v7634_v22  ;;  %7830 = vst.msk [vmem:[%s13690_s28 + $0xf8] sm:$0xff] %vm7799_vm10, %v7634_v22  ;;  %v7652_v26 = vpop.permute.xlu1 %7651  ;;  %v7764_v9 = vsel %vm7732_vm8, %v7731_v44, %v13737_v33 }
 0x505   : > { %7829 = vst [vmem:[%s13690_s28 + $0xf0] sm:$0xff] %v7781_v43  ;;  %v7790_v4 = vsel %vm7765_vm14, %v7757_v18, %v7652_v26  ;;  %7848 = vst.msk [vmem:[%s13690_s28 + $0x188] sm:$0xff] %vm7799_vm10, %v7652_v26 }
 0x506   : > { %7847 = vst [vmem:[%s13690_s28 + $0x180] sm:$0xff] %v7790_v4 }
 0x507   : > { %v7638_v10 = vpop.permute.xlu0 %7637 }
 0x508   : > { %v7783_v17 = vsel %vm7765_vm14, %v7750_v2, %v7638_v10  ;;  %7834 = vst.msk [vmem:[%s13690_s28 + $0x118] sm:$0xff] %vm7799_vm10, %v7638_v10  ;;  %v7656_v27 = vpop.permute.xlu1 %7655 }
 0x509   : > { %7833 = vst [vmem:[%s13690_s28 + $0x110] sm:$0xff] %v7783_v17  ;;  %v7792_v31 = vsel %vm7765_vm14, %v7759_v55, %v7656_v27  ;;  %7852 = vst.msk [vmem:[%s13690_s28 + $0x1a8] sm:$0xff] %vm7799_vm10, %v7656_v27 }
 0x50a   : > { %7851 = vst [vmem:[%s13690_s28 + $0x1a0] sm:$0xff] %v7792_v31 }
 0x50b   : > { %v7642_v39 = vpop.permute.xlu0 %7641 }
 0x50c   : > { %v7785_v50 = vsel %vm7765_vm14, %v7752_v54, %v7642_v39  ;;  %7838 = vst.msk [vmem:[%s13690_s28 + $0x138] sm:$0xff] %vm7799_vm10, %v7642_v39  ;;  %v7660_v58 = vpop.permute.xlu1 %7659 }
 0x50d   : > { %7837 = vst [vmem:[%s13690_s28 + $0x130] sm:$0xff] %v7785_v50  ;;  %v7794_v52 = vsel %vm7765_vm14, %v7761_v60, %v7660_v58  ;;  %7856 = vst.msk [vmem:[%s13690_s28 + $0x1c8] sm:$0xff] %vm7799_vm10, %v7660_v58 }
 0x50e   : > { %7855 = vst [vmem:[%s13690_s28 + $0x1c0] sm:$0xff] %v7794_v52 }
 0x50f   : > { %v7646_v48 = vpop.permute.xlu0 %7645 }
 0x510   : > { %v7787_v5 = vsel %vm7765_vm14, %v7754_v16, %v7646_v48  ;;  %7842 = vst.msk [vmem:[%s13690_s28 + $0x158] sm:$0xff] %vm7799_vm10, %v7646_v48  ;;  %v7664_v56 = vpop.permute.xlu1 %7663 }
 0x511   : > { %7841 = vst [vmem:[%s13690_s28 + $0x150] sm:$0xff] %v7787_v5  ;;  %v7796_v1 = vsel %vm7765_vm14, %v7763_v40, %v7664_v56  ;;  %7860 = vst.msk [vmem:[%s13690_s28 + $0x1e8] sm:$0xff] %vm7799_vm10, %v7664_v56 }
 0x512   : > { %7859 = vst [vmem:[%s13690_s28 + $0x1e0] sm:$0xff] %v7796_v1 }
 0x513   : > { %v7650_v59 = vpop.permute.xlu0 %7649 }
 0x514   : > { %v7789_v63 = vsel %vm7765_vm14, %v7756_v46, %v7650_v59  ;;  %7846 = vst.msk [vmem:[%s13690_s28 + $0x178] sm:$0xff] %vm7799_vm10, %v7650_v59 }
 0x515   : > { %7845 = vst [vmem:[%s13690_s28 + $0x170] sm:$0xff] %v7789_v63 }
 0x517   : > { %v7654_v28 = vpop.permute.xlu0 %7653 }
 0x518   : > { %v7791_v29 = vsel %vm7765_vm14, %v7758_v51, %v7654_v28  ;;  %7850 = vst.msk [vmem:[%s13690_s28 + $0x198] sm:$0xff] %vm7799_vm10, %v7654_v28 }
 0x519   : > { %7849 = vst [vmem:[%s13690_s28 + $0x190] sm:$0xff] %v7791_v29 }
 0x51b   : > { %v7658_v15 = vpop.permute.xlu0 %7657 }
 0x51c   : > { %v7793_v6 = vsel %vm7765_vm14, %v7760_v11, %v7658_v15  ;;  %7854 = vst.msk [vmem:[%s13690_s28 + $0x1b8] sm:$0xff] %vm7799_vm10, %v7658_v15 }
 0x51d   : > { %7853 = vst [vmem:[%s13690_s28 + $0x1b0] sm:$0xff] %v7793_v6 }
 0x51f   : > { %v7662_v0 = vpop.permute.xlu0 %7661 }
 0x520   : > { %v7795_v34 = vsel %vm7765_vm14, %v7762_v30, %v7662_v0  ;;  %7858 = vst.msk [vmem:[%s13690_s28 + $0x1d8] sm:$0xff] %vm7799_vm10, %v7662_v0 }
 0x521   : > { %7857 = vst [vmem:[%s13690_s28 + $0x1d0] sm:$0xff] %v7795_v34 }
 0x523   : > { %v7666_v22 = vpop.permute.xlu0 %7665 }
 0x524   : > { %v7797_v18 = vsel %vm7765_vm14, %v7764_v9, %v7666_v22  ;;  %7862 = vst.msk [vmem:[%s13690_s28 + $0x1f8] sm:$0xff] %vm7799_vm10, %v7666_v22 }
 0x525   : > { %7861 = vst [vmem:[%s13690_s28 + $0x1f0] sm:$0xff] %v7797_v18 }
 0x526 PF: > { %s13_s14 = sadd.s32 1, %s8590_s14   ;;  %s14916_s12 = smov %s8586_s13 }
 0x527   : > { %p10_p5 = scmp.ge.s32.totalorder %s13_s14, 4   ;;  %s14917_s13 = smov %s14919_s15 }
 0x529   :  { %12 = sbr.rel (!%p10_p5) target bundleno = 2 (0x2), region = 65 }

</bundles_post_ra>
